<compile_context>
chip_gen: v7x
topology: tpu7x:2x2x1
jax: 0.10.0
libtpu: 0.0.40
codegen_flags: <defaults>
</compile_context>

<pallas_src>
import functools
import math

import jax
import jax.numpy as jnp
from jax.experimental import pallas as pl
from jax.experimental.pallas import tpu as pltpu

_BN_EPS = 1e-5
_LANE = 128            # TPU lane width: all channel dims padded to multiples of this
_SUBLANE_BF16 = 16     # bf16 sublane pack: left halo rounded up to this


def _round_up(x, m):
    return ((x + m - 1) // m) * m


def _tpu_budget():
    """(vmem_limit_bytes, target M per MXU matmul) derived per TPU generation."""
    cap = 64 * 1024 * 1024                      # conservative default (v7x)
    try:
        cap = int(getattr(pltpu.get_tpu_info(), "vmem_capacity_bytes", cap))
    except Exception:
        pass
    limit = min((cap * 3) // 4, 100 * 1024 * 1024)   # ~96 MiB on 128 MiB parts, 48 MiB on v7x
    target_m = 512 if cap > 96 * 1024 * 1024 else 256
    return limit, target_m


# ---------------------------------------------------------------------------
# In-kernel helpers
# ---------------------------------------------------------------------------
def _conv3x3_im2col(src_ref, w, scale, bias, store_fn, Hout, Wout,
                    stride, dil, col0, target_m):
    """3x3 conv over a zero-haloed VMEM scratch: one im2col MXU dot per row chunk.

    src_ref: (rows, cols, Cpad) bf16, halo already zeroed, interior written.
    w:       (9*Cpad, Coutpad) bf16 (tap-major, channel-minor rows).
    col0:    column in src_ref where output column 0's leftmost tap starts.
    NOTE: Wout should ideally be a multiple of the sublane pack (16 for bf16) so
    the (rows, Wout, C) <-> (rows*Wout, C) reshapes are relayout-free.
    """
    cin = src_ref.shape[-1]
    rh = max(1, min(Hout, target_m // max(1, Wout)))   # rows per chunk
    nchunks = (Hout + rh - 1) // rh

    def chunk(r0):
        pieces = []
        for ty in range(3):
            for tx in range(3):
                rs = r0 * stride + ty * dil
                cs = col0 + tx * dil
                if stride == 1:
                    sl = src_ref[pl.ds(rs, rh), pl.ds(cs, Wout), :]
                else:
                    # TODO(synk): stride>1 path (strided Ref reads) is not exercised
                    # by the demo (stride=1); verify vs the reference before relying on it.
                    sl = src_ref[pl.ds(rs, rh, stride=stride),
                                 pl.ds(cs, Wout, stride=stride), :]
                pieces.append(sl.reshape(rh * Wout, cin))
        # Lane-aligned concat (each piece is a multiple of 128 lanes wide).
        xcol = jnp.concatenate(pieces, axis=-1)                     # (rh*Wout, 9*cin) bf16
        acc = jnp.dot(xcol, w, preferred_element_type=jnp.float32)  # MXU, f32 accumulate
        y = jnp.maximum(acc * scale + bias, 0.0)                    # fused BN + ReLU (f32)
        store_fn(r0, rh, y)

    if nchunks == 1:
        chunk(0)                                           # static slices
    else:
        def body(i, carry):
            # Clamp the tail chunk: it overlaps the previous one and re-stores
            # identical values, keeping every slice shape static.
            chunk(jnp.minimum(i * rh, Hout - rh))
            return carry
        jax.lax.fori_loop(0, nchunks, body, 0, unroll=nchunks <= 4)


def _double_conv_kernel(x_ref, w1_ref, s1_ref, b1_ref, w2_ref, s2_ref, b2_ref,
                        o_ref, xpad_ref, mid_ref,
                        *, stride, dil, lpad, cin, target_m):
    H, W, _ = x_ref.shape
    H1, W1, c2p = o_ref.shape
    d, lp = dil, lpad
    cpad = xpad_ref.shape[-1]
    c1p = mid_ref.shape[-1]

    # ---- zero only the thin halo bands (per step -> safe under megacore) ----
    def zero_halo(buf, hin, win):
        fullw, c = buf.shape[1], buf.shape[2]
        zrow = jnp.zeros((d, fullw, c), buf.dtype)
        buf[pl.ds(0, d), :, :] = zrow                       # top halo rows
        buf[pl.ds(d + hin, d), :, :] = zrow                 # bottom halo rows
        zcol = jnp.zeros((hin, d, c), buf.dtype)
        buf[pl.ds(d, hin), pl.ds(lp - d, d), :] = zcol      # left halo cols
        buf[pl.ds(d, hin), pl.ds(lp + win, d), :] = zcol    # right halo cols

    zero_halo(xpad_ref, H, W)
    zero_halo(mid_ref, H1, W1)

    # ---- write this batch element's input into the aligned interior ----
    xin = x_ref[...].astype(jnp.bfloat16)
    if cin != cpad:   # lane-pad the channels so the store is full-lane (unmasked)
        xin = jnp.concatenate(
            [xin, jnp.zeros((H, W, cpad - cin), jnp.bfloat16)], axis=-1)
    xpad_ref[pl.ds(d, H), pl.ds(lp, W), :] = xin

    # Hoist weight / fused-BN loads out of the row-chunk loops.
    w1 = w1_ref[...]
    w2 = w2_ref[...]
    s1 = s1_ref[...]
    b1 = b1_ref[...]
    s2 = s2_ref[...]
    b2 = b2_ref[...]

    # ---- conv1 (stride, dilation) -> BN -> ReLU ; intermediate stays in VMEM ----
    def store_mid(r0, rows, y):
        mid_ref[pl.ds(d + r0, rows), pl.ds(lp, W1), :] = (
            y.reshape(rows, W1, c1p).astype(jnp.bfloat16))

    _conv3x3_im2col(xpad_ref, w1, s1, b1, store_mid, H1, W1, stride, d,
                    col0=lp - d, target_m=target_m)

    # Dropout2d(p=drop_ratio): inference-mode identity.

    # ---- conv2 (stride 1, dilation) -> BN -> ReLU ; lane-dense store to HBM ----
    def store_out(r0, rows, y):
        o_ref[pl.ds(r0, rows), :, :] = y.reshape(rows, W1, c2p).astype(o_ref.dtype)

    _conv3x3_im2col(mid_ref, w2, s2, b2, store_out, H1, W1, 1, d,
                    col0=lp - d, target_m=target_m)


# ---------------------------------------------------------------------------
# Wrapper: parameter fusion + pallas_call
# ---------------------------------------------------------------------------
def _fuse_bn(conv_bias, bn):
    """Fold eval-mode BatchNorm (+ conv bias) into per-channel scale / bias."""
    scale = bn["gamma"] / jnp.sqrt(bn["var"] + _BN_EPS)
    bias = (conv_bias - bn["mean"]) * scale + bn["beta"]
    return scale.astype(jnp.float32), bias.astype(jnp.float32)


def double_conv_apply(x_nhwc, params, *, stride=1, dilation=1, out_dtype=None):
    N, H, W, Cin = x_nhwc.shape
    d = dilation
    H1 = (H - 1) // stride + 1
    W1 = (W - 1) // stride + 1
    C1 = params["w1"].shape[-1]
    C2 = params["w2"].shape[-1]

    # Lane-dense channel padding for every matmul operand / store.
    Cin_p = _round_up(Cin, _LANE)
    C1_p = _round_up(C1, _LANE)
    C2_p = _round_up(C2, _LANE)
    lp = _round_up(max(d, 1), _SUBLANE_BF16)     # sublane-aligned left halo
    out_dtype = out_dtype or x_nhwc.dtype

    s1, b1 = _fuse_bn(params["b1"], params["bn1"])
    s2, b2 = _fuse_bn(params["b2"], params["bn2"])

    # Weights: HWIO, channel-padded, reshaped to (9*Cin_p, Cout_p) matching the
    # (ty, tx, cin) im2col concat order; bf16 (MXU-native).
    w1 = jnp.pad(params["w1"], ((0, 0), (0, 0), (0, Cin_p - Cin), (0, C1_p - C1)))
    w1 = w1.reshape(9 * Cin_p, C1_p).astype(jnp.bfloat16)
    w2 = jnp.pad(params["w2"], ((0, 0), (0, 0), (0, C1_p - C1), (0, C2_p - C2)))
    w2 = w2.reshape(9 * C1_p, C2_p).astype(jnp.bfloat16)
    s1p = jnp.pad(s1, (0, C1_p - C1)).reshape(1, C1_p)
    b1p = jnp.pad(b1, (0, C1_p - C1)).reshape(1, C1_p)
    s2p = jnp.pad(s2, (0, C2_p - C2)).reshape(1, C2_p)
    b2p = jnp.pad(b2, (0, C2_p - C2)).reshape(1, C2_p)

    vmem_limit, target_m = _tpu_budget()

    kern = functools.partial(_double_conv_kernel, stride=stride, dil=d, lpad=lp,
                             cin=Cin, target_m=target_m)
    out = pl.pallas_call(
        kern,
        out_shape=jax.ShapeDtypeStruct((N, H1, W1, C2_p), out_dtype),
        grid=(N,),
        in_specs=[
            pl.BlockSpec((None, H, W, Cin), lambda b: (b, 0, 0, 0)),
            pl.BlockSpec((9 * Cin_p, C1_p), lambda b: (0, 0)),
            pl.BlockSpec((1, C1_p), lambda b: (0, 0)),
            pl.BlockSpec((1, C1_p), lambda b: (0, 0)),
            pl.BlockSpec((9 * C1_p, C2_p), lambda b: (0, 0)),
            pl.BlockSpec((1, C2_p), lambda b: (0, 0)),
            pl.BlockSpec((1, C2_p), lambda b: (0, 0)),
        ],
        out_specs=pl.BlockSpec((None, H1, W1, C2_p), lambda b: (b, 0, 0, 0)),
        scratch_shapes=[
            # padded input: top/bottom halo d, sublane-aligned left halo lp, right halo d
            pltpu.VMEM((H + 2 * d, lp + W + d, Cin_p), jnp.bfloat16),
            # padded intermediate (conv1 output / conv2 input)
            pltpu.VMEM((H1 + 2 * d, lp + W1 + d, C1_p), jnp.bfloat16),
        ],
        compiler_params=pltpu.CompilerParams(
            dimension_semantics=("parallel",),          # batch across TensorCores
            vmem_limit_bytes=vmem_limit),
    )(x_nhwc, w1, s1p, b1p, w2, s2p, b2p)
    return out[..., :C2] if C2_p != C2 else out


def double_conv_forward(params, x_nchw, *, stride=1, dilation=1,
                        drop_ratio=0.0, in_norm=False):
    """PyTorch-interface forward: NCHW in, NCHW out (inference mode)."""
    # TODO(synk): in_norm=True (InstanceNorm2d) variant not implemented; only the
    # default eval-mode BatchNorm path is provided.
    assert not in_norm, "InstanceNorm2d path not implemented"
    del drop_ratio  # Dropout2d is identity in inference mode.
    x = jnp.transpose(x_nchw, (0, 2, 3, 1))                     # NCHW -> NHWC
    y = double_conv_apply(x, params, stride=stride, dilation=dilation)
    return jnp.transpose(y, (0, 3, 1, 2))                       # NHWC -> NCHW


# ---------------------------------------------------------------------------
# Deterministic parameter construction (Conv2d Kaiming-like init; BN eval stats
# randomized to exercise the scale/bias fusion as if the module were trained).
# ---------------------------------------------------------------------------
def build_double_conv_params(key, in_ch, out_ch1, out_ch2):
    ks = jax.random.split(key, 6)

    def conv_init(k, cin, cout):
        kw, kb = jax.random.split(k)
        fan_in = cin * 9
        w = jax.random.normal(kw, (3, 3, cin, cout), jnp.float32) * math.sqrt(2.0 / fan_in)
        bound = 1.0 / math.sqrt(fan_in)
        b = jax.random.uniform(kb, (cout,), jnp.float32, -bound, bound)
        return w, b                                              # HWIO weight

    def bn_init(k, c):
        k1, k2, k3, k4 = jax.random.split(k, 4)
        return {"gamma": jax.random.uniform(k1, (c,), jnp.float32, 0.5, 1.5),
                "beta": jax.random.normal(k2, (c,), jnp.float32) * 0.1,
                "mean": jax.random.normal(k3, (c,), jnp.float32) * 0.1,
                "var": jax.random.uniform(k4, (c,), jnp.float32, 0.5, 1.5)}

    w1, b1 = conv_init(ks[0], in_ch, out_ch1)
    w2, b2 = conv_init(ks[1], out_ch1, out_ch2)
    return {"w1": w1, "b1": b1, "bn1": bn_init(ks[2], out_ch1),
            "w2": w2, "b2": b2, "bn2": bn_init(ks[3], out_ch2)}


# ---------------------------------------------------------------------------
# Pure-JAX reference.  match_bf16=True reproduces the kernel's bf16 operand
# casts so the comparison tolerance can be tight enough to catch tap/halo bugs.
# ---------------------------------------------------------------------------
def double_conv_reference(params, x_nchw, *, stride=1, dilation=1, match_bf16=True):
    if match_bf16:
        cast = lambda a: a.astype(jnp.bfloat16).astype(jnp.float32)
    else:
        cast = lambda a: a
    x = jnp.transpose(x_nchw, (0, 2, 3, 1))

    def conv(x, w, b, s):
        y = jax.lax.conv_general_dilated(
            cast(x), cast(w), window_strides=(s, s),
            padding=[(dilation, dilation), (dilation, dilation)],
            rhs_dilation=(dilation, dilation),
            dimension_numbers=("NHWC", "HWIO", "NHWC"))
        return y + b

    def bn_relu(y, bn):
        y = (y - bn["mean"]) / jnp.sqrt(bn["var"] + _BN_EPS) * bn["gamma"] + bn["beta"]
        return jnp.maximum(y, 0.0)

    y = bn_relu(conv(x, params["w1"], params["b1"], stride), params["bn1"])
    y = bn_relu(conv(y, params["w2"], params["b2"], 1), params["bn2"])
    return jnp.transpose(y, (0, 3, 1, 2))


if __name__ == "__main__":
    N, Cin, H, W = 2, 4, 16, 16
    out_ch1, out_ch2 = 32, 64
    stride, dilation = 1, 1

    key = jax.random.PRNGKey(0)
    kx, kp = jax.random.split(key)
    x = jax.random.normal(kx, (N, Cin, H, W), jnp.float32)       # NCHW, like PyTorch
    params = build_double_conv_params(kp, Cin, out_ch1, out_ch2)

    fwd = jax.jit(functools.partial(double_conv_forward, stride=stride, dilation=dilation))
    out = fwd(params, x)
    jax.block_until_ready(out)
    assert out.shape == (N, out_ch2, H, W), out.shape

    ref = double_conv_reference(params, x, stride=stride, dilation=dilation)
    # bf16-matched reference -> tight tolerance (catches tap / halo indexing bugs).
    err = jnp.abs(out - ref)
    ok = bool(jnp.all(err <= 2e-2 + 2e-2 * jnp.abs(ref)))
    assert ok, float(jnp.max(err))
    print("KERNEL_OK")
</pallas_src>

<mosaic_0001>
module attributes {stable_mosaic.version = 11 : i64} {
  func.func @_double_conv_kernel(%arg0: i32, %arg1: memref<1x16x16x4xf32, #tpu.memory_space<vmem>>, %arg2: memref<1152x128xbf16, #tpu.memory_space<vmem>>, %arg3: memref<1x128xf32, #tpu.memory_space<vmem>>, %arg4: memref<1x128xf32, #tpu.memory_space<vmem>>, %arg5: memref<1152x128xbf16, #tpu.memory_space<vmem>>, %arg6: memref<1x128xf32, #tpu.memory_space<vmem>>, %arg7: memref<1x128xf32, #tpu.memory_space<vmem>>, %arg8: memref<1x16x16x128xf32, #tpu.memory_space<vmem>>, %arg9: memref<18x33x128xbf16, #tpu.memory_space<vmem>>, %arg10: memref<18x33x128xbf16, #tpu.memory_space<vmem>>) attributes {dimension_semantics = [#tpu.dimension_semantics<parallel>], iteration_bounds = array<i64: 2>, scalar_prefetch = 0 : i64, scratch_operands = 2 : i64, tpu.core_type = #tpu.core_type<tc>, window_params = [{transform_indices = @transform_0, window_bounds = array<i64: 1, 16, 16, 4>}, {pipeline_mode = #tpu.pipeline_mode<synchronous>, transform_indices = @transform_1, window_bounds = array<i64: 1152, 128>}, {pipeline_mode = #tpu.pipeline_mode<synchronous>, transform_indices = @transform_2, window_bounds = array<i64: 1, 128>}, {pipeline_mode = #tpu.pipeline_mode<synchronous>, transform_indices = @transform_3, window_bounds = array<i64: 1, 128>}, {pipeline_mode = #tpu.pipeline_mode<synchronous>, transform_indices = @transform_4, window_bounds = array<i64: 1152, 128>}, {pipeline_mode = #tpu.pipeline_mode<synchronous>, transform_indices = @transform_5, window_bounds = array<i64: 1, 128>}, {pipeline_mode = #tpu.pipeline_mode<synchronous>, transform_indices = @transform_6, window_bounds = array<i64: 1, 128>}, {transform_indices = @transform_7, window_bounds = array<i64: 1, 16, 16, 128>}]} {
    %cst = arith.constant 0.000000e+00 : bf16
    %0 = vector.broadcast %cst : bf16 to vector<1x33x128xbf16>
    %c0 = arith.constant 0 : index
    %c0_0 = arith.constant 0 : index
    %c0_1 = arith.constant 0 : index
    %1 = vector.load %arg9[%c0, %c0_0, %c0_1] : memref<18x33x128xbf16, #tpu.memory_space<vmem>>, vector<1x33x128xbf16>
    tpu.vector_store %arg9[%c0, %c0_0, %c0_1], %0 {strides = array<i32>} : memref<18x33x128xbf16, #tpu.memory_space<vmem>>, vector<1x33x128xbf16>,
    %c17 = arith.constant 17 : index
    %c0_2 = arith.constant 0 : index
    %c0_3 = arith.constant 0 : index
    %2 = vector.load %arg9[%c17, %c0_2, %c0_3] : memref<18x33x128xbf16, #tpu.memory_space<vmem>>, vector<1x33x128xbf16>
    tpu.vector_store %arg9[%c17, %c0_2, %c0_3], %0 {strides = array<i32>} : memref<18x33x128xbf16, #tpu.memory_space<vmem>>, vector<1x33x128xbf16>,
    %cst_4 = arith.constant 0.000000e+00 : bf16
    %3 = vector.broadcast %cst_4 : bf16 to vector<16x1x128xbf16>
    %c1 = arith.constant 1 : index
    %c15 = arith.constant 15 : index
    %c0_5 = arith.constant 0 : index
    %4 = vector.load %arg9[%c1, %c15, %c0_5] : memref<18x33x128xbf16, #tpu.memory_space<vmem>>, vector<16x1x128xbf16>
    tpu.vector_store %arg9[%c1, %c15, %c0_5], %3 {strides = array<i32>} : memref<18x33x128xbf16, #tpu.memory_space<vmem>>, vector<16x1x128xbf16>,
    %c1_6 = arith.constant 1 : index
    %c32 = arith.constant 32 : index
    %c0_7 = arith.constant 0 : index
    %5 = vector.load %arg9[%c1_6, %c32, %c0_7] : memref<18x33x128xbf16, #tpu.memory_space<vmem>>, vector<16x1x128xbf16>
    tpu.vector_store %arg9[%c1_6, %c32, %c0_7], %3 {strides = array<i32>} : memref<18x33x128xbf16, #tpu.memory_space<vmem>>, vector<16x1x128xbf16>,
    %cst_8 = arith.constant 0.000000e+00 : bf16
    %6 = vector.broadcast %cst_8 : bf16 to vector<1x33x128xbf16>
    %c0_9 = arith.constant 0 : index
    %c0_10 = arith.constant 0 : index
    %c0_11 = arith.constant 0 : index
    %7 = vector.load %arg10[%c0_9, %c0_10, %c0_11] : memref<18x33x128xbf16, #tpu.memory_space<vmem>>, vector<1x33x128xbf16>
    tpu.vector_store %arg10[%c0_9, %c0_10, %c0_11], %6 {strides = array<i32>} : memref<18x33x128xbf16, #tpu.memory_space<vmem>>, vector<1x33x128xbf16>,
    %c17_12 = arith.constant 17 : index
    %c0_13 = arith.constant 0 : index
    %c0_14 = arith.constant 0 : index
    %8 = vector.load %arg10[%c17_12, %c0_13, %c0_14] : memref<18x33x128xbf16, #tpu.memory_space<vmem>>, vector<1x33x128xbf16>
    tpu.vector_store %arg10[%c17_12, %c0_13, %c0_14], %6 {strides = array<i32>} : memref<18x33x128xbf16, #tpu.memory_space<vmem>>, vector<1x33x128xbf16>,
    %cst_15 = arith.constant 0.000000e+00 : bf16
    %9 = vector.broadcast %cst_15 : bf16 to vector<16x1x128xbf16>
    %c1_16 = arith.constant 1 : index
    %c15_17 = arith.constant 15 : index
    %c0_18 = arith.constant 0 : index
    %10 = vector.load %arg10[%c1_16, %c15_17, %c0_18] : memref<18x33x128xbf16, #tpu.memory_space<vmem>>, vector<16x1x128xbf16>
    tpu.vector_store %arg10[%c1_16, %c15_17, %c0_18], %9 {strides = array<i32>} : memref<18x33x128xbf16, #tpu.memory_space<vmem>>, vector<16x1x128xbf16>,
    %c1_19 = arith.constant 1 : index
    %c32_20 = arith.constant 32 : index
    %c0_21 = arith.constant 0 : index
    %11 = vector.load %arg10[%c1_19, %c32_20, %c0_21] : memref<18x33x128xbf16, #tpu.memory_space<vmem>>, vector<16x1x128xbf16>
    tpu.vector_store %arg10[%c1_19, %c32_20, %c0_21], %9 {strides = array<i32>} : memref<18x33x128xbf16, #tpu.memory_space<vmem>>, vector<16x1x128xbf16>,
    %c0_22 = arith.constant 0 : index
    %c0_23 = arith.constant 0 : index
    %c0_24 = arith.constant 0 : index
    %c0_25 = arith.constant 0 : index
    %12 = vector.load %arg1[%c0_22, %c0_23, %c0_24, %c0_25] : memref<1x16x16x4xf32, #tpu.memory_space<vmem>>, vector<1x16x16x4xf32>
    %13 = vector.shape_cast %12 : vector<1x16x16x4xf32> to vector<16x16x4xf32>
    %14 = arith.truncf %13 : vector<16x16x4xf32> to vector<16x16x4xbf16>
    %cst_26 = arith.constant 0.000000e+00 : bf16
    %15 = vector.broadcast %cst_26 : bf16 to vector<16x16x124xbf16>
    %16 = tpu.concatenate %14, %15 in 2 : vector<16x16x4xbf16>, vector<16x16x124xbf16> -> vector<16x16x128xbf16>
    %c1_27 = arith.constant 1 : index
    %c16 = arith.constant 16 : index
    %c0_28 = arith.constant 0 : index
    %17 = vector.load %arg9[%c1_27, %c16, %c0_28] : memref<18x33x128xbf16, #tpu.memory_space<vmem>>, vector<16x16x128xbf16>
    tpu.vector_store %arg9[%c1_27, %c16, %c0_28], %16 {strides = array<i32>} : memref<18x33x128xbf16, #tpu.memory_space<vmem>>, vector<16x16x128xbf16>,
    %c0_29 = arith.constant 0 : index
    %c0_30 = arith.constant 0 : index
    %18 = vector.load %arg2[%c0_29, %c0_30] : memref<1152x128xbf16, #tpu.memory_space<vmem>>, vector<1152x128xbf16>
    %c0_31 = arith.constant 0 : index
    %c0_32 = arith.constant 0 : index
    %19 = vector.load %arg5[%c0_31, %c0_32] : memref<1152x128xbf16, #tpu.memory_space<vmem>>, vector<1152x128xbf16>
    %c0_33 = arith.constant 0 : index
    %c0_34 = arith.constant 0 : index
    %20 = vector.load %arg3[%c0_33, %c0_34] : memref<1x128xf32, #tpu.memory_space<vmem>>, vector<1x128xf32>
    %c0_35 = arith.constant 0 : index
    %c0_36 = arith.constant 0 : index
    %21 = vector.load %arg4[%c0_35, %c0_36] : memref<1x128xf32, #tpu.memory_space<vmem>>, vector<1x128xf32>
    %c0_37 = arith.constant 0 : index
    %c0_38 = arith.constant 0 : index
    %22 = vector.load %arg6[%c0_37, %c0_38] : memref<1x128xf32, #tpu.memory_space<vmem>>, vector<1x128xf32>
    %c0_39 = arith.constant 0 : index
    %c0_40 = arith.constant 0 : index
    %23 = vector.load %arg7[%c0_39, %c0_40] : memref<1x128xf32, #tpu.memory_space<vmem>>, vector<1x128xf32>
    %c0_41 = arith.constant 0 : index
    %c15_42 = arith.constant 15 : index
    %c0_43 = arith.constant 0 : index
    %24 = vector.load %arg9[%c0_41, %c15_42, %c0_43] : memref<18x33x128xbf16, #tpu.memory_space<vmem>>, vector<16x16x128xbf16>
    %25 = vector.shape_cast %24 : vector<16x16x128xbf16> to vector<256x128xbf16>
    %c0_44 = arith.constant 0 : index
    %c16_45 = arith.constant 16 : index
    %c0_46 = arith.constant 0 : index
    %26 = vector.load %arg9[%c0_44, %c16_45, %c0_46] : memref<18x33x128xbf16, #tpu.memory_space<vmem>>, vector<16x16x128xbf16>
    %27 = vector.shape_cast %26 : vector<16x16x128xbf16> to vector<256x128xbf16>
    %c0_47 = arith.constant 0 : index
    %c17_48 = arith.constant 17 : index
    %c0_49 = arith.constant 0 : index
    %28 = vector.load %arg9[%c0_47, %c17_48, %c0_49] : memref<18x33x128xbf16, #tpu.memory_space<vmem>>, vector<16x16x128xbf16>
    %29 = vector.shape_cast %28 : vector<16x16x128xbf16> to vector<256x128xbf16>
    %c1_50 = arith.constant 1 : index
    %c15_51 = arith.constant 15 : index
    %c0_52 = arith.constant 0 : index
    %30 = vector.load %arg9[%c1_50, %c15_51, %c0_52] : memref<18x33x128xbf16, #tpu.memory_space<vmem>>, vector<16x16x128xbf16>
    %31 = vector.shape_cast %30 : vector<16x16x128xbf16> to vector<256x128xbf16>
    %c1_53 = arith.constant 1 : index
    %c16_54 = arith.constant 16 : index
    %c0_55 = arith.constant 0 : index
    %32 = vector.load %arg9[%c1_53, %c16_54, %c0_55] : memref<18x33x128xbf16, #tpu.memory_space<vmem>>, vector<16x16x128xbf16>
    %33 = vector.shape_cast %32 : vector<16x16x128xbf16> to vector<256x128xbf16>
    %c1_56 = arith.constant 1 : index
    %c17_57 = arith.constant 17 : index
    %c0_58 = arith.constant 0 : index
    %34 = vector.load %arg9[%c1_56, %c17_57, %c0_58] : memref<18x33x128xbf16, #tpu.memory_space<vmem>>, vector<16x16x128xbf16>
    %35 = vector.shape_cast %34 : vector<16x16x128xbf16> to vector<256x128xbf16>
    %c2 = arith.constant 2 : index
    %c15_59 = arith.constant 15 : index
    %c0_60 = arith.constant 0 : index
    %36 = vector.load %arg9[%c2, %c15_59, %c0_60] : memref<18x33x128xbf16, #tpu.memory_space<vmem>>, vector<16x16x128xbf16>
    %37 = vector.shape_cast %36 : vector<16x16x128xbf16> to vector<256x128xbf16>
    %c2_61 = arith.constant 2 : index
    %c16_62 = arith.constant 16 : index
    %c0_63 = arith.constant 0 : index
    %38 = vector.load %arg9[%c2_61, %c16_62, %c0_63] : memref<18x33x128xbf16, #tpu.memory_space<vmem>>, vector<16x16x128xbf16>
    %39 = vector.shape_cast %38 : vector<16x16x128xbf16> to vector<256x128xbf16>
    %c2_64 = arith.constant 2 : index
    %c17_65 = arith.constant 17 : index
    %c0_66 = arith.constant 0 : index
    %40 = vector.load %arg9[%c2_64, %c17_65, %c0_66] : memref<18x33x128xbf16, #tpu.memory_space<vmem>>, vector<16x16x128xbf16>
    %41 = vector.shape_cast %40 : vector<16x16x128xbf16> to vector<256x128xbf16>
    %42 = tpu.concatenate %25, %27, %29, %31, %33, %35, %37, %39, %41 in 1 : vector<256x128xbf16>, vector<256x128xbf16>, vector<256x128xbf16>, vector<256x128xbf16>, vector<256x128xbf16>, vector<256x128xbf16>, vector<256x128xbf16>, vector<256x128xbf16>, vector<256x128xbf16> -> vector<256x1152xbf16>
    %cst_67 = arith.constant dense<0.000000e+00> : vector<256x128xf32>
    %43 = tpu.matmul %42, %18, %cst_67 {dimension_numbers = #tpu.dot_dimension_numbers<[1], [0], [0], [1], [0, 0, 1, 1], [], []>} : vector<256x1152xbf16>, vector<1152x128xbf16>, vector<256x128xf32> -> vector<256x128xf32>
    %44 = vector.broadcast %20 : vector<1x128xf32> to vector<256x128xf32>
    %45 = arith.mulf %43, %44 : vector<256x128xf32>
    %46 = vector.broadcast %21 : vector<1x128xf32> to vector<256x128xf32>
    %47 = arith.addf %45, %46 : vector<256x128xf32>
    %cst_68 = arith.constant 0.000000e+00 : f32
    %48 = vector.broadcast %cst_68 : f32 to vector<256x128xf32>
    %49 = arith.maximumf %47, %48 : vector<256x128xf32>
    %50 = vector.shape_cast %49 : vector<256x128xf32> to vector<16x16x128xf32>
    %51 = arith.truncf %50 : vector<16x16x128xf32> to vector<16x16x128xbf16>
    %c1_69 = arith.constant 1 : index
    %c16_70 = arith.constant 16 : index
    %c0_71 = arith.constant 0 : index
    %52 = vector.load %arg10[%c1_69, %c16_70, %c0_71] : memref<18x33x128xbf16, #tpu.memory_space<vmem>>, vector<16x16x128xbf16>
    tpu.vector_store %arg10[%c1_69, %c16_70, %c0_71], %51 {strides = array<i32>} : memref<18x33x128xbf16, #tpu.memory_space<vmem>>, vector<16x16x128xbf16>,
    %c0_72 = arith.constant 0 : index
    %c15_73 = arith.constant 15 : index
    %c0_74 = arith.constant 0 : index
    %53 = vector.load %arg10[%c0_72, %c15_73, %c0_74] : memref<18x33x128xbf16, #tpu.memory_space<vmem>>, vector<16x16x128xbf16>
    %54 = vector.shape_cast %53 : vector<16x16x128xbf16> to vector<256x128xbf16>
    %c0_75 = arith.constant 0 : index
    %c16_76 = arith.constant 16 : index
    %c0_77 = arith.constant 0 : index
    %55 = vector.load %arg10[%c0_75, %c16_76, %c0_77] : memref<18x33x128xbf16, #tpu.memory_space<vmem>>, vector<16x16x128xbf16>
    %56 = vector.shape_cast %55 : vector<16x16x128xbf16> to vector<256x128xbf16>
    %c0_78 = arith.constant 0 : index
    %c17_79 = arith.constant 17 : index
    %c0_80 = arith.constant 0 : index
    %57 = vector.load %arg10[%c0_78, %c17_79, %c0_80] : memref<18x33x128xbf16, #tpu.memory_space<vmem>>, vector<16x16x128xbf16>
    %58 = vector.shape_cast %57 : vector<16x16x128xbf16> to vector<256x128xbf16>
    %c1_81 = arith.constant 1 : index
    %c15_82 = arith.constant 15 : index
    %c0_83 = arith.constant 0 : index
    %59 = vector.load %arg10[%c1_81, %c15_82, %c0_83] : memref<18x33x128xbf16, #tpu.memory_space<vmem>>, vector<16x16x128xbf16>
    %60 = vector.shape_cast %59 : vector<16x16x128xbf16> to vector<256x128xbf16>
    %c1_84 = arith.constant 1 : index
    %c16_85 = arith.constant 16 : index
    %c0_86 = arith.constant 0 : index
    %61 = vector.load %arg10[%c1_84, %c16_85, %c0_86] : memref<18x33x128xbf16, #tpu.memory_space<vmem>>, vector<16x16x128xbf16>
    %62 = vector.shape_cast %61 : vector<16x16x128xbf16> to vector<256x128xbf16>
    %c1_87 = arith.constant 1 : index
    %c17_88 = arith.constant 17 : index
    %c0_89 = arith.constant 0 : index
    %63 = vector.load %arg10[%c1_87, %c17_88, %c0_89] : memref<18x33x128xbf16, #tpu.memory_space<vmem>>, vector<16x16x128xbf16>
    %64 = vector.shape_cast %63 : vector<16x16x128xbf16> to vector<256x128xbf16>
    %c2_90 = arith.constant 2 : index
    %c15_91 = arith.constant 15 : index
    %c0_92 = arith.constant 0 : index
    %65 = vector.load %arg10[%c2_90, %c15_91, %c0_92] : memref<18x33x128xbf16, #tpu.memory_space<vmem>>, vector<16x16x128xbf16>
    %66 = vector.shape_cast %65 : vector<16x16x128xbf16> to vector<256x128xbf16>
    %c2_93 = arith.constant 2 : index
    %c16_94 = arith.constant 16 : index
    %c0_95 = arith.constant 0 : index
    %67 = vector.load %arg10[%c2_93, %c16_94, %c0_95] : memref<18x33x128xbf16, #tpu.memory_space<vmem>>, vector<16x16x128xbf16>
    %68 = vector.shape_cast %67 : vector<16x16x128xbf16> to vector<256x128xbf16>
    %c2_96 = arith.constant 2 : index
    %c17_97 = arith.constant 17 : index
    %c0_98 = arith.constant 0 : index
    %69 = vector.load %arg10[%c2_96, %c17_97, %c0_98] : memref<18x33x128xbf16, #tpu.memory_space<vmem>>, vector<16x16x128xbf16>
    %70 = vector.shape_cast %69 : vector<16x16x128xbf16> to vector<256x128xbf16>
    %71 = tpu.concatenate %54, %56, %58, %60, %62, %64, %66, %68, %70 in 1 : vector<256x128xbf16>, vector<256x128xbf16>, vector<256x128xbf16>, vector<256x128xbf16>, vector<256x128xbf16>, vector<256x128xbf16>, vector<256x128xbf16>, vector<256x128xbf16>, vector<256x128xbf16> -> vector<256x1152xbf16>
    %cst_99 = arith.constant dense<0.000000e+00> : vector<256x128xf32>
    %72 = tpu.matmul %71, %19, %cst_99 {dimension_numbers = #tpu.dot_dimension_numbers<[1], [0], [0], [1], [0, 0, 1, 1], [], []>} : vector<256x1152xbf16>, vector<1152x128xbf16>, vector<256x128xf32> -> vector<256x128xf32>
    %73 = vector.broadcast %22 : vector<1x128xf32> to vector<256x128xf32>
    %74 = arith.mulf %72, %73 : vector<256x128xf32>
    %75 = vector.broadcast %23 : vector<1x128xf32> to vector<256x128xf32>
    %76 = arith.addf %74, %75 : vector<256x128xf32>
    %cst_100 = arith.constant 0.000000e+00 : f32
    %77 = vector.broadcast %cst_100 : f32 to vector<256x128xf32>
    %78 = arith.maximumf %76, %77 : vector<256x128xf32>
    %79 = vector.shape_cast %78 : vector<256x128xf32> to vector<16x16x128xf32>
    %c0_101 = arith.constant 0 : index
    %c0_102 = arith.constant 0 : index
    %c0_103 = arith.constant 0 : index
    %c0_104 = arith.constant 0 : index
    %80 = vector.load %arg8[%c0_101, %c0_102, %c0_103, %c0_104] : memref<1x16x16x128xf32, #tpu.memory_space<vmem>>, vector<1x16x16x128xf32>
    %81 = vector.shape_cast %80 : vector<1x16x16x128xf32> to vector<16x16x128xf32>
    %82 = vector.shape_cast %79 : vector<16x16x128xf32> to vector<1x16x16x128xf32>
    tpu.vector_store %arg8[%c0_101, %c0_102, %c0_103, %c0_104], %82 {strides = array<i32>} : memref<1x16x16x128xf32, #tpu.memory_space<vmem>>, vector<1x16x16x128xf32>,
    return
  }
  func.func @transform_0(%arg0: i32) -> (i32, i32, i32, i32) {
    %c0_i32 = arith.constant 0 : i32
    %c0_i32_0 = arith.constant 0 : i32
    %c0_i32_1 = arith.constant 0 : i32
    %c0_i32_2 = arith.constant 0 : i32
    return %arg0, %c0_i32, %c0_i32_0, %c0_i32_1 : i32, i32, i32, i32
  }
  func.func @transform_1(%arg0: i32) -> (i32, i32) {
    %c0_i32 = arith.constant 0 : i32
    %c0_i32_0 = arith.constant 0 : i32
    %c0_i32_1 = arith.constant 0 : i32
    return %c0_i32, %c0_i32_0 : i32, i32
  }
  func.func @transform_2(%arg0: i32) -> (i32, i32) {
    %c0_i32 = arith.constant 0 : i32
    %c0_i32_0 = arith.constant 0 : i32
    %c0_i32_1 = arith.constant 0 : i32
    return %c0_i32, %c0_i32_0 : i32, i32
  }
  func.func @transform_3(%arg0: i32) -> (i32, i32) {
    %c0_i32 = arith.constant 0 : i32
    %c0_i32_0 = arith.constant 0 : i32
    %c0_i32_1 = arith.constant 0 : i32
    return %c0_i32, %c0_i32_0 : i32, i32
  }
  func.func @transform_4(%arg0: i32) -> (i32, i32) {
    %c0_i32 = arith.constant 0 : i32
    %c0_i32_0 = arith.constant 0 : i32
    %c0_i32_1 = arith.constant 0 : i32
    return %c0_i32, %c0_i32_0 : i32, i32
  }
  func.func @transform_5(%arg0: i32) -> (i32, i32) {
    %c0_i32 = arith.constant 0 : i32
    %c0_i32_0 = arith.constant 0 : i32
    %c0_i32_1 = arith.constant 0 : i32
    return %c0_i32, %c0_i32_0 : i32, i32
  }
  func.func @transform_6(%arg0: i32) -> (i32, i32) {
    %c0_i32 = arith.constant 0 : i32
    %c0_i32_0 = arith.constant 0 : i32
    %c0_i32_1 = arith.constant 0 : i32
    return %c0_i32, %c0_i32_0 : i32, i32
  }
  func.func @transform_7(%arg0: i32) -> (i32, i32, i32, i32) {
    %c0_i32 = arith.constant 0 : i32
    %c0_i32_0 = arith.constant 0 : i32
    %c0_i32_1 = arith.constant 0 : i32
    %c0_i32_2 = arith.constant 0 : i32
    return %arg0, %c0_i32, %c0_i32_0, %c0_i32_1 : i32, i32, i32, i32
  }
}

</mosaic_0001>

<bundles_post_ra>
// kernel: double_conv_forward.1
= control target key start
LH: loop header
LB: loop body
LE: loop exit
PB: predicated region body
PF: predicated region fallthrough
CT: control target
= control target key end

     0   :  { %s11233_s24 = smov 0   ;;  %s16120_s0 = inlined_call_operand.vmem [shape: f32[2,16,16,4], index: 0, kind: input, shape index: {}]   ;;  %s16121_s1 = inlined_call_operand.vmem [shape: bf16[1152,128], index: 1, kind: input, shape index: {}]   ;;  %s16122_s2 = inlined_call_operand.vmem [shape: f32[1,128], index: 2, kind: input, shape index: {}]   ;;  %s16123_s3 = inlined_call_operand.vmem [shape: f32[1,128], index: 3, kind: input, shape index: {}]   ;;  %s16124_s4 = inlined_call_operand.vmem [shape: bf16[1152,128], index: 4, kind: input, shape index: {}]   ;;  %s16125_s5 = inlined_call_operand.vmem [shape: f32[1,128], index: 5, kind: input, shape index: {}]   ;;  %s16126_s6 = inlined_call_operand.vmem [shape: f32[1,128], index: 6, kind: input, shape index: {}]   ;;  %s16127_s7 = inlined_call_operand.vmem [shape: f32[2,16,16,128], index: 7, kind: output, shape index: {}]  }
   0x1 LB: > { %s9156_s25 = sadd.s32 4294967295, %s11190_s24   ;;  %p9160_p0 = scmp.ge.s32.totalorder %s11190_s24, 1  ;;  %s11190_s24 = sphi %s11233_s24, %s17_s24  }
   0x2   : > { %p237_p1 = scmp.lt.s32.totalorder %s11190_s24, 3 }
   0x4   : > { %p238_p2 = pnand %p9160_p0, %p237_p1 }
   0x6   : > { %241 = sbr.rel (%p238_p2) target bundleno = 1272 (0x4f8), region = 48 }
   0xd   : > { %v10894_v0 = vld [vmem:[%s16121_s1 + $0x40] sm:$0xff]   ;;  %v11192_v2 = vmov 0   ;;  %v10898_v5 = vld [vmem:[%s16121_s1 + $0x48] sm:$0xff]   ;;  %v10902_v9 = vld [vmem:[%s16121_s1 + $0x50] sm:$0xff]   ;;  %p269_p3 = scmp.lt.s32.totalorder %s9156_s25, 1  ;;  %vm299_vm0 = vcmask 1043459  }
   0xe   : > { %v10895_v1 = vld [vmem:[%s16121_s1 + $0xc0] sm:$0xff]   ;;  %282 = vst [vmem:[#allocation2 + $0x8] sm:$0xf] %v11192_v2  ;;  %283 = vst [vmem:[#allocation2 + $0xc] sm:$0xf] %v11192_v2  ;;  %9845 = vmatprep.subr.bf16.mxu0 %v10894_v0  ;;  %v10899_v6 = vld [vmem:[%s16121_s1 + $0xc8] sm:$0xff]  }
   0xf   : > { %281 = vst [vmem:[#allocation2 + $0x4] sm:$0xf] %v11192_v2  ;;  %292 = vst [vmem:[#allocation2 + $0x158] sm:$0xf] %v11192_v2  ;;  %v10896_v3 = vld [vmem:[%s16121_s1] sm:$0xff]   ;;  %9957 = vmatprep.subr.bf16.mxu1 %v10895_v1  ;;  %v10900_v7 = vld [vmem:[%s16121_s1 + $0x8] sm:$0xff]  }
  0x10   : > { %293 = vst [vmem:[#allocation2 + $0x15c] sm:$0xf] %v11192_v2  ;;  %294 = vst [vmem:[#allocation2 + $0x160] sm:$0xf] %v11192_v2  ;;  %v10897_v4 = vld [vmem:[%s16121_s1 + $0x80] sm:$0xff]   ;;  %9846 = vmatpush3.bf16.msra.mxu0 %v10896_v3  ;;  %v10901_v8 = vld [vmem:[%s16121_s1 + $0x88] sm:$0xff]  }
  0x11   : > { %399 = vst [vmem:[#allocation3 + $0x4] sm:$0xf] %v11192_v2  ;;  %400 = vst [vmem:[#allocation3 + $0x8] sm:$0xf] %v11192_v2  ;;  %9958 = vmatpush3.bf16.msra.mxu1 %v10897_v4  ;;  %9847 = vmatprep.subr.bf16.mxu0 %v10898_v5  ;;  %v10903_v10 = vld [vmem:[%s16121_s1 + $0xd0] sm:$0xff]   ;;  %v10906_v13 = vld [vmem:[%s16121_s1 + $0x58] sm:$0xff]  }
  0x12   : > { %401 = vst [vmem:[#allocation3 + $0xc] sm:$0xf] %v11192_v2  ;;  %407 = vst [vmem:[#allocation3 + $0x158] sm:$0xf] %v11192_v2  ;;  %9959 = vmatprep.subr.bf16.mxu1 %v10899_v6  ;;  %v10904_v11 = vld [vmem:[%s16121_s1 + $0x10] sm:$0xff]   ;;  %v10907_v14 = vld [vmem:[%s16121_s1 + $0xd8] sm:$0xff]  }
  0x13   : > { %408 = vst [vmem:[#allocation3 + $0x15c] sm:$0xf] %v11192_v2  ;;  %409 = vst [vmem:[#allocation3 + $0x160] sm:$0xf] %v11192_v2  ;;  %v10905_v12 = vld [vmem:[%s16121_s1 + $0x90] sm:$0xff]   ;;  %v10908_v15 = vld [vmem:[%s16121_s1 + $0x18] sm:$0xff]  }
  0x14   : > { %9848 = vmatpush3.bf16.msra.mxu0 %v10900_v7  ;;  %v10909_v16 = vld [vmem:[%s16121_s1 + $0x98] sm:$0xff]   ;;  %v10910_v17 = vld [vmem:[%s16121_s1 + $0x60] sm:$0xff]   ;;  %v10914_v21 = vld [vmem:[%s16121_s1 + $0x68] sm:$0xff]   ;;  %s16931_s25 = smov (!%p269_p3, %s9156_s25), 1  ;;  %vm558_vm1 = vcmask 31744   ;;  %vm284_vm2 = vcmask 1040384  }
  0x15   : > { %9960 = vmatpush3.bf16.msra.mxu1 %v10901_v8  ;;  %9849 = vmatprep.subr.bf16.mxu0 %v10902_v9  ;;  %v10911_v18 = vld [vmem:[%s16121_s1 + $0xe0] sm:$0xff]   ;;  %v10915_v22 = vld [vmem:[%s16121_s1 + $0xe8] sm:$0xff]   ;;  %v10918_v25 = vld [vmem:[%s16121_s1 + $0x70] sm:$0xff]   ;;  %s9763_s19 = sshll.u32 %s16931_s25, 8  ;;  %vm285_vm3 = vsmask.f32 256 }
  0x16   : > { %9961 = vmatprep.subr.bf16.mxu1 %v10903_v10  ;;  %v10912_v19 = vld [vmem:[%s16121_s1 + $0x20] sm:$0xff]   ;;  %v10916_v23 = vld [vmem:[%s16121_s1 + $0x28] sm:$0xff]   ;;  %v10919_v26 = vld [vmem:[%s16121_s1 + $0xf0] sm:$0xff]   ;;  %s11349_s30 = scalar_lea.vmem %s16120_s0, %s9763_s19  ;;  %vm300_vm4 = vsmask.f32 7950  ;;  %v16373_v43 = vmov 0  ;;  %s15995_s9 = scalar_lea.vmem %s16127_s7, %s9763_s19 }
  0x17   : > { %v10913_v20 = vld [vmem:[%s16121_s1 + $0xa0] sm:$0xff]   ;;  %v10917_v24 = vld [vmem:[%s16121_s1 + $0xa8] sm:$0xff]   ;;  %v10920_v27 = vld [vmem:[%s16121_s1 + $0x30] sm:$0xff]   ;;  %vm1076_vm5 = vsmask.f32 4368  ;;  %v16376_v48 = vmov 0 }
  0x18   : > { %9850 = vmatpush3.bf16.msra.mxu0 %v10904_v11  ;;  %v10921_v28 = vld [vmem:[%s16121_s1 + $0xb0] sm:$0xff]   ;;  %v10922_v29 = vld [vmem:[%s16121_s1 + $0x78] sm:$0xff]   ;;  %v302_v39 = vld [vmem:[#allocation2 + $0x18] sm:$0x8]  ;;  %vm1446_vm9 = vsmask.f32 3328 }
  0x19   : > { %9962 = vmatpush3.bf16.msra.mxu1 %v10905_v12  ;;  %9851 = vmatprep.subr.bf16.mxu0 %v10906_v13  ;;  %v10923_v30 = vld [vmem:[%s16121_s1 + $0xf8] sm:$0xff]   ;;  %v1029_v33 = vld [vmem:[#allocation2 + $0x8] sm:$0xf]  ;;  %v1030_v34 = vld [vmem:[#allocation2 + $0xc] sm:$0xf] }
  0x1a   : > { %9963 = vmatprep.subr.bf16.mxu1 %v10907_v14  ;;  %v10924_v31 = vld [vmem:[%s16121_s1 + $0x38] sm:$0xff]   ;;  %v1084_v35 = vshrl.u32 %v1029_v33, 16  ;;  %v1087_v36 = vshll.u32 %v1029_v33, 16  ;;  %v1093_v37 = vshrl.u32 %v1030_v34, 16  ;;  %v1096_v38 = vshll.u32 %v1030_v34, 16  ;;  %v510_v41 = vld [vmem:[%s11349_s30] sm:$0xff]  ;;  %vm11355_vm6 = vmand %vm284_vm2, %vm285_vm3 }
  0x1b   : > { %v10925_v32 = vld [vmem:[%s16121_s1 + $0xb8] sm:$0xff]   ;;  %v9261_v40 = vcombine.low %v1029_v33, %v1030_v34  ;;  %v511_v42 = vld [vmem:[%s11349_s30 + $0x8] sm:$0xff]  ;;  %v16374_v43 = vsel %vm11355_vm6, 4294967295, %v16373_v43  ;;  %vm11360_vm7 = vmand %vm299_vm0, %vm300_vm4  ;;  %vm1447_vm10 = vsmask.f32 7440 }
  0x1c   : > { %9852 = vmatpush3.bf16.msra.mxu0 %v10908_v15  ;;  %16375 = vst [vmem:[#allocation4_spill] sm:$0xff] %v16374_v43  ;;  %v1086_v44 = vrot.slane %v1084_v35, 7  ;;  %v1095_v45 = vrot.slane %v1093_v37, 7  ;;  %v1449_v46 = vrot.slane %v1084_v35, 4  ;;  %v1450_v47 = vrot.slane %v1087_v36, 5  ;;  %v10927_v55 = vld [vmem:[%s16121_s1 + $0x140] sm:$0xff]   ;;  %vm11373_vm8 = vmor %vm285_vm3, %vm1076_vm5 }
  0x1d   : > { %9964 = vmatpush3.bf16.msra.mxu1 %v10909_v16  ;;  %9853 = vmatprep.subr.bf16.mxu0 %v10910_v17  ;;  %v16377_v48 = vsel %vm11360_vm7, 4294967295, %v16376_v48  ;;  %v1028_v49 = vld [vmem:[#allocation2 + $0x4] sm:$0x8]  ;;  %v11364_v50 = vrot.slane %v1096_v38, 5  ;;  %v1455_v51 = vrot.slane %v1093_v37, 4  ;;  %v303_v52 = vsel %vm11360_vm7, 0, %v302_v39  ;;  %vm11408_vm11 = vmor %vm1446_vm9, %vm1447_vm10 }
  0x1e   : > { %9965 = vmatprep.subr.bf16.mxu1 %v10911_v18  ;;  %16378 = vst [vmem:[#allocation5_spill] sm:$0xff] %v16377_v48  ;;  %4090 = vmatprep.mubr.bf16.mxu0 %v9261_v40  ;;  %v542_v53 = vpack.c.bf16 %v511_v42, %v510_v41  ;;  %v287_v54 = vld [vmem:[#allocation2 + $0x10] sm:$0x1]  ;;  %v1091_v56 = vrot.slane %v1086_v44, 4  ;;  %v1098_v57 = vor.u32 %v1096_v38, %v1095_v45  ;;  %304 = vst [vmem:[#allocation2 + $0x18] sm:$0x8] %v303_v52 }
  0x1f   : > { %v1451_v58 = vor.u32 %v1450_v47, %v1449_v46  ;;  %v1089_v60 = vor.u32 %v1087_v36, %v1086_v44  ;;  %v1079_v62 = vshrl.u32 %v1028_v49, 16  ;;  %v288_v63 = vsel %vm11355_vm6, 0, %v287_v54  ;;  %v512_v0 = vld [vmem:[%s11349_s30 + $0x10] sm:$0xff]  ;;  %v513_v5 = vld [vmem:[%s11349_s30 + $0x18] sm:$0xff]  ;;  %v10928_v8 = vld [vmem:[%s16121_s1 + $0x100] sm:$0xff]  }
  0x20   : > { %9854 = vmatpush3.bf16.msra.mxu0 %v10912_v19  ;;  %v561_v61 = vsel %vm558_vm1, %v542_v53, 0  ;;  %v1456_v1 = vor.u32 %v1455_v51, %v11364_v50  ;;  %289 = vst [vmem:[#allocation2 + $0x10] sm:$0x1] %v288_v63  ;;  %v305_v4 = vld [vmem:[#allocation2 + $0x2c] sm:$0x8]  ;;  %v1099_v7 = vsel %vm11373_vm8, %v1091_v56, %v1098_v57  ;;  %v543_v11 = vpack.c.bf16 %v513_v5, %v512_v0  ;;  %v514_v17 = vld [vmem:[%s11349_s30 + $0x20] sm:$0xff] }
  0x21   : > { %9966 = vmatpush3.bf16.msra.mxu1 %v10913_v20  ;;  %9855 = vmatprep.subr.bf16.mxu0 %v10914_v21  ;;  %v9165_v2 = vcombine.low %v561_v61, %v561_v61  ;;  %v9166_v3 = vcombine.high %v561_v61, %v561_v61  ;;  %v9197_v6 = vrot.slane %v1079_v62, 11  ;;  %v11388_v9 = vrot.slane %v1451_v58, 4  ;;  %v350_v12 = vld [vmem:[#allocation2 + $0x24] sm:$0x1]  ;;  %v308_v13 = vld [vmem:[#allocation2 + $0x40] sm:$0x8] }
  0x22   : > { %9967 = vmatprep.subr.bf16.mxu1 %v10915_v22  ;;  %v306_v10 = vsel %vm11360_vm7, 0, %v305_v4  ;;  %v351_v15 = vsel %vm11355_vm6, 0, %v350_v12  ;;  %v309_v16 = vsel %vm11360_vm7, 0, %v308_v13  ;;  %v515_v18 = vld [vmem:[%s11349_s30 + $0x28] sm:$0xff]  ;;  %v353_v19 = vld [vmem:[#allocation2 + $0x38] sm:$0x1] }
  0x23   : > { %704 = vst [vmem:[#allocation2 + $0x1c] sm:$0xf] %v9165_v2  ;;  %705 = vst [vmem:[#allocation2 + $0x20] sm:$0xf] %v9166_v3  ;;  %v1090_v14 = vsel %vm11373_vm8, %v9197_v6, %v1089_v60  ;;  %v563_v21 = vsel %vm558_vm1, %v543_v11, 0  ;;  %v544_v22 = vpack.c.bf16 %v515_v18, %v514_v17  ;;  %v10932_v34 = vld [vmem:[%s16121_s1 + $0x108] sm:$0xff]   ;;  %v1454_v49 = vsel %vm11408_vm11, %v11388_v9, %v11364_v50 }
  0x24   : > { %9856 = vmatpush3.bf16.msra.mxu0 %v10916_v23  ;;  %307 = vst [vmem:[#allocation2 + $0x2c] sm:$0x8] %v306_v10  ;;  %v9245_v20 = vcombine.low %v1090_v14, %v1099_v7  ;;  %352 = vst [vmem:[#allocation2 + $0x24] sm:$0x1] %v351_v15  ;;  %v354_v23 = vsel %vm11355_vm6, 0, %v353_v19  ;;  %v11421_v44 = vld [vmem:[%s11349_s30 + $0x30] sm:$0xff] }
  0x25   : > { %9968 = vmatpush3.bf16.msra.mxu1 %v10917_v24  ;;  %9857 = vmatprep.subr.bf16.mxu0 %v10918_v25  ;;  %310 = vst [vmem:[#allocation2 + $0x40] sm:$0x8] %v309_v16  ;;  %v1457_v24 = vrot.slane %v1456_v1, 4  ;;  %v1673_v25 = vld [vmem:[#allocation2 + $0x18] sm:$0x8]  ;;  %v565_v33 = vsel %vm558_vm1, %v544_v22, 0 }
  0x26   : > { %9969 = vmatprep.subr.bf16.mxu1 %v10919_v26  ;;  %v9167_v26 = vcombine.low %v563_v21, %v563_v21  ;;  %355 = vst [vmem:[#allocation2 + $0x38] sm:$0x1] %v354_v23  ;;  %v9169_v36 = vcombine.low %v565_v33, %v565_v33  ;;  %v9170_v37 = vcombine.high %v565_v33, %v565_v33  ;;  %v311_v38 = vld [vmem:[#allocation2 + $0x54] sm:$0x8]  ;;  %v10935_v22 = vld [vmem:[%s16121_s1 + $0x150] sm:$0xff]  }
  0x27   : > { %v1430_v35 = vld [vmem:[#allocation2 + $0x10] sm:$0x1]  ;;  %v312_v42 = vsel %vm11360_vm7, 0, %v311_v38 }
  0x28   : > { %9858 = vmatpush3.bf16.msra.mxu0 %v10920_v27  ;;  %v9168_v27 = vcombine.high %v563_v21, %v563_v21  ;;  %706 = vst [vmem:[#allocation2 + $0x30] sm:$0xf] %v9167_v26  ;;  %v1459_v40 = vshll.u32 %v1430_v35, 16  ;;  %v11424_v45 = vld [vmem:[%s11349_s30 + $0x38] sm:$0xff]  ;;  %708 = vst [vmem:[#allocation2 + $0x44] sm:$0xf] %v9169_v36 }
  0x29   : > { %9970 = vmatpush3.bf16.msra.mxu1 %v10921_v28  ;;  %9859 = vmatprep.subr.bf16.mxu0 %v10922_v29  ;;  %v1031_v28 = vld [vmem:[#allocation2 + $0x18] sm:$0x8]  ;;  %v10931_v29 = vld [vmem:[%s16121_s1 + $0x148] sm:$0xff]   ;;  %709 = vst [vmem:[#allocation2 + $0x48] sm:$0xf] %v9170_v37  ;;  %v545_v52 = vpack.c.bf16 %v11424_v45, %v11421_v44 }
  0x2a   : > { %9971 = vmatprep.subr.bf16.mxu1 %v10923_v30  ;;  %v1722_v30 = vshrl.u32 %v1673_v25, 16  ;;  %707 = vst [vmem:[#allocation2 + $0x34] sm:$0xf] %v9168_v27  ;;  %v1674_v46 = vld [vmem:[#allocation2 + $0x1c] sm:$0xf]  ;;  %v1461_v58 = vrot.slane %v1459_v40, 5 }
  0x2b   : > { %v11426_v47 = vld [vmem:[#allocation2 + $0x20] sm:$0xf]  ;;  %v1032_v51 = vld [vmem:[#allocation2 + $0x1c] sm:$0xf]  ;;  %313 = vst [vmem:[#allocation2 + $0x54] sm:$0x8] %v312_v42 }
  0x2c   : > { %9860 = vmatpush3.bf16.msra.mxu0 %v10924_v31  ;;  %v9213_v39 = vrot.slane %v1722_v30, 11  ;;  %v1727_v53 = vshrl.u32 %v1674_v46, 16  ;;  %v1730_v54 = vshll.u32 %v1674_v46, 16  ;;  %v16172_v56 = vshll.u32 %v11426_v47, 16  ;;  %v1033_v57 = vld [vmem:[#allocation2 + $0x20] sm:$0xf] }
  0x2d   : > { %9972 = vmatpush3.bf16.msra.mxu1 %v10925_v32  ;;  %10069 = vmatprep.subr.bf16.mxu0 %v10927_v55  ;;  %v1101_v32 = vshrl.u32 %v1031_v28, 16  ;;  %v1736_v55 = vshrl.u32 %v11426_v47, 16  ;;  %v1106_v60 = vshrl.u32 %v1032_v51, 16  ;;  %v1109_v61 = vshll.u32 %v1032_v51, 16  ;;  %v1676_v6 = vld [vmem:[#allocation2 + $0x2c] sm:$0x8] }
  0x2e   : > { %v1115_v62 = vshrl.u32 %v1033_v57, 16  ;;  %v1729_v50 = vrot.slane %v1727_v53, 7  ;;  %v11436_v0 = vrot.slane %v1727_v53, 4  ;;  %v11438_v1 = vrot.slane %v1730_v54, 5  ;;  %v1431_v21 = vld [vmem:[#allocation2 + $0x24] sm:$0x1] }
  0x2f   : > { %4091 = vmatmul.mubr.bf16.vlgmr.msra.gmra.mrb[0].mxu0 %v9245_v20  ;;  %v11416_v41 = vrot.slane %v1101_v32, 11  ;;  %v1738_v63 = vrot.slane %v1736_v55, 7  ;;  %v11440_v2 = vrot.slane %v1736_v55, 4  ;;  %v1462_v3 = vsel %vm11408_vm11, %v1457_v24, %v1461_v58  ;;  %v11446_v11 = vld [vmem:[#allocation2 + $0x30] sm:$0xf]  ;;  %v10936_v28 = vld [vmem:[%s16121_s1 + $0x110] sm:$0xff]  }
  0x30   : > { %10070 = vmatpush3.bf16.msra.mxu0 %v10928_v8  ;;  %v1108_v4 = vrot.slane %v1106_v60, 7  ;;  %v1117_v5 = vrot.slane %v1115_v62, 7  ;;  %v1732_v7 = vor.u32 %v1730_v54, %v1729_v50  ;;  %v1734_v8 = vrot.slane %v1729_v50, 4  ;;  %v1035_v27 = vld [vmem:[#allocation2 + $0x30] sm:$0xf] }
  0x31   : > { %10071 = vmatprep.subr.bf16.mxu0 %v10931_v29  ;;  %v1741_v9 = vor.u32 %v16172_v56, %v1738_v63  ;;  %v9277_v10 = vcombine.low %v1454_v49, %v1462_v3  ;;  %v11448_v12 = vld [vmem:[#allocation2 + $0x34] sm:$0xf]  ;;  %v1118_v13 = vshll.u32 %v1033_v57, 16  ;;  %v1463_v14 = vrot.slane %v1106_v60, 4 }
  0x32   : > { %v1464_v15 = vrot.slane %v1109_v61, 5  ;;  %v1469_v16 = vrot.slane %v1115_v62, 4  ;;  %v1733_v17 = vsel %vm11373_vm8, %v9213_v39, %v1732_v7  ;;  %v9262_v19 = vcombine.low %v1032_v51, %v1033_v57  ;;  %v1036_v54 = vld [vmem:[#allocation2 + $0x34] sm:$0xf] }
  0x33   : > { %v1742_v18 = vsel %vm11373_vm8, %v1734_v8, %v1741_v9  ;;  %v1744_v20 = vshrl.u32 %v1676_v6, 16  ;;  %v16171_v24 = vshrl.u32 %v11446_v11, 16  ;;  %v16166_v25 = vshll.u32 %v11446_v11, 16  ;;  %v1040_v44 = vld [vmem:[#allocation2 + $0x54] sm:$0x8] }
  0x34   : > { %10072 = vmatpush3.bf16.msra.mxu0 %v10932_v34  ;;  %v9293_v23 = vcombine.low %v1733_v17, %v1742_v18  ;;  %v16148_v26 = vshrl.u32 %v11448_v12, 16  ;;  %4098 = vmatprep.mubr.bf16.mxu0 %v9262_v19  ;;  %v16149_v30 = vshll.u32 %v11448_v12, 16  ;;  %v1111_v32 = vor.u32 %v1109_v61, %v1108_v4  ;;  %v1679_v61 = vld [vmem:[#allocation2 + $0x40] sm:$0x8] }
  0x35   : > { %v9214_v29 = vrot.slane %v1744_v20, 11  ;;  %v1113_v33 = vrot.slane %v1108_v4, 4  ;;  %10073 = vmatprep.subr.bf16.mxu0 %v10935_v22  ;;  %v1751_v34 = vrot.slane %v16171_v24, 7  ;;  %v1120_v36 = vor.u32 %v1118_v13, %v1117_v5  ;;  %v11483_v4 = vld [vmem:[#allocation2 + $0x48] sm:$0xf]  ;;  %v10939_v20 = vld [vmem:[%s16121_s1 + $0x158] sm:$0xff]  }
  0x36   : > { %4251 = vmatprep.mubr.bf16.mxu1 %v9293_v23  ;;  %v1760_v35 = vrot.slane %v16148_v26, 7  ;;  %v1465_v37 = vor.u32 %v1464_v15, %v1463_v14  ;;  %v1112_v38 = vsel %vm11373_vm8, %v11416_v41, %v1111_v32  ;;  %v1467_v39 = vrot.slane %v1118_v13, 5  ;;  %v11477_v41 = vld [vmem:[#allocation2 + $0x44] sm:$0xf]  ;;  %v1034_v5 = vld [vmem:[#allocation2 + $0x2c] sm:$0x8] }
  0x37   : > { %4252 = vmatmul.mubr.bf16.vlgmr.msra.gmra.mrb[0].mxu1 %v9277_v10  ;;  %v1473_v40 = vshll.u32 %v1431_v21, 16  ;;  %v1128_v42 = vshrl.u32 %v1035_v27, 16  ;;  %v1754_v46 = vor.u32 %v16166_v25, %v1751_v34  ;;  %v1756_v49 = vrot.slane %v1751_v34, 4 }
  0x38   : > { %10074 = vmatpush3.bf16.msra.mxu0 %v10936_v28  ;;  %v1763_v51 = vor.u32 %v16149_v30, %v1760_v35  ;;  %v1121_v53 = vsel %vm11373_vm8, %v1113_v33, %v1120_v36  ;;  %v1466_v57 = vrot.slane %v1465_v37, 4  ;;  %v1470_v58 = vor.u32 %v1469_v16, %v1467_v39 }
  0x39   : > { %v9246_v55 = vcombine.low %v1112_v38, %v1121_v53  ;;  %v1475_v60 = vrot.slane %v1473_v40, 5  ;;  %v1755_v62 = vsel %vm11373_vm8, %v9214_v29, %v1754_v46  ;;  %v1130_v63 = vrot.slane %v1128_v42, 7  ;;  %v10940_v29 = vld [vmem:[%s16121_s1 + $0x118] sm:$0xff]   ;;  %10075 = vmatprep.subr.bf16.mxu0 %v10939_v20  ;;  %v1038_v40 = vld [vmem:[#allocation2 + $0x44] sm:$0xf] }
  0x3a   : > { %v1764_v50 = vsel %vm11373_vm8, %v1756_v49, %v1763_v51  ;;  %v1131_v3 = vshll.u32 %v1035_v27, 16  ;;  %v1468_v7 = vsel %vm11408_vm11, %v1466_v57, %v1467_v39  ;;  %v1471_v8 = vrot.slane %v1470_v58, 4  ;;  %v1039_v53 = vld [vmem:[#allocation2 + $0x48] sm:$0xf] }
  0x3b   : > { %v9294_v6 = vcombine.low %v1755_v62, %v1764_v50  ;;  %4099 = vmatmul.mubr.bf16.gmra.mrb[4].mxu0 %v9246_v55  ;;  %v1137_v9 = vshrl.u32 %v1036_v54, 16  ;;  %v1140_v10 = vshll.u32 %v1036_v54, 16  ;;  %v1477_v13 = vrot.slane %v1128_v42, 4 }
  0x3c   : > { %v1478_v14 = vrot.slane %v1131_v3, 5  ;;  %v9263_v15 = vcombine.low %v1035_v27, %v1036_v54  ;;  %v1476_v16 = vsel %vm11408_vm11, %v1471_v8, %v1475_v60  ;;  %v1766_v19 = vshrl.u32 %v1679_v61, 16  ;;  %v1432_v27 = vld [vmem:[#allocation2 + $0x38] sm:$0x1]  ;;  %10076 = vmatpush3.bf16.msra.mxu0 %v10940_v29 }
  0x3d   : > { %4259 = vmatprep.mubr.bf16.mxu1 %v9294_v6  ;;  %v1139_v17 = vrot.slane %v1137_v9, 7  ;;  %v1483_v18 = vrot.slane %v1137_v9, 4  ;;  %v9278_v21 = vcombine.low %v1468_v7, %v1476_v16  ;;  %v16147_v22 = vshrl.u32 %v11477_v41, 16  ;;  %v1682_v7 = vld [vmem:[#allocation2 + $0x54] sm:$0x8]  ;;  %v10943_v8 = vld [vmem:[%s16121_s1 + $0x160] sm:$0xff]  }
  0x3e   : > { %4106 = vmatprep.mubr.bf16.mxu0 %v9263_v15  ;;  %v16146_v23 = vshll.u32 %v11477_v41, 16  ;;  %v16136_v28 = vshrl.u32 %v11483_v4, 16  ;;  %v9215_v32 = vrot.slane %v1766_v19, 11  ;;  %v16143_v33 = vshll.u32 %v11483_v4, 16  ;;  %v1037_v15 = vld [vmem:[#allocation2 + $0x40] sm:$0x8]  ;;  %10077 = vmatprep.subr.bf16.mxu0 %v10943_v8 }
  0x3f   : > { %v1123_v34 = vshrl.u32 %v1034_v5, 16  ;;  %v1133_v35 = vor.u32 %v1131_v3, %v1130_v63  ;;  %4260 = vmatmul.mubr.bf16.gmra.mrb[4].mxu1 %v9278_v21  ;;  %v1773_v36 = vrot.slane %v16147_v22, 7  ;;  %v1135_v38 = vrot.slane %v1130_v63, 4  ;;  %v356_v16 = vld [vmem:[#allocation2 + $0x4c] sm:$0x1]  ;;  %v11545_v8 = vld [vmem:[%s11349_s30 + $0x68] sm:$0xff] }
  0x40   : > { %v1782_v37 = vrot.slane %v16136_v28, 7  ;;  %v1142_v39 = vor.u32 %v1140_v10, %v1139_v17  ;;  %v1479_v46 = vor.u32 %v1478_v14, %v1477_v13  ;;  %v1481_v49 = vrot.slane %v1140_v10, 5  ;;  %v314_v21 = vld [vmem:[#allocation2 + $0x68] sm:$0x8] }
  0x41   : > { %v9199_v42 = vrot.slane %v1123_v34, 11  ;;  %v1487_v51 = vshll.u32 %v1432_v27, 16  ;;  %v1776_v54 = vor.u32 %v16146_v23, %v1773_v36  ;;  %v1778_v55 = vrot.slane %v1773_v36, 4 }
  0x42   : > { %v1785_v57 = vor.u32 %v16143_v33, %v1782_v37  ;;  %v1143_v58 = vsel %vm11373_vm8, %v1135_v38, %v1142_v39  ;;  %v1480_v61 = vrot.slane %v1479_v46, 4  ;;  %v1484_v62 = vor.u32 %v1483_v18, %v1481_v49  ;;  %v10944_v39 = vld [vmem:[%s16121_s1 + $0x120] sm:$0xff]  }
  0x43   : > { %v1134_v60 = vsel %vm11373_vm8, %v9199_v42, %v1133_v35  ;;  %v1489_v50 = vrot.slane %v1487_v51, 5  ;;  %v1777_v63 = vsel %vm11373_vm8, %v9215_v32, %v1776_v54  ;;  %v1150_v6 = vshrl.u32 %v1038_v40, 16  ;;  %v518_v51 = vld [vmem:[%s11349_s30 + $0x40] sm:$0xff]  ;;  %10078 = vmatpush3.bf16.msra.mxu0 %v10944_v39  ;;  %v10948_v39 = vld [vmem:[%s16121_s1 + $0x128] sm:$0xff]  }
  0x44   : > { %v1786_v3 = vsel %vm11373_vm8, %v1778_v55, %v1785_v57  ;;  %v9247_v5 = vcombine.low %v1134_v60, %v1143_v58  ;;  %v1482_v10 = vsel %vm11408_vm11, %v1480_v61, %v1481_v49  ;;  %v1485_v13 = vrot.slane %v1484_v62, 4  ;;  %v359_v57 = vld [vmem:[#allocation2 + $0x60] sm:$0x1]  ;;  %v317_v58 = vld [vmem:[#allocation2 + $0x7c] sm:$0x8]  ;;  %v520_v60 = vld [vmem:[%s11349_s30 + $0x50] sm:$0xff] }
  0x45   : > { %v9295_v9 = vcombine.low %v1777_v63, %v1786_v3  ;;  %v1153_v14 = vshll.u32 %v1038_v40, 16  ;;  %v1152_v17 = vrot.slane %v1150_v6, 7  ;;  %v1159_v18 = vshrl.u32 %v1039_v53, 16  ;;  %v521_v61 = vld [vmem:[%s11349_s30 + $0x58] sm:$0xff] }
  0x46   : > { %4107 = vmatmul.mubr.bf16.gmra.mrb[8].mxu0 %v9247_v5  ;;  %v1162_v19 = vshll.u32 %v1039_v53, 16  ;;  %v1491_v20 = vrot.slane %v1150_v6, 4  ;;  %v1490_v27 = vsel %vm11408_vm11, %v1485_v13, %v1489_v50  ;;  %v9264_v32 = vcombine.low %v1038_v40, %v1039_v53  ;;  %v519_v53 = vld [vmem:[%s11349_s30 + $0x48] sm:$0xff]  ;;  %v362_v5 = vld [vmem:[#allocation2 + $0x74] sm:$0x1] }
  0x47   : > { %4267 = vmatprep.mubr.bf16.mxu1 %v9295_v9  ;;  %v1492_v29 = vrot.slane %v1153_v14, 5  ;;  %v567_v34 = vsel %vm558_vm1, %v545_v52, 0  ;;  %v9279_v35 = vcombine.low %v1482_v10, %v1490_v27  ;;  %v1161_v36 = vrot.slane %v1159_v18, 7  ;;  %v320_v6 = vld [vmem:[#allocation2 + $0x90] sm:$0x8]  ;;  %v10947_v10 = vld [vmem:[%s16121_s1 + $0x168] sm:$0xff]  }
  0x48   : > { %v1497_v37 = vrot.slane %v1159_v18, 4  ;;  %v9171_v38 = vcombine.low %v567_v34, %v567_v34  ;;  %4114 = vmatprep.mubr.bf16.mxu0 %v9264_v32  ;;  %v9172_v42 = vcombine.high %v567_v34, %v567_v34  ;;  %v1788_v46 = vshrl.u32 %v1682_v7, 16  ;;  %v11542_v7 = vld [vmem:[%s11349_s30 + $0x60] sm:$0xff]  ;;  %v365_v9 = vld [vmem:[#allocation2 + $0x88] sm:$0x1]  ;;  %10079 = vmatprep.subr.bf16.mxu0 %v10947_v10 }
  0x49   : > { %v1145_v49 = vshrl.u32 %v1037_v15, 16  ;;  %v1155_v40 = vor.u32 %v1153_v14, %v1152_v17  ;;  %4268 = vmatmul.mubr.bf16.gmra.mrb[8].mxu1 %v9279_v35  ;;  %v1157_v45 = vrot.slane %v1152_v17, 4  ;;  %v1164_v52 = vor.u32 %v1162_v19, %v1161_v36  ;;  %v323_v17 = vld [vmem:[#allocation2 + $0xa4] sm:$0x8]  ;;  %v11555_v18 = vld [vmem:[%s11349_s30 + $0x70] sm:$0xff]  ;;  %10080 = vmatpush3.bf16.msra.mxu0 %v10948_v39 }
  0x4a   : > { %710 = vst [vmem:[#allocation2 + $0x58] sm:$0xf] %v9171_v38  ;;  %v357_v54 = vsel %vm11355_vm6, 0, %v356_v16  ;;  %v1493_v55 = vor.u32 %v1492_v29, %v1491_v20  ;;  %711 = vst [vmem:[#allocation2 + $0x5c] sm:$0xf] %v9172_v42  ;;  %v11535_v62 = vrot.slane %v1788_v46, 11  ;;  %v546_v15 = vpack.c.bf16 %v519_v53, %v518_v51 }
  0x4b   : > { %v9200_v50 = vrot.slane %v1145_v49, 11  ;;  %358 = vst [vmem:[#allocation2 + $0x4c] sm:$0x1] %v357_v54  ;;  %v11537_v63 = vrot.slane %v1162_v19, 5  ;;  %v315_v3 = vsel %vm11360_vm7, 0, %v314_v21  ;;  %v1165_v13 = vsel %vm11373_vm8, %v1157_v45, %v1164_v52  ;;  %v11558_v19 = vld [vmem:[%s11349_s30 + $0x78] sm:$0xff] }
  0x4c   : > { %v11552_v14 = vrot.slane %v1493_v55, 4  ;;  %316 = vst [vmem:[#allocation2 + $0x68] sm:$0x8] %v315_v3  ;;  %v1167_v16 = vshrl.u32 %v1040_v44, 16  ;;  %v11561_v20 = vld [vmem:[%s11349_s30 + $0x80] sm:$0xff]  ;;  %v360_v29 = vsel %vm11355_vm6, 0, %v359_v57  ;;  %v548_v44 = vpack.c.bf16 %v11545_v8, %v11542_v7 }
  0x4d   : > { %v1156_v21 = vsel %vm11373_vm8, %v9200_v50, %v1155_v40  ;;  %v1498_v27 = vor.u32 %v1497_v37, %v11537_v63  ;;  %v318_v32 = vsel %vm11360_vm7, 0, %v317_v58  ;;  %v569_v36 = vsel %vm558_vm1, %v546_v15, 0  ;;  %361 = vst [vmem:[#allocation2 + $0x60] sm:$0x1] %v360_v29  ;;  %v11578_v37 = vld [vmem:[%s11349_s30 + $0x88] sm:$0xff] }
  0x4e   : > { %v9248_v34 = vcombine.low %v1156_v21, %v1165_v13  ;;  %v1496_v35 = vsel %vm11408_vm11, %v11552_v14, %v11537_v63  ;;  %v11575_v38 = vrot.slane %v1167_v16, 11  ;;  %319 = vst [vmem:[#allocation2 + $0x7c] sm:$0x8] %v318_v32  ;;  %v9173_v46 = vcombine.low %v569_v36, %v569_v36  ;;  %v368_v8 = vld [vmem:[#allocation2 + $0x9c] sm:$0x1] }
  0x4f   : > { %v1499_v42 = vrot.slane %v1498_v27, 4  ;;  %v9174_v49 = vcombine.high %v569_v36, %v569_v36  ;;  %v547_v40 = vpack.c.bf16 %v521_v61, %v520_v60  ;;  %v363_v51 = vsel %vm11355_vm6, 0, %v362_v5 }
  0x50   : > { %4115 = vmatmul.mubr.bf16.gmra.mrb[12].mxu0 %v9248_v34  ;;  %v321_v53 = vsel %vm11360_vm7, 0, %v320_v6  ;;  %v366_v45 = vsel %vm11355_vm6, 0, %v365_v9  ;;  %712 = vst [vmem:[#allocation2 + $0x6c] sm:$0xf] %v9173_v46  ;;  %364 = vst [vmem:[#allocation2 + $0x74] sm:$0x1] %v363_v51  ;;  %v549_v58 = vpack.c.bf16 %v11558_v19, %v11555_v18  ;;  %v550_v60 = vpack.c.bf16 %v11578_v37, %v11561_v20 }
  0x51   : > { %v11591_v52 = vld [vmem:[#allocation2 + $0x58] sm:$0xf]  ;;  %713 = vst [vmem:[#allocation2 + $0x70] sm:$0xf] %v9174_v49  ;;  %v571_v55 = vsel %vm558_vm1, %v547_v40, 0  ;;  %v324_v57 = vsel %vm11360_vm7, 0, %v323_v17 }
  0x52   : > { %v1041_v54 = vld [vmem:[#allocation2 + $0x58] sm:$0xf]  ;;  %322 = vst [vmem:[#allocation2 + $0x90] sm:$0x8] %v321_v53  ;;  %367 = vst [vmem:[#allocation2 + $0x88] sm:$0x1] %v366_v45  ;;  %v9175_v6 = vcombine.low %v571_v55, %v571_v55  ;;  %v9176_v9 = vcombine.high %v571_v55, %v571_v55 }
  0x53   : > { %v11600_v61 = vld [vmem:[#allocation2 + $0x5c] sm:$0xf]  ;;  %v16135_v50 = vshrl.u32 %v11591_v52, 16  ;;  %v16134_v3 = vshll.u32 %v11591_v52, 16  ;;  %v1433_v5 = vld [vmem:[#allocation2 + $0x4c] sm:$0x1] }
  0x54   : > { %325 = vst [vmem:[#allocation2 + $0xa4] sm:$0x8] %v324_v57  ;;  %v16128_v10 = vshrl.u32 %v11600_v61, 16  ;;  %v16129_v13 = vshll.u32 %v11600_v61, 16  ;;  %v1501_v15 = vshll.u32 %v1433_v5, 16  ;;  %v1172_v17 = vshrl.u32 %v1041_v54, 16 }
  0x55   : > { %v1042_v16 = vld [vmem:[#allocation2 + $0x5c] sm:$0xf]  ;;  %v1795_v21 = vrot.slane %v16135_v50, 7  ;;  %v1175_v27 = vshll.u32 %v1041_v54, 16  ;;  %714 = vst [vmem:[#allocation2 + $0x80] sm:$0xf] %v9175_v6 }
  0x56   : > { %v1181_v29 = vshrl.u32 %v1042_v16, 16  ;;  %v1184_v32 = vshll.u32 %v1042_v16, 16  ;;  %715 = vst [vmem:[#allocation2 + $0x84] sm:$0xf] %v9176_v9  ;;  %v1804_v34 = vrot.slane %v16128_v10, 7  ;;  %v1503_v36 = vrot.slane %v1501_v15, 5 }
  0x57   : > { %v1174_v39 = vrot.slane %v1172_v17, 7  ;;  %v1505_v46 = vrot.slane %v1172_v17, 4  ;;  %v1685_v49 = vld [vmem:[#allocation2 + $0x68] sm:$0x8]  ;;  %v1798_v40 = vor.u32 %v16134_v3, %v1795_v21  ;;  %v1800_v51 = vrot.slane %v1795_v21, 4  ;;  %v10963_v18 = vld [vmem:[%s16121_s1 + $0x178] sm:$0xff]  }
  0x58   : > { %v1183_v53 = vrot.slane %v1181_v29, 7  ;;  %v1506_v45 = vrot.slane %v1175_v27, 5  ;;  %v1807_v55 = vor.u32 %v16129_v13, %v1804_v34  ;;  %v1504_v57 = vsel %vm11408_vm11, %v1499_v42, %v1503_v36  ;;  %v1434_v9 = vld [vmem:[#allocation2 + $0x60] sm:$0x1]  ;;  %v10951_v15 = vld [vmem:[%s16121_s1 + $0x170] sm:$0xff]  }
  0x59   : > { %v1511_v5 = vrot.slane %v1181_v29, 4  ;;  %v9265_v6 = vcombine.low %v1041_v54, %v1042_v16  ;;  %v1799_v17 = vsel %vm11373_vm8, %v11535_v62, %v1798_v40  ;;  %v9280_v21 = vcombine.low %v1496_v35, %v1504_v57  ;;  %v11627_v34 = vld [vmem:[#allocation2 + $0x6c] sm:$0xf]  ;;  %v11629_v42 = vld [vmem:[#allocation2 + $0x70] sm:$0xf]  ;;  %10081 = vmatprep.subr.bf16.mxu0 %v10951_v15  ;;  %v10953_v35 = vld [vmem:[%s16121_s1 + $0x1c0] sm:$0xff]  }
  0x5a   : > { %v1810_v54 = vshrl.u32 %v1685_v49, 16  ;;  %v1177_v16 = vor.u32 %v1175_v27, %v1174_v39  ;;  %v10952_v29 = vld [vmem:[%s16121_s1 + $0x130] sm:$0xff]   ;;  %v1808_v36 = vsel %vm11373_vm8, %v1800_v51, %v1807_v55  ;;  %v16132_v62 = vshrl.u32 %v11627_v34, 16  ;;  %10181 = vmatprep.subr.bf16.mxu1 %v10953_v35 }
  0x5b   : > { %4122 = vmatprep.mubr.bf16.mxu0 %v9265_v6  ;;  %v16131_v40 = vshll.u32 %v11627_v34, 16  ;;  %v16130_v63 = vshrl.u32 %v11629_v42, 16  ;;  %v11639_v14 = vld [vmem:[#allocation2 + $0x6c] sm:$0xf]  ;;  %v9296_v27 = vcombine.low %v1799_v17, %v1808_v36  ;;  %v16133_v57 = vshll.u32 %v11629_v42, 16  ;;  %10082 = vmatpush3.bf16.msra.mxu0 %v10952_v29  ;;  %v10954_v17 = vld [vmem:[%s16121_s1 + $0x180] sm:$0xff]  }
  0x5c   : > { %v9217_v49 = vrot.slane %v1810_v54, 11  ;;  %v1178_v51 = vsel %vm11373_vm8, %v11575_v38, %v1177_v16  ;;  %v1817_v55 = vrot.slane %v16132_v62, 7  ;;  %v1179_v15 = vrot.slane %v1174_v39, 4  ;;  %v10955_v16 = vld [vmem:[%s16121_s1 + $0x1c8] sm:$0xff]   ;;  %10182 = vmatpush3.bf16.msra.mxu1 %v10954_v17  ;;  %v1688_v62 = vld [vmem:[#allocation2 + $0x7c] sm:$0x8]  ;;  %10083 = vmatprep.subr.bf16.mxu0 %v10963_v18 }
  0x5d   : > { %v1826_v6 = vrot.slane %v16130_v63, 7  ;;  %v1186_v10 = vor.u32 %v1184_v32, %v1183_v53  ;;  %4275 = vmatprep.mubr.bf16.mxu1 %v9296_v27  ;;  %v1507_v54 = vor.u32 %v1506_v45, %v1505_v46  ;;  %v1509_v36 = vrot.slane %v1184_v32, 5  ;;  %v1045_v46 = vld [vmem:[#allocation2 + $0x70] sm:$0xf]  ;;  %10183 = vmatprep.subr.bf16.mxu1 %v10955_v16  ;;  %v1048_v50 = vld [vmem:[#allocation2 + $0x84] sm:$0xf] }
  0x5e   : > { %v1515_v13 = vshll.u32 %v1434_v9, 16  ;;  %v1194_v38 = vshrl.u32 %v11639_v14, 16  ;;  %4276 = vmatmul.mubr.bf16.gmra.mrb[12].mxu1 %v9280_v21  ;;  %v1820_v39 = vor.u32 %v16131_v40, %v1817_v55  ;;  %v1822_v53 = vrot.slane %v1817_v55, 4 }
  0x5f   : > { %v1829_v29 = vor.u32 %v16133_v57, %v1826_v6  ;;  %v1187_v35 = vsel %vm11373_vm8, %v1179_v15, %v1186_v10  ;;  %v1508_v45 = vrot.slane %v1507_v54, 4  ;;  %v1512_v9 = vor.u32 %v1511_v5, %v1509_v36  ;;  %v1043_v6 = vld [vmem:[#allocation2 + $0x68] sm:$0x8]  ;;  %v11674_v15 = vld [vmem:[#allocation2 + $0x84] sm:$0xf] }
  0x60   : > { %v9249_v32 = vcombine.low %v1178_v51, %v1187_v35  ;;  %v1517_v27 = vrot.slane %v1515_v13, 5  ;;  %v1821_v63 = vsel %vm11373_vm8, %v9217_v49, %v1820_v39  ;;  %v1196_v40 = vrot.slane %v1194_v38, 7  ;;  %v11672_v51 = vld [vmem:[#allocation2 + $0x80] sm:$0xf] }
  0x61   : > { %v1830_v21 = vsel %vm11373_vm8, %v1822_v53, %v1829_v29  ;;  %v1197_v55 = vshll.u32 %v11639_v14, 16  ;;  %v1510_v10 = vsel %vm11408_vm11, %v1508_v45, %v1509_v36  ;;  %v1513_v5 = vrot.slane %v1512_v9, 4  ;;  %v1435_v53 = vld [vmem:[#allocation2 + $0x74] sm:$0x1]  ;;  %v10957_v36 = vld [vmem:[%s16121_s1 + $0x188] sm:$0xff]  }
  0x62   : > { %v9297_v57 = vcombine.low %v1821_v63, %v1830_v21  ;;  %4123 = vmatmul.mubr.bf16.gmra.mrb[16].mxu0 %v9249_v32  ;;  %v1203_v13 = vshrl.u32 %v1045_v46, 16  ;;  %v1206_v49 = vshll.u32 %v1045_v46, 16  ;;  %v1519_v17 = vrot.slane %v1194_v38, 4  ;;  %v1047_v21 = vld [vmem:[#allocation2 + $0x80] sm:$0xf]  ;;  %10184 = vmatpush3.bf16.msra.mxu1 %v10957_v36 }
  0x63   : > { %v1520_v54 = vrot.slane %v1197_v55, 5  ;;  %v9266_v39 = vcombine.low %v11639_v14, %v1045_v46  ;;  %v1518_v63 = vsel %vm11408_vm11, %v1513_v5, %v1517_v27  ;;  %v1832_v35 = vshrl.u32 %v1688_v62, 16 }
  0x64   : > { %4283 = vmatprep.mubr.bf16.mxu1 %v9297_v57  ;;  %v1205_v16 = vrot.slane %v1203_v13, 7  ;;  %v1525_v29 = vrot.slane %v1203_v13, 4  ;;  %v9281_v32 = vcombine.low %v1510_v10, %v1518_v63  ;;  %v16137_v45 = vshrl.u32 %v11672_v51, 16  ;;  %v10958_v57 = vld [vmem:[%s16121_s1 + $0x1d0] sm:$0xff]  }
  0x65   : > { %4130 = vmatprep.mubr.bf16.mxu0 %v9266_v39  ;;  %v16141_v38 = vshll.u32 %v11672_v51, 16  ;;  %v16138_v14 = vshrl.u32 %v11674_v15, 16  ;;  %v9218_v46 = vrot.slane %v1832_v35, 11  ;;  %v16139_v9 = vshll.u32 %v11674_v15, 16  ;;  %v10959_v10 = vld [vmem:[%s16121_s1 + $0x190] sm:$0xff]   ;;  %10185 = vmatprep.subr.bf16.mxu1 %v10958_v57 }
  0x66   : > { %v1189_v62 = vshrl.u32 %v1043_v6, 16  ;;  %v1199_v27 = vor.u32 %v1197_v55, %v1196_v40  ;;  %4284 = vmatmul.mubr.bf16.gmra.mrb[16].mxu1 %v9281_v32  ;;  %v1839_v5 = vrot.slane %v16137_v45, 7  ;;  %v1201_v39 = vrot.slane %v1196_v40, 4  ;;  %v10960_v55 = vld [vmem:[%s16121_s1 + $0x1d8] sm:$0xff]  }
  0x67   : > { %v1848_v13 = vrot.slane %v16138_v14, 7  ;;  %v1208_v63 = vor.u32 %v1206_v49, %v1205_v16  ;;  %v1521_v35 = vor.u32 %v1520_v54, %v1519_v17  ;;  %v1523_v36 = vrot.slane %v1206_v49, 5  ;;  %10186 = vmatpush3.bf16.msra.mxu1 %v10959_v10  ;;  %v1691_v10 = vld [vmem:[#allocation2 + $0x90] sm:$0x8] }
  0x68   : > { %v9202_v6 = vrot.slane %v1189_v62, 11  ;;  %v1529_v3 = vshll.u32 %v1435_v53, 16  ;;  %v1842_v32 = vor.u32 %v16141_v38, %v1839_v5  ;;  %v1844_v28 = vrot.slane %v1839_v5, 4  ;;  %v1046_v5 = vld [vmem:[#allocation2 + $0x7c] sm:$0x8]  ;;  %10187 = vmatprep.subr.bf16.mxu1 %v10960_v55 }
  0x69   : > { %v1851_v45 = vor.u32 %v16139_v9, %v1848_v13  ;;  %v1209_v40 = vsel %vm11373_vm8, %v1201_v39, %v1208_v63  ;;  %v1522_v57 = vrot.slane %v1521_v35, 4  ;;  %v1526_v14 = vor.u32 %v1525_v29, %v1523_v36  ;;  %v10962_v13 = vld [vmem:[%s16121_s1 + $0x198] sm:$0xff]  }
  0x6a   : > { %v1200_v16 = vsel %vm11373_vm8, %v9202_v6, %v1199_v27  ;;  %v1531_v62 = vrot.slane %v1529_v3, 5  ;;  %v1843_v49 = vsel %vm11373_vm8, %v9218_v46, %v1842_v32  ;;  %v1216_v53 = vshrl.u32 %v1047_v21, 16 }
  0x6b   : > { %v1852_v17 = vsel %vm11373_vm8, %v1844_v28, %v1851_v45  ;;  %v9250_v54 = vcombine.low %v1200_v16, %v1209_v40  ;;  %v1524_v29 = vsel %vm11408_vm11, %v1522_v57, %v1523_v36  ;;  %v1527_v3 = vrot.slane %v1526_v14, 4  ;;  %v1436_v45 = vld [vmem:[#allocation2 + $0x88] sm:$0x1]  ;;  %10188 = vmatpush3.bf16.msra.mxu1 %v10962_v13 }
  0x6c   : > { %v9298_v39 = vcombine.low %v1843_v49, %v1852_v17  ;;  %v1219_v27 = vshll.u32 %v1047_v21, 16  ;;  %v1218_v46 = vrot.slane %v1216_v53, 7  ;;  %v1225_v63 = vshrl.u32 %v1048_v50, 16 }
  0x6d   : > { %4131 = vmatmul.mubr.bf16.gmra.mrb[20].mxu0 %v9250_v54  ;;  %v1228_v6 = vshll.u32 %v1048_v50, 16  ;;  %v1533_v28 = vrot.slane %v1216_v53, 4  ;;  %v1532_v55 = vsel %vm11408_vm11, %v1527_v3, %v1531_v62  ;;  %v9267_v32 = vcombine.low %v1047_v21, %v1048_v50 }
  0x6e   : > { %4291 = vmatprep.mubr.bf16.mxu1 %v9298_v39  ;;  %v1534_v35 = vrot.slane %v1219_v27, 5  ;;  %v573_v36 = vsel %vm558_vm1, %v548_v44, 0  ;;  %v9282_v14 = vcombine.low %v1524_v29, %v1532_v55  ;;  %v1227_v40 = vrot.slane %v1225_v63, 7  ;;  %v1694_v39 = vld [vmem:[#allocation2 + $0xa4] sm:$0x8] }
  0x6f   : > { %v1539_v16 = vrot.slane %v1225_v63, 4  ;;  %v9177_v57 = vcombine.low %v573_v36, %v573_v36  ;;  %4138 = vmatprep.mubr.bf16.mxu0 %v9267_v32  ;;  %v9178_v49 = vcombine.high %v573_v36, %v573_v36  ;;  %v1854_v17 = vshrl.u32 %v1691_v10, 16  ;;  %v326_v44 = vld [vmem:[#allocation2 + $0xb8] sm:$0x8]  ;;  %v371_v55 = vld [vmem:[#allocation2 + $0xb0] sm:$0x1] }
  0x70   : > { %v1211_v54 = vshrl.u32 %v1046_v5, 16  ;;  %v1221_v53 = vor.u32 %v1219_v27, %v1218_v46  ;;  %4292 = vmatmul.mubr.bf16.gmra.mrb[20].mxu1 %v9282_v14  ;;  %v1223_v62 = vrot.slane %v1218_v46, 4  ;;  %v1230_v50 = vor.u32 %v1228_v6, %v1227_v40  ;;  %v1049_v27 = vld [vmem:[#allocation2 + $0x90] sm:$0x8]  ;;  %v11744_v14 = vld [vmem:[%s11349_s30 + $0xa0] sm:$0xff]  ;;  %v11747_v40 = vld [vmem:[%s11349_s30 + $0xa8] sm:$0xff] }
  0x71   : > { %716 = vst [vmem:[#allocation2 + $0x94] sm:$0xf] %v9177_v57  ;;  %v1535_v21 = vor.u32 %v1534_v35, %v1533_v28  ;;  %v1537_v7 = vrot.slane %v1228_v6, 5  ;;  %717 = vst [vmem:[#allocation2 + $0x98] sm:$0xf] %v9178_v49  ;;  %v11722_v13 = vrot.slane %v1854_v17, 11 }
  0x72   : > { %v9203_v29 = vrot.slane %v1211_v54, 11  ;;  %v1543_v3 = vshll.u32 %v1436_v45, 16  ;;  %v575_v5 = vsel %vm558_vm1, %v549_v58, 0  ;;  %v1231_v10 = vsel %vm11373_vm8, %v1223_v62, %v1230_v50  ;;  %v11730_v28 = vld [vmem:[#allocation2 + $0xa4] sm:$0x8]  ;;  %v11733_v45 = vld [vmem:[%s11349_s30 + $0x90] sm:$0xff] }
  0x73   : > { %v1536_v46 = vrot.slane %v1535_v21, 4  ;;  %v1540_v63 = vor.u32 %v1539_v16, %v1537_v7  ;;  %v9179_v6 = vcombine.low %v575_v5, %v575_v5  ;;  %v11736_v35 = vld [vmem:[%s11349_s30 + $0x98] sm:$0xff]  ;;  %v9180_v32 = vcombine.high %v575_v5, %v575_v5  ;;  %v11750_v16 = vld [vmem:[%s11349_s30 + $0xb0] sm:$0xff] }
  0x74   : > { %v1222_v19 = vsel %vm11373_vm8, %v9203_v29, %v1221_v53  ;;  %v1545_v58 = vrot.slane %v1543_v3, 5  ;;  %v1876_v36 = vshrl.u32 %v1694_v39, 16  ;;  %v11753_v57 = vld [vmem:[%s11349_s30 + $0xb8] sm:$0xff]  ;;  %v1233_v62 = vshrl.u32 %v1049_v27, 16  ;;  %v10965_v39 = vld [vmem:[%s16121_s1 + $0x1e0] sm:$0xff]  }
  0x75   : > { %v9251_v49 = vcombine.low %v1222_v19, %v1231_v10  ;;  %v1538_v17 = vsel %vm11408_vm11, %v1536_v46, %v1537_v7  ;;  %v1541_v54 = vrot.slane %v1540_v63, 4  ;;  %718 = vst [vmem:[#allocation2 + $0xa8] sm:$0xf] %v9179_v6  ;;  %v10964_v53 = vld [vmem:[%s16121_s1 + $0x138] sm:$0xff]   ;;  %719 = vst [vmem:[#allocation2 + $0xac] sm:$0xf] %v9180_v32  ;;  %10189 = vmatprep.subr.bf16.mxu1 %v10965_v39 }
  0x76   : > { %v11763_v50 = vrot.slane %v1876_v36, 11  ;;  %v369_v21 = vsel %vm11355_vm6, 0, %v368_v8  ;;  %v327_v7 = vsel %vm11360_vm7, 0, %v326_v44  ;;  %v577_v29 = vsel %vm558_vm1, %v550_v60, 0  ;;  %v10966_v8 = vld [vmem:[%s16121_s1 + $0x1a0] sm:$0xff]   ;;  %10084 = vmatpush3.bf16.msra.mxu0 %v10964_v53 }
  0x77   : > { %4139 = vmatmul.mubr.bf16.gmra.mrb[24].mxu0 %v9251_v49  ;;  %v1546_v3 = vsel %vm11408_vm11, %v1541_v54, %v1545_v58  ;;  %v11775_v5 = vrot.slane %v1233_v62, 11  ;;  %370 = vst [vmem:[#allocation2 + $0x9c] sm:$0x1] %v369_v21  ;;  %328 = vst [vmem:[#allocation2 + $0xb8] sm:$0x8] %v327_v7  ;;  %v9181_v27 = vcombine.low %v577_v29, %v577_v29  ;;  %v1255_v60 = vshrl.u32 %v11730_v28, 16 }
  0x78   : > { %v9182_v10 = vcombine.high %v577_v29, %v577_v29  ;;  %v11780_v44 = vld [vmem:[#allocation2 + $0x94] sm:$0xf]  ;;  %v11782_v20 = vcombine.low %v1538_v17, %v1546_v3  ;;  %v372_v46 = vsel %vm11355_vm6, 0, %v371_v55  ;;  %v551_v63 = vpack.c.bf16 %v11736_v35, %v11733_v45  ;;  %v11789_v6 = vld [vmem:[#allocation2 + $0x98] sm:$0xf]  ;;  %10190 = vmatpush3.bf16.msra.mxu1 %v10966_v8  ;;  %v10967_v7 = vld [vmem:[%s16121_s1 + $0x1e8] sm:$0xff]  }
  0x79   : > { %v1050_v37 = vld [vmem:[#allocation2 + $0x94] sm:$0xf]  ;;  %v16140_v18 = vshrl.u32 %v11780_v44, 16  ;;  %v16144_v19 = vshll.u32 %v11780_v44, 16  ;;  %v1051_v58 = vld [vmem:[#allocation2 + $0x98] sm:$0xf]  ;;  %v552_v32 = vpack.c.bf16 %v11747_v40, %v11744_v14  ;;  %v553_v55 = vpack.c.bf16 %v11753_v57, %v11750_v16  ;;  %10191 = vmatprep.subr.bf16.mxu1 %v10967_v7 }
  0x7a   : > { %720 = vst [vmem:[#allocation2 + $0xbc] sm:$0xf] %v9181_v27  ;;  %721 = vst [vmem:[#allocation2 + $0xc0] sm:$0xf] %v9182_v10  ;;  %v16142_v36 = vshrl.u32 %v11789_v6, 16  ;;  %v16145_v49 = vshll.u32 %v11789_v6, 16  ;;  %v9268_v21 = vcombine.low %v1050_v37, %v1051_v58 }
  0x7b   : > { %373 = vst [vmem:[#allocation2 + $0xb0] sm:$0x1] %v372_v46  ;;  %v1238_v17 = vshrl.u32 %v1050_v37, 16  ;;  %v1241_v54 = vshll.u32 %v1050_v37, 16  ;;  %v1861_v62 = vrot.slane %v16140_v18, 7  ;;  %v1247_v53 = vshrl.u32 %v1051_v58, 16 }
  0x7c   : > { %v1250_v39 = vshll.u32 %v1051_v58, 16  ;;  %v1870_v29 = vrot.slane %v16142_v36, 7  ;;  %v11806_v8 = vld [vmem:[#allocation2 + $0xa8] sm:$0xf]  ;;  %4146 = vmatprep.mubr.bf16.mxu0 %v9268_v21  ;;  %v11810_v37 = vld [vmem:[#allocation2 + $0xac] sm:$0xf] }
  0x7d   : > { %v1240_v3 = vrot.slane %v1238_v17, 7  ;;  %v1547_v27 = vrot.slane %v1238_v17, 4  ;;  %v1548_v10 = vrot.slane %v1241_v54, 5  ;;  %v1864_v46 = vor.u32 %v16144_v19, %v1861_v62  ;;  %v341_v14 = vld [vmem:[#allocation2 + $0x11c] sm:$0x8]  ;;  %v537_v40 = vld [vmem:[%s11349_s30 + $0xd8] sm:$0xff] }
  0x7e   : > { %v1866_v9 = vrot.slane %v1861_v62, 4  ;;  %v1249_v18 = vrot.slane %v1247_v53, 7  ;;  %v1553_v38 = vrot.slane %v1247_v53, 4  ;;  %v1873_v58 = vor.u32 %v16145_v49, %v1870_v29  ;;  %v1437_v22 = vld [vmem:[#allocation2 + $0x9c] sm:$0x1] }
  0x7f   : > { %v16151_v36 = vshrl.u32 %v11806_v8, 16  ;;  %v16160_v17 = vshll.u32 %v11806_v8, 16  ;;  %v16150_v33 = vshrl.u32 %v11810_v37, 16  ;;  %v1865_v19 = vsel %vm11373_vm8, %v11722_v13, %v1864_v46 }
  0x80   : > { %v16152_v62 = vshll.u32 %v11810_v37, 16  ;;  %v1243_v53 = vor.u32 %v1241_v54, %v1240_v3  ;;  %v1245_v21 = vrot.slane %v1240_v3, 4  ;;  %v1874_v7 = vsel %vm11373_vm8, %v1866_v9, %v1873_v58  ;;  %v1053_v54 = vld [vmem:[#allocation2 + $0xa8] sm:$0xf]  ;;  %v10969_v9 = vld [vmem:[%s16121_s1 + $0x1a8] sm:$0xff]  }
  0x81   : > { %v1883_v29 = vrot.slane %v16151_v36, 7  ;;  %v1892_v49 = vrot.slane %v16150_v33, 7  ;;  %v1252_v23 = vor.u32 %v1250_v39, %v1249_v18  ;;  %v9299_v26 = vcombine.low %v1865_v19, %v1874_v7  ;;  %v1054_v7 = vld [vmem:[#allocation2 + $0xac] sm:$0xf]  ;;  %v1697_v33 = vld [vmem:[#allocation2 + $0xb8] sm:$0x8]  ;;  %10192 = vmatpush3.bf16.msra.mxu1 %v10969_v9 }
  0x82   : > { %v1244_v13 = vsel %vm11373_vm8, %v11775_v5, %v1243_v53  ;;  %v1549_v46 = vor.u32 %v1548_v10, %v1547_v27  ;;  %v1551_v30 = vrot.slane %v1250_v39, 5  ;;  %v10970_v5 = vld [vmem:[%s16121_s1 + $0x1f0] sm:$0xff]   ;;  %v1557_v53 = vshll.u32 %v1437_v22, 16  ;;  %v11842_v36 = vld [vmem:[#allocation2 + $0xbc] sm:$0xf] }
  0x83   : > { %v1886_v3 = vor.u32 %v16160_v17, %v1883_v29  ;;  %v1888_v58 = vrot.slane %v1883_v29, 4  ;;  %v1895_v18 = vor.u32 %v16152_v62, %v1892_v49  ;;  %v1253_v19 = vsel %vm11373_vm8, %v1245_v21, %v1252_v23  ;;  %4299 = vmatprep.mubr.bf16.mxu1 %v9299_v26  ;;  %10193 = vmatprep.subr.bf16.mxu1 %v10970_v5  ;;  %v1438_v5 = vld [vmem:[#allocation2 + $0xb0] sm:$0x1] }
  0x84   : > { %v9252_v39 = vcombine.low %v1244_v13, %v1253_v19  ;;  %v1550_v27 = vrot.slane %v1549_v46, 4  ;;  %v1554_v10 = vor.u32 %v1553_v38, %v1551_v30  ;;  %4300 = vmatmul.mubr.bf16.gmra.mrb[24].mxu1 %v11782_v20  ;;  %v1260_v21 = vshrl.u32 %v1053_v54, 16  ;;  %v11852_v46 = vld [vmem:[#allocation2 + $0xc0] sm:$0xf] }
  0x85   : > { %v1887_v23 = vsel %vm11373_vm8, %v11763_v50, %v1886_v3  ;;  %v1896_v49 = vsel %vm11373_vm8, %v1888_v58, %v1895_v18  ;;  %v1263_v29 = vshll.u32 %v1053_v54, 16  ;;  %v1559_v13 = vrot.slane %v1557_v53, 5 }
  0x86   : > { %v9300_v26 = vcombine.low %v1887_v23, %v1896_v49  ;;  %4147 = vmatmul.mubr.bf16.gmra.mrb[28].mxu0 %v9252_v39  ;;  %v1552_v22 = vsel %vm11408_vm11, %v1550_v27, %v1551_v30  ;;  %v1555_v38 = vrot.slane %v1554_v10, 4  ;;  %v1262_v20 = vrot.slane %v1260_v21, 7  ;;  %v10971_v27 = vld [vmem:[%s16121_s1 + $0x1b0] sm:$0xff]  }
  0x87   : > { %v1269_v9 = vshrl.u32 %v1054_v7, 16  ;;  %v1272_v19 = vshll.u32 %v1054_v7, 16  ;;  %v1561_v62 = vrot.slane %v1260_v21, 4  ;;  %v1562_v3 = vrot.slane %v1263_v29, 5  ;;  %10194 = vmatpush3.bf16.msra.mxu1 %v10971_v27  ;;  %v1057_v27 = vld [vmem:[#allocation2 + $0xc0] sm:$0xf] }
  0x88   : > { %4307 = vmatprep.mubr.bf16.mxu1 %v9300_v26  ;;  %v1560_v50 = vsel %vm11408_vm11, %v1555_v38, %v1559_v13  ;;  %v9269_v58 = vcombine.low %v1053_v54, %v1054_v7  ;;  %v1898_v18 = vshrl.u32 %v1697_v33, 16  ;;  %v16153_v30 = vshrl.u32 %v11842_v36, 16  ;;  %v1056_v38 = vld [vmem:[#allocation2 + $0xbc] sm:$0xf]  ;;  %v10972_v13 = vld [vmem:[%s16121_s1 + $0x1f8] sm:$0xff]  }
  0x89   : > { %v9284_v39 = vcombine.low %v1552_v22, %v1560_v50  ;;  %v1271_v23 = vrot.slane %v1269_v9, 7  ;;  %v1567_v49 = vrot.slane %v1269_v9, 4  ;;  %v16156_v53 = vshll.u32 %v11842_v36, 16  ;;  %10195 = vmatprep.subr.bf16.mxu1 %v10972_v13 }
  0x8a   : > { %4154 = vmatprep.mubr.bf16.mxu0 %v9269_v58  ;;  %v9221_v10 = vrot.slane %v1898_v18, 11  ;;  %v16154_v21 = vshrl.u32 %v11852_v46, 16  ;;  %v16155_v26 = vshll.u32 %v11852_v46, 16  ;;  %v1905_v33 = vrot.slane %v16153_v30, 7 }
  0x8b   : > { %v9205_v54 = vrot.slane %v1255_v60, 11  ;;  %v1265_v7 = vor.u32 %v1263_v29, %v1262_v20  ;;  %v1267_v22 = vrot.slane %v1262_v20, 4  ;;  %v1274_v50 = vor.u32 %v1272_v19, %v1271_v23  ;;  %v10973_v20 = vld [vmem:[%s16121_s1 + $0x1b8] sm:$0xff]   ;;  %v10974_v23 = vld [vmem:[%s16121_s1 + $0x200] sm:$0xff]  }
  0x8c   : > { %v1914_v9 = vrot.slane %v16154_v21, 7  ;;  %v1563_v58 = vor.u32 %v1562_v3, %v1561_v62  ;;  %v1565_v18 = vrot.slane %v1272_v19, 5  ;;  %4308 = vmatmul.mubr.bf16.gmra.mrb[28].mxu1 %v9284_v39  ;;  %v1908_v30 = vor.u32 %v16156_v53, %v1905_v33  ;;  %10789 = vmatprep.subr.bf16.mxu0 %v10974_v23 }
  0x8d   : > { %v1910_v28 = vrot.slane %v1905_v33, 4  ;;  %v1266_v60 = vsel %vm11373_vm8, %v9205_v54, %v1265_v7  ;;  %v1571_v29 = vshll.u32 %v1438_v5, 16  ;;  %v1275_v19 = vsel %vm11373_vm8, %v1267_v22, %v1274_v50  ;;  %10196 = vmatpush3.bf16.msra.mxu1 %v10973_v20  ;;  %v329_v22 = vld [vmem:[#allocation2 + $0xcc] sm:$0x8]  ;;  %v374_v50 = vld [vmem:[#allocation2 + $0xc4] sm:$0x1] }
  0x8e   : > { %v1917_v62 = vor.u32 %v16155_v26, %v1914_v9  ;;  %v1564_v3 = vrot.slane %v1563_v58, 4  ;;  %v1568_v39 = vor.u32 %v1567_v49, %v1565_v18  ;;  %v1909_v5 = vsel %vm11373_vm8, %v9221_v10, %v1908_v30  ;;  %v1055_v10 = vld [vmem:[#allocation2 + $0xb8] sm:$0x8] }
  0x8f   : > { %v9253_v33 = vcombine.low %v1266_v60, %v1275_v19  ;;  %v1573_v54 = vrot.slane %v1571_v29, 5  ;;  %v1282_v7 = vshrl.u32 %v1056_v38, 16  ;;  %v1285_v26 = vshll.u32 %v1056_v38, 16  ;;  %v332_v60 = vld [vmem:[#allocation2 + $0xe0] sm:$0x8] }
  0x90   : > { %v1918_v13 = vsel %vm11373_vm8, %v1910_v28, %v1917_v62  ;;  %v1566_v9 = vsel %vm11408_vm11, %v1564_v3, %v1565_v18  ;;  %v1569_v21 = vrot.slane %v1568_v39, 4  ;;  %v1291_v53 = vshrl.u32 %v1057_v27, 16  ;;  %v377_v62 = vld [vmem:[#allocation2 + $0xd8] sm:$0x1]  ;;  %v335_v19 = vld [vmem:[#allocation2 + $0xf4] sm:$0x8] }
  0x91   : > { %v9301_v49 = vcombine.low %v1909_v5, %v1918_v13  ;;  %4155 = vmatmul.mubr.bf16.gmra.mrb[32].mxu0 %v9253_v33  ;;  %v1284_v58 = vrot.slane %v1282_v7, 7  ;;  %v1294_v30 = vshll.u32 %v1057_v27, 16  ;;  %v1575_v20 = vrot.slane %v1282_v7, 4 }
  0x92   : > { %v1574_v29 = vsel %vm11408_vm11, %v1569_v21, %v1573_v54  ;;  %v1576_v23 = vrot.slane %v1285_v26, 5  ;;  %v9270_v28 = vcombine.low %v1056_v38, %v1057_v27  ;;  %v1293_v3 = vrot.slane %v1291_v53, 7 }
  0x93   : > { %4315 = vmatprep.mubr.bf16.mxu1 %v9301_v49  ;;  %v9285_v18 = vcombine.low %v1566_v9, %v1574_v29  ;;  %v1581_v39 = vrot.slane %v1291_v53, 4  ;;  %v330_v5 = vsel %vm11360_vm7, 0, %v329_v22  ;;  %v579_v33 = vsel %vm558_vm1, %v551_v63, 0  ;;  %v380_v9 = vld [vmem:[#allocation2 + $0xec] sm:$0x1] }
  0x94   : > { %4162 = vmatprep.mubr.bf16.mxu0 %v9270_v28  ;;  %331 = vst [vmem:[#allocation2 + $0xcc] sm:$0x8] %v330_v5  ;;  %v1277_v21 = vshrl.u32 %v1055_v10, 16  ;;  %v1287_v38 = vor.u32 %v1285_v26, %v1284_v58  ;;  %v1289_v27 = vrot.slane %v1284_v58, 4  ;;  %v9183_v54 = vcombine.low %v579_v33, %v579_v33  ;;  %v338_v63 = vld [vmem:[#allocation2 + $0x108] sm:$0x8] }
  0x95   : > { %4316 = vmatmul.mubr.bf16.gmra.mrb[32].mxu1 %v9285_v18  ;;  %v9184_v7 = vcombine.high %v579_v33, %v579_v33  ;;  %v1296_v13 = vor.u32 %v1294_v30, %v1293_v3  ;;  %v375_v53 = vsel %vm11355_vm6, 0, %v374_v50  ;;  %v1577_v49 = vor.u32 %v1576_v23, %v1575_v20  ;;  %v534_v26 = vld [vmem:[%s11349_s30 + $0xc0] sm:$0xff]  ;;  %v535_v58 = vld [vmem:[%s11349_s30 + $0xc8] sm:$0xff]  ;;  %v536_v20 = vld [vmem:[%s11349_s30 + $0xd0] sm:$0xff] }
  0x96   : > { %v9206_v22 = vrot.slane %v1277_v21, 11  ;;  %376 = vst [vmem:[#allocation2 + $0xc4] sm:$0x1] %v375_v53  ;;  %v11902_v45 = vrot.slane %v1294_v30, 5  ;;  %v333_v35 = vsel %vm11360_vm7, 0, %v332_v60  ;;  %v581_v30 = vsel %vm558_vm1, %v552_v32, 0 }
  0x97   : > { %722 = vst [vmem:[#allocation2 + $0xd0] sm:$0xf] %v9183_v54  ;;  %723 = vst [vmem:[#allocation2 + $0xd4] sm:$0xf] %v9184_v7  ;;  %v1297_v50 = vsel %vm11373_vm8, %v1289_v27, %v1296_v13  ;;  %v378_v10 = vsel %vm11355_vm6, 0, %v377_v62  ;;  %v336_v60 = vsel %vm11360_vm7, 0, %v335_v19  ;;  %v9185_v3 = vcombine.low %v581_v30, %v581_v30 }
  0x98   : > { %334 = vst [vmem:[#allocation2 + $0xe0] sm:$0x8] %v333_v35  ;;  %v383_v29 = vld [vmem:[#allocation2 + $0x100] sm:$0x1]  ;;  %v1288_v23 = vsel %vm11373_vm8, %v9206_v22, %v1287_v38  ;;  %v11921_v28 = vrot.slane %v1577_v49, 4  ;;  %v1582_v18 = vor.u32 %v1581_v39, %v11902_v45  ;;  %v11926_v32 = vld [vmem:[%s11349_s30 + $0xe0] sm:$0xff]  ;;  %v9186_v5 = vcombine.high %v581_v30, %v581_v30 }
  0x99   : > { %379 = vst [vmem:[#allocation2 + $0xd8] sm:$0x1] %v378_v10  ;;  %337 = vst [vmem:[#allocation2 + $0xf4] sm:$0x8] %v336_v60  ;;  %v9254_v62 = vcombine.low %v1288_v23, %v1297_v50  ;;  %v583_v19 = vsel %vm558_vm1, %v553_v55, 0  ;;  %v381_v33 = vsel %vm11355_vm6, 0, %v380_v9  ;;  %v554_v53 = vpack.c.bf16 %v535_v58, %v534_v26 }
  0x9a   : > { %v386_v21 = vld [vmem:[#allocation2 + $0x114] sm:$0x1]  ;;  %v344_v39 = vld [vmem:[#allocation2 + $0x130] sm:$0x8]  ;;  %v1580_v38 = vsel %vm11408_vm11, %v11921_v28, %v11902_v45  ;;  %v1583_v27 = vrot.slane %v1582_v18, 4  ;;  %v9187_v54 = vcombine.low %v583_v19, %v583_v19  ;;  %v9188_v7 = vcombine.high %v583_v19, %v583_v19  ;;  %v11939_v13 = vld [vmem:[%s11349_s30 + $0xe8] sm:$0xff] }
  0x9b   : > { %724 = vst [vmem:[#allocation2 + $0xe4] sm:$0xf] %v9185_v3  ;;  %382 = vst [vmem:[#allocation2 + $0xec] sm:$0x1] %v381_v33  ;;  %v1700_v16 = vld [vmem:[#allocation2 + $0xcc] sm:$0x8]  ;;  %4163 = vmatmul.mubr.bf16.gmra.mrb[36].mxu0 %v9254_v62  ;;  %v555_v22 = vpack.c.bf16 %v537_v40, %v536_v20  ;;  %v556_v10 = vpack.c.bf16 %v11939_v13, %v11926_v32 }
  0x9c   : > { %725 = vst [vmem:[#allocation2 + $0xe8] sm:$0xf] %v9186_v5  ;;  %v1058_v57 = vld [vmem:[#allocation2 + $0xcc] sm:$0x8]  ;;  %v339_v55 = vsel %vm11360_vm7, 0, %v338_v63  ;;  %v384_v9 = vsel %vm11355_vm6, 0, %v383_v29 }
  0x9d   : > { %v1920_v49 = vshrl.u32 %v1700_v16, 16  ;;  %v1299_v45 = vshrl.u32 %v1058_v57, 16  ;;  %726 = vst [vmem:[#allocation2 + $0xf8] sm:$0xf] %v9187_v54  ;;  %727 = vst [vmem:[#allocation2 + $0xfc] sm:$0xf] %v9188_v7 }
  0x9e   : > { %340 = vst [vmem:[#allocation2 + $0x108] sm:$0x8] %v339_v55  ;;  %385 = vst [vmem:[#allocation2 + $0x100] sm:$0x1] %v384_v9  ;;  %v342_v35 = vsel %vm11360_vm7, 0, %v341_v14  ;;  %v387_v50 = vsel %vm11355_vm6, 0, %v386_v21 }
  0x9f   : > { %v1439_v30 = vld [vmem:[#allocation2 + $0xc4] sm:$0x1]  ;;  %v585_v63 = vsel %vm558_vm1, %v554_v53, 0  ;;  %343 = vst [vmem:[#allocation2 + $0x11c] sm:$0x8] %v342_v35  ;;  %v11951_v26 = vsel %vm558_vm1, %v555_v22, 0 }
  0xa0   : > { %388 = vst [vmem:[#allocation2 + $0x114] sm:$0x1] %v387_v50  ;;  %v345_v58 = vsel %vm11360_vm7, 0, %v344_v39  ;;  %v11957_v60 = vld [vmem:[#allocation2 + $0xd0] sm:$0xf]  ;;  %v9222_v20 = vrot.slane %v1920_v49, 11  ;;  %v9189_v28 = vcombine.low %v585_v63, %v585_v63  ;;  %v9190_v18 = vcombine.high %v585_v63, %v585_v63 }
  0xa1   : > { %v11959_v29 = vld [vmem:[#allocation2 + $0xd4] sm:$0xf]  ;;  %v1585_v23 = vshll.u32 %v1439_v30, 16  ;;  %346 = vst [vmem:[#allocation2 + $0x130] sm:$0x8] %v345_v58  ;;  %v16158_v3 = vshrl.u32 %v11957_v60, 16 }
  0xa2   : > { %v16159_v14 = vshll.u32 %v11957_v60, 16  ;;  %v16157_v40 = vshrl.u32 %v11959_v29, 16  ;;  %v16165_v62 = vshll.u32 %v11959_v29, 16  ;;  %v1059_v5 = vld [vmem:[#allocation2 + $0xd0] sm:$0xf]  ;;  %v9207_v54 = vrot.slane %v1299_v45, 11 }
  0xa3   : > { %v1587_v19 = vrot.slane %v1585_v23, 5  ;;  %v1060_v33 = vld [vmem:[#allocation2 + $0xd4] sm:$0xf]  ;;  %v1304_v21 = vshrl.u32 %v1059_v5, 16  ;;  %v1307_v39 = vshll.u32 %v1059_v5, 16  ;;  %v1927_v7 = vrot.slane %v16158_v3, 7 }
  0xa4   : > { %728 = vst [vmem:[#allocation2 + $0x10c] sm:$0xf] %v9189_v28  ;;  %729 = vst [vmem:[#allocation2 + $0x110] sm:$0xf] %v9190_v18  ;;  %v1936_v16 = vrot.slane %v16157_v40, 7  ;;  %v1313_v57 = vshrl.u32 %v1060_v33, 16  ;;  %v9271_v40 = vcombine.low %v1059_v5, %v1060_v33 }
  0xa5   : > { %v1316_v55 = vshll.u32 %v1060_v33, 16  ;;  %v1703_v53 = vld [vmem:[#allocation2 + $0xe0] sm:$0x8]  ;;  %v1588_v9 = vsel %vm11408_vm11, %v1583_v27, %v1587_v19  ;;  %v1306_v22 = vrot.slane %v1304_v21, 7  ;;  %v1589_v49 = vrot.slane %v1304_v21, 4 }
  0xa6   : > { %v1590_v35 = vrot.slane %v1307_v39, 5  ;;  %v11971_v50 = vld [vmem:[#allocation2 + $0xe4] sm:$0xf]  ;;  %v1930_v45 = vor.u32 %v16159_v14, %v1927_v7  ;;  %v1932_v30 = vrot.slane %v1927_v7, 4  ;;  %v1939_v63 = vor.u32 %v16165_v62, %v1936_v16  ;;  %v11977_v23 = vld [vmem:[#allocation2 + $0xe8] sm:$0xf]  ;;  %4170 = vmatprep.mubr.bf16.mxu0 %v9271_v40 }
  0xa7   : > { %v9286_v58 = vcombine.low %v1580_v38, %v1588_v9  ;;  %v1315_v28 = vrot.slane %v1313_v57, 7  ;;  %v1595_v18 = vrot.slane %v1313_v57, 4  ;;  %v1942_v3 = vshrl.u32 %v1703_v53, 16  ;;  %v1440_v14 = vld [vmem:[#allocation2 + $0xd8] sm:$0x1] }
  0xa8   : > { %v1931_v27 = vsel %vm11373_vm8, %v9222_v20, %v1930_v45  ;;  %v1940_v19 = vsel %vm11373_vm8, %v1932_v30, %v1939_v63  ;;  %v16164_v21 = vshrl.u32 %v11971_v50, 16  ;;  %v16163_v7 = vshll.u32 %v11971_v50, 16  ;;  %v392_v32 = vld [vmem:[#allocation2 + $0x13c] sm:$0x1] }
  0xa9   : > { %v9302_v17 = vcombine.low %v1931_v27, %v1940_v19  ;;  %v9223_v38 = vrot.slane %v1942_v3, 11  ;;  %v16161_v16 = vshrl.u32 %v11977_v23, 16  ;;  %v16162_v57 = vshll.u32 %v11977_v23, 16  ;;  %v1062_v27 = vld [vmem:[#allocation2 + $0xe4] sm:$0xf] }
  0xaa   : > { %v1949_v5 = vrot.slane %v16164_v21, 7  ;;  %v1309_v33 = vor.u32 %v1307_v39, %v1306_v22  ;;  %v1311_v20 = vrot.slane %v1306_v22, 4  ;;  %v1318_v53 = vor.u32 %v1316_v55, %v1315_v28  ;;  %v1063_v22 = vld [vmem:[#allocation2 + $0xe8] sm:$0xf]  ;;  %v1441_v21 = vld [vmem:[#allocation2 + $0xec] sm:$0x1] }
  0xab   : > { %4323 = vmatprep.mubr.bf16.mxu1 %v9302_v17  ;;  %v1958_v9 = vrot.slane %v16161_v16, 7  ;;  %v1591_v45 = vor.u32 %v1590_v35, %v1589_v49  ;;  %v1593_v30 = vrot.slane %v1316_v55, 5  ;;  %v1599_v63 = vshll.u32 %v1440_v14, 16  ;;  %v1068_v24 = vld [vmem:[#allocation2 + $0x10c] sm:$0xf] }
  0xac   : > { %4324 = vmatmul.mubr.bf16.gmra.mrb[36].mxu1 %v9286_v58  ;;  %v1952_v3 = vor.u32 %v16163_v7, %v1949_v5  ;;  %v1954_v40 = vrot.slane %v1949_v5, 4  ;;  %v1310_v19 = vsel %vm11373_vm8, %v9207_v54, %v1309_v33  ;;  %v1319_v39 = vsel %vm11373_vm8, %v1311_v20, %v1318_v53  ;;  %v1706_v5 = vld [vmem:[#allocation2 + $0xf4] sm:$0x8] }
  0xad   : > { %v1961_v17 = vor.u32 %v16162_v57, %v1958_v9  ;;  %v9255_v28 = vcombine.low %v1310_v19, %v1319_v39  ;;  %v1592_v49 = vrot.slane %v1591_v45, 4  ;;  %v1596_v55 = vor.u32 %v1595_v18, %v1593_v30  ;;  %v12005_v9 = vld [vmem:[#allocation2 + $0xf8] sm:$0xf]  ;;  %v12007_v45 = vld [vmem:[#allocation2 + $0xfc] sm:$0xf] }
  0xae   : > { %v1953_v14 = vsel %vm11373_vm8, %v9223_v38, %v1952_v3  ;;  %v1601_v35 = vrot.slane %v1599_v63, 5  ;;  %v1326_v58 = vshrl.u32 %v1062_v27, 16  ;;  %v1329_v16 = vshll.u32 %v1062_v27, 16  ;;  %v1061_v3 = vld [vmem:[#allocation2 + $0xe0] sm:$0x8] }
  0xaf   : > { %v1962_v54 = vsel %vm11373_vm8, %v1954_v40, %v1961_v17  ;;  %4171 = vmatmul.mubr.bf16.gmra.mrb[40].mxu0 %v9255_v28  ;;  %v1594_v33 = vsel %vm11408_vm11, %v1592_v49, %v1593_v30  ;;  %v1597_v20 = vrot.slane %v1596_v55, 4  ;;  %v1335_v53 = vshrl.u32 %v1063_v22, 16 }
  0xb0   : > { %v9303_v18 = vcombine.low %v1953_v14, %v1962_v54  ;;  %v1328_v19 = vrot.slane %v1326_v58, 7  ;;  %v1338_v38 = vshll.u32 %v1063_v22, 16  ;;  %v1603_v63 = vrot.slane %v1326_v58, 4 }
  0xb1   : > { %v1602_v39 = vsel %vm11408_vm11, %v1597_v20, %v1601_v35  ;;  %v1337_v57 = vrot.slane %v1335_v53, 7  ;;  %v1604_v40 = vrot.slane %v1329_v16, 5  ;;  %v1609_v17 = vrot.slane %v1335_v53, 4 }
  0xb2   : > { %4331 = vmatprep.mubr.bf16.mxu1 %v9303_v18  ;;  %v9287_v28 = vcombine.low %v1594_v33, %v1602_v39  ;;  %v9272_v30 = vcombine.low %v1062_v27, %v1063_v22  ;;  %v1964_v49 = vshrl.u32 %v1706_v5, 16  ;;  %v16170_v55 = vshrl.u32 %v12005_v9, 16 }
  0xb3   : > { %v16169_v7 = vshll.u32 %v12005_v9, 16  ;;  %v16167_v14 = vshrl.u32 %v12007_v45, 16  ;;  %v16168_v54 = vshll.u32 %v12007_v45, 16  ;;  %v1321_v58 = vshrl.u32 %v1061_v3, 16 }
  0xb4   : > { %4332 = vmatmul.mubr.bf16.gmra.mrb[40].mxu1 %v9287_v28  ;;  %4178 = vmatprep.mubr.bf16.mxu0 %v9272_v30  ;;  %v9224_v35 = vrot.slane %v1964_v49, 11  ;;  %v1971_v20 = vrot.slane %v16170_v55, 7  ;;  %v1331_v53 = vor.u32 %v1329_v16, %v1328_v19  ;;  %v1333_v33 = vrot.slane %v1328_v19, 4  ;;  %v1065_v28 = vld [vmem:[#allocation2 + $0xf8] sm:$0xf] }
  0xb5   : > { %v1980_v27 = vrot.slane %v16167_v14, 7  ;;  %v9208_v22 = vrot.slane %v1321_v58, 11  ;;  %v1340_v5 = vor.u32 %v1338_v38, %v1337_v57  ;;  %v1605_v18 = vor.u32 %v1604_v40, %v1603_v63  ;;  %v1066_v58 = vld [vmem:[#allocation2 + $0xfc] sm:$0xf] }
  0xb6   : > { %v1974_v39 = vor.u32 %v16169_v7, %v1971_v20  ;;  %v1976_v62 = vrot.slane %v1971_v20, 4  ;;  %v1607_v3 = vrot.slane %v1338_v38, 5  ;;  %v1613_v25 = vshll.u32 %v1441_v21, 16  ;;  %v1709_v38 = vld [vmem:[#allocation2 + $0x108] sm:$0x8] }
  0xb7   : > { %v1983_v30 = vor.u32 %v16168_v54, %v1980_v27  ;;  %v1332_v16 = vsel %vm11373_vm8, %v9208_v22, %v1331_v53  ;;  %v1341_v19 = vsel %vm11373_vm8, %v1333_v33, %v1340_v5  ;;  %v1606_v49 = vrot.slane %v1605_v18, 4  ;;  %v12029_v21 = vld [vmem:[#allocation2 + $0x10c] sm:$0xf]  ;;  %v12035_v33 = vld [vmem:[#allocation2 + $0x110] sm:$0xf] }
  0xb8   : > { %v1975_v57 = vsel %vm11373_vm8, %v9224_v35, %v1974_v39  ;;  %v9256_v63 = vcombine.low %v1332_v16, %v1341_v19  ;;  %v1610_v40 = vor.u32 %v1609_v17, %v1607_v3  ;;  %v1615_v20 = vrot.slane %v1613_v25, 5  ;;  %v1064_v5 = vld [vmem:[#allocation2 + $0xf4] sm:$0x8] }
  0xb9   : > { %v1984_v27 = vsel %vm11373_vm8, %v1976_v62, %v1983_v30  ;;  %v1608_v53 = vsel %vm11408_vm11, %v1606_v49, %v1607_v3  ;;  %v1348_v22 = vshrl.u32 %v1065_v28, 16  ;;  %v1351_v14 = vshll.u32 %v1065_v28, 16 }
  0xba   : > { %v9304_v18 = vcombine.low %v1975_v57, %v1984_v27  ;;  %4179 = vmatmul.mubr.bf16.gmra.mrb[44].mxu0 %v9256_v63  ;;  %v1611_v35 = vrot.slane %v1610_v40, 4  ;;  %v1357_v39 = vshrl.u32 %v1066_v58, 16  ;;  %v1360_v17 = vshll.u32 %v1066_v58, 16  ;;  %v1442_v40 = vld [vmem:[#allocation2 + $0x100] sm:$0x1] }
  0xbb   : > { %v1350_v25 = vrot.slane %v1348_v22, 7  ;;  %v1617_v16 = vrot.slane %v1348_v22, 4  ;;  %v1618_v19 = vrot.slane %v1351_v14, 5  ;;  %v9273_v54 = vcombine.low %v1065_v28, %v1066_v58 }
  0xbc   : > { %4339 = vmatprep.mubr.bf16.mxu1 %v9304_v18  ;;  %v1616_v62 = vsel %vm11408_vm11, %v1611_v35, %v1615_v20  ;;  %v1359_v30 = vrot.slane %v1357_v39, 7  ;;  %v1623_v3 = vrot.slane %v1357_v39, 4  ;;  %v1986_v49 = vshrl.u32 %v1709_v38, 16 }
  0xbd   : > { %v9288_v7 = vcombine.low %v1608_v53, %v1616_v62  ;;  %4186 = vmatprep.mubr.bf16.mxu0 %v9273_v54  ;;  %v16176_v55 = vshrl.u32 %v12029_v21, 16  ;;  %v16175_v57 = vshll.u32 %v12029_v21, 16  ;;  %v16173_v63 = vshrl.u32 %v12035_v33, 16 }
  0xbe   : > { %v9225_v27 = vrot.slane %v1986_v49, 11  ;;  %v16174_v22 = vshll.u32 %v12035_v33, 16  ;;  %v1343_v28 = vshrl.u32 %v1064_v5, 16  ;;  %v1353_v58 = vor.u32 %v1351_v14, %v1350_v25 }
  0xbf   : > { %4340 = vmatmul.mubr.bf16.gmra.mrb[44].mxu1 %v9288_v7  ;;  %v1993_v20 = vrot.slane %v16176_v55, 7  ;;  %v2002_v38 = vrot.slane %v16173_v63, 7  ;;  %v1355_v54 = vrot.slane %v1350_v25, 4  ;;  %v1362_v53 = vor.u32 %v1360_v17, %v1359_v30 }
  0xc0   : > { %v9209_v18 = vrot.slane %v1343_v28, 11  ;;  %v1619_v35 = vor.u32 %v1618_v19, %v1617_v16  ;;  %v1621_v39 = vrot.slane %v1360_v17, 5  ;;  %v1627_v62 = vshll.u32 %v1442_v40, 16  ;;  %v1069_v16 = vld [vmem:[#allocation2 + $0x110] sm:$0xf] }
  0xc1   : > { %v1996_v49 = vor.u32 %v16175_v57, %v1993_v20  ;;  %v1998_v56 = vrot.slane %v1993_v20, 4  ;;  %v2005_v7 = vor.u32 %v16174_v22, %v2002_v38  ;;  %v1363_v14 = vsel %vm11373_vm8, %v1355_v54, %v1362_v53  ;;  %v1712_v22 = vld [vmem:[#allocation2 + $0x11c] sm:$0x8] }
  0xc2   : > { %v1354_v5 = vsel %vm11373_vm8, %v9209_v18, %v1353_v58  ;;  %v1620_v25 = vrot.slane %v1619_v35, 4  ;;  %v1624_v30 = vor.u32 %v1623_v3, %v1621_v39  ;;  %v1629_v28 = vrot.slane %v1627_v62, 5  ;;  %v1067_v62 = vld [vmem:[#allocation2 + $0x108] sm:$0x8] }
  0xc3   : > { %v1997_v17 = vsel %vm11373_vm8, %v9225_v27, %v1996_v49  ;;  %v2006_v19 = vsel %vm11373_vm8, %v1998_v56, %v2005_v7  ;;  %v9257_v40 = vcombine.low %v1354_v5, %v1363_v14  ;;  %v1370_v20 = vshrl.u32 %v1068_v24, 16  ;;  %v1443_v14 = vld [vmem:[#allocation2 + $0x114] sm:$0x1] }
  0xc4   : > { %v9305_v63 = vcombine.low %v1997_v17, %v2006_v19  ;;  %v1622_v38 = vsel %vm11408_vm11, %v1620_v25, %v1621_v39  ;;  %v1625_v54 = vrot.slane %v1624_v30, 4  ;;  %v1373_v53 = vshll.u32 %v1068_v24, 16  ;;  %v1715_v17 = vld [vmem:[#allocation2 + $0x130] sm:$0x8] }
  0xc5   : > { %4187 = vmatmul.mubr.bf16.gmra.mrb[48].mxu0 %v9257_v40  ;;  %v1372_v58 = vrot.slane %v1370_v20, 7  ;;  %v1379_v3 = vshrl.u32 %v1069_v16, 16  ;;  %v1382_v18 = vshll.u32 %v1069_v16, 16  ;;  %v1631_v35 = vrot.slane %v1370_v20, 4 }
  0xc6   : > { %4347 = vmatprep.mubr.bf16.mxu1 %v9305_v63  ;;  %v1630_v27 = vsel %vm11408_vm11, %v1625_v54, %v1629_v28  ;;  %v1632_v56 = vrot.slane %v1373_v53, 5  ;;  %v9274_v49 = vcombine.low %v1068_v24, %v1069_v16  ;;  %v9191_v7 = vcombine.low %v11951_v26, %v11951_v26  ;;  %v389_v54 = vld [vmem:[#allocation2 + $0x128] sm:$0x1] }
  0xc7   : > { %v9289_v39 = vcombine.low %v1622_v38, %v1630_v27  ;;  %v1381_v5 = vrot.slane %v1379_v3, 7  ;;  %v1637_v25 = vrot.slane %v1379_v3, 4  ;;  %v9192_v30 = vcombine.high %v11951_v26, %v11951_v26  ;;  %v12068_v3 = vld [vmem:[%s11349_s30 + $0xf0] sm:$0xff]  ;;  %v12071_v27 = vld [vmem:[%s11349_s30 + $0xf8] sm:$0xff] }
  0xc8   : > { %4194 = vmatprep.mubr.bf16.mxu0 %v9274_v49  ;;  %730 = vst [vmem:[#allocation2 + $0x120] sm:$0xf] %v9191_v7  ;;  %v2008_v63 = vshrl.u32 %v1712_v22, 16  ;;  %v1365_v19 = vshrl.u32 %v1067_v62, 16  ;;  %v1375_v28 = vor.u32 %v1373_v53, %v1372_v58  ;;  %v1377_v40 = vrot.slane %v1372_v58, 4 }
  0xc9   : > { %4348 = vmatmul.mubr.bf16.gmra.mrb[48].mxu1 %v9289_v39  ;;  %731 = vst [vmem:[#allocation2 + $0x124] sm:$0xf] %v9192_v30  ;;  %v1384_v24 = vor.u32 %v1382_v18, %v1381_v5  ;;  %v1633_v16 = vor.u32 %v1632_v56, %v1631_v35  ;;  %v1635_v20 = vrot.slane %v1382_v18, 5  ;;  %v1641_v38 = vshll.u32 %v1443_v14, 16  ;;  %v1070_v58 = vld [vmem:[#allocation2 + $0x11c] sm:$0x8] }
  0xca   : > { %v12073_v26 = vrot.slane %v2008_v63, 11  ;;  %v9210_v57 = vrot.slane %v1365_v19, 11  ;;  %v589_v22 = vsel %vm558_vm1, %v556_v10, 0  ;;  %v2030_v53 = vshrl.u32 %v1715_v17, 16  ;;  %v347_v49 = vld [vmem:[#allocation2 + $0x144] sm:$0x8] }
  0xcb   : > { %v1385_v35 = vsel %vm11373_vm8, %v1377_v40, %v1384_v24  ;;  %v1634_v18 = vrot.slane %v1633_v16, 4  ;;  %v1638_v62 = vor.u32 %v1637_v25, %v1635_v20  ;;  %v1643_v56 = vrot.slane %v1641_v38, 5  ;;  %v12081_v7 = vld [vmem:[#allocation2 + $0x130] sm:$0x8] }
  0xcc   : > { %v1376_v14 = vsel %vm11373_vm8, %v9210_v57, %v1375_v28  ;;  %v9193_v39 = vcombine.low %v589_v22, %v589_v22  ;;  %v9194_v5 = vcombine.high %v589_v22, %v589_v22  ;;  %v12085_v30 = vrot.slane %v2030_v53, 11 }
  0xcd   : > { %v9258_v13 = vcombine.low %v1376_v14, %v1385_v35  ;;  %v1636_v10 = vsel %vm11408_vm11, %v1634_v18, %v1635_v20  ;;  %v1639_v17 = vrot.slane %v1638_v62, 4  ;;  %v1387_v63 = vshrl.u32 %v1070_v58, 16  ;;  %v12108_v62 = vld [vmem:[#allocation2 + $0x1c] sm:$0xf] }
  0xce   : > { %732 = vst [vmem:[#allocation2 + $0x134] sm:$0xf] %v9193_v39  ;;  %733 = vst [vmem:[#allocation2 + $0x138] sm:$0xf] %v9194_v5  ;;  %v390_v25 = vsel %vm11355_vm6, 0, %v389_v54  ;;  %v348_v19 = vsel %vm11360_vm7, 0, %v347_v49 }
  0xcf   : > { %v12096_v40 = vld [vmem:[#allocation2 + $0x120] sm:$0xf]  ;;  %4195 = vmatmul.mubr.bf16.gmra.mrb[52].mxu0 %v9258_v13  ;;  %v1644_v24 = vsel %vm11408_vm11, %v1639_v17, %v1643_v56  ;;  %v9211_v20 = vrot.slane %v1387_v63, 11  ;;  %391 = vst [vmem:[#allocation2 + $0x128] sm:$0x1] %v390_v25  ;;  %v393_v38 = vsel %vm11355_vm6, 0, %v392_v32 }
  0xd0   : > { %16383 = vst [vmem:[#allocation6_spill] sm:$0xff] %v12096_v40  ;;  %v1071_v16 = vld [vmem:[#allocation2 + $0x120] sm:$0xf]  ;;  %349 = vst [vmem:[#allocation2 + $0x144] sm:$0x8] %v348_v19  ;;  %v16177_v53 = vshrl.u32 %v12096_v40, 16  ;;  %v9290_v35 = vcombine.low %v1636_v10, %v1644_v24 }
  0xd1   : > { %v12104_v22 = vld [vmem:[#allocation2 + $0x124] sm:$0xf]  ;;  %v16181_v58 = vshll.u32 %v12096_v40, 16  ;;  %394 = vst [vmem:[#allocation2 + $0x13c] sm:$0x1] %v393_v38  ;;  %v1392_v5 = vshrl.u32 %v1071_v16, 16 }
  0xd2   : > { %16384 = vst [vmem:[#allocation7_spill] sm:$0xff] %v12104_v22  ;;  %v1072_v18 = vld [vmem:[#allocation2 + $0x124] sm:$0xf]  ;;  %v12110_v56 = vld [vmem:[#allocation2 + $0x20] sm:$0xf]  ;;  %v16180_v14 = vshrl.u32 %v12104_v22, 16 }
  0xd3   : > { %v16182_v39 = vshll.u32 %v12104_v22, 16  ;;  %v1395_v32 = vshll.u32 %v1071_v16, 16  ;;  %v2015_v13 = vrot.slane %v16177_v53, 7  ;;  %v1401_v17 = vshrl.u32 %v1072_v18, 16 }
  0xd4   : > { %v1404_v10 = vshll.u32 %v1072_v18, 16  ;;  %v9275_v63 = vcombine.low %v1071_v16, %v1072_v18  ;;  %v2024_v25 = vrot.slane %v16180_v14, 7  ;;  %v1394_v19 = vrot.slane %v1392_v5, 7 }
  0xd5   : > { %v1645_v24 = vrot.slane %v1392_v5, 4  ;;  %v1646_v38 = vrot.slane %v1395_v32, 5  ;;  %v2018_v55 = vor.u32 %v16181_v58, %v2015_v13  ;;  %v2020_v49 = vrot.slane %v2015_v13, 4  ;;  %v12124_v53 = vld [vmem:[#allocation2 + $0x134] sm:$0xf] }
  0xd6   : > { %v1403_v54 = vrot.slane %v1401_v17, 7  ;;  %v1651_v28 = vrot.slane %v1401_v17, 4  ;;  %4202 = vmatprep.mubr.bf16.mxu0 %v9275_v63  ;;  %v2027_v57 = vor.u32 %v16182_v39, %v2024_v25  ;;  %16385 = vst [vmem:[#allocation8_spill] sm:$0xff] %v12124_v53  ;;  %v12126_v48 = vld [vmem:[#allocation2 + $0x138] sm:$0xf]  ;;  %v1397_v16 = vor.u32 %v1395_v32, %v1394_v19 }
  0xd7   : > { %16386 = vst [vmem:[#allocation9_spill] sm:$0xff] %v12126_v48  ;;  %v1399_v18 = vrot.slane %v1394_v19, 4  ;;  %v1647_v14 = vor.u32 %v1646_v38, %v1645_v24  ;;  %v2019_v5 = vsel %vm11373_vm8, %v12073_v26, %v2018_v55  ;;  %v16187_v58 = vshrl.u32 %v12124_v53, 16  ;;  %v1444_v63 = vld [vmem:[#allocation2 + $0x128] sm:$0x1] }
  0xd8   : > { %v16188_v17 = vshrl.u32 %v12126_v48, 16  ;;  %v2028_v25 = vsel %vm11373_vm8, %v2020_v49, %v2027_v57  ;;  %v1398_v32 = vsel %vm11373_vm8, %v9211_v20, %v1397_v16  ;;  %v1406_v19 = vor.u32 %v1404_v10, %v1403_v54  ;;  %v1074_v24 = vld [vmem:[#allocation2 + $0x134] sm:$0xf]  ;;  %v1075_v49 = vld [vmem:[#allocation2 + $0x138] sm:$0xf] }
  0xd9   : > { %v9306_v38 = vcombine.low %v2019_v5, %v2028_v25  ;;  %v2037_v55 = vrot.slane %v16187_v58, 7  ;;  %v1648_v13 = vrot.slane %v1647_v14, 4  ;;  %v1649_v22 = vrot.slane %v1404_v10, 5 }
  0xda   : > { %v2046_v26 = vrot.slane %v16188_v17, 7  ;;  %v1407_v43 = vsel %vm11373_vm8, %v1399_v18, %v1406_v19  ;;  %v1655_v57 = vshll.u32 %v1444_v63, 16  ;;  %v1414_v39 = vshrl.u32 %v1074_v24, 16 }
  0xdb   : > { %4355 = vmatprep.mubr.bf16.mxu1 %v9306_v38  ;;  %v16387_v20 = vshll.u32 %v12124_v53, 16  ;;  %v2042_v16 = vrot.slane %v2037_v55, 4  ;;  %v16388_v5 = vshll.u32 %v12126_v48, 16  ;;  %v9259_v58 = vcombine.low %v1398_v32, %v1407_v43  ;;  %v2338_v48 = vld [vmem:[#allocation2 + $0xcc] sm:$0x8] }
  0xdc   : > { %4356 = vmatmul.mubr.bf16.gmra.mrb[52].mxu1 %v9290_v35  ;;  %v1650_v14 = vsel %vm11408_vm11, %v1648_v13, %v1649_v22  ;;  %v1652_v17 = vor.u32 %v1651_v28, %v1649_v22  ;;  %v1657_v40 = vrot.slane %v1655_v57, 5  ;;  %v1416_v18 = vrot.slane %v1414_v39, 7 }
  0xdd   : > { %v2040_v54 = vor.u32 %v16387_v20, %v2037_v55  ;;  %v2049_v25 = vor.u32 %v16388_v5, %v2046_v26  ;;  %4203 = vmatmul.mubr.bf16.gmra.mrb[56].mxu0 %v9259_v58  ;;  %v1417_v19 = vshll.u32 %v1074_v24, 16  ;;  %v1423_v38 = vshrl.u32 %v1075_v49, 16  ;;  %v1718_v55 = vld [vmem:[#allocation2 + $0x144] sm:$0x8]  ;;  %v1445_v20 = vld [vmem:[#allocation2 + $0x13c] sm:$0x1] }
  0xde   : > { %v1653_v43 = vrot.slane %v1652_v17, 4  ;;  %v1426_v35 = vshll.u32 %v1075_v49, 16  ;;  %v1659_v32 = vrot.slane %v1414_v39, 4  ;;  %v9276_v57 = vcombine.low %v1074_v24, %v1075_v49  ;;  %v2073_v5 = vld [vmem:[#allocation2 + $0x24] sm:$0x1] }
  0xdf   : > { %v2041_v10 = vsel %vm11373_vm8, %v12085_v30, %v2040_v54  ;;  %v2050_v63 = vsel %vm11373_vm8, %v2042_v16, %v2049_v25  ;;  %v1425_v13 = vrot.slane %v1423_v38, 7  ;;  %v1660_v28 = vrot.slane %v1417_v19, 5  ;;  %v12164_v39 = vld [vmem:[#allocation2 + $0x30] sm:$0xf] }
  0xe0   : > { %v9307_v26 = vcombine.low %v2041_v10, %v2050_v63  ;;  %v1665_v22 = vrot.slane %v1423_v38, 4  ;;  %v1658_v30 = vsel %vm11408_vm11, %v1653_v43, %v1657_v40  ;;  %v16389_v58 = vpack.c.bf16 %v12071_v27, %v12068_v3  ;;  %4210 = vmatprep.mubr.bf16.mxu0 %v9276_v57 }
  0xe1   : > { %v2052_v16 = vshrl.u32 %v1718_v55, 16  ;;  %v16390_v17 = vshrl.u32 %v12081_v7, 16  ;;  %v9291_v10 = vcombine.low %v1650_v14, %v1658_v30  ;;  %v1419_v49 = vor.u32 %v1417_v19, %v1416_v18 }
  0xe2   : > { %4363 = vmatprep.mubr.bf16.mxu1 %v9307_v26  ;;  %v591_v54 = vsel %vm558_vm1, %v16389_v58, 0  ;;  %v1421_v26 = vrot.slane %v1416_v18, 4  ;;  %v1428_v40 = vor.u32 %v1426_v35, %v1425_v13  ;;  %v1661_v43 = vor.u32 %v1660_v28, %v1659_v32  ;;  %v12177_v28 = vld [vmem:[#allocation2 + $0x34] sm:$0xf] }
  0xe3   : > { %v9212_v25 = vrot.slane %v16390_v17, 11  ;;  %v9195_v63 = vcombine.low %v591_v54, %v591_v54  ;;  %v9196_v24 = vcombine.high %v591_v54, %v591_v54  ;;  %v12166_v38 = vrot.slane %v2052_v16, 11  ;;  %16393 = vst [vmem:[#allocation10_spill] sm:$0xff] %v12177_v28 }
  0xe4   : > { %v1663_v27 = vrot.slane %v1426_v35, 5  ;;  %v1669_v7 = vshll.u32 %v1445_v20, 16  ;;  %v16391_v55 = vor.u32 %v11438_v1, %v11436_v0  ;;  %4364 = vmatmul.mubr.bf16.gmra.mrb[56].mxu1 %v9291_v10  ;;  %v1429_v19 = vsel %vm11373_vm8, %v1421_v26, %v1428_v40 }
  0xe5   : > { %734 = vst [vmem:[#allocation2 + $0x148] sm:$0xf] %v9195_v63  ;;  %735 = vst [vmem:[#allocation2 + $0x14c] sm:$0xf] %v9196_v24  ;;  %v1420_v3 = vsel %vm11373_vm8, %v9212_v25, %v1419_v49  ;;  %v1662_v57 = vrot.slane %v1661_v43, 4  ;;  %v16392_v18 = vshll.u32 %v11426_v47, 16  ;;  %v9357_v24 = vcombine.low %v12164_v39, %v12177_v28 }
  0xe6   : > { %v2092_v14 = vrot.slane %v16391_v55, 4  ;;  %v2099_v32 = vshll.u32 %v2073_v5, 16  ;;  %v9260_v30 = vcombine.low %v1420_v3, %v1429_v19  ;;  %v1666_v58 = vor.u32 %v1665_v22, %v1663_v27  ;;  %v2314_v49 = vld [vmem:[#allocation2 + $0x2c] sm:$0x8] }
  0xe7   : > { %v2093_v13 = vrot.slane %v16392_v18, 5  ;;  %v1671_v54 = vrot.slane %v1669_v7, 5  ;;  %v2368_v35 = vshrl.u32 %v12164_v39, 16  ;;  %v1664_v0 = vsel %vm11408_vm11, %v1662_v57, %v1663_v27 }
  0xe8   : > { %v2101_v16 = vrot.slane %v2099_v32, 5  ;;  %4211 = vmatmul.mubr.bf16.gmra.mrb[60].mxu0 %v9260_v30  ;;  %v1667_v47 = vrot.slane %v1666_v58, 4  ;;  %v2371_v5 = vshll.u32 %v12164_v39, 16  ;;  %v2377_v25 = vshrl.u32 %v12177_v28, 16  ;;  %v2074_v30 = vld [vmem:[#allocation2 + $0x38] sm:$0x1] }
  0xe9   : > { %v2094_v1 = vsel %vm11408_vm11, %v2092_v14, %v2093_v13  ;;  %v2096_v20 = vor.u32 %v11440_v2, %v2093_v13  ;;  %v2370_v17 = vrot.slane %v2368_v35, 7  ;;  %v16191_v10 = vshll.u32 %v12177_v28, 16  ;;  %v12278_v39 = vld [vmem:[#allocation2 + $0x5c] sm:$0xf]  ;;  %v12533_v28 = vld [vmem:[#allocation2 + $0xd0] sm:$0xf] }
  0xea   : > { %v12188_v63 = vrot.slane %v2368_v35, 4  ;;  %v1672_v2 = vsel %vm11408_vm11, %v1667_v47, %v1671_v54  ;;  %v2379_v43 = vrot.slane %v2377_v25, 7  ;;  %v12200_v14 = vrot.slane %v2371_v5, 5  ;;  %16407 = vst [vmem:[#allocation17_spill] sm:$0xff] %v12278_v39 }
  0xeb   : > { %v2097_v22 = vrot.slane %v2096_v20, 4  ;;  %v2373_v26 = vor.u32 %v2371_v5, %v2370_v17  ;;  %v2375_v40 = vrot.slane %v2370_v17, 4  ;;  %v9292_v7 = vcombine.low %v1664_v0, %v1672_v2 }
  0xec   : > { %16394 = vst [vmem:[#allocation11_spill] sm:$0xff] %v12188_v63  ;;  %v12194_v3 = vld [vmem:[#allocation2 + $0x148] sm:$0xf]  ;;  %v12196_v27 = vld [vmem:[#allocation2 + $0x14c] sm:$0xf]  ;;  %16397 = vst [vmem:[#allocation14_spill] sm:$0xff] %v12200_v14  ;;  %v2382_v54 = vor.u32 %v16191_v10, %v2379_v43 }
  0xed   : > { %16395 = vst [vmem:[#allocation12_spill] sm:$0xff] %v12194_v3  ;;  %16396 = vst [vmem:[#allocation13_spill] sm:$0xff] %v12196_v27  ;;  %v2102_v55 = vsel %vm11408_vm11, %v2097_v22, %v2101_v16  ;;  %v12202_v19 = vrot.slane %v2377_v25, 4  ;;  %v16192_v57 = vshrl.u32 %v12194_v3, 16  ;;  %v16195_v18 = vshll.u32 %v12194_v3, 16  ;;  %v10978_v16 = vld [vmem:[%s16121_s1 + $0x208] sm:$0xff]  }
  0xee   : > { %v16193_v13 = vshrl.u32 %v12196_v27, 16  ;;  %v16194_v32 = vshll.u32 %v12196_v27, 16  ;;  %v9325_v58 = vcombine.low %v2094_v1, %v2102_v55  ;;  %v2363_v35 = vshrl.u32 %v2314_v49, 16 }
  0xef   : > { %16398 = vst [vmem:[#allocation15_spill] sm:$0xff] %v12202_v19  ;;  %v16399_v0 = vshrl.u32 %v11446_v11, 16  ;;  %v2059_v47 = vrot.slane %v16192_v57, 7  ;;  %v16400_v5 = vshll.u32 %v11446_v11, 16  ;;  %v16401_v25 = vshll.u32 %v11448_v12, 16 }
  0xf0   : > { %v2068_v17 = vrot.slane %v16193_v13, 7  ;;  %4412 = vmatprep.mubr.bf16.mxu0 %v9325_v58  ;;  %v9229_v49 = vrot.slane %v2363_v35, 11  ;;  %v2383_v2 = vsel %vm11373_vm8, %v2375_v40, %v2382_v54  ;;  %v16402_v43 = vshrl.u32 %v11448_v12, 16  ;;  %v12234_v35 = vld [vmem:[#allocation2 + $0x44] sm:$0xf]  ;;  %v11120_v12 = vld [vmem:[%s16121_s1 + $0x200] sm:$0xff]  }
  0xf1   : > { %v2103_v20 = vrot.slane %v16399_v0, 4  ;;  %v2104_v1 = vrot.slane %v16400_v5, 5  ;;  %v2107_v22 = vrot.slane %v16401_v25, 5  ;;  %v2113_v0 = vshll.u32 %v2074_v30, 16  ;;  %v11122_v25 = vld [vmem:[#allocation2 + $0x34] sm:$0xf] }
  0xf2   : > { %v2109_v55 = vrot.slane %v16402_v43, 4  ;;  %v2062_v10 = vor.u32 %v16195_v18, %v2059_v47  ;;  %v2064_v57 = vrot.slane %v2059_v47, 4  ;;  %v2071_v11 = vor.u32 %v16194_v32, %v2068_v17  ;;  %v11121_v47 = vld [vmem:[#allocation2 + $0x30] sm:$0xf]  ;;  %v12241_v43 = vld [vmem:[#allocation2 + $0x48] sm:$0xf] }
  0xf3   : > { %v16403_v5 = vcombine.low %v12108_v62, %v12110_v56  ;;  %v2105_v58 = vor.u32 %v2104_v1, %v2103_v20  ;;  %v2374_v40 = vsel %vm11373_vm8, %v9229_v49, %v2373_v26  ;;  %v2115_v54 = vrot.slane %v2113_v0, 5  ;;  %v10982_v26 = vld [vmem:[%s16121_s1 + $0x210] sm:$0xff]  }
  0xf4   : > { %v2110_v30 = vor.u32 %v2109_v55, %v2107_v22  ;;  %v9310_v17 = vcombine.low %v11121_v47, %v11122_v25  ;;  %v2063_v62 = vsel %vm11373_vm8, %v12166_v38, %v2062_v10  ;;  %v2072_v56 = vsel %vm11373_vm8, %v2064_v57, %v2071_v11  ;;  %v2075_v47 = vld [vmem:[#allocation2 + $0x4c] sm:$0x1]  ;;  %v2323_v18 = vld [vmem:[#allocation2 + $0x68] sm:$0x8] }
  0xf5   : > { %4413 = vmatmul.mubr.bf16.vlgmr.msra.gmra.mrb[64].mxu0 %v16403_v5  ;;  %v12248_v20 = vcombine.low %v2374_v40, %v2383_v2  ;;  %v2106_v1 = vrot.slane %v2105_v58, 4  ;;  %v2317_v5 = vld [vmem:[#allocation2 + $0x40] sm:$0x8]  ;;  %v9308_v49 = vcombine.low %v2063_v62, %v2072_v56  ;;  %v2390_v0 = vshrl.u32 %v12234_v35, 16 }
  0xf6   : > { %10790 = vmatpush3.bf16.msra.mxu0 %v11120_v12  ;;  %v2111_v55 = vrot.slane %v2110_v30, 4  ;;  %v2393_v12 = vshll.u32 %v12234_v35, 16  ;;  %v2399_v10 = vshrl.u32 %v12241_v43, 16  ;;  %v2402_v57 = vshll.u32 %v12241_v43, 16 }
  0xf7   : > { %10791 = vmatprep.subr.bf16.mxu0 %v10978_v16  ;;  %v2108_v38 = vsel %vm11408_vm11, %v2106_v1, %v2107_v22  ;;  %v9358_v2 = vcombine.low %v12234_v35, %v12241_v43  ;;  %4371 = vmatprep.mubr.bf16.mxu1 %v9308_v49  ;;  %v2392_v58 = vrot.slane %v2390_v0, 7  ;;  %v2744_v40 = vrot.slane %v2390_v0, 4  ;;  %v12265_v1 = vld [vmem:[#allocation2 + $0x58] sm:$0xf] }
  0xf8   : > { %v2116_v11 = vsel %vm11408_vm11, %v2111_v55, %v2115_v54  ;;  %v2745_v30 = vrot.slane %v2393_v12, 5  ;;  %4372 = vmatmul.mubr.bf16.gmra.mrb[60].mxu1 %v9292_v7  ;;  %v2401_v62 = vrot.slane %v2399_v10, 7  ;;  %v12263_v22 = vrot.slane %v2402_v57, 5  ;;  %v10986_v7 = vld [vmem:[%s16121_s1 + $0x218] sm:$0xff]  }
  0xf9   : > { %v9326_v25 = vcombine.low %v2108_v38, %v2116_v11  ;;  %v2750_v56 = vrot.slane %v2399_v10, 4  ;;  %4573 = vmatprep.mubr.bf16.mxu1 %v9357_v24  ;;  %v2385_v54 = vshrl.u32 %v2317_v5, 16  ;;  %v2395_v43 = vor.u32 %v2393_v12, %v2392_v58 }
  0xfa   : > { %10792 = vmatpush3.bf16.msra.mxu0 %v10978_v16  ;;  %16404 = vst [vmem:[#allocation16_spill] sm:$0xff] %v12263_v22  ;;  %v2746_v35 = vor.u32 %v2745_v30, %v2744_v40  ;;  %v2397_v49 = vrot.slane %v2392_v58, 4  ;;  %v2404_v55 = vor.u32 %v2402_v57, %v2401_v62  ;;  %v16405_v0 = vshrl.u32 %v11477_v41, 16 }
  0xfb   : > { %10793 = vmatprep.subr.bf16.mxu0 %v10982_v26  ;;  %4420 = vmatprep.mubr.bf16.mxu0 %v9326_v25  ;;  %v2751_v16 = vor.u32 %v2750_v56, %v12263_v22  ;;  %v16406_v10 = vshll.u32 %v11477_v41, 16  ;;  %v9230_v5 = vrot.slane %v2385_v54, 11  ;;  %v16409_v12 = vshll.u32 %v11483_v4, 16  ;;  %v2320_v56 = vld [vmem:[#allocation2 + $0x54] sm:$0x8] }
  0xfc   : > { %v2117_v38 = vrot.slane %v16405_v0, 4  ;;  %v12280_v24 = vrot.slane %v2746_v35, 4  ;;  %v16410_v40 = vshrl.u32 %v11483_v4, 16  ;;  %v2405_v57 = vsel %vm11373_vm8, %v2397_v49, %v2404_v55  ;;  %v11123_v54 = vld [vmem:[#allocation2 + $0x44] sm:$0xf]  ;;  %v10990_v4 = vld [vmem:[%s16121_s1 + $0x220] sm:$0xff]  }
  0xfd   : > { %v2118_v11 = vrot.slane %v16406_v10, 5  ;;  %4421 = vmatmul.mubr.bf16.gmra.mrb[68].mxu0 %v9310_v17  ;;  %v2121_v58 = vrot.slane %v16409_v12, 5  ;;  %v12286_v25 = vrot.slane %v2751_v16, 4  ;;  %v2127_v41 = vshll.u32 %v2075_v47, 16  ;;  %v11124_v0 = vld [vmem:[#allocation2 + $0x48] sm:$0xf] }
  0xfe   : > { %16408 = vst [vmem:[#allocation18_spill] sm:$0xff] %v12280_v24  ;;  %v2123_v30 = vrot.slane %v16410_v40, 4  ;;  %10794 = vmatpush3.bf16.msra.mxu0 %v10982_v26  ;;  %v2396_v17 = vsel %vm11373_vm8, %v9230_v5, %v2395_v43  ;;  %v9311_v10 = vcombine.low %v11123_v54, %v11124_v0  ;;  %v2412_v12 = vshrl.u32 %v12265_v1, 16  ;;  %v12312_v54 = vld [vmem:[#allocation2 + $0x6c] sm:$0xf] }
  0xff   : > { %16411 = vst [vmem:[#allocation19_spill] sm:$0xff] %v12286_v25  ;;  %v2119_v62 = vor.u32 %v2118_v11, %v2117_v38  ;;  %10795 = vmatprep.subr.bf16.mxu0 %v10986_v7  ;;  %v9342_v16 = vcombine.low %v2396_v17, %v2405_v57  ;;  %v2129_v55 = vrot.slane %v2127_v41, 5  ;;  %v2415_v47 = vshll.u32 %v12265_v1, 16 }
 0x100   : > { %v2124_v35 = vor.u32 %v2123_v30, %v2121_v58  ;;  %v2414_v38 = vrot.slane %v2412_v12, 7  ;;  %v2421_v43 = vshrl.u32 %v12278_v39, 16  ;;  %v16196_v11 = vshll.u32 %v12278_v39, 16  ;;  %4574 = vmatmul.mubr.bf16.vlgmr.msra.gmra.mrb[64].mxu1 %v12248_v20 }
 0x101   : > { %v2120_v49 = vrot.slane %v2119_v62, 4  ;;  %v12302_v40 = vrot.slane %v2412_v12, 4  ;;  %v12304_v30 = vrot.slane %v2415_v47, 5  ;;  %v9359_v57 = vcombine.low %v12265_v1, %v12278_v39  ;;  %v2076_v62 = vld [vmem:[#allocation2 + $0x60] sm:$0x1]  ;;  %4581 = vmatprep.mubr.bf16.mxu1 %v9358_v2 }
 0x102   : > { %v2125_v26 = vrot.slane %v2124_v35, 4  ;;  %10796 = vmatpush3.bf16.msra.mxu0 %v10986_v7  ;;  %v2423_v17 = vrot.slane %v2421_v43, 7  ;;  %v12310_v35 = vrot.slane %v2421_v43, 4  ;;  %v2407_v20 = vshrl.u32 %v2320_v56, 16 }
 0x103   : > { %v2122_v5 = vsel %vm11408_vm11, %v2120_v49, %v2121_v58  ;;  %16412 = vst [vmem:[#allocation20_spill] sm:$0xff] %v12302_v40  ;;  %16413 = vst [vmem:[#allocation21_spill] sm:$0xff] %v12304_v30  ;;  %10797 = vmatprep.subr.bf16.mxu0 %v10990_v4  ;;  %v10994_v58 = vld [vmem:[%s16121_s1 + $0x228] sm:$0xff]   ;;  %v2417_v12 = vor.u32 %v2415_v47, %v2414_v38  ;;  %v2419_v1 = vrot.slane %v2414_v38, 4  ;;  %v16415_v7 = vshrl.u32 %v11591_v52, 16 }
 0x104   : > { %v2130_v41 = vsel %vm11408_vm11, %v2125_v26, %v2129_v55  ;;  %16414 = vst [vmem:[#allocation22_spill] sm:$0xff] %v12310_v35  ;;  %v12319_v49 = vld [vmem:[#allocation2 + $0x70] sm:$0xf]  ;;  %v9231_v55 = vrot.slane %v2407_v20, 11  ;;  %v2426_v26 = vor.u32 %v16196_v11, %v2423_v17  ;;  %v16417_v56 = vshll.u32 %v11591_v52, 16 }
 0x105   : > { %v9327_v0 = vcombine.low %v2122_v5, %v2130_v41  ;;  %v2131_v2 = vrot.slane %v16415_v7, 4  ;;  %16416 = vst [vmem:[#allocation23_spill] sm:$0xff] %v12319_v49  ;;  %v16418_v13 = vshll.u32 %v11600_v61, 16  ;;  %v16419_v47 = vshrl.u32 %v11600_v61, 16  ;;  %v11125_v41 = vld [vmem:[#allocation2 + $0x58] sm:$0xf] }
 0x106   : > { %v2132_v43 = vrot.slane %v16417_v56, 5  ;;  %v2141_v5 = vshll.u32 %v2076_v62, 16  ;;  %v11126_v7 = vld [vmem:[#allocation2 + $0x5c] sm:$0xf]  ;;  %v2434_v20 = vshrl.u32 %v12312_v54, 16  ;;  %10798 = vmatpush3.bf16.msra.mxu0 %v10990_v4  ;;  %v2418_v52 = vsel %vm11373_vm8, %v9231_v55, %v2417_v12  ;;  %v10998_v61 = vld [vmem:[%s16121_s1 + $0x230] sm:$0xff]  }
 0x107   : > { %v2135_v32 = vrot.slane %v16418_v13, 5  ;;  %4428 = vmatprep.mubr.bf16.mxu0 %v9327_v0  ;;  %v2137_v38 = vrot.slane %v16419_v47, 4  ;;  %v9312_v35 = vcombine.low %v11125_v41, %v11126_v7  ;;  %v2427_v17 = vsel %vm11373_vm8, %v2419_v1, %v2426_v26  ;;  %10799 = vmatprep.subr.bf16.mxu0 %v10994_v58  ;;  %v12338_v4 = vpop.f32.mrb[0].mxu0  ;;  %v11128_v40 = vld [vmem:[#allocation2 + $0x70] sm:$0xf] }
 0x108   : > { %4429 = vmatmul.mubr.bf16.gmra.mrb[72].mxu0 %v9311_v10  ;;  %v2133_v13 = vor.u32 %v2132_v43, %v2131_v2  ;;  %v2437_v0 = vshll.u32 %v12312_v54, 16  ;;  %v9343_v62 = vcombine.low %v2418_v52, %v2427_v17  ;;  %v2143_v47 = vrot.slane %v2141_v5, 5  ;;  %v2077_v2 = vld [vmem:[#allocation2 + $0x74] sm:$0x1]  ;;  %v12344_v26 = vpop.f32.mrb[1].mxu0  ;;  %4582 = vmatmul.mubr.bf16.gmra.mrb[68].mxu1 %v9342_v16 }
 0x109   : > { %v2138_v56 = vor.u32 %v2137_v38, %v2135_v32  ;;  %v2436_v41 = vrot.slane %v2434_v20, 7  ;;  %v2443_v12 = vshrl.u32 %v12319_v49, 16  ;;  %v12342_v1 = vrot.slane %v2434_v20, 4  ;;  %v12350_v52 = vld [vmem:[#allocation2 + $0x80] sm:$0xf]  ;;  %v12352_v17 = vpop.f32.mrb[2].mxu0  ;;  %4589 = vmatprep.mubr.bf16.mxu1 %v9359_v57 }
 0x10a   : > { %v2134_v10 = vrot.slane %v2133_v13, 4  ;;  %v12346_v7 = vrot.slane %v2437_v0, 5  ;;  %v9360_v38 = vcombine.low %v12312_v54, %v12319_v49  ;;  %v2429_v5 = vshrl.u32 %v2323_v18, 16  ;;  %10800 = vmatpush3.bf16.msra.mxu0 %v10994_v58  ;;  %v12360_v55 = vpop.f32.mrb[3].mxu0  ;;  %v11002_v18 = vld [vmem:[%s16121_s1 + $0x238] sm:$0xff]  }
 0x10b   : > { %16420 = vst [vmem:[#allocation24_spill] sm:$0xff] %v12342_v1  ;;  %v2139_v43 = vrot.slane %v2138_v56, 4  ;;  %v2445_v13 = vrot.slane %v2443_v12, 7  ;;  %v12356_v11 = vrot.slane %v2443_v12, 4  ;;  %v2439_v16 = vor.u32 %v2437_v0, %v2436_v41  ;;  %v12358_v56 = vld [vmem:[#allocation2 + $0x84] sm:$0xf]  ;;  %10801 = vmatprep.subr.bf16.mxu0 %v10998_v61 }
 0x10c   : > { %16421 = vst [vmem:[#allocation25_spill] sm:$0xff] %v12346_v7  ;;  %v2136_v20 = vsel %vm11408_vm11, %v2134_v10, %v2135_v32  ;;  %16423 = vst [vmem:[#allocation27_spill] sm:$0xff] %v12358_v56  ;;  %v9232_v57 = vrot.slane %v2429_v5, 11  ;;  %v2441_v58 = vrot.slane %v2436_v41, 4  ;;  %v16424_v32 = vshrl.u32 %v11627_v34, 16 }
 0x10d   : > { %16422 = vst [vmem:[#allocation26_spill] sm:$0xff] %v12356_v11  ;;  %v2144_v54 = vsel %vm11408_vm11, %v2139_v43, %v2143_v47  ;;  %v16425_v0 = vshll.u32 %v12319_v49, 16  ;;  %v16426_v7 = vshll.u32 %v11627_v34, 16  ;;  %v16427_v39 = vshll.u32 %v11629_v42, 16  ;;  %v11127_v5 = vld [vmem:[#allocation2 + $0x6c] sm:$0xf] }
 0x10e   : > { %v2145_v10 = vrot.slane %v16424_v32, 4  ;;  %v9328_v12 = vcombine.low %v2136_v20, %v2144_v54  ;;  %v2440_v30 = vsel %vm11373_vm8, %v9232_v57, %v2439_v16  ;;  %v16428_v47 = vshrl.u32 %v11629_v42, 16  ;;  %v2326_v20 = vld [vmem:[#allocation2 + $0x7c] sm:$0x8]  ;;  %10802 = vmatpush3.bf16.msra.mxu0 %v10998_v61 }
 0x10f   : > { %v2448_v11 = vor.u32 %v16425_v0, %v2445_v13  ;;  %v2146_v1 = vrot.slane %v16426_v7, 5  ;;  %v2149_v25 = vrot.slane %v16427_v39, 5  ;;  %v2155_v41 = vshll.u32 %v2077_v2, 16  ;;  %10803 = vmatprep.subr.bf16.mxu0 %v11002_v18  ;;  %v2078_v0 = vld [vmem:[#allocation2 + $0x88] sm:$0x1] }
 0x110   : > { %v2151_v43 = vrot.slane %v16428_v47, 4  ;;  %v9313_v32 = vcombine.low %v11127_v5, %v11128_v40  ;;  %4436 = vmatprep.mubr.bf16.mxu0 %v9328_v12  ;;  %v2456_v13 = vshrl.u32 %v12350_v52, 16  ;;  %v2459_v39 = vshll.u32 %v12350_v52, 16  ;;  %4590 = vmatmul.mubr.bf16.gmra.mrb[72].mxu1 %v9343_v62  ;;  %v12397_v5 = vld [vmem:[#allocation2 + $0x98] sm:$0xf] }
 0x111   : > { %v2449_v34 = vsel %vm11373_vm8, %v2441_v58, %v2448_v11  ;;  %v2147_v7 = vor.u32 %v2146_v1, %v2145_v10  ;;  %4437 = vmatmul.mubr.bf16.gmra.mrb[76].mxu0 %v9312_v35  ;;  %v2157_v54 = vrot.slane %v2155_v41, 5  ;;  %v2465_v2 = vshrl.u32 %v12358_v56, 16  ;;  %v12391_v35 = vld [vmem:[#allocation2 + $0x94] sm:$0xf]  ;;  %4597 = vmatprep.mubr.bf16.mxu1 %v9360_v38  ;;  %16432 = vst [vmem:[#allocation31_spill] sm:$0xff] %v12397_v5 }
 0x112   : > { %v9344_v16 = vcombine.low %v2440_v30, %v2449_v34  ;;  %v2152_v42 = vor.u32 %v2151_v43, %v2149_v25  ;;  %v2458_v40 = vrot.slane %v2456_v13, 7  ;;  %v16198_v61 = vshll.u32 %v12358_v56, 16  ;;  %10804 = vmatpush3.bf16.msra.mxu0 %v11002_v18 }
 0x113   : > { %v2148_v57 = vrot.slane %v2147_v7, 4  ;;  %v12385_v12 = vrot.slane %v2456_v13, 4  ;;  %v2467_v1 = vrot.slane %v2465_v2, 7  ;;  %v12387_v58 = vrot.slane %v2459_v39, 5 }
 0x114   : > { %v2153_v11 = vrot.slane %v2152_v42, 4  ;;  %v12389_v10 = vrot.slane %v2465_v2, 4  ;;  %v9361_v47 = vcombine.low %v12350_v52, %v12358_v56  ;;  %v2451_v43 = vshrl.u32 %v2326_v20, 16 }
 0x115   : > { %16429 = vst [vmem:[#allocation28_spill] sm:$0xff] %v12385_v12  ;;  %16430 = vst [vmem:[#allocation29_spill] sm:$0xff] %v12387_v58  ;;  %v2150_v30 = vsel %vm11408_vm11, %v2148_v57, %v2149_v25  ;;  %v2461_v41 = vor.u32 %v2459_v39, %v2458_v40  ;;  %v2463_v34 = vrot.slane %v2458_v40, 4  ;;  %v2470_v7 = vor.u32 %v16198_v61, %v2467_v1  ;;  %v11130_v1 = vld [vmem:[#allocation2 + $0x84] sm:$0xf] }
 0x116   : > { %16431 = vst [vmem:[#allocation30_spill] sm:$0xff] %v12389_v10  ;;  %v2158_v62 = vsel %vm11408_vm11, %v2153_v11, %v2157_v54  ;;  %v16433_v18 = vshrl.u32 %v11672_v51, 16  ;;  %v9233_v42 = vrot.slane %v2451_v43, 11  ;;  %v16434_v25 = vshll.u32 %v11672_v51, 16  ;;  %v11129_v11 = vld [vmem:[#allocation2 + $0x80] sm:$0xf] }
 0x117   : > { %v9329_v13 = vcombine.low %v2150_v30, %v2158_v62  ;;  %v16435_v52 = vshll.u32 %v11674_v15, 16  ;;  %v2471_v39 = vsel %vm11373_vm8, %v2463_v34, %v2470_v7  ;;  %v16436_v54 = vshrl.u32 %v11674_v15, 16  ;;  %v2329_v10 = vld [vmem:[#allocation2 + $0x90] sm:$0x8] }
 0x118   : > { %v2159_v38 = vrot.slane %v16433_v18, 4  ;;  %v2160_v2 = vrot.slane %v16434_v25, 5  ;;  %v2169_v40 = vshll.u32 %v2078_v0, 16  ;;  %v9314_v61 = vcombine.low %v11129_v11, %v11130_v1  ;;  %v12413_v18 = vpop.f32.mrb[0].mxu1  ;;  %4598 = vmatmul.mubr.bf16.gmra.mrb[76].mxu1 %v9344_v16  ;;  %v12439_v11 = vld [vmem:[#allocation2 + $0xa8] sm:$0xf] }
 0x119   : > { %v2163_v20 = vrot.slane %v16435_v52, 5  ;;  %v2165_v57 = vrot.slane %v16436_v54, 4  ;;  %4444 = vmatprep.mubr.bf16.mxu0 %v9329_v13  ;;  %v2462_v51 = vsel %vm11373_vm8, %v9233_v42, %v2461_v41  ;;  %v2478_v43 = vshrl.u32 %v12391_v35, 16  ;;  %v12419_v34 = vpop.f32.mrb[1].mxu1  ;;  %4605 = vmatprep.mubr.bf16.mxu1 %v9361_v47  ;;  %v12441_v16 = vld [vmem:[#allocation2 + $0xac] sm:$0xf] }
 0x11a   : > { %v2161_v30 = vor.u32 %v2160_v2, %v2159_v38  ;;  %v2481_v62 = vshll.u32 %v12391_v35, 16  ;;  %4445 = vmatmul.mubr.bf16.gmra.mrb[80].mxu0 %v9313_v32  ;;  %v9345_v15 = vcombine.low %v2462_v51, %v2471_v39  ;;  %v2171_v7 = vrot.slane %v2169_v40, 5  ;;  %v12422_v52 = vpop.f32.mrb[2].mxu1  ;;  %v2079_v38 = vld [vmem:[#allocation2 + $0x9c] sm:$0x1]  ;;  %16440 = vst [vmem:[#allocation35_spill] sm:$0xff] %v12441_v16 }
 0x11b   : > { %v2166_v0 = vor.u32 %v2165_v57, %v2163_v20  ;;  %v2487_v25 = vshrl.u32 %v12397_v5, 16  ;;  %v2480_v13 = vrot.slane %v2478_v43, 7  ;;  %v12425_v41 = vrot.slane %v2478_v43, 4  ;;  %v12427_v42 = vpop.f32.mrb[3].mxu1  ;;  %v12433_v57 = vpop.f32.mrb[4].mxu0 }
 0x11c   : > { %v2162_v54 = vrot.slane %v2161_v30, 4  ;;  %v12429_v32 = vrot.slane %v2481_v62, 5  ;;  %v9362_v51 = vcombine.low %v12391_v35, %v12397_v5  ;;  %v2473_v30 = vshrl.u32 %v2329_v10, 16 }
 0x11d   : > { %16437 = vst [vmem:[#allocation32_spill] sm:$0xff] %v12425_v41  ;;  %v2167_v2 = vrot.slane %v2166_v0, 4  ;;  %v2489_v1 = vrot.slane %v2487_v25, 7  ;;  %v12431_v39 = vrot.slane %v2487_v25, 4  ;;  %v2483_v43 = vor.u32 %v2481_v62, %v2480_v13  ;;  %v12443_v0 = vpop.f32.mrb[5].mxu0 }
 0x11e   : > { %16438 = vst [vmem:[#allocation33_spill] sm:$0xff] %v12429_v32  ;;  %v2164_v40 = vsel %vm11408_vm11, %v2162_v54, %v2163_v20  ;;  %v16441_v47 = vshll.u32 %v12397_v5, 16  ;;  %v16442_v20 = vshrl.u32 %v11780_v44, 16  ;;  %v12451_v41 = vpop.f32.mrb[6].mxu0  ;;  %v9234_v35 = vrot.slane %v2473_v30, 11 }
 0x11f   : > { %16439 = vst [vmem:[#allocation34_spill] sm:$0xff] %v12431_v39  ;;  %v2172_v25 = vsel %vm11408_vm11, %v2167_v2, %v2171_v7  ;;  %v2485_v39 = vrot.slane %v2480_v13, 4  ;;  %v16443_v62 = vshll.u32 %v11780_v44, 16  ;;  %v16444_v58 = vshll.u32 %v11789_v6, 16  ;;  %v12457_v49 = vpop.f32.mrb[7].mxu0 }
 0x120   : > { %v2492_v32 = vor.u32 %v16441_v47, %v2489_v1  ;;  %v2173_v54 = vrot.slane %v16442_v20, 4  ;;  %v9330_v10 = vcombine.low %v2164_v40, %v2172_v25  ;;  %v16445_v13 = vshrl.u32 %v11789_v6, 16  ;;  %v11131_v47 = vld [vmem:[#allocation2 + $0x94] sm:$0xf]  ;;  %v11132_v20 = vld [vmem:[#allocation2 + $0x98] sm:$0xf]  ;;  %4606 = vmatmul.mubr.bf16.gmra.mrb[80].mxu1 %v9345_v15 }
 0x121   : > { %v2174_v56 = vrot.slane %v16443_v62, 5  ;;  %v2177_v12 = vrot.slane %v16444_v58, 5  ;;  %v2183_v1 = vshll.u32 %v2079_v38, 16  ;;  %v9315_v5 = vcombine.low %v11131_v47, %v11132_v20  ;;  %v2332_v40 = vld [vmem:[#allocation2 + $0xa4] sm:$0x8]  ;;  %v12467_v62 = vpop.f32.mrb[4].mxu1  ;;  %4613 = vmatprep.mubr.bf16.mxu1 %v9362_v51 }
 0x122   : > { %v2493_v7 = vsel %vm11373_vm8, %v2485_v39, %v2492_v32  ;;  %v2179_v2 = vrot.slane %v16445_v13, 4  ;;  %4452 = vmatprep.mubr.bf16.mxu0 %v9330_v10  ;;  %v2484_v44 = vsel %vm11373_vm8, %v9234_v35, %v2483_v43  ;;  %v2500_v58 = vshrl.u32 %v12439_v11, 16  ;;  %v12470_v13 = vpop.f32.mrb[5].mxu1  ;;  %v12487_v20 = vld [vmem:[#allocation2 + $0xbc] sm:$0xf]  ;;  %v12501_v22 = vpop.f32.mrb[8].mxu0 }
 0x123   : > { %v2175_v30 = vor.u32 %v2174_v56, %v2173_v54  ;;  %v2503_v25 = vshll.u32 %v12439_v11, 16  ;;  %4453 = vmatmul.mubr.bf16.gmra.mrb[84].mxu0 %v9314_v61  ;;  %v9346_v32 = vcombine.low %v2484_v44, %v2493_v7  ;;  %v2185_v39 = vrot.slane %v2183_v1, 5  ;;  %v2080_v56 = vld [vmem:[#allocation2 + $0xb0] sm:$0x1]  ;;  %v12475_v54 = vpop.f32.mrb[6].mxu1 }
 0x124   : > { %v2180_v6 = vor.u32 %v2179_v2, %v2177_v12  ;;  %v2509_v38 = vshrl.u32 %v12441_v16, 16  ;;  %v2502_v10 = vrot.slane %v2500_v58, 7  ;;  %v12473_v43 = vrot.slane %v2500_v58, 4  ;;  %v12481_v2 = vpop.f32.mrb[7].mxu1  ;;  %v12489_v15 = vld [vmem:[#allocation2 + $0xc0] sm:$0xf] }
 0x125   : > { %v2176_v47 = vrot.slane %v2175_v30, 4  ;;  %v12477_v61 = vrot.slane %v2503_v25, 5  ;;  %v9363_v44 = vcombine.low %v12439_v11, %v12441_v16  ;;  %v2495_v30 = vshrl.u32 %v2332_v40, 16  ;;  %16449 = vst [vmem:[#allocation39_spill] sm:$0xff] %v12489_v15 }
 0x126   : > { %16446 = vst [vmem:[#allocation36_spill] sm:$0xff] %v12473_v43  ;;  %v2181_v35 = vrot.slane %v2180_v6, 4  ;;  %v2511_v19 = vrot.slane %v2509_v38, 7  ;;  %v12479_v7 = vrot.slane %v2509_v38, 4  ;;  %v2505_v58 = vor.u32 %v2503_v25, %v2502_v10 }
 0x127   : > { %16447 = vst [vmem:[#allocation37_spill] sm:$0xff] %v12477_v61  ;;  %v2178_v1 = vsel %vm11408_vm11, %v2176_v47, %v2177_v12  ;;  %v2507_v38 = vrot.slane %v2502_v10, 4  ;;  %v16451_v51 = vshrl.u32 %v11806_v8, 16  ;;  %v9235_v47 = vrot.slane %v2495_v30, 11  ;;  %v12507_v30 = vpop.f32.mrb[9].mxu0 }
 0x128   : > { %16448 = vst [vmem:[#allocation38_spill] sm:$0xff] %v12479_v7  ;;  %v2186_v6 = vsel %vm11408_vm11, %v2181_v35, %v2185_v39  ;;  %v16450_v7 = vshll.u32 %v12441_v16, 16  ;;  %v16452_v11 = vshll.u32 %v11806_v8, 16  ;;  %v16453_v25 = vshll.u32 %v11810_v37, 16  ;;  %v11134_v16 = vld [vmem:[#allocation2 + $0xac] sm:$0xf]  ;;  %4614 = vmatmul.mubr.bf16.gmra.mrb[84].mxu1 %v9346_v32 }
 0x129   : > { %v2187_v43 = vrot.slane %v16451_v51, 4  ;;  %v9331_v12 = vcombine.low %v2178_v1, %v2186_v6  ;;  %v16454_v10 = vshrl.u32 %v11810_v37, 16  ;;  %v2335_v1 = vld [vmem:[#allocation2 + $0xb8] sm:$0x8]  ;;  %v2506_v8 = vsel %vm11373_vm8, %v9235_v47, %v2505_v58  ;;  %4621 = vmatprep.mubr.bf16.mxu1 %v9363_v44 }
 0x12a   : > { %v2514_v61 = vor.u32 %v16450_v7, %v2511_v19  ;;  %v2188_v40 = vrot.slane %v16452_v11, 5  ;;  %v2191_v24 = vrot.slane %v16453_v25, 5  ;;  %v2197_v19 = vshll.u32 %v2080_v56, 16  ;;  %v11133_v7 = vld [vmem:[#allocation2 + $0xa8] sm:$0xf] }
 0x12b   : > { %v2193_v35 = vrot.slane %v16454_v10, 4  ;;  %v9316_v51 = vcombine.low %v11133_v7, %v11134_v16  ;;  %4460 = vmatprep.mubr.bf16.mxu0 %v9331_v12  ;;  %v2522_v11 = vshrl.u32 %v12487_v20, 16  ;;  %v2525_v25 = vshll.u32 %v12487_v20, 16 }
 0x12c   : > { %v2515_v39 = vsel %vm11373_vm8, %v2507_v38, %v2514_v61  ;;  %v2189_v6 = vor.u32 %v2188_v40, %v2187_v43  ;;  %v12513_v61 = vpop.f32.mrb[10].mxu0  ;;  %4461 = vmatmul.mubr.bf16.gmra.mrb[88].mxu0 %v9315_v5  ;;  %v2199_v38 = vrot.slane %v2197_v19, 5  ;;  %v2531_v16 = vshrl.u32 %v12489_v15, 16  ;;  %v12521_v43 = vpop.f32.mrb[8].mxu1 }
 0x12d   : > { %v9347_v37 = vcombine.low %v2506_v8, %v2515_v39  ;;  %v2194_v56 = vor.u32 %v2193_v35, %v2191_v24  ;;  %v12516_v10 = vpop.f32.mrb[11].mxu0  ;;  %v2524_v12 = vrot.slane %v2522_v11, 7  ;;  %v12519_v58 = vrot.slane %v2522_v11, 4  ;;  %v12527_v39 = vpop.f32.mrb[9].mxu1  ;;  %v2081_v11 = vld [vmem:[#allocation2 + $0xc4] sm:$0x1] }
 0x12e   : > { %v2190_v7 = vrot.slane %v2189_v6, 4  ;;  %v2533_v40 = vrot.slane %v2531_v16, 7  ;;  %v12523_v14 = vrot.slane %v2525_v25, 5  ;;  %v12525_v5 = vrot.slane %v2531_v16, 4  ;;  %v12535_v32 = vpop.f32.mrb[10].mxu1 }
 0x12f   : > { %16455 = vst [vmem:[#allocation40_spill] sm:$0xff] %v12519_v58  ;;  %v2195_v47 = vrot.slane %v2194_v56, 4  ;;  %v9364_v19 = vcombine.low %v12487_v20, %v12489_v15  ;;  %v2517_v8 = vshrl.u32 %v2335_v1, 16  ;;  %v2527_v6 = vor.u32 %v2525_v25, %v2524_v12  ;;  %v12545_v20 = vpop.f32.mrb[11].mxu1 }
 0x130   : > { %16456 = vst [vmem:[#allocation41_spill] sm:$0xff] %v12523_v14  ;;  %16457 = vst [vmem:[#allocation42_spill] sm:$0xff] %v12525_v5  ;;  %v2192_v35 = vsel %vm11408_vm11, %v2190_v7, %v2191_v24  ;;  %v2529_v16 = vrot.slane %v2524_v12, 4  ;;  %v16458_v5 = vshll.u32 %v12489_v15, 16  ;;  %v16459_v14 = vshrl.u32 %v11842_v36, 16  ;;  %4622 = vmatmul.mubr.bf16.gmra.mrb[88].mxu1 %v9347_v37 }
 0x131   : > { %v2200_v56 = vsel %vm11408_vm11, %v2195_v47, %v2199_v38  ;;  %v12543_v7 = vld [vmem:[#allocation2 + $0xd4] sm:$0xf]  ;;  %v9236_v25 = vrot.slane %v2517_v8, 11  ;;  %v16461_v58 = vshll.u32 %v11842_v36, 16  ;;  %v16462_v27 = vshll.u32 %v11852_v46, 16  ;;  %v12559_v8 = vpop.f32.mrb[12].mxu0  ;;  %4629 = vmatprep.mubr.bf16.mxu1 %v9364_v19 }
 0x132   : > { %v2536_v44 = vor.u32 %v16458_v5, %v2533_v40  ;;  %v2201_v24 = vrot.slane %v16459_v14, 4  ;;  %16460 = vst [vmem:[#allocation43_spill] sm:$0xff] %v12543_v7  ;;  %v9332_v1 = vcombine.low %v2192_v35, %v2200_v56  ;;  %v16463_v12 = vshrl.u32 %v11852_v46, 16  ;;  %v11135_v14 = vld [vmem:[#allocation2 + $0xbc] sm:$0xf] }
 0x133   : > { %v2202_v63 = vrot.slane %v16461_v58, 5  ;;  %v2205_v3 = vrot.slane %v16462_v27, 5  ;;  %v2211_v40 = vshll.u32 %v2081_v11, 16  ;;  %v11136_v5 = vld [vmem:[#allocation2 + $0xc0] sm:$0xf]  ;;  %v2528_v35 = vsel %vm11373_vm8, %v9236_v25, %v2527_v6 }
 0x134   : > { %v2537_v38 = vsel %vm11373_vm8, %v2529_v16, %v2536_v44  ;;  %v2207_v47 = vrot.slane %v16463_v12, 4  ;;  %v9317_v15 = vcombine.low %v11135_v14, %v11136_v5  ;;  %4468 = vmatprep.mubr.bf16.mxu0 %v9332_v1  ;;  %v2544_v58 = vshrl.u32 %v12533_v28, 16  ;;  %v12562_v44 = vpop.f32.mrb[13].mxu0  ;;  %v12581_v37 = vld [vmem:[#allocation2 + $0xe8] sm:$0xf] }
 0x135   : > { %v2203_v36 = vor.u32 %v2202_v63, %v2201_v24  ;;  %v2547_v27 = vshll.u32 %v12533_v28, 16  ;;  %4469 = vmatmul.mubr.bf16.gmra.mrb[92].mxu0 %v9316_v51  ;;  %v9348_v56 = vcombine.low %v2528_v35, %v2537_v38  ;;  %v2213_v16 = vrot.slane %v2211_v40, 5  ;;  %v2082_v63 = vld [vmem:[#allocation2 + $0xd8] sm:$0x1]  ;;  %v12567_v24 = vpop.f32.mrb[14].mxu0  ;;  %16469 = vst [vmem:[#allocation49_spill] sm:$0xff] %v12581_v37 }
 0x136   : > { %v2208_v46 = vor.u32 %v2207_v47, %v2205_v3  ;;  %v2553_v11 = vshrl.u32 %v12543_v7, 16  ;;  %v2546_v1 = vrot.slane %v2544_v58, 7  ;;  %v12565_v6 = vrot.slane %v2544_v58, 4  ;;  %16465 = vst [vmem:[#allocation45_spill] sm:$0xff] %v12567_v24  ;;  %v12573_v47 = vld [vmem:[#allocation2 + $0xe4] sm:$0xf] }
 0x137   : > { %v2204_v12 = vrot.slane %v2203_v36, 4  ;;  %v12569_v51 = vrot.slane %v2547_v27, 5  ;;  %v12575_v40 = vpop.f32.mrb[15].mxu0  ;;  %v9365_v36 = vcombine.low %v12533_v28, %v12543_v7  ;;  %v2539_v58 = vshrl.u32 %v2338_v48, 16  ;;  %v2341_v24 = vld [vmem:[#allocation2 + $0xe0] sm:$0x8] }
 0x138   : > { %16464 = vst [vmem:[#allocation44_spill] sm:$0xff] %v12565_v6  ;;  %v2209_v25 = vrot.slane %v2208_v46, 4  ;;  %v2555_v5 = vrot.slane %v2553_v11, 7  ;;  %v12571_v38 = vrot.slane %v2553_v11, 4  ;;  %16468 = vst [vmem:[#allocation48_spill] sm:$0xff] %v12575_v40  ;;  %v2549_v14 = vor.u32 %v2547_v27, %v2546_v1  ;;  %4630 = vmatmul.mubr.bf16.gmra.mrb[92].mxu1 %v9348_v56 }
 0x139   : > { %16466 = vst [vmem:[#allocation46_spill] sm:$0xff] %v12569_v51  ;;  %v2206_v35 = vsel %vm11408_vm11, %v2204_v12, %v2205_v3  ;;  %v2551_v11 = vrot.slane %v2546_v1, 4  ;;  %v16471_v6 = vshrl.u32 %v11957_v60, 16  ;;  %v9237_v40 = vrot.slane %v2539_v58, 11  ;;  %4637 = vmatprep.mubr.bf16.mxu1 %v9365_v36 }
 0x13a   : > { %16467 = vst [vmem:[#allocation47_spill] sm:$0xff] %v12571_v38  ;;  %v2214_v46 = vsel %vm11408_vm11, %v2209_v25, %v2213_v16  ;;  %v16470_v38 = vshll.u32 %v12543_v7, 16  ;;  %v16472_v3 = vshll.u32 %v11957_v60, 16  ;;  %v16473_v48 = vshll.u32 %v11959_v29, 16  ;;  %v11137_v7 = vld [vmem:[#allocation2 + $0xd0] sm:$0xf] }
 0x13b   : > { %v2215_v19 = vrot.slane %v16471_v6, 4  ;;  %v9333_v53 = vcombine.low %v2206_v35, %v2214_v46  ;;  %v16474_v16 = vshrl.u32 %v11959_v29, 16  ;;  %v2225_v25 = vshll.u32 %v2082_v63, 16 }
 0x13c   : > { %v2558_v51 = vor.u32 %v16470_v38, %v2555_v5  ;;  %v2216_v12 = vrot.slane %v16472_v3, 5  ;;  %v2219_v28 = vrot.slane %v16473_v48, 5  ;;  %v11138_v5 = vld [vmem:[#allocation2 + $0xd4] sm:$0xf]  ;;  %v2550_v6 = vsel %vm11373_vm8, %v9237_v40, %v2549_v14 }
 0x13d   : > { %v2221_v1 = vrot.slane %v16474_v16, 4  ;;  %v9318_v38 = vcombine.low %v11137_v7, %v11138_v5  ;;  %4476 = vmatprep.mubr.bf16.mxu0 %v9333_v53  ;;  %v2566_v35 = vshrl.u32 %v12573_v47, 16  ;;  %v2569_v58 = vshll.u32 %v12573_v47, 16  ;;  %v2083_v53 = vld [vmem:[#allocation2 + $0xec] sm:$0x1] }
 0x13e   : > { %v2559_v27 = vsel %vm11373_vm8, %v2551_v11, %v2558_v51  ;;  %v2217_v60 = vor.u32 %v2216_v12, %v2215_v19  ;;  %4477 = vmatmul.mubr.bf16.gmra.mrb[96].mxu0 %v9317_v15  ;;  %v2227_v11 = vrot.slane %v2225_v25, 5  ;;  %v2575_v29 = vshrl.u32 %v12581_v37, 16  ;;  %v12609_v15 = vld [vmem:[#allocation2 + $0xf8] sm:$0xf]  ;;  %v12615_v5 = vld [vmem:[#allocation2 + $0xfc] sm:$0xf] }
 0x13f   : > { %v9349_v46 = vcombine.low %v2550_v6, %v2559_v27  ;;  %v2222_v51 = vor.u32 %v2221_v1, %v2219_v28  ;;  %v2568_v3 = vrot.slane %v2566_v35, 7  ;;  %v16215_v7 = vshll.u32 %v12581_v37, 16 }
 0x140   : > { %v2218_v63 = vrot.slane %v2217_v60, 4  ;;  %v12603_v48 = vrot.slane %v2566_v35, 4  ;;  %v2577_v40 = vrot.slane %v2575_v29, 7  ;;  %v12605_v19 = vrot.slane %v2569_v58, 5 }
 0x141   : > { %v2223_v14 = vrot.slane %v2222_v51, 4  ;;  %v12607_v12 = vrot.slane %v2575_v29, 4  ;;  %v9366_v16 = vcombine.low %v12573_v47, %v12581_v37  ;;  %v2561_v1 = vshrl.u32 %v2341_v24, 16  ;;  %v12623_v51 = vpop.f32.mrb[12].mxu1  ;;  %4638 = vmatmul.mubr.bf16.gmra.mrb[96].mxu1 %v9349_v46 }
 0x142   : > { %16475 = vst [vmem:[#allocation50_spill] sm:$0xff] %v12603_v48  ;;  %16476 = vst [vmem:[#allocation51_spill] sm:$0xff] %v12605_v19  ;;  %v2220_v27 = vsel %vm11408_vm11, %v2218_v63, %v2219_v28  ;;  %v2571_v25 = vor.u32 %v2569_v58, %v2568_v3  ;;  %v2573_v6 = vrot.slane %v2568_v3, 4  ;;  %v2580_v60 = vor.u32 %v16215_v7, %v2577_v40  ;;  %v11140_v7 = vld [vmem:[#allocation2 + $0xe8] sm:$0xf] }
 0x143   : > { %16477 = vst [vmem:[#allocation52_spill] sm:$0xff] %v12607_v12  ;;  %v2228_v56 = vsel %vm11408_vm11, %v2223_v14, %v2227_v11  ;;  %v16478_v35 = vshrl.u32 %v11971_v50, 16  ;;  %v9238_v29 = vrot.slane %v2561_v1, 11  ;;  %v16479_v47 = vshll.u32 %v11971_v50, 16  ;;  %v12629_v12 = vpop.f32.mrb[13].mxu1  ;;  %4645 = vmatprep.mubr.bf16.mxu1 %v9366_v16 }
 0x144   : > { %v9334_v28 = vcombine.low %v2220_v27, %v2228_v56  ;;  %v16480_v58 = vshll.u32 %v11977_v23, 16  ;;  %v2581_v11 = vsel %vm11373_vm8, %v2573_v6, %v2580_v60  ;;  %v16481_v3 = vshrl.u32 %v11977_v23, 16  ;;  %v2344_v27 = vld [vmem:[#allocation2 + $0xf4] sm:$0x8]  ;;  %v12635_v1 = vpop.f32.mrb[14].mxu1  ;;  %v12643_v23 = vpop.f32.mrb[16].mxu0 }
 0x145   : > { %v2229_v36 = vrot.slane %v16478_v35, 4  ;;  %v2230_v24 = vrot.slane %v16479_v47, 5  ;;  %v2239_v40 = vshll.u32 %v2083_v53, 16  ;;  %v11139_v35 = vld [vmem:[#allocation2 + $0xe4] sm:$0xf]  ;;  %v2572_v50 = vsel %vm11373_vm8, %v9238_v29, %v2571_v25  ;;  %v12641_v6 = vpop.f32.mrb[15].mxu1 }
 0x146   : > { %v2233_v63 = vrot.slane %v16480_v58, 5  ;;  %v2235_v14 = vrot.slane %v16481_v3, 4  ;;  %v9319_v37 = vcombine.low %v11139_v35, %v11140_v7  ;;  %4484 = vmatprep.mubr.bf16.mxu0 %v9334_v28  ;;  %v2588_v47 = vshrl.u32 %v12609_v15, 16  ;;  %16482 = vst [vmem:[#allocation53_spill] sm:$0xff] %v12643_v23  ;;  %v12646_v35 = vpop.f32.mrb[17].mxu0 }
 0x147   : > { %v2231_v56 = vor.u32 %v2230_v24, %v2229_v36  ;;  %v2591_v58 = vshll.u32 %v12609_v15, 16  ;;  %4485 = vmatmul.mubr.bf16.gmra.mrb[100].mxu0 %v9318_v38  ;;  %v9350_v53 = vcombine.low %v2572_v50, %v2581_v11  ;;  %v2241_v7 = vrot.slane %v2239_v40, 5  ;;  %v12651_v29 = vpop.f32.mrb[18].mxu0  ;;  %v2084_v11 = vld [vmem:[#allocation2 + $0x100] sm:$0x1] }
 0x148   : > { %v2236_v60 = vor.u32 %v2235_v14, %v2233_v63  ;;  %v2597_v3 = vshrl.u32 %v12615_v5, 16  ;;  %v2590_v19 = vrot.slane %v2588_v47, 7  ;;  %v12649_v36 = vrot.slane %v2588_v47, 4  ;;  %v12657_v14 = vpop.f32.mrb[19].mxu0  ;;  %v12663_v25 = vld [vmem:[#allocation2 + $0x10c] sm:$0xf] }
 0x149   : > { %v2232_v28 = vrot.slane %v2231_v56, 4  ;;  %v12653_v23 = vrot.slane %v2591_v58, 5  ;;  %v9367_v50 = vcombine.low %v12609_v15, %v12615_v5  ;;  %v2583_v56 = vshrl.u32 %v2344_v27, 16  ;;  %4646 = vmatmul.mubr.bf16.gmra.mrb[100].mxu1 %v9350_v53 }
 0x14a   : > { %v2237_v24 = vrot.slane %v2236_v60, 4  ;;  %v2599_v48 = vrot.slane %v2597_v3, 7  ;;  %v12655_v38 = vrot.slane %v2597_v3, 4  ;;  %v2593_v47 = vor.u32 %v2591_v58, %v2590_v19 }
 0x14b   : > { %16483 = vst [vmem:[#allocation54_spill] sm:$0xff] %v12653_v23  ;;  %v2234_v40 = vsel %vm11408_vm11, %v2232_v28, %v2233_v63  ;;  %v2595_v60 = vrot.slane %v2590_v19, 4  ;;  %v16485_v3 = vshll.u32 %v12615_v5, 16  ;;  %v12671_v16 = vadd.f32 %v12344_v26, %v12338_v4  ;;  %v12673_v23 = vld [vmem:[#allocation2 + $0x110] sm:$0xf]  ;;  %v12675_v63 = vpop.f32.mrb[16].mxu1  ;;  %4653 = vmatprep.mubr.bf16.mxu1 %v9367_v50 }
 0x14c   : > { %16484 = vst [vmem:[#allocation55_spill] sm:$0xff] %v12655_v38  ;;  %v2242_v46 = vsel %vm11408_vm11, %v2237_v24, %v2241_v7  ;;  %v9239_v27 = vrot.slane %v2583_v56, 11  ;;  %v12679_v58 = vadd.f32 %v12419_v34, %v12413_v18  ;;  %v12683_v19 = vadd.f32 %v12360_v55, %v12352_v17  ;;  %v12685_v7 = vpop.f32.mrb[17].mxu1 }
 0x14d   : > { %v2602_v38 = vor.u32 %v16485_v3, %v2599_v48  ;;  %16486 = vst [vmem:[#allocation56_spill] sm:$0xff] %v12671_v16  ;;  %v9335_v15 = vcombine.low %v2234_v40, %v2242_v46  ;;  %v12691_v26 = vadd.f32 %v12427_v42, %v12422_v52  ;;  %v16490_v48 = vshrl.u32 %v12005_v9, 16  ;;  %v12697_v34 = vpop.f32.mrb[18].mxu1  ;;  %v2347_v42 = vld [vmem:[#allocation2 + $0x108] sm:$0x8] }
 0x14e   : > { %16487 = vst [vmem:[#allocation57_spill] sm:$0xff] %v12679_v58  ;;  %16488 = vst [vmem:[#allocation58_spill] sm:$0xff] %v12683_v19  ;;  %v16491_v24 = vshll.u32 %v12005_v9, 16  ;;  %v2594_v55 = vsel %vm11373_vm8, %v9239_v27, %v2593_v47  ;;  %v16492_v17 = vshll.u32 %v12007_v45, 16  ;;  %v2253_v52 = vshll.u32 %v2084_v11, 16  ;;  %v12705_v46 = vpop.f32.mrb[19].mxu1 }
 0x14f   : > { %v2603_v4 = vsel %vm11373_vm8, %v2595_v60, %v2602_v38  ;;  %16489 = vst [vmem:[#allocation59_spill] sm:$0xff] %v12691_v26  ;;  %v2243_v28 = vrot.slane %v16490_v48, 4  ;;  %4492 = vmatprep.mubr.bf16.mxu0 %v9335_v15  ;;  %v16493_v38 = vshrl.u32 %v12007_v45, 16  ;;  %v11141_v3 = vld [vmem:[#allocation2 + $0xf8] sm:$0xf]  ;;  %v2610_v15 = vshrl.u32 %v12663_v25, 16 }
 0x150   : > { %v2244_v18 = vrot.slane %v16491_v24, 5  ;;  %v2247_v40 = vrot.slane %v16492_v17, 5  ;;  %4493 = vmatmul.mubr.bf16.gmra.mrb[104].mxu0 %v9319_v37  ;;  %v9351_v60 = vcombine.low %v2594_v55, %v2603_v4  ;;  %v11142_v48 = vld [vmem:[#allocation2 + $0xfc] sm:$0xf]  ;;  %v2255_v47 = vrot.slane %v2253_v52, 5  ;;  %v12713_v37 = vpop.f32.mrb[20].mxu0 }
 0x151   : > { %v2249_v56 = vrot.slane %v16493_v38, 4  ;;  %v9320_v24 = vcombine.low %v11141_v3, %v11142_v48  ;;  %v2613_v27 = vshll.u32 %v12663_v25, 16  ;;  %v2619_v17 = vshrl.u32 %v12673_v23, 16  ;;  %v12719_v52 = vpop.f32.mrb[21].mxu0 }
 0x152   : > { %v2245_v9 = vor.u32 %v2244_v18, %v2243_v28  ;;  %v2612_v11 = vrot.slane %v2610_v15, 7  ;;  %v16217_v38 = vshll.u32 %v12673_v23, 16  ;;  %v12711_v19 = vrot.slane %v2610_v15, 4  ;;  %v12725_v15 = vld [vmem:[#allocation2 + $0x120] sm:$0xf]  ;;  %v12727_v50 = vpop.f32.mrb[22].mxu0  ;;  %4654 = vmatmul.mubr.bf16.gmra.mrb[104].mxu1 %v9351_v60 }
 0x153   : > { %v2250_v26 = vor.u32 %v2249_v56, %v2247_v40  ;;  %v2621_v28 = vrot.slane %v2619_v17, 7  ;;  %v12715_v18 = vrot.slane %v2613_v27, 5  ;;  %v12717_v55 = vrot.slane %v2619_v17, 4  ;;  %v2085_v56 = vld [vmem:[#allocation2 + $0x114] sm:$0x1] }
 0x154   : > { %v2246_v45 = vrot.slane %v2245_v9, 4  ;;  %v9368_v9 = vcombine.low %v12663_v25, %v12673_v23  ;;  %v2605_v3 = vshrl.u32 %v2347_v42, 16  ;;  %v2615_v48 = vor.u32 %v2613_v27, %v2612_v11  ;;  %v12739_v25 = vpop.f32.mrb[23].mxu0  ;;  %v2086_v60 = vld [vmem:[#allocation2 + $0x128] sm:$0x1] }
 0x155   : > { %v2251_v4 = vrot.slane %v2250_v26, 4  ;;  %v2617_v17 = vrot.slane %v2612_v11, 4  ;;  %v2624_v58 = vor.u32 %v16217_v38, %v2621_v28  ;;  %v12735_v16 = vadd.f32 %v12443_v0, %v12433_v57  ;;  %v12749_v11 = vpop.f32.mrb[20].mxu1  ;;  %v11144_v38 = vld [vmem:[#allocation2 + $0x110] sm:$0xf] }
 0x156   : > { %v2248_v53 = vsel %vm11408_vm11, %v2246_v45, %v2247_v40  ;;  %v12737_v40 = vld [vmem:[#allocation2 + $0x124] sm:$0xf]  ;;  %v9240_v27 = vrot.slane %v2605_v3, 11  ;;  %v12743_v45 = vadd.f32 %v12470_v13, %v12467_v62  ;;  %v12755_v0 = vadd.f32 %v12481_v2, %v12475_v54  ;;  %v12761_v13 = vpop.f32.mrb[21].mxu1  ;;  %v2350_v2 = vld [vmem:[#allocation2 + $0x11c] sm:$0x8]  ;;  %4661 = vmatprep.mubr.bf16.mxu1 %v9368_v9 }
 0x157   : > { %v2256_v26 = vsel %vm11408_vm11, %v2251_v4, %v2255_v47  ;;  %16494 = vst [vmem:[#allocation60_spill] sm:$0xff] %v12735_v16  ;;  %v12747_v47 = vadd.f32 %v12457_v49, %v12451_v41  ;;  %v2625_v57 = vsel %vm11373_vm8, %v2617_v17, %v2624_v58  ;;  %v16498_v4 = vshrl.u32 %v12029_v21, 16  ;;  %v12769_v17 = vpop.f32.mrb[22].mxu1 }
 0x158   : > { %v9336_v42 = vcombine.low %v2248_v53, %v2256_v26  ;;  %16495 = vst [vmem:[#allocation61_spill] sm:$0xff] %v12743_v45  ;;  %16497 = vst [vmem:[#allocation63_spill] sm:$0xff] %v12755_v0  ;;  %v16499_v53 = vshll.u32 %v12029_v21, 16  ;;  %v2616_v49 = vsel %vm11373_vm8, %v9240_v27, %v2615_v48  ;;  %v16500_v41 = vshll.u32 %v12035_v33, 16 }
 0x159   : > { %16496 = vst [vmem:[#allocation62_spill] sm:$0xff] %v12747_v47  ;;  %v2257_v28 = vrot.slane %v16498_v4, 4  ;;  %v16501_v58 = vshrl.u32 %v12035_v33, 16  ;;  %v2267_v54 = vshll.u32 %v2085_v56, 16  ;;  %v9352_v4 = vcombine.low %v2616_v49, %v2625_v57  ;;  %v12772_v47 = vpop.f32.mrb[23].mxu1 }
 0x15a   : > { %v2258_v62 = vrot.slane %v16499_v53, 5  ;;  %4500 = vmatprep.mubr.bf16.mxu0 %v9336_v42  ;;  %v2261_v3 = vrot.slane %v16500_v41, 5  ;;  %v11143_v53 = vld [vmem:[#allocation2 + $0x10c] sm:$0xf]  ;;  %v2632_v42 = vshrl.u32 %v12725_v15, 16  ;;  %v2635_v33 = vshll.u32 %v12725_v15, 16 }
 0x15b   : > { %v2263_v26 = vrot.slane %v16501_v58, 4  ;;  %4501 = vmatmul.mubr.bf16.gmra.mrb[108].mxu0 %v9320_v24  ;;  %v9321_v0 = vcombine.low %v11143_v53, %v11144_v38  ;;  %v2269_v27 = vrot.slane %v2267_v54, 5  ;;  %v2641_v56 = vshrl.u32 %v12737_v40, 16  ;;  %v12789_v24 = vld [vmem:[#allocation2 + $0x134] sm:$0xf]  ;;  %4662 = vmatmul.mubr.bf16.gmra.mrb[108].mxu1 %v9352_v4 }
 0x15c   : > { %v2259_v21 = vor.u32 %v2258_v62, %v2257_v28  ;;  %v2634_v58 = vrot.slane %v2632_v42, 7  ;;  %v12777_v57 = vrot.slane %v2632_v42, 4  ;;  %v12779_v62 = vrot.slane %v2635_v33, 5 }
 0x15d   : > { %v2264_v48 = vor.u32 %v2263_v26, %v2261_v3  ;;  %v2643_v38 = vrot.slane %v2641_v56, 7  ;;  %v12781_v49 = vrot.slane %v2641_v56, 4  ;;  %v12783_v26 = vpop.f32.mrb[24].mxu0  ;;  %v9369_v9 = vcombine.low %v12725_v15, %v12737_v40 }
 0x15e   : > { %v2260_v41 = vrot.slane %v2259_v21, 4  ;;  %v2627_v21 = vshrl.u32 %v2350_v2, 16  ;;  %v2637_v53 = vor.u32 %v2635_v33, %v2634_v58  ;;  %v12791_v42 = vpop.f32.mrb[25].mxu0  ;;  %v2639_v56 = vrot.slane %v2634_v58, 4 }
 0x15f   : > { %v2265_v28 = vrot.slane %v2264_v48, 4  ;;  %16502 = vst [vmem:[#allocation64_spill] sm:$0xff] %v12781_v49  ;;  %v16503_v45 = vshll.u32 %v12737_v40, 16  ;;  %v12799_v49 = vadd.f32 %v12507_v30, %v12501_v22  ;;  %v12803_v15 = vpop.f32.mrb[26].mxu0  ;;  %v12819_v30 = vadd.f32 %v12545_v20, %v12535_v32  ;;  %4669 = vmatprep.mubr.bf16.mxu1 %v9369_v9 }
 0x160   : > { %v2262_v54 = vsel %vm11408_vm11, %v2260_v41, %v2261_v3  ;;  %v12801_v3 = vld [vmem:[#allocation2 + $0x138] sm:$0xf]  ;;  %v9241_v33 = vrot.slane %v2627_v21, 11  ;;  %v12807_v41 = vadd.f32 %v12527_v39, %v12521_v43  ;;  %v12813_v58 = vpop.f32.mrb[27].mxu0 }
 0x161   : > { %v2270_v48 = vsel %vm11408_vm11, %v2265_v28, %v2269_v27  ;;  %v2646_v16 = vor.u32 %v16503_v45, %v2643_v38  ;;  %16504 = vst [vmem:[#allocation65_spill] sm:$0xff] %v12799_v49  ;;  %16505 = vst [vmem:[#allocation66_spill] sm:$0xff] %v12801_v3  ;;  %v12811_v27 = vadd.f32 %v12516_v10, %v12513_v61  ;;  %v16509_v45 = vld [vmem:[#allocation6_spill] sm:$0xff]  ;;  %v16512_v10 = vld [vmem:[#allocation7_spill] sm:$0xff] }
 0x162   : > { %v9337_v2 = vcombine.low %v2262_v54, %v2270_v48  ;;  %16506 = vst [vmem:[#allocation67_spill] sm:$0xff] %v12807_v41  ;;  %16508 = vst [vmem:[#allocation69_spill] sm:$0xff] %v12819_v30  ;;  %v16510_v28 = vshrl.u32 %v16509_v45, 16  ;;  %v16511_v54 = vshll.u32 %v16509_v45, 16  ;;  %v2638_v61 = vsel %vm11373_vm8, %v9241_v33, %v2637_v53  ;;  %v11146_v30 = vld [vmem:[#allocation2 + $0x124] sm:$0xf] }
 0x163   : > { %16507 = vst [vmem:[#allocation68_spill] sm:$0xff] %v12811_v27  ;;  %v2647_v22 = vsel %vm11373_vm8, %v2639_v56, %v2646_v16  ;;  %v16513_v39 = vshll.u32 %v16512_v10, 16  ;;  %v16514_v48 = vshrl.u32 %v16512_v10, 16  ;;  %v2281_v56 = vshll.u32 %v2086_v60, 16  ;;  %v2353_v27 = vld [vmem:[#allocation2 + $0x130] sm:$0x8] }
 0x164   : > { %v2271_v38 = vrot.slane %v16510_v28, 4  ;;  %v2272_v43 = vrot.slane %v16511_v54, 5  ;;  %4508 = vmatprep.mubr.bf16.mxu0 %v9337_v2  ;;  %v9353_v32 = vcombine.low %v2638_v61, %v2647_v22  ;;  %v11145_v28 = vld [vmem:[#allocation2 + $0x120] sm:$0xf]  ;;  %v2654_v2 = vshrl.u32 %v12789_v24, 16 }
 0x165   : > { %v2275_v21 = vrot.slane %v16513_v39, 5  ;;  %v2277_v16 = vrot.slane %v16514_v48, 4  ;;  %4509 = vmatmul.mubr.bf16.gmra.mrb[112].mxu0 %v9321_v0  ;;  %v9322_v45 = vcombine.low %v11145_v28, %v11146_v30  ;;  %v2283_v53 = vrot.slane %v2281_v56, 5  ;;  %v12855_v41 = vld [vmem:[#allocation2 + $0x14c] sm:$0xf] }
 0x166   : > { %v2273_v20 = vor.u32 %v2272_v43, %v2271_v38  ;;  %v2657_v33 = vshll.u32 %v12789_v24, 16  ;;  %v2663_v39 = vshrl.u32 %v12801_v3, 16  ;;  %v2656_v48 = vrot.slane %v2654_v2, 7  ;;  %v2087_v43 = vld [vmem:[#allocation2 + $0x13c] sm:$0x1]  ;;  %4670 = vmatmul.mubr.bf16.gmra.mrb[112].mxu1 %v9353_v32 }
 0x167   : > { %v2278_v54 = vor.u32 %v2277_v16, %v2275_v21  ;;  %v16218_v60 = vshll.u32 %v12801_v3, 16  ;;  %v12835_v4 = vrot.slane %v2654_v2, 4  ;;  %v9370_v61 = vcombine.low %v12789_v24, %v12801_v3 }
 0x168   : > { %v2274_v10 = vrot.slane %v2273_v20, 4  ;;  %v2665_v22 = vrot.slane %v2663_v39, 7  ;;  %v12837_v38 = vrot.slane %v2657_v33, 5  ;;  %v12839_v30 = vrot.slane %v2663_v39, 4  ;;  %v12845_v20 = vld [vmem:[#allocation2 + $0x148] sm:$0xf] }
 0x169   : > { %v2279_v0 = vrot.slane %v2278_v54, 4  ;;  %v2649_v16 = vshrl.u32 %v2353_v27, 16  ;;  %v2659_v56 = vor.u32 %v2657_v33, %v2656_v48  ;;  %v2661_v2 = vrot.slane %v2656_v48, 4  ;;  %v16519_v27 = vld [vmem:[#allocation45_spill] sm:$0xff]  ;;  %v16520_v33 = vld [vmem:[#allocation48_spill] sm:$0xff]  ;;  %4677 = vmatprep.mubr.bf16.mxu1 %v9370_v61 }
 0x16a   : > { %16515 = vst [vmem:[#allocation6_spill] sm:$0xff] %v12837_v38  ;;  %16516 = vst [vmem:[#allocation7_spill] sm:$0xff] %v12839_v30  ;;  %v2276_v9 = vsel %vm11408_vm11, %v2274_v10, %v2275_v21  ;;  %v2668_v54 = vor.u32 %v16218_v60, %v2665_v22  ;;  %v12853_v39 = vadd.f32 %v12562_v44, %v12559_v8  ;;  %v16523_v8 = vld [vmem:[#allocation8_spill] sm:$0xff]  ;;  %v16533_v38 = vld [vmem:[#allocation53_spill] sm:$0xff] }
 0x16b   : > { %v2284_v28 = vsel %vm11408_vm11, %v2279_v0, %v2283_v53  ;;  %v9242_v10 = vrot.slane %v2649_v16, 11  ;;  %v12859_v24 = vadd.f32 %v12629_v12, %v12623_v51  ;;  %v12863_v49 = vadd.f32 %v16520_v33, %v16519_v27  ;;  %v12875_v16 = vpop.f32.mrb[24].mxu1  ;;  %v16526_v51 = vld [vmem:[#allocation9_spill] sm:$0xff]  ;;  %v2356_v27 = vld [vmem:[#allocation2 + $0x144] sm:$0x8] }
 0x16c   : > { %16517 = vst [vmem:[#allocation70_spill] sm:$0xff] %v12853_v39  ;;  %v9338_v21 = vcombine.low %v2276_v9, %v2284_v28  ;;  %v2669_v53 = vsel %vm11373_vm8, %v2661_v2, %v2668_v54  ;;  %v12869_v48 = vadd.f32 %v12641_v6, %v12635_v1  ;;  %v16524_v44 = vshrl.u32 %v16523_v8, 16  ;;  %v12883_v33 = vpop.f32.mrb[25].mxu1 }
 0x16d   : > { %16518 = vst [vmem:[#allocation71_spill] sm:$0xff] %v12859_v24  ;;  %16521 = vst [vmem:[#allocation45_spill] sm:$0xff] %v12863_v49  ;;  %v16525_v22 = vshll.u32 %v16523_v8, 16  ;;  %v2660_v12 = vsel %vm11373_vm8, %v9242_v10, %v2659_v56  ;;  %v16527_v28 = vshll.u32 %v16526_v51, 16  ;;  %v16528_v54 = vshrl.u32 %v16526_v51, 16  ;;  %v12888_v10 = vpop.f32.mrb[26].mxu1 }
 0x16e   : > { %16522 = vst [vmem:[#allocation48_spill] sm:$0xff] %v12869_v48  ;;  %v2285_v0 = vrot.slane %v16524_v44, 4  ;;  %4516 = vmatprep.mubr.bf16.mxu0 %v9338_v21  ;;  %v2295_v6 = vshll.u32 %v2087_v43, 16  ;;  %v12885_v44 = vpop.f32.mrb[28].mxu0  ;;  %v9354_v8 = vcombine.low %v2660_v12, %v2669_v53  ;;  %v11147_v21 = vld [vmem:[#allocation2 + $0x134] sm:$0xf] }
 0x16f   : > { %v2286_v9 = vrot.slane %v16525_v22, 5  ;;  %v2289_v2 = vrot.slane %v16527_v28, 5  ;;  %v2291_v1 = vrot.slane %v16528_v54, 4  ;;  %4517 = vmatmul.mubr.bf16.gmra.mrb[116].mxu0 %v9322_v45  ;;  %v11148_v22 = vld [vmem:[#allocation2 + $0x138] sm:$0xf]  ;;  %v2676_v56 = vshrl.u32 %v12845_v20, 16 }
 0x170   : > { %v9323_v60 = vcombine.low %v11147_v21, %v11148_v22  ;;  %v12890_v28 = vpop.f32.mrb[29].mxu0  ;;  %v2297_v43 = vrot.slane %v2295_v6, 5  ;;  %v2679_v54 = vshll.u32 %v12845_v20, 16  ;;  %v2685_v48 = vshrl.u32 %v12855_v41, 16  ;;  %v12894_v49 = vpop.f32.mrb[27].mxu1  ;;  %4678 = vmatmul.mubr.bf16.gmra.mrb[116].mxu1 %v9354_v8 }
 0x171   : > { %v2287_v32 = vor.u32 %v2286_v9, %v2285_v0  ;;  %v2292_v51 = vor.u32 %v2291_v1, %v2289_v2  ;;  %v12896_v45 = vpop.f32.mrb[30].mxu0  ;;  %v2678_v53 = vrot.slane %v2676_v56, 7  ;;  %v12899_v9 = vrot.slane %v2676_v56, 4  ;;  %v395_v12 = vld [vmem:[#allocation2 + $0x150] sm:$0x1] }
 0x172   : > { %v12901_v21 = vpop.f32.mrb[31].mxu0  ;;  %v2687_v1 = vrot.slane %v2685_v48, 7  ;;  %v12903_v6 = vrot.slane %v2679_v54, 5  ;;  %v12905_v24 = vrot.slane %v2685_v48, 4  ;;  %v2671_v30 = vshrl.u32 %v2356_v27, 16 }
 0x173   : > { %v2288_v61 = vrot.slane %v2287_v32, 4  ;;  %16529 = vst [vmem:[#allocation8_spill] sm:$0xff] %v12899_v9  ;;  %v2293_v22 = vrot.slane %v2292_v51, 4  ;;  %v9371_v32 = vcombine.low %v12845_v20, %v12855_v41  ;;  %v2681_v3 = vor.u32 %v2679_v54, %v2678_v53  ;;  %v12927_v27 = vld [vmem:[#allocation2 + $0x15c] sm:$0xf] }
 0x174   : > { %16530 = vst [vmem:[#allocation9_spill] sm:$0xff] %v12903_v6  ;;  %16531 = vst [vmem:[#allocation72_spill] sm:$0xff] %v12905_v24  ;;  %v2683_v0 = vrot.slane %v2678_v53, 4  ;;  %v16532_v9 = vshll.u32 %v12855_v41, 16  ;;  %v12917_v6 = vadd.f32 %v12646_v35, %v16533_v38  ;;  %v9243_v24 = vrot.slane %v2671_v30, 11  ;;  %v11006_v54 = vld [vmem:[%s16124_s4 + $0x40] sm:$0xff]  }
 0x175   : > { %v2290_v39 = vsel %vm11408_vm11, %v2288_v61, %v2289_v2  ;;  %v2298_v56 = vsel %vm11408_vm11, %v2293_v22, %v2297_v43  ;;  %v12921_v2 = vadd.f32 %v12685_v7, %v12675_v63  ;;  %v12925_v20 = vadd.f32 %v12657_v14, %v12651_v29  ;;  %v12929_v43 = vpop.f32.mrb[28].mxu1  ;;  %v11007_v35 = vld [vmem:[%s16124_s4] sm:$0xff]   ;;  %v16539_v38 = vld [vmem:[#allocation12_spill] sm:$0xff]  ;;  %v12947_v61 = vld [vmem:[#allocation2 + $0x160] sm:$0xf]  ;;  %4685 = vmatprep.mubr.bf16.mxu1 %v9371_v32 }
 0x176   : > { %v2690_v51 = vor.u32 %v16532_v9, %v2687_v1  ;;  %16534 = vst [vmem:[#allocation53_spill] sm:$0xff] %v12917_v6  ;;  %v9339_v48 = vcombine.low %v2290_v39, %v2298_v56  ;;  %v12941_v29 = vadd.f32 %v12705_v46, %v12697_v34  ;;  %v396_v7 = vsel %vm11355_vm6, 0, %v395_v12  ;;  %v12949_v53 = vpop.f32.mrb[29].mxu1  ;;  %v16542_v46 = vld [vmem:[#allocation13_spill] sm:$0xff]  ;;  %v12965_v32 = vld [vmem:[#allocation2 + $0x14c] sm:$0xf]  ;;  %10317 = vmatprep.subr.bf16.mxu1 %v11006_v54 }
 0x177   : > { %16535 = vst [vmem:[#allocation73_spill] sm:$0xff] %v12921_v2  ;;  %16536 = vst [vmem:[#allocation74_spill] sm:$0xff] %v12925_v20  ;;  %v16540_v30 = vshrl.u32 %v16539_v38, 16  ;;  %v2682_v8 = vsel %vm11373_vm8, %v9243_v24, %v2681_v3  ;;  %v16543_v9 = vshll.u32 %v16542_v46, 16  ;;  %v16544_v12 = vshrl.u32 %v16542_v46, 16  ;;  %v12961_v56 = vpop.f32.mrb[30].mxu1  ;;  %10318 = vmatpush3.bf16.msra.mxu1 %v11007_v35 }
 0x178   : > { %v2691_v63 = vsel %vm11373_vm8, %v2683_v0, %v2690_v51  ;;  %16537 = vst [vmem:[#allocation75_spill] sm:$0xff] %v12941_v29  ;;  %4524 = vmatprep.mubr.bf16.mxu0 %v9339_v48  ;;  %397 = vst [vmem:[#allocation2 + $0x150] sm:$0x1] %v396_v7  ;;  %v16541_v0 = vshll.u32 %v16539_v38, 16  ;;  %v12963_v48 = vld [vmem:[#allocation2 + $0x148] sm:$0xf]  ;;  %v9372_v29 = vcombine.low %v12927_v27, %v12947_v61 }
 0x179   : > { %v2299_v39 = vrot.slane %v16540_v30, 4  ;;  %v12957_v22 = vrot.slane %v16543_v9, 5  ;;  %v2305_v1 = vrot.slane %v16544_v12, 4  ;;  %4525 = vmatmul.mubr.bf16.gmra.mrb[120].mxu0 %v9323_v60  ;;  %v9355_v51 = vcombine.low %v2682_v8, %v2691_v63  ;;  %v12971_v38 = vpop.f32.mrb[31].mxu1  ;;  %v2359_v8 = vld [vmem:[#allocation2 + $0x158] sm:$0x8] }
 0x17a   : > { %v2300_v34 = vrot.slane %v16541_v0, 5  ;;  %v2698_v24 = vshrl.u32 %v12927_v27, 16  ;;  %v2701_v7 = vshll.u32 %v12927_v27, 16  ;;  %v2707_v60 = vshrl.u32 %v12947_v61, 16  ;;  %v12976_v46 = vpop.f32.mrb[32].mxu0 }
 0x17b   : > { %v2306_v0 = vor.u32 %v2305_v1, %v12957_v22  ;;  %v12984_v54 = vpop.f32.mrb[33].mxu0  ;;  %v2693_v2 = vshrl.u32 %v2359_v8, 16  ;;  %4686 = vmatmul.mubr.bf16.gmra.mrb[120].mxu1 %v9355_v51 }
 0x17c   : > { %v2301_v30 = vor.u32 %v2300_v34, %v2299_v39  ;;  %v2700_v9 = vrot.slane %v2698_v24, 7  ;;  %v12978_v12 = vrot.slane %v2698_v24, 4  ;;  %v12980_v3 = vrot.slane %v2701_v7, 5  ;;  %v12988_v63 = vpop.f32.mrb[34].mxu0  ;;  %4693 = vmatprep.mubr.bf16.mxu1 %v9372_v29 }
 0x17d   : > { %v2307_v34 = vrot.slane %v2306_v0, 4  ;;  %v2709_v1 = vrot.slane %v2707_v60, 7  ;;  %v12986_v20 = vrot.slane %v2707_v60, 4  ;;  %v12992_v24 = vadd.f32 %v12719_v52, %v12713_v37  ;;  %v2715_v37 = vld [vmem:[#allocation2 + $0x4c] sm:$0x1]  ;;  %v13009_v52 = vpop.f32.mrb[32].mxu1 }
 0x17e   : > { %16545 = vst [vmem:[#allocation12_spill] sm:$0xff] %v12978_v12  ;;  %16546 = vst [vmem:[#allocation13_spill] sm:$0xff] %v12980_v3  ;;  %v2302_v39 = vrot.slane %v2301_v30, 4  ;;  %v2703_v6 = vor.u32 %v2701_v7, %v2700_v9  ;;  %v2705_v35 = vrot.slane %v2700_v9, 4  ;;  %v2714_v3 = vld [vmem:[#allocation2 + $0x38] sm:$0x1]  ;;  %v13003_v60 = vadd.f32 %v12761_v13, %v12749_v11 }
 0x17f   : > { %16547 = vst [vmem:[#allocation76_spill] sm:$0xff] %v12986_v20  ;;  %16548 = vst [vmem:[#allocation77_spill] sm:$0xff] %v12992_v24  ;;  %v12994_v12 = vpop.f32.mrb[35].mxu0  ;;  %v16549_v30 = vshll.u32 %v12947_v61, 16  ;;  %v13007_v7 = vadd.f32 %v12739_v25, %v12727_v50  ;;  %v2088_v8 = vld [vmem:[#allocation2 + $0x150] sm:$0x1] }
 0x180   : > { %v2304_v27 = vsel %vm11408_vm11, %v2302_v39, %v12957_v22  ;;  %16550 = vst [vmem:[#allocation78_spill] sm:$0xff] %v13003_v60  ;;  %v9244_v9 = vrot.slane %v2693_v2, 11  ;;  %v13013_v22 = vadd.f32 %v12772_v47, %v12769_v17  ;;  %v16553_v39 = vld [vmem:[#allocation11_spill] sm:$0xff]  ;;  %v16555_v24 = vld [vmem:[#allocation10_spill] sm:$0xff]  ;;  %v13019_v60 = vpop.f32.mrb[33].mxu1  ;;  %v2309_v50 = vshll.u32 %v2088_v8, 16 }
 0x181   : > { %v2712_v0 = vor.u32 %v16549_v30, %v2709_v1  ;;  %16551 = vst [vmem:[#allocation79_spill] sm:$0xff] %v13007_v7  ;;  %v16554_v1 = vld [vmem:[#allocation14_spill] sm:$0xff]  ;;  %v16556_v11 = vshll.u32 %v16555_v24, 16  ;;  %v2740_v51 = vshll.u32 %v2714_v3, 16  ;;  %v16557_v7 = vld [vmem:[#allocation16_spill] sm:$0xff]  ;;  %v13027_v17 = vpop.f32.mrb[34].mxu1  ;;  %v13036_v3 = vadd.f32 %v12791_v42, %v12783_v26 }
 0x182   : > { %16552 = vst [vmem:[#allocation80_spill] sm:$0xff] %v13013_v22  ;;  %v2732_v30 = vor.u32 %v16554_v1, %v16553_v39  ;;  %v16558_v2 = vld [vmem:[#allocation18_spill] sm:$0xff]  ;;  %v2704_v39 = vsel %vm11373_vm8, %v9244_v9, %v2703_v6  ;;  %v16559_v1 = vld [vmem:[#allocation15_spill] sm:$0xff]  ;;  %v2754_v22 = vshll.u32 %v2715_v37, 16  ;;  %v13032_v8 = vpop.f32.mrb[35].mxu1  ;;  %v2311_v29 = vrot.slane %v2309_v50, 5 }
 0x183   : > { %v2734_v13 = vrot.slane %v16556_v11, 5  ;;  %v2713_v25 = vsel %vm11373_vm8, %v2705_v35, %v2712_v0  ;;  %v2749_v47 = vsel %vm11408_vm11, %v16558_v2, %v16557_v7  ;;  %v2742_v35 = vrot.slane %v2740_v51, 5  ;;  %v2716_v9 = vld [vmem:[#allocation2 + $0x60] sm:$0x1]  ;;  %v16560_v42 = vld [vmem:[#allocation20_spill] sm:$0xff]  ;;  %v16562_v51 = vld [vmem:[#allocation19_spill] sm:$0xff] }
 0x184   : > { %v2733_v24 = vrot.slane %v2732_v30, 4  ;;  %v9356_v20 = vcombine.low %v2704_v39, %v2713_v25  ;;  %v2756_v2 = vrot.slane %v2754_v22, 5  ;;  %v13042_v6 = vadd.f32 %v12883_v33, %v12875_v16  ;;  %v2717_v22 = vld [vmem:[#allocation2 + $0x74] sm:$0x1]  ;;  %v13056_v25 = vpop.f32.mrb[36].mxu0 }
 0x185   : > { %v2737_v11 = vor.u32 %v16559_v1, %v2734_v13  ;;  %v2312_v37 = vsel %vm11408_vm11, %v2307_v34, %v2311_v29  ;;  %v13048_v30 = vadd.f32 %v12813_v58, %v12803_v15  ;;  %v13052_v26 = vadd.f32 %v12894_v49, %v12888_v10  ;;  %v16563_v15 = vld [vmem:[#allocation17_spill] sm:$0xff] }
 0x186   : > { %v2735_v0 = vsel %vm11408_vm11, %v2733_v24, %v2734_v13  ;;  %v16561_v13 = vld [vmem:[#allocation21_spill] sm:$0xff]  ;;  %v9340_v16 = vcombine.low %v2304_v27, %v2312_v37  ;;  %v2757_v34 = vsel %vm11408_vm11, %v16562_v51, %v2756_v2  ;;  %v16564_v58 = vshll.u32 %v16563_v15, 16  ;;  %v13065_v24 = vpop.f32.mrb[37].mxu0  ;;  %v11008_v27 = vld [vmem:[%s16124_s4 + $0x48] sm:$0xff]   ;;  %4694 = vmatmul.mubr.bf16.gmra.mrb[124].mxu1 %v9356_v20  ;;  %v16566_v37 = vld [vmem:[#allocation24_spill] sm:$0xff] }
 0x187   : > { %v2738_v7 = vrot.slane %v2737_v11, 4  ;;  %v2760_v50 = vor.u32 %v16561_v13, %v16560_v42  ;;  %v9374_v10 = vcombine.low %v2749_v47, %v2757_v34  ;;  %v2768_v11 = vshll.u32 %v2716_v9, 16  ;;  %v13067_v29 = vpop.f32.mrb[38].mxu0  ;;  %v16567_v42 = vld [vmem:[#allocation25_spill] sm:$0xff]  ;;  %v16568_v47 = vld [vmem:[#allocation23_spill] sm:$0xff]  ;;  %10319 = vmatprep.subr.bf16.mxu1 %v11008_v27 }
 0x188   : > { %v2762_v39 = vrot.slane %v16564_v58, 5  ;;  %4532 = vmatprep.mubr.bf16.mxu0 %v9340_v16  ;;  %v16569_v13 = vshll.u32 %v16568_v47, 16  ;;  %v16570_v51 = vcombine.low %v12963_v48, %v12965_v32  ;;  %v13089_v20 = vadd.f32 %v12890_v28, %v12885_v44  ;;  %v2718_v58 = vld [vmem:[#allocation2 + $0x88] sm:$0x1]  ;;  %v16572_v28 = vld [vmem:[#allocation28_spill] sm:$0xff]  ;;  %v16576_v47 = vld [vmem:[#allocation30_spill] sm:$0xff] }
 0x189   : > { %v2743_v33 = vsel %vm11408_vm11, %v2738_v7, %v2742_v35  ;;  %v2761_v1 = vrot.slane %v2760_v50, 4  ;;  %v11009_v35 = vld [vmem:[%s16124_s4 + $0x8] sm:$0xff]   ;;  %v2782_v50 = vshll.u32 %v2717_v22, 16  ;;  %v2770_v16 = vrot.slane %v2768_v11, 5  ;;  %v2719_v27 = vld [vmem:[#allocation2 + $0x9c] sm:$0x1] }
 0x18a   : > { %v9373_v49 = vcombine.low %v2735_v0, %v2743_v33  ;;  %v16565_v7 = vld [vmem:[#allocation22_spill] sm:$0xff]  ;;  %v2774_v0 = vor.u32 %v16567_v42, %v16566_v37  ;;  %v2776_v9 = vrot.slane %v16569_v13, 5  ;;  %v13080_v33 = vpop.f32.mrb[39].mxu0  ;;  %4533 = vmatmul.mubr.bf16.gmra.mrb[124].mxu0 %v16570_v51  ;;  %v13093_v15 = vadd.f32 %v12949_v53, %v12929_v43  ;;  %10320 = vmatpush3.bf16.msra.mxu1 %v11009_v35  ;;  %v16573_v43 = vld [vmem:[#allocation29_spill] sm:$0xff] }
 0x18b   : > { %v2765_v2 = vor.u32 %v16565_v7, %v2762_v39  ;;  %v2763_v34 = vsel %vm11408_vm11, %v2761_v1, %v2762_v39  ;;  %v16571_v37 = vld [vmem:[#allocation26_spill] sm:$0xff]  ;;  %v2784_v32 = vrot.slane %v2782_v50, 5  ;;  %v13098_v39 = vadd.f32 %v12901_v21, %v12896_v45  ;;  %v16574_v1 = vld [vmem:[#allocation27_spill] sm:$0xff]  ;;  %v16578_v13 = vld [vmem:[#allocation33_spill] sm:$0xff] }
 0x18c   : > { %10805 = vmatprep.mubr.bf16.mxu0 %v9373_v49  ;;  %v2775_v7 = vrot.slane %v2774_v0, 4  ;;  %v2779_v48 = vor.u32 %v16571_v37, %v2776_v9  ;;  %v13102_v44 = vadd.f32 %v12971_v38, %v12961_v56  ;;  %v2788_v53 = vor.u32 %v16573_v43, %v16572_v28  ;;  %v16577_v38 = vld [vmem:[#allocation32_spill] sm:$0xff]  ;;  %v16579_v28 = vld [vmem:[#allocation31_spill] sm:$0xff] }
 0x18d   : > { %v2766_v22 = vrot.slane %v2765_v2, 4  ;;  %v16575_v11 = vshll.u32 %v16574_v1, 16  ;;  %v2796_v45 = vshll.u32 %v2718_v58, 16  ;;  %v2802_v50 = vor.u32 %v16578_v13, %v16577_v38 }
 0x18e   : > { %v2777_v35 = vsel %vm11408_vm11, %v2775_v7, %v2776_v9  ;;  %v2780_v42 = vrot.slane %v2779_v48, 4  ;;  %v2789_v0 = vrot.slane %v2788_v53, 4  ;;  %v16580_v43 = vshll.u32 %v16579_v28, 16  ;;  %v16581_v7 = vld [vmem:[#allocation34_spill] sm:$0xff] }
 0x18f   : > { %v2790_v49 = vrot.slane %v16575_v11, 5  ;;  %v2771_v2 = vsel %vm11408_vm11, %v2766_v22, %v2770_v16  ;;  %v2798_v37 = vrot.slane %v2796_v45, 5  ;;  %v2810_v16 = vshll.u32 %v2719_v27, 16  ;;  %v2721_v45 = vld [vmem:[#allocation2 + $0xc4] sm:$0x1] }
 0x190   : > { %v9375_v21 = vcombine.low %v2763_v34, %v2771_v2  ;;  %v2785_v51 = vsel %vm11408_vm11, %v2780_v42, %v2784_v32  ;;  %v2804_v1 = vrot.slane %v16580_v43, 5  ;;  %v2803_v34 = vrot.slane %v2802_v50, 4  ;;  %v2720_v2 = vld [vmem:[#allocation2 + $0xb0] sm:$0x1] }
 0x191   : > { %v2793_v56 = vor.u32 %v16576_v47, %v2790_v49  ;;  %v9376_v22 = vcombine.low %v2777_v35, %v2785_v51  ;;  %v2791_v9 = vsel %vm11408_vm11, %v2789_v0, %v2790_v49  ;;  %v2812_v53 = vrot.slane %v2810_v16, 5  ;;  %v16586_v51 = vld [vmem:[#allocation40_spill] sm:$0xff] }
 0x192   : > { %v2807_v48 = vor.u32 %v16581_v7, %v2804_v1  ;;  %v9911_v11 = vadd.f32 %v12984_v54, %v12976_v46  ;;  %v10023_v32 = vadd.f32 %v13019_v60, %v13009_v52  ;;  %10806 = vmatmul.mubr.bf16.vlgmr.msra.gmra.mrb[128].mxu0 %v9374_v10  ;;  %v2805_v35 = vsel %vm11408_vm11, %v2803_v34, %v2804_v1  ;;  %v16582_v60 = vld [vmem:[#allocation36_spill] sm:$0xff]  ;;  %v16583_v52 = vld [vmem:[#allocation37_spill] sm:$0xff] }
 0x193   : > { %v2794_v58 = vrot.slane %v2793_v56, 4  ;;  %v9914_v49 = vadd.f32 %v12994_v12, %v12988_v63  ;;  %v10026_v42 = vadd.f32 %v13032_v8, %v13027_v17  ;;  %10809 = vmatprep.mubr.bf16.mxu0 %v9375_v21  ;;  %v2816_v10 = vor.u32 %v16583_v52, %v16582_v60  ;;  %v16584_v56 = vld [vmem:[#allocation35_spill] sm:$0xff]  ;;  %v16587_v63 = vld [vmem:[#allocation41_spill] sm:$0xff] }
 0x194   : > { %v2808_v54 = vrot.slane %v2807_v48, 4  ;;  %v13134_v0 = vadd.f32 %v10023_v32, %v9911_v11  ;;  %v16585_v38 = vshll.u32 %v16584_v56, 16  ;;  %v2824_v50 = vshll.u32 %v2720_v2, 16  ;;  %v16588_v21 = vld [vmem:[#allocation39_spill] sm:$0xff]  ;;  %v16591_v2 = vld [vmem:[#allocation42_spill] sm:$0xff] }
 0x195   : > { %v2799_v27 = vsel %vm11408_vm11, %v2794_v58, %v2798_v37  ;;  %v13138_v47 = vadd.f32 %v10026_v42, %v9914_v49  ;;  %v2830_v12 = vor.u32 %v16587_v63, %v16586_v51  ;;  %v10027_v37 = vpop.f32.mrb[36].mxu1  ;;  %v2817_v8 = vrot.slane %v2816_v10, 4  ;;  %v16590_v58 = vld [vmem:[#allocation38_spill] sm:$0xff] }
 0x196   : > { %v9377_v46 = vcombine.low %v2791_v9, %v2799_v27  ;;  %v2818_v13 = vrot.slane %v16585_v38, 5  ;;  %v2813_v17 = vsel %vm11408_vm11, %v2808_v54, %v2812_v53  ;;  %v16589_v28 = vshll.u32 %v16588_v21, 16  ;;  %v10028_v16 = vpop.f32.mrb[37].mxu1  ;;  %v2722_v54 = vld [vmem:[#allocation2 + $0xd8] sm:$0x1]  ;;  %v11010_v38 = vld [vmem:[%s16124_s4 + $0x50] sm:$0xff]  }
 0x197   : > { %v2838_v1 = vshll.u32 %v2721_v45, 16  ;;  %v13148_v9 = vcombine.low %v2805_v35, %v2813_v17  ;;  %v2826_v7 = vrot.slane %v2824_v50, 5  ;;  %v2831_v48 = vrot.slane %v2830_v12, 4  ;;  %v10030_v11 = vpop.f32.mrb[38].mxu1  ;;  %v9921_v45 = vpop.f32.mrb[40].mxu0  ;;  %v16592_v50 = vld [vmem:[#allocation44_spill] sm:$0xff]  ;;  %10321 = vmatprep.subr.bf16.mxu1 %v11010_v38 }
 0x198   : > { %v2832_v43 = vrot.slane %v16589_v28, 5  ;;  %v2821_v34 = vor.u32 %v16590_v58, %v2818_v13  ;;  %v2819_v32 = vsel %vm11408_vm11, %v2817_v8, %v2818_v13  ;;  %v9917_v53 = vadd.f32 %v13065_v24, %v13056_v25  ;;  %v10031_v42 = vpop.f32.mrb[39].mxu1  ;;  %v9922_v56 = vpop.f32.mrb[41].mxu0  ;;  %v11011_v25 = vld [vmem:[%s16124_s4 + $0x10] sm:$0xff]   ;;  %v16593_v51 = vld [vmem:[#allocation46_spill] sm:$0xff] }
 0x199   : > { %v2840_v49 = vrot.slane %v2838_v1, 5  ;;  %v10029_v52 = vadd.f32 %v10028_v16, %v10027_v37  ;;  %v9920_v10 = vadd.f32 %v13080_v33, %v13067_v29  ;;  %v10032_v13 = vadd.f32 %v10031_v42, %v10030_v11  ;;  %v16594_v12 = vld [vmem:[#allocation43_spill] sm:$0xff]  ;;  %v9924_v8 = vpop.f32.mrb[42].mxu0  ;;  %10322 = vmatpush3.bf16.msra.mxu1 %v11011_v25 }
 0x19a   : > { %v2835_v27 = vor.u32 %v16591_v2, %v2832_v43  ;;  %v2822_v60 = vrot.slane %v2821_v34, 4  ;;  %v2833_v35 = vsel %vm11408_vm11, %v2831_v48, %v2832_v43  ;;  %v2844_v63 = vor.u32 %v16593_v51, %v16592_v50  ;;  %10810 = vmatmul.mubr.bf16.gmra.mrb[132].mxu0 %v9376_v22  ;;  %v2723_v28 = vld [vmem:[#allocation2 + $0xec] sm:$0x1]  ;;  %v16596_v43 = vld [vmem:[#allocation50_spill] sm:$0xff]  ;;  %v9925_v58 = vpop.f32.mrb[43].mxu0 }
 0x19b   : > { %v16595_v17 = vshll.u32 %v16594_v12, 16  ;;  %v13172_v33 = vadd.f32 %v10029_v52, %v9917_v53  ;;  %v2852_v21 = vshll.u32 %v2722_v54, 16  ;;  %v16597_v1 = vld [vmem:[#allocation51_spill] sm:$0xff]  ;;  %10813 = vmatprep.mubr.bf16.mxu0 %v9377_v46  ;;  %v13178_v11 = vadd.f32 %v10032_v13, %v9920_v10  ;;  %v10033_v54 = vpop.f32.mrb[40].mxu1  ;;  %v16599_v52 = vld [vmem:[#allocation49_spill] sm:$0xff]  ;;  %v16601_v51 = vld [vmem:[#allocation54_spill] sm:$0xff] }
 0x19c   : > { %v2836_v24 = vrot.slane %v2835_v27, 4  ;;  %v2827_v29 = vsel %vm11408_vm11, %v2822_v60, %v2826_v7  ;;  %v2858_v16 = vor.u32 %v16597_v1, %v16596_v43  ;;  %v2845_v22 = vrot.slane %v2844_v63, 4  ;;  %v16598_v7 = vld [vmem:[#allocation47_spill] sm:$0xff] }
 0x19d   : > { %v2846_v37 = vrot.slane %v16595_v17, 5  ;;  %v9379_v34 = vcombine.low %v2819_v32, %v2827_v29  ;;  %v2854_v53 = vrot.slane %v2852_v21, 5  ;;  %v16600_v46 = vshll.u32 %v16599_v52, 16  ;;  %v16602_v17 = vld [vmem:[#allocation52_spill] sm:$0xff]  ;;  %v9927_v52 = vpop.f32.mrb[44].mxu0 }
 0x19e   : > { %v2841_v48 = vsel %vm11408_vm11, %v2836_v24, %v2840_v49  ;;  %v2859_v42 = vrot.slane %v2858_v16, 4  ;;  %v2866_v38 = vshll.u32 %v2723_v28, 16  ;;  %v9923_v50 = vadd.f32 %v9922_v56, %v9921_v45  ;;  %v10034_v49 = vpop.f32.mrb[41].mxu1  ;;  %v2725_v16 = vld [vmem:[#allocation2 + $0x114] sm:$0x1] }
 0x19f   : > { %v13180_v2 = vcombine.low %v2833_v35, %v2841_v48  ;;  %v2849_v27 = vor.u32 %v16598_v7, %v2846_v37  ;;  %v2847_v60 = vsel %vm11408_vm11, %v2845_v22, %v2846_v37  ;;  %v2860_v32 = vrot.slane %v16600_v46, 5  ;;  %v10036_v13 = vpop.f32.mrb[42].mxu1  ;;  %v2724_v35 = vld [vmem:[#allocation2 + $0x100] sm:$0x1]  ;;  %v16604_v48 = vld [vmem:[#allocation55_spill] sm:$0xff] }
 0x1a0   : > { %v10035_v24 = vadd.f32 %v10034_v49, %v10033_v54  ;;  %v9926_v25 = vadd.f32 %v9925_v58, %v9924_v8  ;;  %v2872_v63 = vor.u32 %v16601_v51, %v12649_v36  ;;  %v2868_v37 = vrot.slane %v2866_v38, 5  ;;  %v10037_v21 = vpop.f32.mrb[43].mxu1 }
 0x1a1   : > { %v2850_v10 = vrot.slane %v2849_v27, 4  ;;  %v2861_v12 = vsel %vm11408_vm11, %v2859_v42, %v2860_v32  ;;  %v2863_v29 = vor.u32 %v16602_v17, %v2860_v32  ;;  %v16603_v43 = vshll.u32 %v12615_v5, 16 }
 0x1a2   : > { %v13196_v56 = vadd.f32 %v10035_v24, %v9923_v50  ;;  %v10038_v8 = vadd.f32 %v10037_v21, %v10036_v13  ;;  %v2873_v1 = vrot.slane %v2872_v63, 4  ;;  %v2880_v7 = vshll.u32 %v2724_v35, 16  ;;  %10814 = vmatmul.mubr.bf16.gmra.mrb[136].mxu0 %v13148_v9  ;;  %v9928_v9 = vpop.f32.mrb[45].mxu0  ;;  %v2727_v63 = vld [vmem:[#allocation2 + $0x13c] sm:$0x1] }
 0x1a3   : > { %v2874_v28 = vrot.slane %v16603_v43, 5  ;;  %v2855_v45 = vsel %vm11408_vm11, %v2850_v10, %v2854_v53  ;;  %v2864_v36 = vrot.slane %v2863_v29, 4  ;;  %v2886_v53 = vor.u32 %v12715_v18, %v12711_v19  ;;  %10817 = vmatprep.mubr.bf16.mxu0 %v9379_v34  ;;  %v9930_v13 = vpop.f32.mrb[46].mxu0  ;;  %v2726_v19 = vld [vmem:[#allocation2 + $0x128] sm:$0x1]  ;;  %v16607_v43 = vld [vmem:[#allocation64_spill] sm:$0xff] }
 0x1a4   : > { %v9381_v58 = vcombine.low %v2847_v60, %v2855_v45  ;;  %v13200_v27 = vadd.f32 %v10038_v8, %v9926_v25  ;;  %v16605_v42 = vshll.u32 %v12673_v23, 16  ;;  %v2882_v32 = vrot.slane %v2880_v7, 5  ;;  %v9931_v34 = vpop.f32.mrb[47].mxu0  ;;  %v16608_v8 = vld [vmem:[#allocation6_spill] sm:$0xff]  ;;  %v16612_v7 = vld [vmem:[#allocation9_spill] sm:$0xff] }
 0x1a5   : > { %v2877_v22 = vor.u32 %v16604_v48, %v2874_v28  ;;  %v2875_v5 = vsel %vm11408_vm11, %v2873_v1, %v2874_v28  ;;  %v2869_v60 = vsel %vm11408_vm11, %v2864_v36, %v2868_v37  ;;  %v2894_v38 = vshll.u32 %v2725_v16, 16  ;;  %v10039_v37 = vpop.f32.mrb[44].mxu1 }
 0x1a6   : > { %v2888_v54 = vrot.slane %v16605_v42, 5  ;;  %v13210_v50 = vcombine.low %v2861_v12, %v2869_v60  ;;  %v2887_v49 = vrot.slane %v2886_v53, 4  ;;  %v9929_v24 = vadd.f32 %v9928_v9, %v9927_v52  ;;  %v11012_v53 = vld [vmem:[%s16124_s4 + $0x58] sm:$0xff]  }
 0x1a7   : > { %v2878_v46 = vrot.slane %v2877_v22, 4  ;;  %v2896_v18 = vrot.slane %v2894_v38, 5  ;;  %v2900_v25 = vor.u32 %v12779_v62, %v12777_v57  ;;  %v16606_v35 = vshll.u32 %v12737_v40, 16  ;;  %v10040_v57 = vpop.f32.mrb[45].mxu1  ;;  %v16609_v62 = vld [vmem:[#allocation66_spill] sm:$0xff]  ;;  %v16611_v22 = vld [vmem:[#allocation8_spill] sm:$0xff]  ;;  %10323 = vmatprep.subr.bf16.mxu1 %v11012_v53 }
 0x1a8   : > { %v2891_v10 = vor.u32 %v12717_v55, %v2888_v54  ;;  %v2889_v55 = vsel %vm11408_vm11, %v2887_v49, %v2888_v54  ;;  %v9932_v29 = vadd.f32 %v9931_v34, %v9930_v13  ;;  %v2908_v45 = vshll.u32 %v2726_v19, 16  ;;  %v11013_v42 = vld [vmem:[%s16124_s4 + $0x18] sm:$0xff]   ;;  %v10042_v52 = vpop.f32.mrb[46].mxu1 }
 0x1a9   : > { %v2883_v23 = vsel %vm11408_vm11, %v2878_v46, %v2882_v32  ;;  %v2902_v51 = vrot.slane %v16606_v35, 5  ;;  %v2901_v21 = vrot.slane %v2900_v25, 4  ;;  %v2914_v1 = vor.u32 %v16608_v8, %v12835_v4  ;;  %v2728_v32 = vld [vmem:[#allocation2 + $0x150] sm:$0x1]  ;;  %v10043_v38 = vpop.f32.mrb[47].mxu1  ;;  %10324 = vmatpush3.bf16.msra.mxu1 %v11013_v42  ;;  %v16620_v42 = vld [vmem:[#allocation57_spill] sm:$0xff] }
 0x1aa   : > { %v13219_v12 = vcombine.low %v2875_v5, %v2883_v23  ;;  %v2892_v17 = vrot.slane %v2891_v10, 4  ;;  %v16610_v16 = vshll.u32 %v16609_v62, 16  ;;  %v2922_v48 = vshll.u32 %v2727_v63, 16  ;;  %10818 = vmatmul.mubr.bf16.gmra.mrb[140].mxu0 %v13180_v2  ;;  %v16613_v10 = vld [vmem:[#allocation7_spill] sm:$0xff]  ;;  %v16619_v53 = vld [vmem:[#allocation56_spill] sm:$0xff] }
 0x1ab   : > { %v2905_v28 = vor.u32 %v16607_v43, %v2902_v51  ;;  %v2928_v5 = vor.u32 %v16612_v7, %v16611_v22  ;;  %v10041_v54 = vadd.f32 %v10040_v57, %v10039_v37  ;;  %v2903_v60 = vsel %vm11408_vm11, %v2901_v21, %v2902_v51  ;;  %10821 = vmatprep.mubr.bf16.mxu0 %v9381_v58  ;;  %v295_v51 = vld [vmem:[#allocation2 + $0x164] sm:$0x1]  ;;  %v16615_v43 = vld [vmem:[#allocation72_spill] sm:$0xff]  ;;  %v16617_v57 = vld [vmem:[#allocation13_spill] sm:$0xff] }
 0x1ac   : > { %v2897_v40 = vsel %vm11408_vm11, %v2892_v17, %v2896_v18  ;;  %v2916_v36 = vrot.slane %v16610_v16, 5  ;;  %v2910_v9 = vrot.slane %v2908_v45, 5  ;;  %v2915_v49 = vrot.slane %v2914_v1, 4 }
 0x1ad   : > { %v13238_v4 = vcombine.low %v2889_v55, %v2897_v40  ;;  %v2906_v46 = vrot.slane %v2905_v28, 4  ;;  %v2924_v19 = vrot.slane %v2922_v48, 5  ;;  %v13244_v23 = vadd.f32 %v10041_v54, %v9929_v24  ;;  %v9933_v24 = vpop.f32.mrb[48].mxu0  ;;  %v16616_v40 = vld [vmem:[#allocation12_spill] sm:$0xff] }
 0x1ae   : > { %v2919_v13 = vor.u32 %v16613_v10, %v2916_v36  ;;  %v10044_v18 = vadd.f32 %v10043_v38, %v10042_v52  ;;  %v2929_v34 = vrot.slane %v2928_v5, 4  ;;  %v16614_v25 = vshll.u32 %v12855_v41, 16  ;;  %v9934_v45 = vpop.f32.mrb[49].mxu0  ;;  %v16621_v52 = vld [vmem:[#allocation58_spill] sm:$0xff]  ;;  %v16624_v38 = vld [vmem:[#allocation61_spill] sm:$0xff] }
 0x1af   : > { %v2911_v2 = vsel %vm11408_vm11, %v2906_v46, %v2910_v9  ;;  %v2917_v63 = vsel %vm11408_vm11, %v2915_v49, %v2916_v36  ;;  %v2936_v17 = vshll.u32 %v2728_v32, 16  ;;  %v296_v1 = vsel %vm11355_vm6, 0, %v295_v51  ;;  %v9936_v36 = vpop.f32.mrb[50].mxu0  ;;  %v16623_v32 = vld [vmem:[#allocation60_spill] sm:$0xff]  ;;  %v10045_v49 = vpop.f32.mrb[48].mxu1  ;;  %v16627_v51 = vld [vmem:[#allocation65_spill] sm:$0xff] }
 0x1b0   : > { %v2930_v35 = vrot.slane %v16614_v25, 5  ;;  %v2920_v55 = vrot.slane %v2919_v13, 4  ;;  %v13252_v37 = vadd.f32 %v10044_v18, %v9932_v29  ;;  %v9385_v58 = vcombine.low %v2903_v60, %v2911_v2  ;;  %297 = vst [vmem:[#allocation2 + $0x164] sm:$0x1] %v296_v1  ;;  %v9937_v5 = vpop.f32.mrb[51].mxu0  ;;  %v16622_v60 = vld [vmem:[#allocation59_spill] sm:$0xff] }
 0x1b1   : > { %v2938_v8 = vrot.slane %v2936_v17, 5  ;;  %v2942_v62 = vor.u32 %v16617_v57, %v16616_v40  ;;  %v9935_v16 = vadd.f32 %v9934_v45, %v9933_v24  ;;  %v16618_v22 = vshll.u32 %v12947_v61, 16  ;;  %v16625_v61 = vld [vmem:[#allocation62_spill] sm:$0xff]  ;;  %v16628_v2 = vld [vmem:[#allocation67_spill] sm:$0xff]  ;;  %v16630_v17 = vld [vmem:[#allocation69_spill] sm:$0xff] }
 0x1b2   : > { %v2931_v21 = vsel %vm11408_vm11, %v2929_v34, %v2930_v35  ;;  %v2933_v41 = vor.u32 %v16615_v43, %v2930_v35  ;;  %v2925_v28 = vsel %vm11408_vm11, %v2920_v55, %v2924_v19  ;;  %v13267_v54 = vadd.f32 %v16620_v42, %v16619_v53  ;;  %v16626_v19 = vld [vmem:[#allocation63_spill] sm:$0xff]  ;;  %10822 = vmatmul.mubr.bf16.gmra.mrb[144].mxu0 %v13210_v50  ;;  %v10046_v34 = vpop.f32.mrb[49].mxu1  ;;  %v16629_v55 = vld [vmem:[#allocation68_spill] sm:$0xff]  ;;  %v16640_v42 = vld [vmem:[#allocation77_spill] sm:$0xff] }
 0x1b3   : > { %v9386_v29 = vcombine.low %v2917_v63, %v2925_v28  ;;  %v2944_v7 = vrot.slane %v16618_v22, 5  ;;  %v13271_v46 = vadd.f32 %v16622_v60, %v16621_v52  ;;  %v13275_v9 = vadd.f32 %v16624_v38, %v16623_v32  ;;  %10825 = vmatprep.mubr.bf16.mxu0 %v13219_v12  ;;  %v16631_v28 = vld [vmem:[#allocation76_spill] sm:$0xff]  ;;  %v16633_v1 = vld [vmem:[#allocation71_spill] sm:$0xff]  ;;  %v16641_v52 = vld [vmem:[#allocation78_spill] sm:$0xff] }
 0x1b4   : > { %v2934_v48 = vrot.slane %v2933_v41, 4  ;;  %v9938_v10 = vadd.f32 %v9937_v5, %v9936_v36  ;;  %v13281_v18 = vadd.f32 %v16626_v19, %v16625_v61  ;;  %v2943_v35 = vrot.slane %v2942_v62, 4  ;;  %v10048_v41 = vpop.f32.mrb[50].mxu1  ;;  %v16635_v40 = vld [vmem:[#allocation48_spill] sm:$0xff]  ;;  %v16636_v36 = vld [vmem:[#allocation53_spill] sm:$0xff]  ;;  %v16638_v5 = vld [vmem:[#allocation74_spill] sm:$0xff] }
 0x1b5   : > { %v13286_v63 = vadd.f32 %v16628_v2, %v16627_v51  ;;  %v13290_v24 = vadd.f32 %v16630_v17, %v16629_v55  ;;  %v10047_v43 = vadd.f32 %v10046_v34, %v10045_v49  ;;  %v2947_v45 = vor.u32 %v16631_v28, %v2944_v7  ;;  %v10049_v62 = vpop.f32.mrb[51].mxu1  ;;  %v16639_v53 = vld [vmem:[#allocation75_spill] sm:$0xff]  ;;  %v16643_v38 = vld [vmem:[#allocation80_spill] sm:$0xff] }
 0x1b6   : > { %v2939_v13 = vsel %vm11408_vm11, %v2934_v48, %v2938_v8  ;;  %v16632_v8 = vld [vmem:[#allocation70_spill] sm:$0xff]  ;;  %v16637_v48 = vld [vmem:[#allocation73_spill] sm:$0xff]  ;;  %v13308_v12 = vadd.f32 %v16639_v53, %v16638_v5  ;;  %v13312_v60 = vadd.f32 %v16641_v52, %v16640_v42  ;;  %v16642_v32 = vld [vmem:[#allocation79_spill] sm:$0xff]  ;;  %v10050_v61 = vadd.f32 %v10049_v62, %v10048_v41  ;;  %v9939_v41 = vpop.f32.mrb[52].mxu0 }
 0x1b7   : > { %v9387_v25 = vcombine.low %v2931_v21, %v2939_v13  ;;  %v13296_v50 = vadd.f32 %v16633_v1, %v16632_v8  ;;  %v16634_v21 = vld [vmem:[#allocation45_spill] sm:$0xff]  ;;  %v13304_v22 = vadd.f32 %v16637_v48, %v16636_v36  ;;  %v13316_v49 = vadd.f32 %v16643_v38, %v16642_v32  ;;  %v2729_v51 = vld [vmem:[#allocation2 + $0x164] sm:$0x1]  ;;  %v10051_v8 = vpop.f32.mrb[52].mxu1 }
 0x1b8   : > { %v13300_v57 = vadd.f32 %v16635_v40, %v16634_v21  ;;  %v13318_v13 = vadd.f32 %v10047_v43, %v9935_v16  ;;  %v13322_v19 = vadd.f32 %v13042_v6, %v13036_v3  ;;  %v13326_v34 = vadd.f32 %v13052_v26, %v13048_v30  ;;  %v9940_v3 = vpop.f32.mrb[53].mxu0  ;;  %v11014_v6 = vld [vmem:[%s16124_s4 + $0x60] sm:$0xff]   ;;  %v10052_v1 = vpop.f32.mrb[53].mxu1  ;;  %v11016_v42 = vld [vmem:[%s16124_s4 + $0x68] sm:$0xff]  }
 0x1b9   : > { %v13330_v2 = vadd.f32 %v13093_v15, %v13089_v20  ;;  %v13334_v55 = vadd.f32 %v13102_v44, %v13098_v39  ;;  %v13336_v16 = vadd.f32 %v10050_v61, %v9938_v10  ;;  %v2948_v17 = vrot.slane %v2947_v45, 4  ;;  %v11015_v30 = vld [vmem:[%s16124_s4 + $0x20] sm:$0xff]   ;;  %v9942_v39 = vpop.f32.mrb[54].mxu0  ;;  %10325 = vmatprep.subr.bf16.mxu1 %v11014_v6 }
 0x1ba   : > { %v2950_v43 = vshll.u32 %v2729_v51, 16  ;;  %v2945_v26 = vsel %vm11408_vm11, %v2943_v35, %v2944_v7  ;;  %v9941_v15 = vadd.f32 %v9940_v3, %v9939_v41  ;;  %10826 = vmatmul.mubr.bf16.gmra.mrb[148].mxu0 %v13238_v4  ;;  %v9943_v44 = vpop.f32.mrb[55].mxu0  ;;  %10326 = vmatpush3.bf16.msra.mxu1 %v11015_v30  ;;  %v10053_v7 = vadd.f32 %v10052_v1, %v10051_v8  ;;  %v10054_v35 = vpop.f32.mrb[54].mxu1 }
 0x1bb   : > { %10829 = vmatprep.mubr.bf16.mxu0 %v9385_v58  ;;  %v9944_v28 = vadd.f32 %v9943_v44, %v9942_v39  ;;  %v9945_v21 = vpop.f32.mrb[56].mxu0  ;;  %v10055_v62 = vpop.f32.mrb[55].mxu1  ;;  %10327 = vmatprep.subr.bf16.mxu1 %v11016_v42 }
 0x1bc   : > { %v2952_v20 = vrot.slane %v2950_v43, 5  ;;  %v9946_v40 = vpop.f32.mrb[57].mxu0  ;;  %v13349_v48 = vadd.f32 %v10053_v7, %v9941_v15  ;;  %v10056_v58 = vadd.f32 %v10055_v62, %v10054_v35  ;;  %v10057_v52 = vpop.f32.mrb[56].mxu1  ;;  %v11019_v62 = vld [vmem:[%s16124_s4 + $0x30] sm:$0xff]  }
 0x1bd   : > { %v9947_v36 = vadd.f32 %v9946_v40, %v9945_v21  ;;  %v9948_v4 = vpop.f32.mrb[58].mxu0  ;;  %v10058_v32 = vpop.f32.mrb[57].mxu1 }
 0x1be   : > { %v2953_v10 = vsel %vm11408_vm11, %v2948_v17, %v2952_v20  ;;  %v9949_v5 = vpop.f32.mrb[59].mxu0  ;;  %v10059_v38 = vadd.f32 %v10058_v32, %v10057_v52  ;;  %v10060_v61 = vpop.f32.mrb[58].mxu1 }
 0x1bf   : > { %v9388_v45 = vcombine.low %v2945_v26, %v2953_v10  ;;  %v9950_v53 = vadd.f32 %v9949_v5, %v9948_v4  ;;  %v10061_v51 = vpop.f32.mrb[59].mxu1  ;;  %v9951_v17 = vpop.f32.mrb[60].mxu0 }
 0x1c0   : > { %v13359_v43 = vadd.f32 %v10059_v38, %v9947_v36  ;;  %v10062_v41 = vadd.f32 %v10061_v51, %v10060_v61  ;;  %v9952_v3 = vpop.f32.mrb[61].mxu0 }
 0x1c1   : > { %v9953_v6 = vadd.f32 %v9952_v3, %v9951_v17  ;;  %v9954_v30 = vpop.f32.mrb[62].mxu0 }
 0x1c2   : > { %10830 = vmatmul.mubr.bf16.gmra.mrb[152].mxu0 %v9386_v29  ;;  %v11017_v29 = vld [vmem:[%s16124_s4 + $0x28] sm:$0xff]   ;;  %v13361_v26 = vadd.f32 %v10062_v41, %v9950_v53  ;;  %v9955_v20 = vpop.f32.mrb[63].mxu0 }
 0x1c3   : > { %10833 = vmatprep.mubr.bf16.mxu0 %v9387_v25  ;;  %v13357_v25 = vadd.f32 %v10056_v58, %v9944_v28  ;;  %10328 = vmatpush3.bf16.msra.mxu1 %v11017_v29  ;;  %v9956_v15 = vadd.f32 %v9955_v20, %v9954_v30 }
 0x1c8   : > { %v10085_v39 = vpop.f32.mrb[64].mxu0 }
 0x1c9   : > { %v10086_v44 = vpop.f32.mrb[65].mxu0 }
 0x1ca   : > { %10834 = vmatmul.mubr.bf16.gmra.mrb[156].mxu0 %v9388_v45  ;;  %v10087_v10 = vadd.f32 %v10086_v44, %v10085_v39  ;;  %v10088_v28 = vpop.f32.mrb[66].mxu0  ;;  %v11018_v45 = vld [vmem:[%s16124_s4 + $0x70] sm:$0xff]  }
 0x1cb   : > { %v10089_v8 = vpop.f32.mrb[67].mxu0  ;;  %10329 = vmatprep.subr.bf16.mxu1 %v11018_v45  ;;  %v10063_v7 = vpop.f32.mrb[60].mxu1 }
 0x1cc   : > { %v4415_v1 = vadd.f32 %v10087_v10, %v13267_v54  ;;  %v10090_v21 = vadd.f32 %v10089_v8, %v10088_v28  ;;  %v10064_v40 = vpop.f32.mrb[61].mxu1  ;;  %10330 = vmatpush3.bf16.msra.mxu1 %v11019_v62 }
 0x1cd   : > { %v10065_v36 = vadd.f32 %v10064_v40, %v10063_v7  ;;  %v10066_v4 = vpop.f32.mrb[62].mxu1 }
 0x1ce   : > { %v4418_v35 = vadd.f32 %v10090_v21, %v13271_v46  ;;  %v10067_v58 = vpop.f32.mrb[63].mxu1 }
 0x1cf   : > { %v13371_v53 = vadd.f32 %v10065_v36, %v9953_v6  ;;  %v10068_v42 = vadd.f32 %v10067_v58, %v10066_v4 }
 0x1d0   : > { %v10091_v5 = vpop.f32.mrb[68].mxu0 }
 0x1d1   : > { %v10092_v29 = vpop.f32.mrb[69].mxu0  ;;  %v13373_v32 = vadd.f32 %v10068_v42, %v9956_v15 }
 0x1d2   : > { %v10093_v54 = vadd.f32 %v10092_v29, %v10091_v5  ;;  %v10094_v52 = vpop.f32.mrb[70].mxu0  ;;  %v11021_v5 = vld [vmem:[%s16124_s4 + $0x80] sm:$0xff]  }
 0x1d3   : > { %v10095_v38 = vpop.f32.mrb[71].mxu0  ;;  %v10197_v51 = vpop.f32.mrb[64].mxu1 }
 0x1d4   : > { %v4423_v46 = vadd.f32 %v10093_v54, %v13275_v9  ;;  %v10096_v61 = vadd.f32 %v10095_v38, %v10094_v52  ;;  %v10198_v17 = vpop.f32.mrb[65].mxu1  ;;  %v11020_v9 = vld [vmem:[%s16124_s4 + $0xc0] sm:$0xff]   ;;  %v11024_v52 = vld [vmem:[%s16124_s4 + $0x78] sm:$0xff]  }
 0x1d5   : > { %v10199_v3 = vadd.f32 %v10198_v17, %v10197_v51  ;;  %v10200_v30 = vpop.f32.mrb[66].mxu1  ;;  %10429 = vmatprep.subr.bf16.mxu0 %v11020_v9  ;;  %v11025_v51 = vld [vmem:[%s16124_s4 + $0x38] sm:$0xff]   ;;  %v11026_v17 = vld [vmem:[%s16124_s4 + $0xd0] sm:$0xff]   ;;  %10331 = vmatprep.subr.bf16.mxu1 %v11024_v52 }
 0x1d6   : > { %v4426_v41 = vadd.f32 %v10096_v61, %v13281_v18  ;;  %v10201_v20 = vpop.f32.mrb[67].mxu1  ;;  %10430 = vmatpush3.bf16.msra.mxu0 %v11021_v5  ;;  %10332 = vmatpush3.bf16.msra.mxu1 %v11025_v51 }
 0x1d7   : > { %v10202_v39 = vadd.f32 %v10201_v20, %v10200_v30  ;;  %v13377_v6 = vadd.f32 %v10199_v3, %v4415_v1 }
 0x1d9   : > { %v13379_v28 = vadd.f32 %v10202_v39, %v4418_v35 }
 0x1db   : > { %v10097_v44 = vpop.f32.mrb[72].mxu0  ;;  %v10203_v8 = vpop.f32.mrb[68].mxu1 }
 0x1dc   : > { %v10098_v10 = vpop.f32.mrb[73].mxu0  ;;  %v10204_v7 = vpop.f32.mrb[69].mxu1 }
 0x1dd   : > { %v10099_v15 = vadd.f32 %v10098_v10, %v10097_v44  ;;  %v10100_v45 = vpop.f32.mrb[74].mxu0  ;;  %v10205_v62 = vadd.f32 %v10204_v7, %v10203_v8  ;;  %v10206_v36 = vpop.f32.mrb[70].mxu1 }
 0x1de   : > { %v10101_v21 = vpop.f32.mrb[75].mxu0  ;;  %v10207_v1 = vpop.f32.mrb[71].mxu1 }
 0x1df   : > { %v4431_v18 = vadd.f32 %v10099_v15, %v13286_v63  ;;  %v10102_v40 = vadd.f32 %v10101_v21, %v10100_v45  ;;  %v10208_v35 = vadd.f32 %v10207_v1, %v10206_v36  ;;  %v13386_v58 = vadd.f32 %v10205_v62, %v4423_v46  ;;  %v11022_v63 = vld [vmem:[%s16124_s4 + $0xc8] sm:$0xff]   ;;  %v11027_v21 = vld [vmem:[%s16124_s4 + $0x90] sm:$0xff]   ;;  %v11030_v1 = vld [vmem:[%s16124_s4 + $0xe0] sm:$0xff]  }
 0x1e0   : > { %10431 = vmatprep.subr.bf16.mxu0 %v11022_v63 }
 0x1e1   : > { %v4434_v4 = vadd.f32 %v10102_v40, %v13290_v24  ;;  %v13391_v29 = vadd.f32 %v10208_v35, %v4426_v41  ;;  %v11023_v24 = vld [vmem:[%s16124_s4 + $0x88] sm:$0xff]  }
 0x1e2   : > { %10432 = vmatpush3.bf16.msra.mxu0 %v11023_v24 }
 0x1e3   : > { %v10209_v38 = vpop.f32.mrb[72].mxu1  ;;  %10433 = vmatprep.subr.bf16.mxu0 %v11026_v17 }
 0x1e4   : > { %v10103_v42 = vpop.f32.mrb[76].mxu0  ;;  %v10210_v41 = vpop.f32.mrb[73].mxu1 }
 0x1e5   : > { %v10104_v54 = vpop.f32.mrb[77].mxu0  ;;  %v10211_v30 = vadd.f32 %v10210_v41, %v10209_v38  ;;  %v10212_v20 = vpop.f32.mrb[74].mxu1 }
 0x1e6   : > { %v10105_v46 = vadd.f32 %v10104_v54, %v10103_v42  ;;  %v10106_v61 = vpop.f32.mrb[78].mxu0  ;;  %v10213_v10 = vpop.f32.mrb[75].mxu1  ;;  %10434 = vmatpush3.bf16.msra.mxu0 %v11027_v21 }
 0x1e7   : > { %v10107_v3 = vpop.f32.mrb[79].mxu0  ;;  %v10214_v15 = vadd.f32 %v10213_v10, %v10212_v20  ;;  %v13410_v8 = vadd.f32 %v10211_v30, %v4431_v18  ;;  %v11033_v30 = vld [vmem:[%s16124_s4 + $0xe8] sm:$0xff]  }
 0x1e8   : > { %v4439_v39 = vadd.f32 %v10105_v46, %v13296_v50  ;;  %v10108_v44 = vadd.f32 %v10107_v3, %v10106_v61  ;;  %v11028_v50 = vld [vmem:[%s16124_s4 + $0xd8] sm:$0xff]   ;;  %v11031_v61 = vld [vmem:[%s16124_s4 + $0xa0] sm:$0xff]  }
 0x1e9   : > { %v13415_v7 = vadd.f32 %v10214_v15, %v4434_v4  ;;  %10435 = vmatprep.subr.bf16.mxu0 %v11028_v50  ;;  %v5132_v3 = vld [vmem:[#allocation3 + $0x8] sm:$0xf]  ;;  %v11034_v15 = vld [vmem:[%s16124_s4 + $0xa8] sm:$0xff]  }
 0x1ea   : > { %v4442_v45 = vadd.f32 %v10108_v44, %v13300_v57  ;;  %v11029_v57 = vld [vmem:[%s16124_s4 + $0x98] sm:$0xff]   ;;  %v5185_v44 = vshrl.u32 %v5132_v3, 16 }
 0x1eb   : > { %v10215_v62 = vpop.f32.mrb[76].mxu1  ;;  %10436 = vmatpush3.bf16.msra.mxu0 %v11029_v57  ;;  %v11035_v57 = vld [vmem:[%s16124_s4 + $0x140] sm:$0xff]  }
 0x1ec   : > { %v10216_v35 = vpop.f32.mrb[77].mxu1  ;;  %10437 = vmatprep.subr.bf16.mxu0 %v11030_v1  ;;  %10541 = vmatprep.subr.bf16.mxu1 %v11035_v57 }
 0x1ed   : > { %v10109_v9 = vpop.f32.mrb[80].mxu0  ;;  %v10217_v5 = vadd.f32 %v10216_v35, %v10215_v62  ;;  %v10218_v42 = vpop.f32.mrb[78].mxu1  ;;  %v5187_v35 = vrot.slane %v5185_v44, 7 }
 0x1ee   : > { %v10110_v40 = vpop.f32.mrb[81].mxu0  ;;  %v10219_v24 = vpop.f32.mrb[79].mxu1 }
 0x1ef   : > { %v10111_v18 = vadd.f32 %v10110_v40, %v10109_v9  ;;  %v10112_v36 = vpop.f32.mrb[82].mxu0  ;;  %v10220_v52 = vadd.f32 %v10219_v24, %v10218_v42  ;;  %v13428_v46 = vadd.f32 %v10217_v5, %v4439_v39  ;;  %10438 = vmatpush3.bf16.msra.mxu0 %v11031_v61  ;;  %v5188_v9 = vshll.u32 %v5132_v3, 16  ;;  %v11037_v5 = vld [vmem:[%s16124_s4 + $0xf0] sm:$0xff]  }
 0x1f0   : > { %v10113_v4 = vpop.f32.mrb[83].mxu0  ;;  %10439 = vmatprep.subr.bf16.mxu0 %v11033_v30  ;;  %v5547_v24 = vrot.slane %v5185_v44, 4 }
 0x1f1   : > { %v4447_v54 = vadd.f32 %v10111_v18, %v13304_v22  ;;  %v10114_v63 = vadd.f32 %v10113_v4, %v10112_v36  ;;  %v13433_v17 = vadd.f32 %v10220_v52, %v4442_v45  ;;  %v5133_v22 = vld [vmem:[#allocation3 + $0xc] sm:$0xf]  ;;  %v5131_v4 = vld [vmem:[#allocation3 + $0x4] sm:$0x8]  ;;  %v5548_v52 = vrot.slane %v5188_v9, 5 }
 0x1f2   : > { %v5194_v10 = vshrl.u32 %v5133_v22, 16  ;;  %v5197_v40 = vshll.u32 %v5133_v22, 16  ;;  %v9559_v50 = vcombine.low %v5132_v3, %v5133_v22 }
 0x1f3   : > { %v4450_v38 = vadd.f32 %v10114_v63, %v13308_v12  ;;  %v10221_v20 = vpop.f32.mrb[80].mxu1  ;;  %10440 = vmatpush3.bf16.msra.mxu0 %v11034_v15  ;;  %v5549_v30 = vor.u32 %v5548_v52, %v5547_v24  ;;  %v5180_v15 = vshrl.u32 %v5131_v4, 16 }
 0x1f4   : > { %v10222_v21 = vpop.f32.mrb[81].mxu1  ;;  %v5196_v63 = vrot.slane %v5194_v10, 7  ;;  %v13448_v61 = vrot.slane %v5197_v40, 5  ;;  %8188 = vmatprep.mubr.bf16.mxu1 %v9559_v50  ;;  %10441 = vmatprep.subr.bf16.mxu0 %v11037_v5 }
 0x1f5   : > { %v10223_v62 = vadd.f32 %v10222_v21, %v10221_v20  ;;  %v10224_v18 = vpop.f32.mrb[82].mxu1  ;;  %v5553_v20 = vrot.slane %v5194_v10, 4  ;;  %v5190_v21 = vor.u32 %v5188_v9, %v5187_v35  ;;  %v13458_v50 = vrot.slane %v5549_v30, 4  ;;  %v11041_v10 = vld [vmem:[%s16124_s4 + $0xb8] sm:$0xff]  }
 0x1f6   : > { %v10115_v51 = vpop.f32.mrb[84].mxu0  ;;  %v10225_v42 = vpop.f32.mrb[83].mxu1  ;;  %v5199_v22 = vor.u32 %v5197_v40, %v5196_v63  ;;  %v414_v40 = vld [vmem:[#allocation3 + $0x18] sm:$0x8]  ;;  %v9495_v9 = vrot.slane %v5180_v15, 11 }
 0x1f7   : > { %v10116_v41 = vpop.f32.mrb[85].mxu0  ;;  %v13451_v3 = vadd.f32 %v10223_v62, %v4447_v54  ;;  %v11040_v54 = vld [vmem:[%s16124_s4 + $0xf8] sm:$0xff]   ;;  %v5552_v63 = vsel %vm11408_vm11, %v13458_v50, %v13448_v61 }
 0x1f8   : > { %v10117_v12 = vadd.f32 %v10116_v41, %v10115_v51  ;;  %v10118_v39 = vpop.f32.mrb[86].mxu0  ;;  %v10226_v51 = vadd.f32 %v10225_v42, %v10224_v18  ;;  %v402_v42 = vld [vmem:[#allocation3 + $0x10] sm:$0x1] }
 0x1f9   : > { %v10119_v45 = vpop.f32.mrb[87].mxu0 }
 0x1fa   : > { %v4455_v36 = vadd.f32 %v10117_v12, %v13312_v60  ;;  %v10120_v1 = vadd.f32 %v10119_v45, %v10118_v39  ;;  %v5192_v60 = vrot.slane %v5187_v35, 4  ;;  %v11039_v12 = vld [vmem:[%s16124_s4 + $0xb0] sm:$0xff]   ;;  %v13456_v44 = vadd.f32 %v10226_v51, %v4450_v38 }
 0x1fb   : > { %10442 = vmatpush3.bf16.msra.mxu0 %v11039_v12  ;;  %v10227_v57 = vpop.f32.mrb[84].mxu1  ;;  %v415_v35 = vsel %vm11360_vm7, 0, %v414_v40 }
 0x1fc   : > { %v4458_v41 = vadd.f32 %v10120_v1, %v13316_v49  ;;  %v5554_v49 = vor.u32 %v5553_v20, %v13448_v61  ;;  %v5200_v18 = vsel %vm11373_vm8, %v5192_v60, %v5199_v22  ;;  %v10228_v4 = vpop.f32.mrb[85].mxu1  ;;  %10443 = vmatprep.subr.bf16.mxu0 %v11040_v54  ;;  %416 = vst [vmem:[#allocation3 + $0x18] sm:$0x8] %v415_v35  ;;  %v11038_v22 = vld [vmem:[%s16124_s4 + $0x100] sm:$0xff]  }
 0x1fd   : > { %v10229_v24 = vadd.f32 %v10228_v4, %v10227_v57  ;;  %v10230_v52 = vpop.f32.mrb[86].mxu1  ;;  %v5191_v60 = vsel %vm11373_vm8, %v9495_v9, %v5190_v21 }
 0x1fe   : > { %v10231_v20 = vpop.f32.mrb[87].mxu1  ;;  %v9543_v12 = vcombine.low %v5191_v60, %v5200_v18  ;;  %v5555_v4 = vrot.slane %v5554_v49, 4  ;;  %v11043_v60 = vld [vmem:[%s16124_s4 + $0x148] sm:$0xff]  }
 0x1ff   : > { %v10121_v39 = vpop.f32.mrb[88].mxu0  ;;  %10444 = vmatpush3.bf16.msra.mxu0 %v11041_v10  ;;  %v10232_v15 = vadd.f32 %v10231_v20, %v10230_v52 }
 0x200   : > { %v10122_v45 = vpop.f32.mrb[89].mxu0  ;;  %8189 = vmatmul.mubr.bf16.vlgmr.msra.gmra.mrb[128].mxu1 %v9543_v12 }
 0x201   : > { %v10123_v38 = vadd.f32 %v10122_v45, %v10121_v39  ;;  %v10124_v62 = vpop.f32.mrb[90].mxu0  ;;  %v403_v39 = vsel %vm11355_vm6, 0, %v402_v42  ;;  %v13484_v45 = vadd.f32 %v10229_v24, %v4455_v36  ;;  %v13486_v50 = vadd.f32 %v10232_v15, %v4458_v41  ;;  %10542 = vmatpush3.bf16.msra.mxu1 %v11038_v22 }
 0x202   : > { %v10125_v5 = vpop.f32.mrb[91].mxu0  ;;  %404 = vst [vmem:[#allocation3 + $0x10] sm:$0x1] %v403_v39  ;;  %10543 = vmatprep.subr.bf16.mxu1 %v11043_v60 }
 0x203   : > { %v4463_v51 = vadd.f32 %v10123_v38, %v13322_v19  ;;  %v10126_v30 = vadd.f32 %v10125_v5, %v10124_v62  ;;  %v10233_v54 = vpop.f32.mrb[88].mxu1 }
 0x204   : > { %v10234_v38 = vpop.f32.mrb[89].mxu1 }
 0x205   : > { %v4466_v61 = vadd.f32 %v10126_v30, %v13326_v34  ;;  %v10235_v62 = vadd.f32 %v10234_v38, %v10233_v54  ;;  %v10236_v9 = vpop.f32.mrb[90].mxu1  ;;  %v417_v34 = vld [vmem:[#allocation3 + $0x2c] sm:$0x8] }
 0x206   : > { %v10237_v36 = vpop.f32.mrb[91].mxu1  ;;  %v418_v41 = vsel %vm11360_vm7, 0, %v417_v34 }
 0x207   : > { %v10238_v42 = vadd.f32 %v10237_v36, %v10236_v9  ;;  %v13492_v52 = vadd.f32 %v10235_v62, %v4463_v51  ;;  %419 = vst [vmem:[#allocation3 + $0x2c] sm:$0x8] %v418_v41  ;;  %v11045_v36 = vld [vmem:[%s16124_s4 + $0x108] sm:$0xff]  }
 0x208   : > { %v10127_v19 = vpop.f32.mrb[92].mxu0  ;;  %10544 = vmatpush3.bf16.msra.mxu1 %v11045_v36 }
 0x209   : > { %v10128_v21 = vpop.f32.mrb[93].mxu0  ;;  %v5531_v5 = vld [vmem:[#allocation3 + $0x10] sm:$0x1]  ;;  %v13497_v20 = vadd.f32 %v10238_v42, %v4466_v61 }
 0x20a   : > { %v10129_v40 = vadd.f32 %v10128_v21, %v10127_v19  ;;  %v10130_v57 = vpop.f32.mrb[94].mxu0  ;;  %v5557_v30 = vshll.u32 %v5531_v5, 16 }
 0x20b   : > { %v10131_v10 = vpop.f32.mrb[95].mxu0 }
 0x20c   : > { %v4471_v18 = vadd.f32 %v10129_v40, %v13330_v2  ;;  %v10132_v35 = vadd.f32 %v10131_v10, %v10130_v57  ;;  %v462_v2 = vld [vmem:[#allocation3 + $0x24] sm:$0x1]  ;;  %v5559_v49 = vrot.slane %v5557_v30, 5 }
 0x20d   : > { %v463_v12 = vsel %vm11355_vm6, 0, %v462_v2 }
 0x20e   : > { %v4474_v24 = vadd.f32 %v10132_v35, %v13334_v55  ;;  %464 = vst [vmem:[#allocation3 + $0x24] sm:$0x1] %v463_v12  ;;  %v10239_v55 = vpop.f32.mrb[92].mxu1  ;;  %v5560_v19 = vsel %vm11408_vm11, %v5555_v4, %v5559_v49 }
 0x20f   : > { %v10240_v21 = vpop.f32.mrb[93].mxu1  ;;  %v13503_v40 = vcombine.low %v5552_v63, %v5560_v19  ;;  %v420_v63 = vld [vmem:[#allocation3 + $0x40] sm:$0x8] }
 0x210   : > { %v10241_v57 = vadd.f32 %v10240_v21, %v10239_v55  ;;  %v10242_v61 = vpop.f32.mrb[94].mxu1 }
 0x211   : > { %v10133_v22 = vpop.f32.mrb[96].mxu0  ;;  %v10243_v62 = vpop.f32.mrb[95].mxu1 }
 0x212   : > { %v10134_v39 = vpop.f32.mrb[97].mxu0  ;;  %v10244_v9 = vadd.f32 %v10243_v62, %v10242_v61  ;;  %v13507_v34 = vadd.f32 %v10241_v57, %v4471_v18 }
 0x213   : > { %v10135_v51 = vadd.f32 %v10134_v39, %v10133_v22  ;;  %v10136_v15 = vpop.f32.mrb[98].mxu0 }
 0x214   : > { %v10137_v54 = vpop.f32.mrb[99].mxu0  ;;  %v13512_v5 = vadd.f32 %v10244_v9, %v4474_v24  ;;  %v10245_v42 = vpop.f32.mrb[96].mxu1  ;;  %v465_v24 = vld [vmem:[#allocation3 + $0x38] sm:$0x1] }
 0x215   : > { %v4479_v38 = vadd.f32 %v10135_v51, %v13134_v0  ;;  %v10138_v10 = vadd.f32 %v10137_v54, %v10136_v15  ;;  %v421_v0 = vsel %vm11360_vm7, 0, %v420_v63  ;;  %v466_v19 = vsel %vm11355_vm6, 0, %v465_v24 }
 0x216   : > { %422 = vst [vmem:[#allocation3 + $0x40] sm:$0x8] %v421_v0  ;;  %467 = vst [vmem:[#allocation3 + $0x38] sm:$0x1] %v466_v19 }
 0x217   : > { %v4482_v35 = vadd.f32 %v10138_v10, %v13138_v47  ;;  %v10246_v47 = vpop.f32.mrb[97].mxu1 }
 0x218   : > { %v10247_v2 = vadd.f32 %v10246_v47, %v10245_v42  ;;  %v10248_v22 = vpop.f32.mrb[98].mxu1 }
 0x219   : > { %v10249_v39 = vpop.f32.mrb[99].mxu1 }
 0x21a   : > { %v10139_v4 = vpop.f32.mrb[100].mxu0  ;;  %v10250_v55 = vadd.f32 %v10249_v39, %v10248_v22  ;;  %v13518_v15 = vadd.f32 %v10247_v2, %v4479_v38 }
 0x21b   : > { %v10140_v41 = vpop.f32.mrb[101].mxu0 }
 0x21c   : > { %v10141_v30 = vadd.f32 %v10140_v41, %v10139_v4  ;;  %v10142_v60 = vpop.f32.mrb[102].mxu0  ;;  %v13522_v54 = vadd.f32 %v10250_v55, %v4482_v35  ;;  %v10251_v61 = vpop.f32.mrb[100].mxu1 }
 0x21d   : > { %v10143_v18 = vpop.f32.mrb[103].mxu0 }
 0x21e   : > { %v4487_v49 = vadd.f32 %v10141_v30, %v13172_v33  ;;  %v10144_v12 = vadd.f32 %v10143_v18, %v10142_v60  ;;  %v10252_v33 = vpop.f32.mrb[101].mxu1  ;;  %v423_v30 = vld [vmem:[#allocation3 + $0x54] sm:$0x8]  ;;  %v11047_v18 = vld [vmem:[%s16124_s4 + $0x150] sm:$0xff]  }
 0x21f   : > { %v10253_v36 = vadd.f32 %v10252_v33, %v10251_v61  ;;  %v10254_v4 = vpop.f32.mrb[102].mxu1  ;;  %v424_v35 = vsel %vm11360_vm7, 0, %v423_v30  ;;  %10545 = vmatprep.subr.bf16.mxu1 %v11047_v18 }
 0x220   : > { %v4490_v51 = vadd.f32 %v10144_v12, %v13178_v11  ;;  %v10255_v38 = vpop.f32.mrb[103].mxu1  ;;  %425 = vst [vmem:[#allocation3 + $0x54] sm:$0x8] %v424_v35 }
 0x221   : > { %v10256_v41 = vadd.f32 %v10255_v38, %v10254_v4  ;;  %v13526_v42 = vadd.f32 %v10253_v36, %v4487_v49  ;;  %v11049_v4 = vld [vmem:[%s16124_s4 + $0x110] sm:$0xff]  }
 0x222   : > { %10546 = vmatpush3.bf16.msra.mxu1 %v11049_v4 }
 0x223   : > { %v10145_v21 = vpop.f32.mrb[104].mxu0  ;;  %v13530_v60 = vadd.f32 %v10256_v41, %v4490_v51  ;;  %v426_v41 = vld [vmem:[#allocation3 + $0x68] sm:$0x8] }
 0x224   : > { %v10146_v57 = vpop.f32.mrb[105].mxu0 }
 0x225   : > { %v10147_v10 = vadd.f32 %v10146_v57, %v10145_v21  ;;  %v10148_v62 = vpop.f32.mrb[106].mxu0 }
 0x226   : > { %v10149_v9 = vpop.f32.mrb[107].mxu0 }
 0x227   : > { %v4495_v63 = vadd.f32 %v10147_v10, %v13196_v56  ;;  %v10150_v11 = vadd.f32 %v10149_v9, %v10148_v62  ;;  %v10257_v56 = vpop.f32.mrb[104].mxu1 }
 0x228   : > { %v10258_v22 = vpop.f32.mrb[105].mxu1 }
 0x229   : > { %v4498_v0 = vadd.f32 %v10150_v11, %v13200_v27  ;;  %v468_v27 = vld [vmem:[#allocation3 + $0x4c] sm:$0x1]  ;;  %v10259_v49 = vadd.f32 %v10258_v22, %v10257_v56  ;;  %v10260_v24 = vpop.f32.mrb[106].mxu1 }
 0x22a   : > { %v469_v51 = vsel %vm11355_vm6, 0, %v468_v27  ;;  %v10261_v19 = vpop.f32.mrb[107].mxu1  ;;  %v471_v27 = vld [vmem:[#allocation3 + $0x60] sm:$0x1] }
 0x22b   : > { %470 = vst [vmem:[#allocation3 + $0x4c] sm:$0x1] %v469_v51  ;;  %v10262_v61 = vadd.f32 %v10261_v19, %v10260_v24  ;;  %v13538_v10 = vadd.f32 %v10259_v49, %v4495_v63  ;;  %v427_v63 = vsel %vm11360_vm7, 0, %v426_v41  ;;  %v472_v49 = vsel %vm11355_vm6, 0, %v471_v27 }
 0x22c   : > { %428 = vst [vmem:[#allocation3 + $0x68] sm:$0x8] %v427_v63  ;;  %473 = vst [vmem:[#allocation3 + $0x60] sm:$0x1] %v472_v49  ;;  %v477_v63 = vld [vmem:[#allocation3 + $0x88] sm:$0x1] }
 0x22d   : > { %v13541_v33 = vadd.f32 %v10262_v61, %v4498_v0 }
 0x22e   : > { %v10151_v47 = vpop.f32.mrb[108].mxu0  ;;  %v10263_v9 = vpop.f32.mrb[108].mxu1 }
 0x22f   : > { %v10152_v2 = vpop.f32.mrb[109].mxu0  ;;  %16645 = vst [vmem:[#allocation11_spill] sm:$0xff] %v13541_v33  ;;  %v10264_v11 = vpop.f32.mrb[109].mxu1 }
 0x230   : > { %v10153_v12 = vadd.f32 %v10152_v2, %v10151_v47  ;;  %v10154_v39 = vpop.f32.mrb[110].mxu0  ;;  %v10265_v30 = vadd.f32 %v10264_v11, %v10263_v9 }
 0x231   : > { %v10155_v55 = vpop.f32.mrb[111].mxu0 }
 0x232   : > { %v4503_v21 = vadd.f32 %v10153_v12, %v13244_v23  ;;  %v10156_v57 = vadd.f32 %v10155_v55, %v10154_v39  ;;  %v10266_v23 = vpop.f32.mrb[110].mxu1 }
 0x234   : > { %v4506_v62 = vadd.f32 %v10156_v57, %v13252_v37  ;;  %v10267_v37 = vpop.f32.mrb[111].mxu1  ;;  %v13549_v22 = vadd.f32 %v10265_v30, %v4503_v21 }
 0x235   : > { %v10268_v18 = vadd.f32 %v10267_v37, %v10266_v23  ;;  %v11051_v23 = vld [vmem:[%s16124_s4 + $0x158] sm:$0xff]  }
 0x236   : > { %10547 = vmatprep.subr.bf16.mxu1 %v11051_v23 }
 0x237   : > { %v13552_v39 = vadd.f32 %v10268_v18, %v4506_v62 }
 0x238   : > { %v10157_v36 = vpop.f32.mrb[112].mxu0 }
 0x239   : > { %v10158_v38 = vpop.f32.mrb[113].mxu0  ;;  %v10269_v24 = vpop.f32.mrb[112].mxu1 }
 0x23a   : > { %v10159_v35 = vadd.f32 %v10158_v38, %v10157_v36  ;;  %v10160_v47 = vpop.f32.mrb[114].mxu0  ;;  %v10270_v55 = vpop.f32.mrb[113].mxu1  ;;  %v429_v38 = vld [vmem:[#allocation3 + $0x7c] sm:$0x8] }
 0x23b   : > { %v10161_v0 = vpop.f32.mrb[115].mxu0  ;;  %v10271_v19 = vadd.f32 %v10270_v55, %v10269_v24  ;;  %v10272_v57 = vpop.f32.mrb[114].mxu1  ;;  %v430_v30 = vsel %vm11360_vm7, 0, %v429_v38  ;;  %v11053_v38 = vld [vmem:[%s16124_s4 + $0x118] sm:$0xff]  }
 0x23c   : > { %v4511_v56 = vadd.f32 %v10159_v35, %v13318_v13  ;;  %v10162_v2 = vadd.f32 %v10161_v0, %v10160_v47  ;;  %v10273_v9 = vpop.f32.mrb[115].mxu1  ;;  %431 = vst [vmem:[#allocation3 + $0x7c] sm:$0x8] %v430_v30  ;;  %v474_v47 = vld [vmem:[#allocation3 + $0x74] sm:$0x1]  ;;  %v478_v0 = vsel %vm11355_vm6, 0, %v477_v63  ;;  %10548 = vmatpush3.bf16.msra.mxu1 %v11053_v38 }
 0x23d   : > { %v10274_v21 = vadd.f32 %v10273_v9, %v10272_v57  ;;  %479 = vst [vmem:[#allocation3 + $0x88] sm:$0x1] %v478_v0  ;;  %v435_v9 = vld [vmem:[#allocation3 + $0xa4] sm:$0x8]  ;;  %v5774_v30 = vld [vmem:[#allocation3 + $0x2c] sm:$0x8] }
 0x23e   : > { %v4514_v12 = vadd.f32 %v10162_v2, %v13336_v16  ;;  %v13556_v11 = vadd.f32 %v10271_v19, %v4511_v56  ;;  %v432_v19 = vld [vmem:[#allocation3 + $0x90] sm:$0x8]  ;;  %v5137_v63 = vld [vmem:[#allocation3 + $0x2c] sm:$0x8] }
 0x240   : > { %16646 = vst [vmem:[#allocation14_spill] sm:$0xff] %v13556_v11  ;;  %v13559_v41 = vadd.f32 %v10274_v21, %v4514_v12  ;;  %v5134_v21 = vld [vmem:[#allocation3 + $0x18] sm:$0x8] }
 0x242   : > { %v10163_v51 = vpop.f32.mrb[116].mxu0  ;;  %16647 = vst [vmem:[#allocation10_spill] sm:$0xff] %v13559_v41 }
 0x243   : > { %v10164_v61 = vpop.f32.mrb[117].mxu0  ;;  %v10275_v37 = vpop.f32.mrb[116].mxu1 }
 0x244   : > { %v10165_v13 = vadd.f32 %v10164_v61, %v10163_v51  ;;  %v10166_v36 = vpop.f32.mrb[118].mxu0  ;;  %v10276_v18 = vpop.f32.mrb[117].mxu1  ;;  %v433_v61 = vsel %vm11360_vm7, 0, %v432_v19  ;;  %v5140_v19 = vld [vmem:[#allocation3 + $0x40] sm:$0x8] }
 0x245   : > { %v10167_v4 = vpop.f32.mrb[119].mxu0  ;;  %v10277_v56 = vadd.f32 %v10276_v18, %v10275_v37  ;;  %v10278_v2 = vpop.f32.mrb[118].mxu1  ;;  %434 = vst [vmem:[#allocation3 + $0x90] sm:$0x8] %v433_v61  ;;  %v5202_v37 = vshrl.u32 %v5134_v21, 16 }
 0x246   : > { %v4519_v16 = vadd.f32 %v10165_v13, %v13349_v48  ;;  %v10168_v62 = vadd.f32 %v10167_v4, %v10166_v36  ;;  %v475_v48 = vsel %vm11355_vm6, 0, %v474_v47  ;;  %v10279_v27 = vpop.f32.mrb[119].mxu1  ;;  %v5771_v4 = vld [vmem:[#allocation3 + $0x18] sm:$0x8] }
 0x247   : > { %476 = vst [vmem:[#allocation3 + $0x74] sm:$0x1] %v475_v48  ;;  %v5820_v48 = vshrl.u32 %v5771_v4, 16  ;;  %v5780_v4 = vld [vmem:[#allocation3 + $0x54] sm:$0x8] }
 0x248   : > { %v4522_v35 = vadd.f32 %v10168_v62, %v13357_v25  ;;  %v10280_v25 = vadd.f32 %v10279_v27, %v10278_v2  ;;  %v13571_v51 = vadd.f32 %v10277_v56, %v4519_v16  ;;  %v436_v16 = vsel %vm11360_vm7, 0, %v435_v9  ;;  %v480_v2 = vld [vmem:[#allocation3 + $0x9c] sm:$0x1]  ;;  %v438_v9 = vld [vmem:[#allocation3 + $0xb8] sm:$0x8] }
 0x249   : > { %437 = vst [vmem:[#allocation3 + $0xa4] sm:$0x8] %v436_v16  ;;  %v5842_v56 = vshrl.u32 %v5774_v30, 16  ;;  %v13592_v21 = vrot.slane %v5820_v48, 11  ;;  %v439_v38 = vsel %vm11360_vm7, 0, %v438_v9 }
 0x24a   : > { %16648 = vst [vmem:[#allocation16_spill] sm:$0xff] %v13571_v51  ;;  %v13576_v62 = vadd.f32 %v10280_v25, %v4522_v35  ;;  %v5532_v35 = vld [vmem:[#allocation3 + $0x24] sm:$0x1]  ;;  %v5777_v25 = vld [vmem:[#allocation3 + $0x40] sm:$0x8] }
 0x24b   : > { %v5571_v16 = vshll.u32 %v5532_v35, 16  ;;  %v5864_v30 = vshrl.u32 %v5777_v25, 16  ;;  %440 = vst [vmem:[#allocation3 + $0xb8] sm:$0x8] %v439_v38  ;;  %v11055_v35 = vld [vmem:[%s16124_s4 + $0x1c0] sm:$0xff]  }
 0x24c   : > { %v10169_v12 = vpop.f32.mrb[120].mxu0  ;;  %16649 = vst [vmem:[#allocation18_spill] sm:$0xff] %v13576_v62  ;;  %10653 = vmatprep.subr.bf16.mxu0 %v11055_v35  ;;  %v5786_v51 = vld [vmem:[#allocation3 + $0x7c] sm:$0x8] }
 0x24d   : > { %v10170_v49 = vpop.f32.mrb[121].mxu0  ;;  %v13608_v9 = vrot.slane %v5571_v16, 5 }
 0x24e   : > { %v10171_v24 = vadd.f32 %v10170_v49, %v10169_v12  ;;  %v10172_v55 = vpop.f32.mrb[122].mxu0  ;;  %v10281_v23 = vpop.f32.mrb[120].mxu1  ;;  %v483_v12 = vld [vmem:[#allocation3 + $0xb0] sm:$0x1]  ;;  %v5224_v49 = vshrl.u32 %v5137_v63, 16 }
 0x24f   : > { %v10173_v57 = vpop.f32.mrb[123].mxu0  ;;  %v5534_v63 = vld [vmem:[#allocation3 + $0x4c] sm:$0x1] }
 0x250   : > { %v4527_v13 = vadd.f32 %v10171_v24, %v13359_v43  ;;  %v10174_v36 = vadd.f32 %v10173_v57, %v10172_v55  ;;  %v10282_v43 = vpop.f32.mrb[121].mxu1  ;;  %v481_v24 = vsel %vm11355_vm6, 0, %v480_v2  ;;  %v5533_v57 = vld [vmem:[#allocation3 + $0x38] sm:$0x1]  ;;  %v5783_v2 = vld [vmem:[#allocation3 + $0x68] sm:$0x8] }
 0x251   : > { %v10283_v0 = vadd.f32 %v10282_v43, %v10281_v23  ;;  %v10284_v18 = vpop.f32.mrb[122].mxu1  ;;  %482 = vst [vmem:[#allocation3 + $0x9c] sm:$0x1] %v481_v24  ;;  %v5143_v23 = vld [vmem:[#allocation3 + $0x54] sm:$0x8]  ;;  %v5908_v38 = vshrl.u32 %v5783_v2, 16 }
 0x252   : > { %v4530_v47 = vadd.f32 %v10174_v36, %v13361_v26  ;;  %v10285_v27 = vpop.f32.mrb[123].mxu1  ;;  %v484_v26 = vsel %vm11355_vm6, 0, %v483_v12  ;;  %v13590_v36 = vrot.slane %v5202_v37, 11  ;;  %v5585_v37 = vshll.u32 %v5533_v57, 16 }
 0x253   : > { %v10286_v55 = vadd.f32 %v10285_v27, %v10284_v18  ;;  %v13588_v61 = vadd.f32 %v10283_v0, %v4527_v13  ;;  %485 = vst [vmem:[#allocation3 + $0xb0] sm:$0x1] %v484_v26  ;;  %v13598_v13 = vrot.slane %v5842_v56, 11  ;;  %v13600_v0 = vrot.slane %v5224_v49, 11  ;;  %v5146_v27 = vld [vmem:[#allocation3 + $0x68] sm:$0x8] }
 0x254   : > { %v5246_v18 = vshrl.u32 %v5140_v19, 16  ;;  %v5886_v12 = vshrl.u32 %v5780_v4, 16  ;;  %v5268_v56 = vshrl.u32 %v5143_v23, 16  ;;  %v5599_v26 = vshll.u32 %v5534_v63, 16  ;;  %v5535_v49 = vld [vmem:[#allocation3 + $0x60] sm:$0x1] }
 0x255   : > { %16650 = vst [vmem:[#allocation15_spill] sm:$0xff] %v13588_v61  ;;  %v13596_v43 = vadd.f32 %v10286_v55, %v4530_v47  ;;  %v11057_v47 = vld [vmem:[%s16124_s4 + $0x160] sm:$0xff]   ;;  %v13610_v4 = vrot.slane %v5864_v30, 11  ;;  %v5290_v11 = vshrl.u32 %v5146_v27, 16  ;;  %v13614_v33 = vrot.slane %v5585_v37, 5 }
 0x256   : > { %10549 = vmatprep.subr.bf16.mxu1 %v11057_v47  ;;  %v13612_v62 = vrot.slane %v5246_v18, 11  ;;  %v5613_v16 = vshll.u32 %v5535_v49, 16  ;;  %v13619_v2 = vrot.slane %v5268_v56, 11  ;;  %v13621_v35 = vrot.slane %v5599_v26, 5  ;;  %v441_v27 = vld [vmem:[#allocation3 + $0xcc] sm:$0x8] }
 0x257   : > { %16651 = vst [vmem:[#allocation20_spill] sm:$0xff] %v13596_v43  ;;  %v13623_v47 = vrot.slane %v5908_v38, 11  ;;  %v5930_v18 = vshrl.u32 %v5786_v51, 16  ;;  %v5789_v51 = vld [vmem:[#allocation3 + $0x90] sm:$0x8] }
 0x258   : > { %16652 = vst [vmem:[#allocation21_spill] sm:$0xff] %v13621_v35  ;;  %v13637_v56 = vrot.slane %v5613_v16, 5  ;;  %v5152_v26 = vld [vmem:[#allocation3 + $0x90] sm:$0x8]  ;;  %v486_v38 = vld [vmem:[#allocation3 + $0xc4] sm:$0x1] }
 0x259   : > { %v10287_v48 = vpop.f32.mrb[124].mxu1  ;;  %16653 = vst [vmem:[#allocation19_spill] sm:$0xff] %v13623_v47 }
 0x25a   : > { %v10288_v24 = vpop.f32.mrb[125].mxu1  ;;  %16655 = vst [vmem:[#allocation22_spill] sm:$0xff] %v13637_v56  ;;  %v5334_v56 = vshrl.u32 %v5152_v26, 16 }
 0x25b   : > { %v10289_v19 = vadd.f32 %v10288_v24, %v10287_v48  ;;  %v10290_v57 = vpop.f32.mrb[126].mxu1  ;;  %v13616_v48 = vrot.slane %v5886_v12, 11  ;;  %v442_v12 = vsel %vm11360_vm7, 0, %v441_v27  ;;  %v487_v27 = vsel %vm11355_vm6, 0, %v486_v38  ;;  %v489_v38 = vld [vmem:[#allocation3 + $0xd8] sm:$0x1] }
 0x25c   : > { %v10291_v41 = vpop.f32.mrb[127].mxu1  ;;  %443 = vst [vmem:[#allocation3 + $0xcc] sm:$0x8] %v442_v12  ;;  %v13652_v12 = vld [vmem:[%s16123_s3] ss:$0 sm:$0xff] }
 0x25d   : > { %v10175_v25 = vpop.f32.mrb[124].mxu0  ;;  %v10292_v63 = vadd.f32 %v10291_v41, %v10290_v57  ;;  %v13629_v41 = vld [vmem:[%s16122_s2] ss:$0 sm:$0xff]  ;;  %488 = vst [vmem:[#allocation3 + $0xc4] sm:$0x1] %v487_v27 }
 0x25e   : > { %v10176_v55 = vpop.f32.mrb[125].mxu0 }
 0x25f   : > { %v10177_v43 = vadd.f32 %v10176_v55, %v10175_v25  ;;  %v10178_v61 = vpop.f32.mrb[126].mxu0  ;;  %v5149_v25 = vld [vmem:[#allocation3 + $0x7c] sm:$0x8] }
 0x260   : > { %v10179_v23 = vpop.f32.mrb[127].mxu0 }
 0x261   : > { %v4535_v30 = vadd.f32 %v10177_v43, %v13371_v53  ;;  %v10180_v24 = vadd.f32 %v10179_v23, %v10178_v61  ;;  %v13633_v53 = vrot.slane %v5290_v11, 11  ;;  %v5536_v61 = vld [vmem:[#allocation3 + $0x74] sm:$0x1]  ;;  %v5537_v43 = vld [vmem:[#allocation3 + $0x88] sm:$0x1] }
 0x262   : > { %v5792_v11 = vld [vmem:[#allocation3 + $0xa4] sm:$0x8]  ;;  %v5627_v16 = vshll.u32 %v5536_v61, 16 }
 0x263   : > { %v4538_v55 = vadd.f32 %v10180_v24, %v13373_v32  ;;  %v13631_v37 = vadd.f32 %v10289_v19, %v4535_v30  ;;  %16654 = vst [vmem:[#allocation17_spill] sm:$0xff] %v13633_v53  ;;  %v11059_v32 = vld [vmem:[%s16124_s4 + $0x120] sm:$0xff]   ;;  %v5312_v19 = vshrl.u32 %v5149_v25, 16  ;;  %v13645_v24 = vrot.slane %v5930_v18, 11 }
 0x264   : > { %10550 = vmatpush3.bf16.msra.mxu1 %v11059_v32  ;;  %v5641_v53 = vshll.u32 %v5537_v43, 16  ;;  %v5974_v32 = vshrl.u32 %v5792_v11, 16  ;;  %v5795_v11 = vld [vmem:[#allocation3 + $0xb8] sm:$0x8] }
 0x265   : > { %v10807_v49 = vpop.f32.mrb[128].mxu0  ;;  %v13642_v57 = vadd.f32 %v10292_v63, %v4538_v55  ;;  %16656 = vst [vmem:[#allocation24_spill] sm:$0xff] %v13645_v24  ;;  %v5952_v55 = vshrl.u32 %v5789_v51, 16  ;;  %v13659_v35 = vrot.slane %v5312_v19, 11  ;;  %v490_v51 = vsel %vm11355_vm6, 0, %v489_v38 }
 0x266   : > { %v4745_v23 = vadd.f32 %v10807_v49, %v13386_v58  ;;  %v4736_v30 = vpop.f32.mrb[129].mxu0  ;;  %v5155_v49 = vld [vmem:[#allocation3 + $0xa4] sm:$0x8]  ;;  %491 = vst [vmem:[#allocation3 + $0xd8] sm:$0x1] %v490_v51  ;;  %v13671_v27 = vrot.slane %v5641_v53, 5 }
 0x267   : > { %v4737_v63 = vadd.f32 %v4736_v30, %v13377_v6  ;;  %v10808_v25 = vpop.f32.mrb[130].mxu0  ;;  %v444_v6 = vld [vmem:[#allocation3 + $0xe0] sm:$0x8]  ;;  %v5539_v38 = vld [vmem:[#allocation3 + $0xb0] sm:$0x1] }
 0x268   : > { %v4871_v58 = vmul.f32 %v13629_v41, %v4745_v23  ;;  %v4748_v18 = vadd.f32 %v10808_v25, %v13391_v29  ;;  %v4739_v61 = vpop.f32.mrb[131].mxu0  ;;  %v13665_v23 = vrot.slane %v5627_v16, 5  ;;  %v5538_v29 = vld [vmem:[#allocation3 + $0x9c] sm:$0x1]  ;;  %v445_v30 = vsel %vm11360_vm7, 0, %v444_v6  ;;  %16658 = vst [vmem:[#allocation23_spill] sm:$0xff] %v13671_v27 }
 0x269   : > { %v4869_v24 = vmul.f32 %v13629_v41, %v4737_v63  ;;  %v4740_v47 = vadd.f32 %v4739_v61, %v13379_v28  ;;  %v5356_v63 = vshrl.u32 %v5155_v49, 16  ;;  %v5158_v25 = vld [vmem:[#allocation3 + $0xb8] sm:$0x8]  ;;  %446 = vst [vmem:[#allocation3 + $0xe0] sm:$0x8] %v445_v30  ;;  %v13676_v16 = vrot.slane %v5334_v56, 11 }
 0x26a   : > { %v4909_v43 = vadd.f32 %v13652_v12, %v4871_v58  ;;  %v4872_v26 = vmul.f32 %v13629_v41, %v4748_v18  ;;  %16657 = vst [vmem:[#allocation25_spill] sm:$0xff] %v13665_v23  ;;  %v13674_v18 = vrot.slane %v5952_v55, 11  ;;  %v13678_v61 = vrot.slane %v5974_v32, 11  ;;  %v5798_v53 = vld [vmem:[#allocation3 + $0xcc] sm:$0x8] }
 0x26b   : > { %v4907_v28 = vadd.f32 %v13652_v12, %v4869_v24  ;;  %v4870_v19 = vmul.f32 %v13629_v41, %v4740_v47  ;;  %v5655_v14 = vshll.u32 %v5538_v29, 16  ;;  %v5996_v47 = vshrl.u32 %v5795_v11, 16 }
 0x26c   : > { %v4910_v58 = vadd.f32 %v13652_v12, %v4872_v26  ;;  %16659 = vst [vmem:[#allocation26_spill] sm:$0xff] %v13674_v18  ;;  %16660 = vst [vmem:[#allocation28_spill] sm:$0xff] %v13678_v61  ;;  %v4941_v27 = vmax.f32 %v4909_v43, 0.0  ;;  %v5378_v26 = vshrl.u32 %v5158_v25, 16  ;;  %v5669_v61 = vshll.u32 %v5539_v38, 16 }
 0x26d   : > { %v4939_v6 = vmax.f32 %v4907_v28, 0.0  ;;  %v4908_v51 = vadd.f32 %v13652_v12, %v4870_v19  ;;  %v10811_v24 = vpop.f32.mrb[132].mxu0  ;;  %v11063_v28 = vld [vmem:[%s16124_s4 + $0x168] sm:$0xff]   ;;  %v5540_v38 = vld [vmem:[#allocation3 + $0xc4] sm:$0x1] }
 0x26e   : > { %v4942_v49 = vmax.f32 %v4910_v58, 0.0  ;;  %v4761_v30 = vadd.f32 %v10811_v24, %v13428_v46  ;;  %v4752_v23 = vpop.f32.mrb[133].mxu0  ;;  %v6018_v58 = vshrl.u32 %v5798_v53, 16  ;;  %v5161_v46 = vld [vmem:[#allocation3 + $0xcc] sm:$0x8]  ;;  %10551 = vmatprep.subr.bf16.mxu1 %v11063_v28  ;;  %v13694_v24 = vrot.slane %v5655_v14, 5 }
 0x26f   : > { %v9765_v55 = vpack.c.bf16 %v4939_v6, %v4939_v6  ;;  %v4940_v18 = vmax.f32 %v4908_v51, 0.0  ;;  %v4753_v56 = vadd.f32 %v4752_v23, %v13410_v8  ;;  %v10812_v32 = vpop.f32.mrb[134].mxu0  ;;  %v13690_v23 = vrot.slane %v5356_v63, 11  ;;  %v447_v28 = vld [vmem:[#allocation3 + $0xf4] sm:$0x8] }
 0x270   : > { %v9800_v19 = vpack.c.bf16 %v4942_v49, %v4941_v27  ;;  %v4875_v29 = vmul.f32 %v13629_v41, %v4761_v30  ;;  %v4764_v43 = vadd.f32 %v10812_v32, %v13433_v17  ;;  %v4755_v11 = vpop.f32.mrb[135].mxu0  ;;  %v13696_v17 = vrot.slane %v5996_v47, 11  ;;  %v5801_v53 = vld [vmem:[#allocation3 + $0xe0] sm:$0x8] }
 0x271   : > { %5099 = vst [vmem:[#allocation3 + $0x1c] sm:$0xf] %v9765_v55  ;;  %v9766_v25 = vpack.c.bf16 %v4940_v18, %v4940_v18  ;;  %v4873_v6 = vmul.f32 %v13629_v41, %v4753_v56  ;;  %v4756_v8 = vadd.f32 %v4755_v11, %v13415_v7  ;;  %v5164_v49 = vld [vmem:[#allocation3 + $0xe0] sm:$0x8]  ;;  %v13700_v63 = vrot.slane %v5378_v26, 11 }
 0x272   : > { %9837 = vst [vmem:[#allocation3 + $0x30] sm:$0xff] %v9800_v19   ;;  %v4913_v27 = vadd.f32 %v13652_v12, %v4875_v29  ;;  %v4876_v51 = vmul.f32 %v13629_v41, %v4764_v43  ;;  %v5400_v30 = vshrl.u32 %v5161_v46, 16  ;;  %v13703_v56 = vrot.slane %v5669_v61, 5  ;;  %v11065_v61 = vld [vmem:[%s16124_s4 + $0x128] sm:$0xff]  }
 0x273   : > { %5100 = vst [vmem:[#allocation3 + $0x20] sm:$0xf] %v9766_v25  ;;  %v4911_v18 = vadd.f32 %v13652_v12, %v4873_v6  ;;  %v4874_v7 = vmul.f32 %v13629_v41, %v4756_v8  ;;  %v13705_v32 = vrot.slane %v6018_v58, 11  ;;  %v5683_v14 = vshll.u32 %v5540_v38, 16  ;;  %10552 = vmatpush3.bf16.msra.mxu1 %v11065_v61 }
 0x274   : > { %v4914_v55 = vadd.f32 %v13652_v12, %v4876_v51  ;;  %v6040_v43 = vshrl.u32 %v5801_v53, 16  ;;  %v5422_v11 = vshrl.u32 %v5164_v49, 16  ;;  %v4945_v25 = vmax.f32 %v4913_v27, 0.0 }
 0x275   : > { %v4943_v47 = vmax.f32 %v4911_v18, 0.0  ;;  %v4912_v19 = vadd.f32 %v13652_v12, %v4874_v7  ;;  %v10815_v29 = vpop.f32.mrb[136].mxu0  ;;  %v448_v58 = vsel %vm11360_vm7, 0, %v447_v28  ;;  %v13715_v7 = vrot.slane %v5400_v30, 11  ;;  %v13723_v28 = vld [vmem:[#allocation3 + $0xd8] sm:$0x1] }
 0x276   : > { %v4946_v6 = vmax.f32 %v4914_v55, 0.0  ;;  %v4777_v26 = vadd.f32 %v10815_v29, %v13484_v45  ;;  %v4768_v8 = vpop.f32.mrb[137].mxu0  ;;  %449 = vst [vmem:[#allocation3 + $0xf4] sm:$0x8] %v448_v58  ;;  %v13721_v29 = vrot.slane %v5683_v14, 5  ;;  %16661 = vst [vmem:[#allocation29_spill] sm:$0xff] %v13723_v28 }
 0x277   : > { %v9769_v46 = vpack.c.bf16 %v4943_v47, %v4943_v47  ;;  %v4944_v38 = vmax.f32 %v4912_v19, 0.0  ;;  %v4769_v51 = vadd.f32 %v4768_v8, %v13451_v3  ;;  %v10816_v18 = vpop.f32.mrb[138].mxu0  ;;  %v13736_v8 = vrot.slane %v5422_v11, 11 }
 0x278   : > { %v9805_v27 = vpack.c.bf16 %v4946_v6, %v4945_v25  ;;  %v4879_v53 = vmul.f32 %v13629_v41, %v4777_v26  ;;  %v4780_v45 = vadd.f32 %v10816_v18, %v13486_v50  ;;  %v4771_v49 = vpop.f32.mrb[139].mxu0  ;;  %v13719_v55 = vld [vmem:[#allocation3 + $0x1c] sm:$0xf]  ;;  %v13734_v26 = vrot.slane %v6040_v43, 11 }
 0x279   : > { %5103 = vst [vmem:[#allocation3 + $0x44] sm:$0xf] %v9769_v46  ;;  %v9770_v47 = vpack.c.bf16 %v4944_v38, %v4944_v38  ;;  %v4877_v3 = vmul.f32 %v13629_v41, %v4769_v51  ;;  %v4772_v30 = vadd.f32 %v4771_v49, %v13456_v44  ;;  %v5207_v19 = vshrl.u32 %v13719_v55, 16  ;;  %v13728_v25 = vld [vmem:[#allocation3 + $0x1c] sm:$0xf] }
 0x27a   : > { %16662 = vst [vmem:[#allocation27_spill] sm:$0xff] %v13728_v25  ;;  %9838 = vst [vmem:[#allocation3 + $0x58] sm:$0xff] %v9805_v27   ;;  %v4917_v50 = vadd.f32 %v13652_v12, %v4879_v53  ;;  %v4880_v6 = vmul.f32 %v13629_v41, %v4780_v45  ;;  %v13732_v14 = vld [vmem:[#allocation3 + $0x20] sm:$0xf]  ;;  %v5210_v18 = vshll.u32 %v13719_v55, 16 }
 0x27b   : > { %5104 = vst [vmem:[#allocation3 + $0x48] sm:$0xf] %v9770_v47  ;;  %v4915_v61 = vadd.f32 %v13652_v12, %v4877_v3  ;;  %v4878_v44 = vmul.f32 %v13629_v41, %v4772_v30  ;;  %v16223_v58 = vshrl.u32 %v13732_v14, 16  ;;  %v5209_v51 = vrot.slane %v5207_v19, 7 }
 0x27c   : > { %v4918_v38 = vadd.f32 %v13652_v12, %v4880_v6  ;;  %v4949_v43 = vmax.f32 %v4917_v50, 0.0  ;;  %v9560_v6 = vcombine.low %v13719_v55, %v13732_v14  ;;  %v13752_v27 = vrot.slane %v5207_v19, 4 }
 0x27d   : > { %v4947_v53 = vmax.f32 %v4915_v61, 0.0  ;;  %v4916_v11 = vadd.f32 %v13652_v12, %v4878_v44  ;;  %v10819_v45 = vpop.f32.mrb[140].mxu0  ;;  %v5218_v30 = vrot.slane %v16223_v58, 7  ;;  %v13757_v58 = vld [vmem:[#allocation3 + $0x20] sm:$0xf] }
 0x27e   : > { %v4950_v47 = vmax.f32 %v4918_v38, 0.0  ;;  %v4793_v3 = vadd.f32 %v10819_v45, %v13507_v34  ;;  %v4784_v46 = vpop.f32.mrb[141].mxu0  ;;  %8196 = vmatprep.mubr.bf16.mxu1 %v9560_v6  ;;  %v5212_v45 = vor.u32 %v5210_v18, %v5209_v51  ;;  %16663 = vst [vmem:[#allocation30_spill] sm:$0xff] %v13757_v58  ;;  %v16225_v6 = vshll.u32 %v13728_v25, 16 }
 0x27f   : > { %v9773_v1 = vpack.c.bf16 %v4947_v53, %v4947_v53  ;;  %v4948_v28 = vmax.f32 %v4916_v11, 0.0  ;;  %v4785_v50 = vadd.f32 %v4784_v46, %v13492_v52  ;;  %v10820_v61 = vpop.f32.mrb[142].mxu0  ;;  %v5214_v11 = vrot.slane %v5209_v51, 4  ;;  %v11069_v51 = vld [vmem:[%s16124_s4 + $0x170] sm:$0xff]  }
 0x280   : > { %v9810_v44 = vpack.c.bf16 %v4950_v47, %v4949_v43  ;;  %v4883_v49 = vmul.f32 %v13629_v41, %v4793_v3  ;;  %v4796_v34 = vadd.f32 %v10820_v61, %v13512_v5  ;;  %v4787_v38 = vpop.f32.mrb[143].mxu0  ;;  %v16664_v43 = vshll.u32 %v13732_v14, 16  ;;  %10553 = vmatprep.subr.bf16.mxu1 %v11069_v51 }
 0x281   : > { %5107 = vst [vmem:[#allocation3 + $0x6c] sm:$0xf] %v9773_v1  ;;  %v9774_v55 = vpack.c.bf16 %v4948_v28, %v4948_v28  ;;  %v4881_v53 = vmul.f32 %v13629_v41, %v4785_v50  ;;  %v4788_v19 = vadd.f32 %v4787_v38, %v13497_v20  ;;  %v16665_v5 = vshrl.u32 %v13728_v25, 16 }
 0x282   : > { %9839 = vst [vmem:[#allocation3 + $0x80] sm:$0xff] %v9810_v44   ;;  %v4921_v52 = vadd.f32 %v13652_v12, %v4883_v49  ;;  %v4884_v46 = vmul.f32 %v13629_v41, %v4796_v34  ;;  %v5221_v47 = vor.u32 %v16664_v43, %v5218_v30  ;;  %v16224_v20 = vshrl.u32 %v13757_v58, 16  ;;  %v13780_v44 = vld [vmem:[#allocation3 + $0x30] sm:$0xf] }
 0x283   : > { %v5827_v3 = vrot.slane %v16665_v5, 7  ;;  %5108 = vst [vmem:[#allocation3 + $0x70] sm:$0xf] %v9774_v55  ;;  %v4919_v1 = vadd.f32 %v13652_v12, %v4881_v53  ;;  %v4882_v28 = vmul.f32 %v13629_v41, %v4788_v19  ;;  %v5213_v30 = vsel %vm11373_vm8, %v13590_v36, %v5212_v45 }
 0x284   : > { %v4953_v49 = vmax.f32 %v4921_v52, 0.0  ;;  %v4922_v50 = vadd.f32 %v13652_v12, %v4884_v46  ;;  %v5222_v61 = vsel %vm11373_vm8, %v5214_v11, %v5221_v47  ;;  %v5836_v46 = vrot.slane %v16224_v20, 7  ;;  %v13789_v11 = vld [vmem:[#allocation3 + $0x34] sm:$0xf] }
 0x285   : > { %v4951_v34 = vmax.f32 %v4919_v1, 0.0  ;;  %v4920_v38 = vadd.f32 %v13652_v12, %v4882_v28  ;;  %v9544_v55 = vcombine.low %v5213_v30, %v5222_v61  ;;  %v5830_v53 = vor.u32 %v16225_v6, %v5827_v3  ;;  %v10823_v19 = vpop.f32.mrb[144].mxu0 }
 0x286   : > { %v4954_v52 = vmax.f32 %v4922_v50, 0.0  ;;  %v16226_v36 = vshll.u32 %v13757_v58, 16  ;;  %v4809_v45 = vadd.f32 %v10823_v19, %v13526_v42  ;;  %v4800_v43 = vpop.f32.mrb[145].mxu0  ;;  %v13791_v47 = vrot.slane %v5210_v18, 5 }
 0x287   : > { %v9777_v5 = vpack.c.bf16 %v4951_v34, %v4951_v34  ;;  %v4952_v1 = vmax.f32 %v4920_v38, 0.0  ;;  %8197 = vmatmul.mubr.bf16.gmra.mrb[132].mxu1 %v9544_v55  ;;  %v16228_v28 = vshrl.u32 %v13780_v44, 16  ;;  %v10824_v30 = vpop.f32.mrb[146].mxu0  ;;  %v5832_v50 = vrot.slane %v5827_v3, 4 }
 0x288   : > { %v9815_v51 = vpack.c.bf16 %v4954_v52, %v4953_v49  ;;  %v5839_v61 = vor.u32 %v16226_v36, %v5836_v46  ;;  %v4887_v20 = vmul.f32 %v13629_v41, %v4809_v45  ;;  %v4803_v6 = vpop.f32.mrb[147].mxu0  ;;  %v16666_v42 = vshrl.u32 %v13732_v14, 16  ;;  %v13805_v49 = vld [vmem:[#allocation3 + $0x30] sm:$0xf]  ;;  %v13815_v45 = vld [vmem:[#allocation3 + $0x34] sm:$0xf] }
 0x289   : > { %5111 = vst [vmem:[#allocation3 + $0x94] sm:$0xf] %v9777_v5  ;;  %v9778_v18 = vpack.c.bf16 %v4952_v1, %v4952_v1  ;;  %v5831_v34 = vsel %vm11373_vm8, %v13592_v21, %v5830_v53  ;;  %v16227_v38 = vshrl.u32 %v13789_v11, 16  ;;  %16667 = vst [vmem:[#allocation32_spill] sm:$0xff] %v13805_v49  ;;  %v5231_v52 = vrot.slane %v16228_v28, 7 }
 0x28a   : > { %v13799_v19 = vrot.slane %v16666_v42, 4  ;;  %9840 = vst [vmem:[#allocation3 + $0xa8] sm:$0xff] %v9815_v51   ;;  %v5840_v3 = vsel %vm11373_vm8, %v5832_v50, %v5839_v61  ;;  %v13810_v55 = vadd.f32 %v13652_v12, %v4887_v20  ;;  %v16233_v46 = vshll.u32 %v13780_v44, 16  ;;  %16668 = vst [vmem:[#allocation33_spill] sm:$0xff] %v13815_v45  ;;  %v11056_v20 = vld [vmem:[%s16124_s4 + $0x180] sm:$0xff]  }
 0x28b   : > { %5112 = vst [vmem:[#allocation3 + $0x98] sm:$0xf] %v9778_v18  ;;  %v9591_v21 = vcombine.low %v5831_v34, %v5840_v3  ;;  %v5240_v53 = vrot.slane %v16227_v38, 7  ;;  %v16231_v5 = vshll.u32 %v13789_v11, 16  ;;  %v9561_v1 = vcombine.low %v13780_v44, %v13789_v11  ;;  %v11061_v18 = vld [vmem:[%s16124_s4 + $0x1c8] sm:$0xff]  }
 0x28c   : > { %v4957_v51 = vmax.f32 %v13810_v55, 0.0  ;;  %v4801_v50 = vadd.f32 %v4800_v43, %v13518_v15  ;;  %v16230_v61 = vshrl.u32 %v13805_v49, 16  ;;  %v16232_v42 = vshll.u32 %v13805_v49, 16  ;;  %v13878_v49 = vld [vmem:[#allocation3 + $0x48] sm:$0xf] }
 0x28d   : > { %8349 = vmatprep.mubr.bf16.mxu0 %v9591_v21  ;;  %8204 = vmatprep.mubr.bf16.mxu1 %v9561_v1  ;;  %v16229_v34 = vshrl.u32 %v13815_v45, 16  ;;  %v4812_v36 = vadd.f32 %v10824_v30, %v13530_v60  ;;  %v4804_v55 = vadd.f32 %v4803_v6, %v13522_v54  ;;  %v10827_v38 = vpop.f32.mrb[148].mxu0  ;;  %v5234_v21 = vor.u32 %v16233_v46, %v5231_v52  ;;  %v11062_v30 = vld [vmem:[%s16124_s4 + $0x188] sm:$0xff]  }
 0x28e   : > { %8350 = vmatmul.mubr.bf16.vlgmr.msra.gmra.mrb[160].mxu0 %v13503_v40  ;;  %v4885_v15 = vmul.f32 %v13629_v41, %v4801_v50  ;;  %v5849_v43 = vrot.slane %v16230_v61, 7  ;;  %v5236_v1 = vrot.slane %v5231_v52, 4  ;;  %v13842_v28 = vpop.f32.mrb[149].mxu0  ;;  %v5243_v40 = vor.u32 %v16231_v5, %v5240_v53 }
 0x28f   : > { %v5858_v3 = vrot.slane %v16229_v34, 7  ;;  %v4888_v60 = vmul.f32 %v13629_v41, %v4812_v36  ;;  %v4886_v54 = vmul.f32 %v13629_v41, %v4804_v55  ;;  %v13850_v6 = vpop.f32.mrb[150].mxu0  ;;  %10654 = vmatpush3.bf16.msra.mxu0 %v11056_v20  ;;  %v5235_v36 = vsel %vm11373_vm8, %v13600_v0, %v5234_v21  ;;  %v13861_v55 = vld [vmem:[#allocation3 + $0x44] sm:$0xf] }
 0x290   : > { %v4923_v52 = vadd.f32 %v13652_v12, %v4885_v15  ;;  %v5852_v50 = vor.u32 %v16232_v42, %v5849_v43  ;;  %v5854_v34 = vrot.slane %v5849_v43, 4  ;;  %v13863_v53 = vpop.f32.mrb[151].mxu0  ;;  %10655 = vmatprep.subr.bf16.mxu0 %v11061_v18  ;;  %v11067_v20 = vld [vmem:[%s16124_s4 + $0x1d0] sm:$0xff]   ;;  %v16669_v61 = vshll.u32 %v13815_v45, 16 }
 0x291   : > { %v4926_v5 = vadd.f32 %v13652_v12, %v4888_v60  ;;  %v4924_v43 = vadd.f32 %v13652_v12, %v4886_v54  ;;  %v5244_v42 = vsel %vm11373_vm8, %v5236_v1, %v5243_v40  ;;  %v4825_v46 = vadd.f32 %v10827_v38, %v13549_v22 }
 0x292   : > { %v5861_v15 = vor.u32 %v16669_v61, %v5858_v3  ;;  %v4955_v0 = vmax.f32 %v4923_v52, 0.0  ;;  %v5853_v21 = vsel %vm11373_vm8, %v13598_v13, %v5852_v50  ;;  %v9545_v18 = vcombine.low %v5235_v36, %v5244_v42  ;;  %v11071_v61 = vld [vmem:[%s16124_s4 + $0x130] sm:$0xff]  }
 0x293   : > { %v4958_v60 = vmax.f32 %v4926_v5, 0.0  ;;  %v4956_v54 = vmax.f32 %v4924_v43, 0.0  ;;  %v5251_v1 = vshrl.u32 %v13861_v55, 16  ;;  %10656 = vmatpush3.bf16.msra.mxu0 %v11062_v30  ;;  %v11068_v13 = vld [vmem:[%s16124_s4 + $0x190] sm:$0xff]   ;;  %v4891_v38 = vmul.f32 %v13629_v41, %v4825_v46  ;;  %10554 = vmatpush3.bf16.msra.mxu1 %v11071_v61 }
 0x294   : > { %v5862_v3 = vsel %vm11373_vm8, %v5854_v34, %v5861_v15  ;;  %v9781_v42 = vpack.c.bf16 %v4955_v0, %v4955_v0  ;;  %8205 = vmatmul.mubr.bf16.gmra.mrb[136].mxu1 %v9545_v18  ;;  %v5254_v40 = vshll.u32 %v13861_v55, 16  ;;  %10657 = vmatprep.subr.bf16.mxu0 %v11067_v20  ;;  %v16670_v52 = vshrl.u32 %v13780_v44, 16  ;;  %v13896_v36 = vld [vmem:[#allocation3 + $0x44] sm:$0xf]  ;;  %v13913_v18 = vld [vmem:[#allocation3 + $0x48] sm:$0xf] }
 0x295   : > { %v9592_v22 = vcombine.low %v5853_v21, %v5862_v3  ;;  %v9820_v5 = vpack.c.bf16 %v4958_v60, %v4957_v51  ;;  %v9782_v50 = vpack.c.bf16 %v4956_v54, %v4956_v54  ;;  %v16237_v30 = vshrl.u32 %v13878_v49, 16  ;;  %v13898_v15 = vpop.f32.mrb[152].mxu0 }
 0x296   : > { %v13893_v34 = vrot.slane %v16670_v52, 4  ;;  %v16671_v43 = vshll.u32 %v13780_v44, 16  ;;  %v16672_v46 = vshrl.u32 %v13789_v11, 16  ;;  %5115 = vst [vmem:[#allocation3 + $0xbc] sm:$0xf] %v9781_v42  ;;  %v13909_v51 = vadd.f32 %v13652_v12, %v4891_v38  ;;  %v13915_v3 = vpop.f32.mrb[153].mxu0 }
 0x297   : > { %8357 = vmatprep.mubr.bf16.mxu0 %v9592_v22  ;;  %v13911_v21 = vrot.slane %v5251_v1, 7  ;;  %9841 = vst [vmem:[#allocation3 + $0xd0] sm:$0xff] %v9820_v5   ;;  %5116 = vst [vmem:[#allocation3 + $0xc0] sm:$0xf] %v9782_v50  ;;  %v13918_v61 = vrot.slane %v5251_v1, 4  ;;  %v9562_v60 = vcombine.low %v13861_v55, %v13878_v49  ;;  %v5563_v54 = vor.u32 %v13791_v47, %v13752_v27  ;;  %v13924_v42 = vpop.f32.mrb[154].mxu0 }
 0x298   : > { %v13902_v0 = vrot.slane %v16671_v43, 5  ;;  %v13906_v20 = vrot.slane %v16672_v46, 4  ;;  %10658 = vmatpush3.bf16.msra.mxu0 %v11068_v13  ;;  %v13926_v22 = vrot.slane %v5254_v40, 5  ;;  %v16673_v38 = vshll.u32 %v13732_v14, 16  ;;  %v13933_v50 = vpop.f32.mrb[155].mxu0  ;;  %v11073_v46 = vld [vmem:[%s16124_s4 + $0x1d8] sm:$0xff]  }
 0x299   : > { %v4817_v5 = vadd.f32 %v13842_v28, %v13538_v10  ;;  %v16236_v1 = vshrl.u32 %v13896_v36, 16  ;;  %v5262_v55 = vrot.slane %v16237_v30, 7  ;;  %8212 = vmatprep.mubr.bf16.mxu1 %v9562_v60  ;;  %v5564_v27 = vrot.slane %v5563_v54, 4  ;;  %v11074_v60 = vld [vmem:[%s16124_s4 + $0x198] sm:$0xff]   ;;  %10659 = vmatprep.subr.bf16.mxu0 %v11073_v46 }
 0x29a   : > { %v5565_v52 = vrot.slane %v16673_v38, 5  ;;  %v16286_v47 = vshll.u32 %v13896_v36, 16  ;;  %v16242_v13 = vshrl.u32 %v13913_v18, 16  ;;  %v4828_v28 = vadd.f32 %v13850_v6, %v13552_v39  ;;  %v16674_v6 = vld [vmem:[#allocation11_spill] sm:$0xff] }
 0x29b   : > { %v4889_v14 = vmul.f32 %v13629_v41, %v4817_v5  ;;  %v5871_v10 = vrot.slane %v16236_v1, 7  ;;  %v16246_v39 = vshll.u32 %v13913_v18, 16  ;;  %v4820_v5 = vadd.f32 %v13863_v53, %v16674_v6  ;;  %v16676_v6 = vld [vmem:[#allocation16_spill] sm:$0xff] }
 0x29c   : > { %v5568_v43 = vor.u32 %v13799_v19, %v5565_v52  ;;  %v11075_v19 = vld [vmem:[%s16124_s4 + $0x178] sm:$0xff]   ;;  %v5566_v54 = vsel %vm11408_vm11, %v5564_v27, %v5565_v52  ;;  %v5880_v38 = vrot.slane %v16242_v13, 7  ;;  %v5256_v45 = vor.u32 %v5254_v40, %v13911_v21  ;;  %10660 = vmatpush3.bf16.msra.mxu0 %v11074_v60 }
 0x29d   : > { %v4927_v30 = vadd.f32 %v13652_v12, %v4889_v14  ;;  %v5874_v44 = vor.u32 %v16286_v47, %v5871_v10  ;;  %10555 = vmatprep.subr.bf16.mxu1 %v11075_v19  ;;  %v5876_v58 = vrot.slane %v5871_v10, 4  ;;  %v4892_v27 = vmul.f32 %v13629_v41, %v4828_v28  ;;  %v13969_v25 = vpop.f32.mrb[156].mxu0  ;;  %v13978_v10 = vld [vmem:[#allocation3 + $0x58] sm:$0xf] }
 0x29e   : > { %v5569_v1 = vrot.slane %v5568_v43, 4  ;;  %v5883_v52 = vor.u32 %v16246_v39, %v5880_v38  ;;  %v4890_v13 = vmul.f32 %v13629_v41, %v4820_v5  ;;  %v5258_v14 = vrot.slane %v13911_v21, 4  ;;  %v13980_v46 = vpop.f32.mrb[157].mxu0 }
 0x29f   : > { %v4959_v43 = vmax.f32 %v4927_v30, 0.0  ;;  %v5875_v40 = vsel %vm11373_vm8, %v13610_v4, %v5874_v44  ;;  %v4930_v60 = vadd.f32 %v13652_v12, %v4892_v27  ;;  %v13988_v30 = vpop.f32.mrb[158].mxu0  ;;  %v16675_v21 = vshll.u32 %v13878_v49, 16 }
 0x2a0   : > { %v5574_v53 = vsel %vm11408_vm11, %v5569_v1, %v13608_v9  ;;  %v5884_v19 = vsel %vm11373_vm8, %v5876_v58, %v5883_v52  ;;  %v4928_v38 = vadd.f32 %v13652_v12, %v4890_v13  ;;  %v13986_v9 = vld [vmem:[#allocation3 + $0x5c] sm:$0xf]  ;;  %v4841_v5 = vadd.f32 %v13898_v15, %v16676_v6 }
 0x2a1   : > { %v9576_v28 = vcombine.low %v5566_v54, %v5574_v53  ;;  %v9785_v1 = vpack.c.bf16 %v4959_v43, %v4959_v43  ;;  %v9593_v4 = vcombine.low %v5875_v40, %v5884_v19  ;;  %v5265_v44 = vor.u32 %v16675_v21, %v5262_v55  ;;  %v13994_v54 = vpop.f32.mrb[159].mxu0  ;;  %v14019_v21 = vld [vmem:[#allocation3 + $0x5c] sm:$0xf] }
 0x2a2   : > { %v4961_v58 = vmax.f32 %v13909_v51, 0.0  ;;  %v4962_v52 = vmax.f32 %v4930_v60, 0.0  ;;  %v4960_v27 = vmax.f32 %v4928_v38, 0.0  ;;  %v5273_v13 = vshrl.u32 %v13978_v10, 16  ;;  %v11077_v51 = vld [vmem:[%s16124_s4 + $0x138] sm:$0xff]  }
 0x2a3   : > { %8358 = vmatmul.mubr.bf16.gmra.mrb[164].mxu0 %v9576_v28  ;;  %5119 = vst [vmem:[#allocation3 + $0xe4] sm:$0xf] %v9785_v1  ;;  %v5257_v53 = vsel %vm11373_vm8, %v13612_v62, %v5256_v45  ;;  %v5266_v55 = vsel %vm11373_vm8, %v5258_v14, %v5265_v44  ;;  %v4895_v15 = vmul.f32 %v13629_v41, %v4841_v5  ;;  %v5282_v43 = vshrl.u32 %v13986_v9, 16  ;;  %v14012_v1 = vld [vmem:[#allocation3 + $0x58] sm:$0xf] }
 0x2a4   : > { %8365 = vmatprep.mubr.bf16.mxu0 %v9593_v4  ;;  %v16677_v40 = vshrl.u32 %v13878_v49, 16  ;;  %v9825_v19 = vpack.c.bf16 %v4962_v52, %v4961_v58  ;;  %v9786_v60 = vpack.c.bf16 %v4960_v27, %v4960_v27  ;;  %v9546_v38 = vcombine.low %v5257_v53, %v5266_v55  ;;  %10556 = vmatpush3.bf16.msra.mxu1 %v11077_v51  ;;  %v16679_v53 = vld [vmem:[#allocation14_spill] sm:$0xff] }
 0x2a5   : > { %v4933_v62 = vadd.f32 %v13652_v12, %v4895_v15  ;;  %v5275_v45 = vrot.slane %v5273_v13, 7  ;;  %v5276_v14 = vshll.u32 %v13978_v10, 16  ;;  %v5285_v4 = vshll.u32 %v13986_v9, 16 }
 0x2a6   : > { %v14010_v28 = vrot.slane %v16677_v40, 4  ;;  %9842 = vst [vmem:[#allocation3 + $0xf8] sm:$0xff] %v9825_v19   ;;  %5120 = vst [vmem:[#allocation3 + $0xe8] sm:$0xf] %v9786_v60  ;;  %8213 = vmatmul.mubr.bf16.gmra.mrb[140].mxu1 %v9546_v38  ;;  %v5284_v44 = vrot.slane %v5282_v43, 7  ;;  %v9563_v6 = vcombine.low %v13978_v10, %v13986_v9  ;;  %v5577_v5 = vor.u32 %v13902_v0, %v13893_v34  ;;  %v16680_v0 = vld [vmem:[#allocation18_spill] sm:$0xff] }
 0x2a7   : > { %v16678_v58 = vshll.u32 %v13789_v11, 16  ;;  %v4965_v27 = vmax.f32 %v4933_v62, 0.0  ;;  %v4833_v55 = vadd.f32 %v13915_v3, %v16679_v53  ;;  %v16245_v15 = vshrl.u32 %v14012_v1, 16  ;;  %v16681_v62 = vld [vmem:[#allocation10_spill] sm:$0xff] }
 0x2a8   : > { %v16283_v51 = vshll.u32 %v14012_v1, 16  ;;  %8220 = vmatprep.mubr.bf16.mxu1 %v9563_v6  ;;  %v5578_v40 = vrot.slane %v5577_v5, 4  ;;  %v16281_v60 = vshrl.u32 %v14019_v21, 16  ;;  %v16282_v38 = vshll.u32 %v14019_v21, 16 }
 0x2a9   : > { %v5579_v52 = vrot.slane %v16678_v58, 5  ;;  %v4893_v34 = vmul.f32 %v13629_v41, %v4833_v55  ;;  %v5893_v11 = vrot.slane %v16245_v15, 7  ;;  %v4844_v3 = vadd.f32 %v13924_v42, %v16680_v0 }
 0x2aa   : > { %v4836_v58 = vadd.f32 %v13933_v50, %v16681_v62  ;;  %v5278_v53 = vor.u32 %v5276_v14, %v5275_v45  ;;  %v14069_v62 = vld [vmem:[#allocation3 + $0x6c] sm:$0xf] }
 0x2ab   : > { %v5582_v19 = vor.u32 %v13906_v20, %v5579_v52  ;;  %v5580_v6 = vsel %vm11408_vm11, %v5578_v40, %v5579_v52  ;;  %v5902_v20 = vrot.slane %v16281_v60, 7  ;;  %v4931_v55 = vadd.f32 %v13652_v12, %v4893_v34  ;;  %v11078_v34 = vld [vmem:[%s16124_s4 + $0x1e0] sm:$0xff]  }
 0x2ac   : > { %v5896_v15 = vor.u32 %v16283_v51, %v5893_v11  ;;  %v5898_v39 = vrot.slane %v5893_v11, 4  ;;  %v4896_v42 = vmul.f32 %v13629_v41, %v4844_v3  ;;  %v4894_v40 = vmul.f32 %v13629_v41, %v4836_v58  ;;  %10661 = vmatprep.subr.bf16.mxu0 %v11078_v34 }
 0x2ad   : > { %v5583_v5 = vrot.slane %v5582_v19, 4  ;;  %v5905_v52 = vor.u32 %v16282_v38, %v5902_v20  ;;  %v5279_v19 = vsel %vm11373_vm8, %v13619_v2, %v5278_v53  ;;  %v4963_v0 = vmax.f32 %v4931_v55, 0.0  ;;  %v14076_v53 = vld [vmem:[#allocation3 + $0x70] sm:$0xf] }
 0x2ae   : > { %v5897_v3 = vsel %vm11373_vm8, %v13616_v48, %v5896_v15  ;;  %v5280_v2 = vrot.slane %v5275_v45, 4  ;;  %v5287_v20 = vor.u32 %v5285_v4, %v5284_v44  ;;  %v4857_v15 = vadd.f32 %v13969_v25, %v13631_v37 }
 0x2af   : > { %v5588_v50 = vsel %vm11408_vm11, %v5583_v5, %v13614_v33  ;;  %v4934_v33 = vadd.f32 %v13652_v12, %v4896_v42  ;;  %v5906_v58 = vsel %vm11373_vm8, %v5898_v39, %v5905_v52  ;;  %v4932_v5 = vadd.f32 %v13652_v12, %v4894_v40 }
 0x2b0   : > { %v9577_v11 = vcombine.low %v5580_v6, %v5588_v50  ;;  %v9789_v6 = vpack.c.bf16 %v4963_v0, %v4963_v0  ;;  %v9594_v55 = vcombine.low %v5897_v3, %v5906_v58  ;;  %v14082_v42 = vrot.slane %v5273_v13, 4  ;;  %v14100_v3 = vld [vmem:[#allocation3 + $0x70] sm:$0xf] }
 0x2b1   : > { %v4966_v48 = vmax.f32 %v4934_v33, 0.0  ;;  %v4964_v39 = vmax.f32 %v4932_v5, 0.0  ;;  %v5288_v45 = vsel %vm11373_vm8, %v5280_v2, %v5287_v20  ;;  %v5295_v44 = vshrl.u32 %v14069_v62, 16  ;;  %v11080_v33 = vld [vmem:[%s16124_s4 + $0x1e8] sm:$0xff]  }
 0x2b2   : > { %8366 = vmatmul.mubr.bf16.gmra.mrb[168].mxu0 %v9577_v11  ;;  %5123 = vst [vmem:[#allocation3 + $0x10c] sm:$0xf] %v9789_v6  ;;  %v9547_v52 = vcombine.low %v5279_v19, %v5288_v45  ;;  %v4899_v40 = vmul.f32 %v13629_v41, %v4857_v15  ;;  %v5304_v34 = vshrl.u32 %v14076_v53, 16  ;;  %v14089_v11 = vld [vmem:[#allocation3 + $0x6c] sm:$0xf]  ;;  %v14093_v37 = vrot.slane %v5276_v14, 5 }
 0x2b3   : > { %8373 = vmatprep.mubr.bf16.mxu0 %v9594_v55  ;;  %v9830_v50 = vpack.c.bf16 %v4966_v48, %v4965_v27  ;;  %v14097_v25 = vrot.slane %v5282_v43, 4  ;;  %v9790_v13 = vpack.c.bf16 %v4964_v39, %v4964_v39  ;;  %v5298_v0 = vshll.u32 %v14069_v62, 16  ;;  %v11079_v43 = vld [vmem:[%s16124_s4 + $0x1a0] sm:$0xff]   ;;  %v16683_v6 = vld [vmem:[#allocation15_spill] sm:$0xff] }
 0x2b4   : > { %8221 = vmatmul.mubr.bf16.gmra.mrb[144].mxu1 %v9547_v52  ;;  %v14103_v27 = vadd.f32 %v13652_v12, %v4899_v40  ;;  %v14105_v19 = vrot.slane %v5295_v44, 7  ;;  %v5307_v10 = vshll.u32 %v14076_v53, 16  ;;  %v14108_v14 = vrot.slane %v5295_v44, 4  ;;  %v11082_v48 = vld [vmem:[%s16124_s4 + $0x200] sm:$0xff]   ;;  %10662 = vmatpush3.bf16.msra.mxu0 %v11079_v43 }
 0x2b5   : > { %9843 = vst [vmem:[#allocation3 + $0x120] sm:$0xff] %v9830_v50   ;;  %5124 = vst [vmem:[#allocation3 + $0x110] sm:$0xf] %v9790_v13  ;;  %v9564_v58 = vcombine.low %v14069_v62, %v14076_v53  ;;  %v5591_v5 = vor.u32 %v13926_v22, %v13918_v61  ;;  %v16682_v2 = vshll.u32 %v13878_v49, 16  ;;  %v4849_v55 = vadd.f32 %v13980_v46, %v16683_v6  ;;  %v11081_v49 = vld [vmem:[%s16124_s4 + $0x1a8] sm:$0xff]   ;;  %v16684_v13 = vld [vmem:[#allocation20_spill] sm:$0xff] }
 0x2b6   : > { %v5306_v15 = vrot.slane %v5304_v34, 7  ;;  %v16280_v39 = vshrl.u32 %v14089_v11, 16  ;;  %v16279_v62 = vshll.u32 %v14089_v11, 16  ;;  %v16254_v45 = vshrl.u32 %v14100_v3, 16  ;;  %10663 = vmatprep.subr.bf16.mxu0 %v11080_v33  ;;  %10837 = vmatprep.subr.bf16.mxu1 %v11082_v48 }
 0x2b7   : > { %v5593_v20 = vrot.slane %v16682_v2, 5  ;;  %8228 = vmatprep.mubr.bf16.mxu1 %v9564_v58  ;;  %v5592_v61 = vrot.slane %v5591_v5, 4  ;;  %v4897_v46 = vmul.f32 %v13629_v41, %v4849_v55  ;;  %v16263_v44 = vshll.u32 %v14100_v3, 16  ;;  %v11083_v2 = vld [vmem:[%s16124_s4 + $0x1f0] sm:$0xff]   ;;  %v16685_v55 = vld [vmem:[#allocation21_spill] sm:$0xff] }
 0x2b8   : > { %v5915_v50 = vrot.slane %v16280_v39, 7  ;;  %v5924_v52 = vrot.slane %v16254_v45, 7  ;;  %v4860_v40 = vadd.f32 %v13988_v30, %v13642_v57  ;;  %v4852_v43 = vadd.f32 %v13994_v54, %v16684_v13  ;;  %10664 = vmatpush3.bf16.msra.mxu0 %v11081_v49  ;;  %v16686_v13 = vld [vmem:[#allocation19_spill] sm:$0xff]  ;;  %v14295_v45 = vld [vmem:[#allocation3 + $0xa8] sm:$0xf] }
 0x2b9   : > { %v5596_v22 = vor.u32 %v14010_v28, %v5593_v20  ;;  %v14146_v58 = vrot.slane %v5298_v0, 5  ;;  %v5594_v28 = vsel %vm11408_vm11, %v5592_v61, %v5593_v20  ;;  %v4935_v33 = vadd.f32 %v13652_v12, %v4897_v46  ;;  %v14164_v46 = vld [vmem:[#allocation3 + $0x80] sm:$0xf]  ;;  %10665 = vmatprep.subr.bf16.mxu0 %v11083_v2  ;;  %v453_v39 = vld [vmem:[#allocation3 + $0x11c] sm:$0x8] }
 0x2ba   : > { %v5918_v6 = vor.u32 %v16279_v62, %v5915_v50  ;;  %v5920_v57 = vrot.slane %v5915_v50, 4  ;;  %v5927_v30 = vor.u32 %v16263_v44, %v5924_v52  ;;  %v4900_v54 = vmul.f32 %v13629_v41, %v4860_v40  ;;  %v11084_v50 = vld [vmem:[%s16124_s4 + $0x1b0] sm:$0xff]   ;;  %v14398_v44 = vld [vmem:[#allocation3 + $0xd0] sm:$0xf] }
 0x2bb   : > { %v5597_v5 = vrot.slane %v5596_v22, 4  ;;  %v4967_v48 = vmax.f32 %v4935_v33, 0.0  ;;  %v4898_v61 = vmul.f32 %v13629_v41, %v4852_v43  ;;  %v5300_v22 = vor.u32 %v5298_v0, %v14105_v19  ;;  %v14175_v41 = vld [vmem:[#allocation3 + $0x84] sm:$0xf]  ;;  %v11086_v0 = vld [vmem:[%s16124_s4 + $0x1f8] sm:$0xff]  }
 0x2bc   : > { %v5919_v49 = vsel %vm11373_vm8, %v16686_v13, %v5918_v6  ;;  %v5928_v40 = vsel %vm11373_vm8, %v5920_v57, %v5927_v30  ;;  %v4969_v43 = vmax.f32 %v14103_v27, 0.0  ;;  %v5302_v6 = vrot.slane %v14105_v19, 4  ;;  %10666 = vmatpush3.bf16.msra.mxu0 %v11084_v50  ;;  %v11087_v19 = vld [vmem:[%s16124_s4 + $0x1b8] sm:$0xff]   ;;  %v14606_v60 = vld [vmem:[#allocation3 + $0x120] sm:$0xf] }
 0x2bd   : > { %v5602_v20 = vsel %vm11408_vm11, %v5597_v5, %v16685_v55  ;;  %v4938_v5 = vadd.f32 %v13652_v12, %v4900_v54  ;;  %v9793_v33 = vpack.c.bf16 %v4967_v48, %v4967_v48  ;;  %v9595_v2 = vcombine.low %v5919_v49, %v5928_v40  ;;  %v14202_v49 = vld [vmem:[#allocation3 + $0x84] sm:$0xf]  ;;  %10667 = vmatprep.subr.bf16.mxu0 %v11086_v0 }
 0x2be   : > { %v9578_v52 = vcombine.low %v5594_v28, %v5602_v20  ;;  %v4936_v28 = vadd.f32 %v13652_v12, %v4898_v61  ;;  %v5309_v57 = vor.u32 %v5307_v10, %v5306_v15  ;;  %v5317_v30 = vshrl.u32 %v14164_v46, 16  ;;  %v16687_v20 = vld [vmem:[#allocation17_spill] sm:$0xff]  ;;  %v14194_v61 = vld [vmem:[#allocation3 + $0x80] sm:$0xf]  ;;  %16700 = vst [vmem:[#allocation36_spill] sm:$0xff] %v14606_v60 }
 0x2bf   : > { %v4970_v55 = vmax.f32 %v4938_v5, 0.0  ;;  %v14188_v54 = vrot.slane %v5304_v34, 4  ;;  %5127 = vst [vmem:[#allocation3 + $0x134] sm:$0xf] %v9793_v33  ;;  %v5301_v12 = vsel %vm11373_vm8, %v16687_v20, %v5300_v22  ;;  %v5326_v48 = vshrl.u32 %v14175_v41, 16 }
 0x2c0   : > { %8374 = vmatmul.mubr.bf16.gmra.mrb[172].mxu0 %v9578_v52  ;;  %v4968_v27 = vmax.f32 %v4936_v28, 0.0  ;;  %v5310_v34 = vsel %vm11373_vm8, %v5302_v6, %v5309_v57  ;;  %v5319_v52 = vrot.slane %v5317_v30, 7  ;;  %v5320_v13 = vshll.u32 %v14164_v46, 16 }
 0x2c1   : > { %8381 = vmatprep.mubr.bf16.mxu0 %v9595_v2  ;;  %v9835_v15 = vpack.c.bf16 %v4970_v55, %v4969_v43  ;;  %v9548_v40 = vcombine.low %v5301_v12, %v5310_v34  ;;  %v5328_v5 = vrot.slane %v5326_v48, 7  ;;  %v5329_v33 = vshll.u32 %v14175_v41, 16  ;;  %v5153_v55 = vld [vmem:[#allocation3 + $0x94] sm:$0xf]  ;;  %10668 = vmatpush3.bf16.msra.mxu0 %v11087_v19 }
 0x2c2   : > { %v9794_v22 = vpack.c.bf16 %v4968_v27, %v4968_v27  ;;  %v9565_v50 = vcombine.low %v14164_v46, %v14175_v41  ;;  %v5605_v43 = vor.u32 %v14093_v37, %v14082_v42  ;;  %v5607_v2 = vrot.slane %v5285_v4, 5 }
 0x2c3   : > { %9844 = vst [vmem:[#allocation3 + $0x148] sm:$0xff] %v9835_v15   ;;  %v16253_v28 = vshrl.u32 %v14194_v61, 16  ;;  %8229 = vmatmul.mubr.bf16.gmra.mrb[148].mxu1 %v9548_v40  ;;  %v16249_v0 = vshll.u32 %v14194_v61, 16  ;;  %v16247_v6 = vshrl.u32 %v14202_v49, 16  ;;  %v16248_v57 = vshll.u32 %v14202_v49, 16 }
 0x2c4   : > { %5128 = vst [vmem:[#allocation3 + $0x138] sm:$0xf] %v9794_v22  ;;  %v5322_v27 = vor.u32 %v5320_v13, %v5319_v52  ;;  %8236 = vmatprep.mubr.bf16.mxu1 %v9565_v50  ;;  %v5606_v46 = vrot.slane %v5605_v43, 4  ;;  %v5610_v42 = vor.u32 %v14097_v25, %v5607_v2  ;;  %v5324_v4 = vrot.slane %v5319_v52, 4  ;;  %v14225_v15 = vld [vmem:[#allocation3 + $0x98] sm:$0xf] }
 0x2c5   : > { %v5937_v9 = vrot.slane %v16253_v28, 7  ;;  %v5946_v37 = vrot.slane %v16247_v6, 7  ;;  %v5331_v12 = vor.u32 %v5329_v33, %v5328_v5  ;;  %v5339_v19 = vshrl.u32 %v5153_v55, 16  ;;  %v16688_v43 = vld [vmem:[#allocation22_spill] sm:$0xff] }
 0x2c6   : > { %v5323_v20 = vsel %vm11373_vm8, %v13659_v35, %v5322_v27  ;;  %v5608_v25 = vsel %vm11408_vm11, %v5606_v46, %v5607_v2  ;;  %v5611_v34 = vrot.slane %v5610_v42, 4  ;;  %v14231_v40 = vrot.slane %v5317_v30, 4  ;;  %v16689_v2 = vld [vmem:[#allocation24_spill] sm:$0xff] }
 0x2c7   : > { %v5940_v52 = vor.u32 %v16249_v0, %v5937_v9  ;;  %v5942_v22 = vrot.slane %v5937_v9, 4  ;;  %v14233_v50 = vrot.slane %v5320_v13, 5  ;;  %v5949_v35 = vor.u32 %v16248_v57, %v5946_v37  ;;  %v14246_v9 = vld [vmem:[#allocation3 + $0x94] sm:$0xf] }
 0x2c8   : > { %v5332_v5 = vsel %vm11373_vm8, %v5324_v4, %v5331_v12  ;;  %v5616_v27 = vsel %vm11408_vm11, %v5611_v34, %v16688_v43  ;;  %v5341_v42 = vrot.slane %v5339_v19, 7  ;;  %v5348_v30 = vshrl.u32 %v14225_v15, 16  ;;  %v14252_v12 = vld [vmem:[#allocation3 + $0x98] sm:$0xf] }
 0x2c9   : > { %v5941_v46 = vsel %vm11373_vm8, %v16689_v2, %v5940_v52  ;;  %v14248_v13 = vrot.slane %v5326_v48, 4  ;;  %v9579_v6 = vcombine.low %v5608_v25, %v5616_v27  ;;  %v5950_v37 = vsel %vm11373_vm8, %v5942_v22, %v5949_v35 }
 0x2ca   : > { %v9549_v4 = vcombine.low %v5323_v20, %v5332_v5  ;;  %v9596_v57 = vcombine.low %v5941_v46, %v5950_v37  ;;  %v5342_v34 = vshll.u32 %v5153_v55, 16  ;;  %v5350_v43 = vrot.slane %v5348_v30, 7  ;;  %v14261_v20 = vld [vmem:[#allocation3 + $0xa8] sm:$0xf] }
 0x2cb   : > { %v5351_v0 = vshll.u32 %v14225_v15, 16  ;;  %8382 = vmatmul.mubr.bf16.gmra.mrb[176].mxu0 %v9579_v6  ;;  %v9566_v52 = vcombine.low %v5153_v55, %v14225_v15  ;;  %v5619_v48 = vor.u32 %v14146_v58, %v14108_v14  ;;  %v5621_v25 = vrot.slane %v5307_v10, 5 }
 0x2cc   : > { %8237 = vmatmul.mubr.bf16.gmra.mrb[152].mxu1 %v9549_v4  ;;  %v16251_v22 = vshrl.u32 %v14246_v9, 16  ;;  %8389 = vmatprep.mubr.bf16.mxu0 %v9596_v57  ;;  %v14263_v35 = vrot.slane %v5339_v19, 4  ;;  %v16252_v5 = vshll.u32 %v14246_v9, 16  ;;  %v16250_v6 = vshrl.u32 %v14252_v12, 16  ;;  %v14275_v19 = vld [vmem:[#allocation3 + $0xac] sm:$0xf] }
 0x2cd   : > { %v5344_v27 = vor.u32 %v5342_v34, %v5341_v42  ;;  %8244 = vmatprep.mubr.bf16.mxu1 %v9566_v52  ;;  %v5620_v55 = vrot.slane %v5619_v48, 4  ;;  %v5624_v2 = vor.u32 %v14188_v54, %v5621_v25  ;;  %v16257_v10 = vshll.u32 %v14252_v12, 16 }
 0x2ce   : > { %v5959_v53 = vrot.slane %v16251_v22, 7  ;;  %v5968_v14 = vrot.slane %v16250_v6, 7  ;;  %v5346_v58 = vrot.slane %v5341_v42, 4  ;;  %v5353_v57 = vor.u32 %v5351_v0, %v5350_v43 }
 0x2cf   : > { %v5361_v46 = vshrl.u32 %v14261_v20, 16  ;;  %v14278_v37 = vrot.slane %v5342_v34, 5  ;;  %v5625_v4 = vrot.slane %v5624_v2, 4  ;;  %v5345_v52 = vsel %vm11373_vm8, %v13676_v16, %v5344_v27  ;;  %v16690_v34 = vld [vmem:[#allocation25_spill] sm:$0xff]  ;;  %v16691_v27 = vld [vmem:[#allocation26_spill] sm:$0xff] }
 0x2d0   : > { %v5962_v54 = vor.u32 %v16252_v5, %v5959_v53  ;;  %v5622_v42 = vsel %vm11408_vm11, %v5620_v55, %v5621_v25  ;;  %v5964_v48 = vrot.slane %v5959_v53, 4  ;;  %v5971_v43 = vor.u32 %v16257_v10, %v5968_v14  ;;  %v14304_v14 = vld [vmem:[#allocation3 + $0xac] sm:$0xf] }
 0x2d1   : > { %v5354_v6 = vsel %vm11373_vm8, %v5346_v58, %v5353_v57  ;;  %v5630_v2 = vsel %vm11408_vm11, %v5625_v4, %v16690_v34  ;;  %v5363_v5 = vrot.slane %v5361_v46, 7  ;;  %v5370_v28 = vshrl.u32 %v14275_v19, 16  ;;  %v16693_v10 = vld [vmem:[#allocation28_spill] sm:$0xff] }
 0x2d2   : > { %v9550_v22 = vcombine.low %v5345_v52, %v5354_v6  ;;  %v14297_v16 = vrot.slane %v5348_v30, 4  ;;  %v9580_v25 = vcombine.low %v5622_v42, %v5630_v2  ;;  %v5963_v55 = vsel %vm11373_vm8, %v16691_v27, %v5962_v54 }
 0x2d3   : > { %v5972_v53 = vsel %vm11373_vm8, %v5964_v48, %v5971_v43  ;;  %v5364_v6 = vshll.u32 %v14261_v20, 16  ;;  %v5372_v57 = vrot.slane %v5370_v28, 7  ;;  %v5373_v4 = vshll.u32 %v14275_v19, 16  ;;  %v5159_v48 = vld [vmem:[#allocation3 + $0xbc] sm:$0xf] }
 0x2d4   : > { %v9597_v58 = vcombine.low %v5963_v55, %v5972_v53  ;;  %8245 = vmatmul.mubr.bf16.gmra.mrb[156].mxu1 %v9550_v22  ;;  %8390 = vmatmul.mubr.bf16.gmra.mrb[180].mxu0 %v9580_v25  ;;  %v9567_v30 = vcombine.low %v14261_v20, %v14275_v19  ;;  %v5633_v52 = vor.u32 %v14233_v50, %v14231_v40  ;;  %v5635_v54 = vrot.slane %v5329_v33, 5  ;;  %v14328_v55 = vld [vmem:[#allocation3 + $0xc0] sm:$0xf] }
 0x2d5   : > { %v16256_v42 = vshrl.u32 %v14295_v45, 16  ;;  %v16259_v22 = vshll.u32 %v14295_v45, 16  ;;  %v16255_v43 = vshrl.u32 %v14304_v14, 16  ;;  %v16258_v34 = vshll.u32 %v14304_v14, 16 }
 0x2d6   : > { %8397 = vmatprep.mubr.bf16.mxu0 %v9597_v58  ;;  %v5366_v2 = vor.u32 %v5364_v6, %v5363_v5  ;;  %8252 = vmatprep.mubr.bf16.mxu1 %v9567_v30  ;;  %v5634_v25 = vrot.slane %v5633_v52, 4  ;;  %v5638_v20 = vor.u32 %v14248_v13, %v5635_v54  ;;  %v5368_v41 = vrot.slane %v5363_v5, 4 }
 0x2d7   : > { %v5981_v40 = vrot.slane %v16256_v42, 7  ;;  %v5990_v33 = vrot.slane %v16255_v43, 7  ;;  %v5375_v27 = vor.u32 %v5373_v4, %v5372_v57  ;;  %v5383_v53 = vshrl.u32 %v5159_v48, 16 }
 0x2d8   : > { %v5367_v50 = vsel %vm11373_vm8, %v13690_v23, %v5366_v2  ;;  %v5636_v13 = vsel %vm11408_vm11, %v5634_v25, %v5635_v54  ;;  %v5639_v58 = vrot.slane %v5638_v20, 4  ;;  %v14334_v52 = vrot.slane %v5361_v46, 4  ;;  %v16692_v2 = vld [vmem:[#allocation23_spill] sm:$0xff]  ;;  %v14347_v46 = vld [vmem:[#allocation3 + $0xbc] sm:$0xf] }
 0x2d9   : > { %v5984_v5 = vor.u32 %v16259_v22, %v5981_v40  ;;  %v5986_v30 = vrot.slane %v5981_v40, 4  ;;  %v5993_v43 = vor.u32 %v16258_v34, %v5990_v33  ;;  %v5376_v23 = vsel %vm11373_vm8, %v5368_v41, %v5375_v27  ;;  %v14355_v27 = vld [vmem:[#allocation3 + $0xc0] sm:$0xf] }
 0x2da   : > { %v5385_v57 = vrot.slane %v5383_v53, 7  ;;  %v5644_v42 = vsel %vm11408_vm11, %v5639_v58, %v16692_v2  ;;  %v9551_v25 = vcombine.low %v5367_v50, %v5376_v23  ;;  %v5392_v20 = vshrl.u32 %v14328_v55, 16 }
 0x2db   : > { %v5985_v54 = vsel %vm11373_vm8, %v16693_v10, %v5984_v5  ;;  %v14349_v40 = vrot.slane %v5364_v6, 5  ;;  %v14351_v33 = vrot.slane %v5370_v28, 4  ;;  %v9581_v34 = vcombine.low %v5636_v13, %v5644_v42 }
 0x2dc   : > { %v5994_v41 = vsel %vm11373_vm8, %v5986_v30, %v5993_v43  ;;  %8253 = vmatmul.mubr.bf16.gmra.mrb[160].mxu1 %v9551_v25  ;;  %v5386_v2 = vshll.u32 %v5159_v48, 16  ;;  %v5394_v22 = vrot.slane %v5392_v20, 7  ;;  %v5395_v10 = vshll.u32 %v14328_v55, 16  ;;  %v14364_v43 = vld [vmem:[#allocation3 + $0xd0] sm:$0xf] }
 0x2dd   : > { %v9598_v58 = vcombine.low %v5985_v54, %v5994_v41  ;;  %8398 = vmatmul.mubr.bf16.gmra.mrb[184].mxu0 %v9581_v34  ;;  %v9568_v50 = vcombine.low %v5159_v48, %v14328_v55  ;;  %v5647_v6 = vor.u32 %v14278_v37, %v14263_v35  ;;  %v5649_v28 = vrot.slane %v5351_v0, 5  ;;  %v14378_v54 = vld [vmem:[#allocation3 + $0xd4] sm:$0xf] }
 0x2de   : > { %v16262_v42 = vshrl.u32 %v14347_v46, 16  ;;  %v14366_v13 = vrot.slane %v5383_v53, 4  ;;  %v16261_v5 = vshll.u32 %v14347_v46, 16  ;;  %v16260_v30 = vshrl.u32 %v14355_v27, 16 }
 0x2df   : > { %8405 = vmatprep.mubr.bf16.mxu0 %v9598_v58  ;;  %v5388_v34 = vor.u32 %v5386_v2, %v5385_v57  ;;  %8260 = vmatprep.mubr.bf16.mxu1 %v9568_v50  ;;  %v5648_v48 = vrot.slane %v5647_v6, 4  ;;  %v5652_v23 = vor.u32 %v14297_v16, %v5649_v28  ;;  %v16277_v0 = vshll.u32 %v14355_v27, 16 }
 0x2e0   : > { %v6003_v15 = vrot.slane %v16262_v42, 7  ;;  %v6012_v35 = vrot.slane %v16260_v30, 7  ;;  %v5390_v37 = vrot.slane %v5385_v57, 4  ;;  %v5397_v53 = vor.u32 %v5395_v10, %v5394_v22 }
 0x2e1   : > { %v5405_v25 = vshrl.u32 %v14364_v43, 16  ;;  %v14381_v41 = vrot.slane %v5386_v2, 5  ;;  %v5653_v58 = vrot.slane %v5652_v23, 4  ;;  %v5389_v50 = vsel %vm11373_vm8, %v13700_v63, %v5388_v34 }
 0x2e2   : > { %v6006_v16 = vor.u32 %v16261_v5, %v6003_v15  ;;  %v5650_v57 = vsel %vm11408_vm11, %v5648_v48, %v5649_v28  ;;  %v6008_v6 = vrot.slane %v6003_v15, 4  ;;  %v6015_v22 = vor.u32 %v16277_v0, %v6012_v35  ;;  %v14407_v15 = vld [vmem:[#allocation3 + $0xd4] sm:$0xf] }
 0x2e3   : > { %v5398_v30 = vsel %vm11373_vm8, %v5390_v37, %v5397_v53  ;;  %v5658_v2 = vsel %vm11408_vm11, %v5653_v58, %v13694_v24  ;;  %v5407_v5 = vrot.slane %v5405_v25, 7  ;;  %v5414_v42 = vshrl.u32 %v14378_v54, 16 }
 0x2e4   : > { %v9552_v23 = vcombine.low %v5389_v50, %v5398_v30  ;;  %v14400_v63 = vrot.slane %v5392_v20, 4  ;;  %v9582_v28 = vcombine.low %v5650_v57, %v5658_v2  ;;  %v6007_v34 = vsel %vm11373_vm8, %v13696_v17, %v6006_v16  ;;  %v5165_v16 = vld [vmem:[#allocation3 + $0xe4] sm:$0xf] }
 0x2e5   : > { %v6016_v48 = vsel %vm11373_vm8, %v6008_v6, %v6015_v22  ;;  %v5408_v24 = vshll.u32 %v14364_v43, 16  ;;  %v5416_v30 = vrot.slane %v5414_v42, 7  ;;  %v5417_v37 = vshll.u32 %v14378_v54, 16 }
 0x2e6   : > { %v9599_v35 = vcombine.low %v6007_v34, %v6016_v48  ;;  %8261 = vmatmul.mubr.bf16.gmra.mrb[164].mxu1 %v9552_v23  ;;  %8406 = vmatmul.mubr.bf16.gmra.mrb[188].mxu0 %v9582_v28  ;;  %v9569_v20 = vcombine.low %v14364_v43, %v14378_v54  ;;  %v5661_v53 = vor.u32 %v14349_v40, %v14334_v52  ;;  %v5663_v17 = vrot.slane %v5373_v4, 5  ;;  %v14431_v28 = vld [vmem:[#allocation3 + $0xe8] sm:$0xf] }
 0x2e7   : > { %v16275_v58 = vshrl.u32 %v14398_v44, 16  ;;  %v16270_v50 = vshll.u32 %v14398_v44, 16  ;;  %v16264_v57 = vshrl.u32 %v14407_v15, 16  ;;  %v16265_v6 = vshll.u32 %v14407_v15, 16 }
 0x2e8   : > { %8413 = vmatprep.mubr.bf16.mxu0 %v9599_v35  ;;  %v5410_v22 = vor.u32 %v5408_v24, %v5407_v5  ;;  %8268 = vmatprep.mubr.bf16.mxu1 %v9569_v20  ;;  %v5662_v2 = vrot.slane %v5661_v53, 4  ;;  %v5666_v43 = vor.u32 %v14351_v33, %v5663_v17  ;;  %v5412_v19 = vrot.slane %v5407_v5, 4 }
 0x2e9   : > { %v6025_v52 = vrot.slane %v16275_v58, 7  ;;  %v6034_v4 = vrot.slane %v16264_v57, 7  ;;  %v5419_v23 = vor.u32 %v5417_v37, %v5416_v30  ;;  %v5427_v34 = vshrl.u32 %v5165_v16, 16  ;;  %v14554_v58 = vld [vmem:[#allocation3 + $0x10c] sm:$0xf] }
 0x2ea   : > { %v5411_v40 = vsel %vm11373_vm8, %v13715_v7, %v5410_v22  ;;  %v5664_v33 = vsel %vm11408_vm11, %v5662_v2, %v5663_v17  ;;  %v5667_v48 = vrot.slane %v5666_v43, 4  ;;  %v14437_v20 = vrot.slane %v5405_v25, 4  ;;  %v14450_v25 = vld [vmem:[#allocation3 + $0xe4] sm:$0xf]  ;;  %16696 = vst [vmem:[#allocation31_spill] sm:$0xff] %v14554_v58 }
 0x2eb   : > { %v6028_v5 = vor.u32 %v16270_v50, %v6025_v52  ;;  %v6030_v35 = vrot.slane %v6025_v52, 4  ;;  %v6037_v53 = vor.u32 %v16265_v6, %v6034_v4  ;;  %v5420_v7 = vsel %vm11373_vm8, %v5412_v19, %v5419_v23  ;;  %v14458_v23 = vld [vmem:[#allocation3 + $0xe8] sm:$0xf] }
 0x2ec   : > { %v5429_v30 = vrot.slane %v5427_v34, 7  ;;  %v5672_v22 = vsel %vm11408_vm11, %v5667_v48, %v13703_v56  ;;  %v9553_v2 = vcombine.low %v5411_v40, %v5420_v7  ;;  %v5436_v43 = vshrl.u32 %v14431_v28, 16 }
 0x2ed   : > { %v6029_v17 = vsel %vm11373_vm8, %v13705_v32, %v6028_v5  ;;  %v14452_v52 = vrot.slane %v5408_v24, 5  ;;  %v14454_v4 = vrot.slane %v5414_v42, 4  ;;  %v9583_v57 = vcombine.low %v5664_v33, %v5672_v22  ;;  %v14467_v5 = vld [vmem:[#allocation3 + $0xf8] sm:$0xf] }
 0x2ee   : > { %v6038_v19 = vsel %vm11373_vm8, %v6030_v35, %v6037_v53  ;;  %8269 = vmatmul.mubr.bf16.gmra.mrb[168].mxu1 %v9553_v2  ;;  %v5430_v48 = vshll.u32 %v5165_v16, 16  ;;  %v5438_v6 = vrot.slane %v5436_v43, 7  ;;  %v5439_v32 = vshll.u32 %v14431_v28, 16 }
 0x2ef   : > { %v9600_v56 = vcombine.low %v6029_v17, %v6038_v19  ;;  %8414 = vmatmul.mubr.bf16.gmra.mrb[192].mxu0 %v9583_v57  ;;  %v9570_v40 = vcombine.low %v5165_v16, %v14431_v28  ;;  %v5675_v24 = vor.u32 %v14381_v41, %v14366_v13  ;;  %v5677_v42 = vrot.slane %v5395_v10, 5  ;;  %v14481_v17 = vld [vmem:[#allocation3 + $0xfc] sm:$0xf] }
 0x2f0   : > { %v16268_v33 = vshrl.u32 %v14450_v25, 16  ;;  %v14469_v35 = vrot.slane %v5427_v34, 4  ;;  %v16267_v53 = vshll.u32 %v14450_v25, 16  ;;  %v16266_v7 = vshrl.u32 %v14458_v23, 16 }
 0x2f1   : > { %8421 = vmatprep.mubr.bf16.mxu0 %v9600_v56  ;;  %v5432_v57 = vor.u32 %v5430_v48, %v5429_v30  ;;  %8276 = vmatprep.mubr.bf16.mxu1 %v9570_v40  ;;  %v5676_v16 = vrot.slane %v5675_v24, 4  ;;  %v5680_v22 = vor.u32 %v14400_v63, %v5677_v42  ;;  %v16269_v10 = vshll.u32 %v14458_v23, 16 }
 0x2f2   : > { %v6047_v55 = vrot.slane %v16268_v33, 7  ;;  %v6056_v13 = vrot.slane %v16266_v7, 7  ;;  %v5434_v41 = vrot.slane %v5429_v30, 4  ;;  %v5441_v34 = vor.u32 %v5439_v32, %v5438_v6 }
 0x2f3   : > { %v5449_v2 = vshrl.u32 %v14467_v5, 16  ;;  %v14484_v19 = vrot.slane %v5430_v48, 5  ;;  %v14486_v56 = vrot.slane %v5436_v43, 4  ;;  %v5681_v63 = vrot.slane %v5680_v22, 4 }
 0x2f4   : > { %v6050_v40 = vor.u32 %v16267_v53, %v6047_v55  ;;  %v6052_v24 = vrot.slane %v6047_v55, 4  ;;  %v6059_v7 = vor.u32 %v16269_v10, %v6056_v13  ;;  %v5433_v6 = vsel %vm11373_vm8, %v13736_v8, %v5432_v57  ;;  %v5804_v53 = vld [vmem:[#allocation3 + $0xf4] sm:$0x8] }
 0x2f5   : > { %v5442_v30 = vsel %vm11373_vm8, %v5434_v41, %v5441_v34  ;;  %v5678_v48 = vsel %vm11408_vm11, %v5676_v16, %v5677_v42  ;;  %v5686_v43 = vsel %vm11408_vm11, %v5681_v63, %v13721_v29  ;;  %v5458_v55 = vshrl.u32 %v14481_v17, 16  ;;  %v14508_v41 = vld [vmem:[#allocation3 + $0xf8] sm:$0xf]  ;;  %v14510_v42 = vld [vmem:[#allocation3 + $0xfc] sm:$0xf] }
 0x2f6   : > { %v9554_v22 = vcombine.low %v5433_v6, %v5442_v30  ;;  %v9584_v33 = vcombine.low %v5678_v48, %v5686_v43  ;;  %v6051_v13 = vsel %vm11373_vm8, %v13734_v26, %v6050_v40  ;;  %v6060_v8 = vsel %vm11373_vm8, %v6052_v24, %v6059_v7  ;;  %v5167_v6 = vld [vmem:[#allocation3 + $0xf4] sm:$0x8] }
 0x2f7   : > { %v5451_v57 = vrot.slane %v5449_v2, 7  ;;  %v9601_v16 = vcombine.low %v6051_v13, %v6060_v8  ;;  %v5452_v29 = vshll.u32 %v14467_v5, 16  ;;  %v5460_v34 = vrot.slane %v5458_v55, 7  ;;  %v16694_v24 = vld [vmem:[#allocation29_spill] sm:$0xff] }
 0x2f8   : > { %8277 = vmatmul.mubr.bf16.gmra.mrb[172].mxu1 %v9554_v22  ;;  %v5461_v63 = vshll.u32 %v14481_v17, 16  ;;  %8422 = vmatmul.mubr.bf16.gmra.mrb[196].mxu0 %v9584_v33  ;;  %v9571_v26 = vcombine.low %v14467_v5, %v14481_v17  ;;  %v5689_v7 = vor.u32 %v14452_v52, %v14437_v20  ;;  %v5691_v40 = vrot.slane %v5417_v37, 5  ;;  %v14641_v17 = vpop.f32.mrb[128].mxu1 }
 0x2f9   : > { %v16695_v30 = vshll.u32 %v16694_v24, 16  ;;  %8429 = vmatprep.mubr.bf16.mxu0 %v9601_v16  ;;  %v6062_v43 = vshrl.u32 %v5804_v53, 16  ;;  %v16271_v22 = vshrl.u32 %v14508_v41, 16  ;;  %v16274_v13 = vshll.u32 %v14508_v41, 16  ;;  %v5171_v24 = vld [vmem:[#allocation3 + $0x10c] sm:$0xf] }
 0x2fa   : > { %v16272_v33 = vshrl.u32 %v14510_v42, 16  ;;  %8284 = vmatprep.mubr.bf16.mxu1 %v9571_v26  ;;  %v5690_v8 = vrot.slane %v5689_v7, 4  ;;  %v5694_v5 = vor.u32 %v14454_v4, %v5691_v40  ;;  %v16273_v20 = vshll.u32 %v14510_v42, 16 }
 0x2fb   : > { %v5699_v48 = vrot.slane %v16695_v30, 5  ;;  %v5444_v52 = vshrl.u32 %v5167_v6, 16  ;;  %v9522_v54 = vrot.slane %v6062_v43, 11  ;;  %v6069_v37 = vrot.slane %v16271_v22, 7  ;;  %v14539_v22 = vld [vmem:[#allocation3 + $0x110] sm:$0xf] }
 0x2fc   : > { %v6078_v53 = vrot.slane %v16272_v33, 7  ;;  %v5454_v16 = vor.u32 %v5452_v29, %v5451_v57  ;;  %v5692_v30 = vsel %vm11408_vm11, %v5690_v8, %v5691_v40  ;;  %v5695_v10 = vrot.slane %v5694_v5, 4 }
 0x2fd   : > { %v9507_v26 = vrot.slane %v5444_v52, 11  ;;  %v5456_v7 = vrot.slane %v5451_v57, 4  ;;  %v6072_v4 = vor.u32 %v16274_v13, %v6069_v37  ;;  %v6074_v50 = vrot.slane %v6069_v37, 4 }
 0x2fe   : > { %v6081_v6 = vor.u32 %v16273_v20, %v6078_v53  ;;  %v5463_v43 = vor.u32 %v5461_v63, %v5460_v34  ;;  %v14541_v33 = vrot.slane %v5449_v2, 4  ;;  %v5700_v40 = vsel %vm11408_vm11, %v5695_v10, %v5699_v48  ;;  %v492_v53 = vld [vmem:[#allocation3 + $0xec] sm:$0x1]  ;;  %v450_v48 = vld [vmem:[#allocation3 + $0x108] sm:$0x8] }
 0x2ff   : > { %v5455_v57 = vsel %vm11373_vm8, %v9507_v26, %v5454_v16  ;;  %v5471_v8 = vshrl.u32 %v5171_v24, 16  ;;  %v9585_v5 = vcombine.low %v5692_v30, %v5700_v40  ;;  %v6073_v52 = vsel %vm11373_vm8, %v9522_v54, %v6072_v4  ;;  %v14561_v26 = vld [vmem:[#allocation3 + $0x110] sm:$0xf] }
 0x300   : > { %v6082_v37 = vsel %vm11373_vm8, %v6074_v50, %v6081_v6  ;;  %v5464_v34 = vsel %vm11373_vm8, %v5456_v7, %v5463_v43  ;;  %v5474_v13 = vshll.u32 %v5171_v24, 16  ;;  %v5480_v10 = vshrl.u32 %v14539_v22, 16  ;;  %16697 = vst [vmem:[#allocation34_spill] sm:$0xff] %v14561_v26 }
 0x301   : > { %v9602_v2 = vcombine.low %v6073_v52, %v6082_v37  ;;  %v9555_v20 = vcombine.low %v5455_v57, %v5464_v34  ;;  %v14556_v16 = vrot.slane %v5452_v29, 5  ;;  %v14558_v30 = vrot.slane %v5458_v55, 4  ;;  %8430 = vmatmul.mubr.bf16.gmra.mrb[200].mxu0 %v9585_v5  ;;  %v14577_v5 = vld [vmem:[#allocation3 + $0x120] sm:$0xf] }
 0x302   : > { %v5473_v54 = vrot.slane %v5471_v8, 7  ;;  %v9572_v50 = vcombine.low %v5171_v24, %v14539_v22  ;;  %v5482_v7 = vrot.slane %v5480_v10, 7  ;;  %v16287_v4 = vshll.u32 %v14539_v22, 16 }
 0x303   : > { %8437 = vmatprep.mubr.bf16.mxu0 %v9602_v2  ;;  %8285 = vmatmul.mubr.bf16.gmra.mrb[176].mxu1 %v9555_v20  ;;  %v493_v43 = vsel %vm11355_vm6, 0, %v492_v53  ;;  %v5703_v29 = vor.u32 %v14484_v19, %v14469_v35  ;;  %v14568_v40 = vrot.slane %v5471_v8, 4  ;;  %v14572_v55 = vrot.slane %v5439_v32, 5  ;;  %v14591_v53 = vld [vmem:[#allocation3 + $0x124] sm:$0xf] }
 0x304   : > { %8292 = vmatprep.mubr.bf16.mxu1 %v9572_v50  ;;  %494 = vst [vmem:[#allocation3 + $0xec] sm:$0x1] %v493_v43  ;;  %v451_v20 = vsel %vm11360_vm7, 0, %v450_v48  ;;  %v16276_v57 = vshrl.u32 %v14554_v58, 16  ;;  %v14579_v52 = vrot.slane %v5474_v13, 5  ;;  %v14581_v37 = vrot.slane %v5480_v10, 4 }
 0x305   : > { %v5704_v35 = vrot.slane %v5703_v29, 4  ;;  %452 = vst [vmem:[#allocation3 + $0x108] sm:$0x8] %v451_v20  ;;  %v16278_v19 = vshrl.u32 %v14561_v26, 16  ;;  %v5708_v28 = vor.u32 %v14486_v56, %v14572_v55  ;;  %v16285_v8 = vshll.u32 %v14554_v58, 16 }
 0x306   : > { %v6091_v32 = vrot.slane %v16276_v57, 7  ;;  %v5485_v34 = vor.u32 %v16287_v4, %v5482_v7  ;;  %v16284_v10 = vshll.u32 %v14561_v26, 16  ;;  %v5493_v48 = vshrl.u32 %v14577_v5, 16  ;;  %v495_v56 = vld [vmem:[#allocation3 + $0x100] sm:$0x1] }
 0x307   : > { %v6100_v2 = vrot.slane %v16278_v19, 7  ;;  %v5496_v50 = vshll.u32 %v14577_v5, 16  ;;  %v5706_v43 = vsel %vm11408_vm11, %v5704_v35, %v14572_v55  ;;  %v5709_v29 = vrot.slane %v5708_v28, 4  ;;  %v14615_v55 = vld [vmem:[#allocation3 + $0x124] sm:$0xf] }
 0x308   : > { %v5476_v20 = vor.u32 %v5474_v13, %v5473_v54  ;;  %v5478_v57 = vrot.slane %v5473_v54, 4  ;;  %v6094_v7 = vor.u32 %v16285_v8, %v6091_v32  ;;  %v6096_v0 = vrot.slane %v6091_v32, 4  ;;  %16701 = vst [vmem:[#allocation37_spill] sm:$0xff] %v14615_v55 }
 0x309   : > { %v6103_v19 = vor.u32 %v16284_v10, %v6100_v2  ;;  %v5502_v62 = vshrl.u32 %v14591_v53, 16  ;;  %v14610_v51 = vrot.slane %v5493_v48, 7  ;;  %v496_v54 = vsel %vm11355_vm6, 0, %v495_v56 }
 0x30a   : > { %v5486_v38 = vsel %vm11373_vm8, %v5478_v57, %v5485_v34  ;;  %v14617_v32 = vrot.slane %v5493_v48, 4  ;;  %v14619_v2 = vrot.slane %v5496_v50, 5  ;;  %497 = vst [vmem:[#allocation3 + $0x100] sm:$0x1] %v496_v54  ;;  %v5717_v10 = vor.u32 %v14556_v16, %v14541_v33 }
 0x30b   : > { %v5542_v35 = vld [vmem:[#allocation3 + $0xec] sm:$0x1]  ;;  %v5504_v28 = vrot.slane %v5502_v62, 7  ;;  %v6104_v8 = vsel %vm11373_vm8, %v6096_v0, %v6103_v19  ;;  %v9573_v56 = vcombine.low %v14577_v5, %v14591_v53  ;;  %v14629_v4 = vrot.slane %v5461_v63, 5 }
 0x30c   : > { %v5711_v57 = vshll.u32 %v5542_v35, 16  ;;  %v5807_v34 = vld [vmem:[#allocation3 + $0x108] sm:$0x8]  ;;  %v14631_v26 = vrot.slane %v5502_v62, 4  ;;  %v454_v33 = vsel %vm11360_vm7, 0, %v453_v39  ;;  %v16290_v0 = vshrl.u32 %v14606_v60, 16 }
 0x30d   : > { %v5170_v47 = vld [vmem:[#allocation3 + $0x108] sm:$0x8]  ;;  %v6084_v48 = vshrl.u32 %v5807_v34, 16  ;;  %v5722_v54 = vor.u32 %v14558_v30, %v14629_v4  ;;  %455 = vst [vmem:[#allocation3 + $0x11c] sm:$0x8] %v454_v33  ;;  %v14639_v5 = vor.u32 %v5496_v50, %v14610_v51  ;;  %v16293_v62 = vshrl.u32 %v14615_v55, 16 }
 0x30e   : > { %v5466_v13 = vshrl.u32 %v5170_v47, 16  ;;  %v5713_v16 = vrot.slane %v5711_v57, 5  ;;  %v5718_v47 = vrot.slane %v5717_v10, 4  ;;  %v6113_v35 = vrot.slane %v16290_v0, 7  ;;  %v498_v57 = vld [vmem:[#allocation3 + $0x114] sm:$0x1] }
 0x30f   : > { %v9523_v63 = vrot.slane %v6084_v48, 11  ;;  %v6122_v10 = vrot.slane %v16293_v62, 7  ;;  %v14656_v48 = vld [vmem:[#allocation3 + $0x134] sm:$0xf]  ;;  %v5723_v30 = vrot.slane %v5722_v54, 4 }
 0x310   : > { %v9508_v19 = vrot.slane %v5466_v13, 11  ;;  %v5714_v39 = vsel %vm11408_vm11, %v5709_v29, %v5713_v16  ;;  %v14658_v29 = vld [vmem:[#allocation3 + $0x138] sm:$0xf]  ;;  %v6118_v58 = vrot.slane %v6113_v35, 4  ;;  %v5515_v62 = vshrl.u32 %v14656_v48, 16 }
 0x311   : > { %v9586_v34 = vcombine.low %v5706_v43, %v5714_v39  ;;  %v6095_v50 = vsel %vm11373_vm8, %v9523_v63, %v6094_v7  ;;  %v5543_v0 = vld [vmem:[#allocation3 + $0x100] sm:$0x1]  ;;  %v16702_v7 = vshll.u32 %v14615_v55, 16  ;;  %v9574_v54 = vcombine.low %v14656_v48, %v14658_v29  ;;  %v14682_v55 = vld [vmem:[#allocation3 + $0x134] sm:$0xf] }
 0x312   : > { %v5477_v13 = vsel %vm11373_vm8, %v9508_v19, %v5476_v20  ;;  %v9603_v33 = vcombine.low %v6095_v50, %v6104_v8  ;;  %v5725_v43 = vshll.u32 %v5543_v0, 16  ;;  %v5500_v20 = vrot.slane %v14610_v51, 4  ;;  %v456_v0 = vld [vmem:[#allocation3 + $0x130] sm:$0x8]  ;;  %16705 = vst [vmem:[#allocation35_spill] sm:$0xff] %v14682_v55 }
 0x313   : > { %v9556_v16 = vcombine.low %v5477_v13, %v5486_v38  ;;  %8438 = vmatmul.mubr.bf16.gmra.mrb[204].mxu0 %v9586_v34  ;;  %v6125_v63 = vor.u32 %v16702_v7, %v6122_v10  ;;  %v16703_v19 = vshll.u32 %v14591_v53, 16  ;;  %v5518_v38 = vshll.u32 %v14656_v48, 16  ;;  %v14670_v34 = vpop.f32.mrb[129].mxu1 }
 0x314   : > { %8445 = vmatprep.mubr.bf16.mxu0 %v9603_v33  ;;  %v5524_v8 = vshrl.u32 %v14658_v29, 16  ;;  %v5720_v51 = vsel %vm11408_vm11, %v5718_v47, %v14629_v4  ;;  %v5810_v50 = vld [vmem:[#allocation3 + $0x11c] sm:$0x8]  ;;  %v16704_v13 = vshll.u32 %v14606_v60, 16  ;;  %v14684_v4 = vpop.f32.mrb[130].mxu1 }
 0x315   : > { %v5507_v39 = vor.u32 %v16703_v19, %v5504_v28  ;;  %8293 = vmatmul.mubr.bf16.gmra.mrb[180].mxu1 %v9556_v16  ;;  %v5727_v28 = vrot.slane %v5725_v43, 5  ;;  %v5173_v33 = vld [vmem:[#allocation3 + $0x11c] sm:$0x8]  ;;  %v499_v16 = vsel %vm11355_vm6, 0, %v498_v57  ;;  %v6106_v7 = vshrl.u32 %v5810_v50, 16 }
 0x316   : > { %8300 = vmatprep.mubr.bf16.mxu1 %v9573_v56  ;;  %v6116_v10 = vor.u32 %v16704_v13, %v6113_v35  ;;  %v6126_v48 = vsel %vm11373_vm8, %v6118_v58, %v6125_v63  ;;  %v5488_v19 = vshrl.u32 %v5173_v33, 16  ;;  %500 = vst [vmem:[#allocation3 + $0x114] sm:$0x1] %v499_v16  ;;  %v14690_v43 = vrot.slane %v5515_v62, 7  ;;  %v14692_v50 = vld [vmem:[#allocation3 + $0x138] sm:$0xf] }
 0x317   : > { %v5728_v47 = vsel %vm11408_vm11, %v5723_v30, %v5727_v28  ;;  %v5508_v35 = vsel %vm11373_vm8, %v5500_v20, %v5507_v39  ;;  %v5526_v57 = vrot.slane %v5524_v8, 7  ;;  %16706 = vst [vmem:[#allocation40_spill] sm:$0xff] %v14692_v50  ;;  %v14694_v58 = vpop.f32.mrb[131].mxu1  ;;  %v9524_v63 = vrot.slane %v6106_v7, 11 }
 0x318   : > { %16707 = vst [vmem:[#allocation41_spill] sm:$0xff] %v14694_v58  ;;  %v9509_v13 = vrot.slane %v5488_v19, 11  ;;  %v14696_v33 = vrot.slane %v5515_v62, 4  ;;  %v5731_v16 = vor.u32 %v14579_v52, %v14568_v40  ;;  %v9587_v56 = vcombine.low %v5720_v51, %v5728_v47  ;;  %v501_v19 = vld [vmem:[#allocation3 + $0x128] sm:$0x1] }
 0x319   : > { %v16708_v30 = vshll.u32 %v14539_v22, 16  ;;  %v457_v20 = vsel %vm11360_vm7, 0, %v456_v0  ;;  %v16301_v39 = vshrl.u32 %v14682_v55, 16  ;;  %v6117_v60 = vsel %vm11373_vm8, %v9524_v63, %v6116_v10 }
 0x31a   : > { %v5499_v62 = vsel %vm11373_vm8, %v9509_v13, %v14639_v5  ;;  %v5732_v7 = vrot.slane %v5731_v16, 4  ;;  %458 = vst [vmem:[#allocation3 + $0x130] sm:$0x8] %v457_v20  ;;  %v16298_v40 = vshrl.u32 %v14692_v50, 16  ;;  %v9604_v52 = vcombine.low %v6117_v60, %v6126_v48 }
 0x31b   : > { %v5733_v28 = vrot.slane %v16708_v30, 5  ;;  %8446 = vmatmul.mubr.bf16.gmra.mrb[208].mxu0 %v9587_v56  ;;  %v9557_v22 = vcombine.low %v5499_v62, %v5508_v35  ;;  %v6135_v0 = vrot.slane %v16301_v39, 7  ;;  %v14714_v47 = vrot.slane %v5518_v38, 5 }
 0x31c   : > { %v16300_v10 = vshll.u32 %v14682_v55, 16  ;;  %v6144_v5 = vrot.slane %v16298_v40, 7  ;;  %v16299_v63 = vshll.u32 %v14692_v50, 16  ;;  %8453 = vmatprep.mubr.bf16.mxu0 %v9604_v52  ;;  %v14720_v56 = vrot.slane %v5524_v8, 4 }
 0x31d   : > { %v5736_v51 = vor.u32 %v14581_v37, %v5733_v28  ;;  %8301 = vmatmul.mubr.bf16.gmra.mrb[184].mxu1 %v9557_v22  ;;  %v5544_v60 = vld [vmem:[#allocation3 + $0x114] sm:$0x1]  ;;  %v5734_v37 = vsel %vm11408_vm11, %v5732_v7, %v5733_v28  ;;  %v5520_v35 = vor.u32 %v5518_v38, %v14690_v43  ;;  %v502_v20 = vsel %vm11355_vm6, 0, %v501_v19  ;;  %v6171_v38 = vld [vmem:[#allocation3 + $0x24] sm:$0x1]  ;;  %v16714_v19 = vld [vmem:[#allocation30_spill] sm:$0xff] }
 0x31e   : > { %8308 = vmatprep.mubr.bf16.mxu1 %v9574_v54  ;;  %v5739_v13 = vshll.u32 %v5544_v60, 16  ;;  %v6138_v16 = vor.u32 %v16300_v10, %v6135_v0  ;;  %v6147_v30 = vor.u32 %v16299_v63, %v6144_v5  ;;  %v16709_v8 = vshll.u32 %v14658_v29, 16  ;;  %503 = vst [vmem:[#allocation3 + $0x128] sm:$0x1] %v502_v20  ;;  %v16711_v54 = vld [vmem:[#allocation27_spill] sm:$0xff] }
 0x31f   : > { %v5737_v48 = vrot.slane %v5736_v51, 4  ;;  %v16710_v28 = vshll.u32 %v14591_v53, 16  ;;  %v16712_v52 = vshrl.u32 %v16711_v54, 16  ;;  %v16713_v51 = vshll.u32 %v16711_v54, 16 }
 0x320   : > { %v5529_v62 = vor.u32 %v16709_v8, %v5526_v57  ;;  %v5741_v40 = vrot.slane %v5739_v13, 5  ;;  %v6140_v5 = vrot.slane %v6135_v0, 4  ;;  %v5522_v63 = vrot.slane %v14690_v43, 4  ;;  %v459_v57 = vld [vmem:[#allocation3 + $0x144] sm:$0x8] }
 0x321   : > { %v14735_v7 = vrot.slane %v16710_v28, 5  ;;  %v6187_v22 = vrot.slane %v16712_v52, 4  ;;  %v6188_v60 = vrot.slane %v16713_v51, 5  ;;  %v16715_v10 = vshll.u32 %v16714_v19, 16  ;;  %v5813_v20 = vld [vmem:[#allocation3 + $0x130] sm:$0x8] }
 0x322   : > { %v5176_v8 = vld [vmem:[#allocation3 + $0x130] sm:$0x8]  ;;  %v5745_v53 = vor.u32 %v14619_v2, %v14617_v32  ;;  %v16716_v54 = vshrl.u32 %v16714_v19, 16  ;;  %v5742_v0 = vsel %vm11408_vm11, %v5737_v48, %v5741_v40  ;;  %v6128_v43 = vshrl.u32 %v5813_v20, 16  ;;  %v14758_v2 = vld [vmem:[#allocation3 + $0x14c] sm:$0xf] }
 0x323   : > { %v6191_v39 = vrot.slane %v16715_v10, 5  ;;  %v5750_v28 = vor.u32 %v14631_v26, %v14735_v7  ;;  %v6189_v52 = vor.u32 %v6188_v60, %v6187_v22  ;;  %v5510_v13 = vshrl.u32 %v5176_v8, 16  ;;  %v14752_v10 = vld [vmem:[#allocation3 + $0x148] sm:$0xf] }
 0x324   : > { %v6193_v51 = vrot.slane %v16716_v54, 4  ;;  %v6197_v50 = vshll.u32 %v6171_v38, 16  ;;  %v9588_v55 = vcombine.low %v5734_v37, %v5742_v0  ;;  %v6148_v58 = vsel %vm11373_vm8, %v6140_v5, %v6147_v30 }
 0x325   : > { %v5530_v32 = vsel %vm11373_vm8, %v5522_v63, %v5529_v62  ;;  %v6190_v26 = vrot.slane %v6189_v52, 4  ;;  %v9525_v22 = vrot.slane %v6128_v43, 11  ;;  %v9510_v60 = vrot.slane %v5510_v13, 11  ;;  %v5545_v62 = vld [vmem:[#allocation3 + $0x128] sm:$0x1] }
 0x326   : > { %v6194_v19 = vor.u32 %v6193_v51, %v6191_v39  ;;  %v6199_v54 = vrot.slane %v6197_v50, 5  ;;  %8454 = vmatmul.mubr.bf16.gmra.mrb[212].mxu0 %v9588_v55  ;;  %v5746_v40 = vrot.slane %v5745_v53, 4  ;;  %v5751_v48 = vrot.slane %v5750_v28, 4 }
 0x327   : > { %v460_v38 = vsel %vm11360_vm7, 0, %v459_v57  ;;  %v16316_v37 = vshrl.u32 %v14752_v10, 16  ;;  %v6139_v30 = vsel %vm11373_vm8, %v9525_v22, %v6138_v16  ;;  %v5521_v63 = vsel %vm11373_vm8, %v9510_v60, %v5520_v35  ;;  %v504_v57 = vld [vmem:[#allocation3 + $0x13c] sm:$0x1]  ;;  %v6172_v22 = vld [vmem:[#allocation3 + $0x38] sm:$0x1] }
 0x328   : > { %v6195_v5 = vrot.slane %v6194_v19, 4  ;;  %461 = vst [vmem:[#allocation3 + $0x144] sm:$0x8] %v460_v38  ;;  %v16306_v20 = vshrl.u32 %v14758_v2, 16  ;;  %v9605_v50 = vcombine.low %v6139_v30, %v6148_v58  ;;  %v9558_v55 = vcombine.low %v5521_v63, %v5530_v32  ;;  %v14790_v60 = vld [vmem:[#allocation3 + $0x30] sm:$0xf] }
 0x329   : > { %v5753_v8 = vshll.u32 %v5545_v62, 16  ;;  %v6157_v24 = vrot.slane %v16316_v37, 7  ;;  %v6192_v53 = vsel %vm11408_vm11, %v6190_v26, %v6191_v39  ;;  %v16307_v28 = vshll.u32 %v14758_v2, 16  ;;  %v16718_v19 = vld [vmem:[#allocation32_spill] sm:$0xff]  ;;  %v16721_v63 = vld [vmem:[#allocation33_spill] sm:$0xff] }
 0x32a   : > { %v6200_v16 = vsel %vm11408_vm11, %v6195_v5, %v6199_v54  ;;  %v6166_v35 = vrot.slane %v16306_v20, 7  ;;  %8461 = vmatprep.mubr.bf16.mxu0 %v9605_v50  ;;  %8309 = vmatmul.mubr.bf16.gmra.mrb[188].mxu1 %v9558_v55  ;;  %v5748_v58 = vsel %vm11408_vm11, %v5746_v40, %v14735_v7  ;;  %v505_v43 = vsel %vm11355_vm6, 0, %v504_v57  ;;  %v11165_v37 = vld [vmem:[#allocation3 + $0x98] sm:$0xf] }
 0x32b   : > { %v5755_v52 = vrot.slane %v5753_v8, 5  ;;  %v9623_v51 = vcombine.low %v6192_v53, %v6200_v16  ;;  %v6162_v0 = vrot.slane %v6157_v24, 4  ;;  %v5759_v13 = vor.u32 %v14714_v47, %v14696_v33  ;;  %506 = vst [vmem:[#allocation3 + $0x13c] sm:$0x1] %v505_v43  ;;  %v11151_v43 = vld [vmem:[#allocation3 + $0x1c] sm:$0xf] }
 0x32c   : > { %v6169_v39 = vor.u32 %v16307_v28, %v6166_v35  ;;  %v16717_v32 = vshll.u32 %v14658_v29, 16  ;;  %v16719_v54 = vshrl.u32 %v16718_v19, 16  ;;  %v16720_v38 = vshll.u32 %v16718_v19, 16 }
 0x32d   : > { %v5756_v7 = vsel %vm11408_vm11, %v5751_v48, %v5755_v52  ;;  %8510 = vmatprep.mubr.bf16.mxu1 %v9623_v51  ;;  %v16722_v33 = vshll.u32 %v16721_v63, 16  ;;  %v16311_v62 = vshll.u32 %v14752_v10, 16  ;;  %v14801_v5 = vrot.slane %v5759_v13, 4  ;;  %v14805_v48 = vld [vmem:[#allocation3 + $0x34] sm:$0xf] }
 0x32e   : > { %v14788_v26 = vrot.slane %v16717_v32, 5  ;;  %v6201_v40 = vrot.slane %v16719_v54, 4  ;;  %v6202_v30 = vrot.slane %v16720_v38, 5  ;;  %v9589_v29 = vcombine.low %v5748_v58, %v5756_v7 }
 0x32f   : > { %v6205_v47 = vrot.slane %v16722_v33, 5  ;;  %v5816_v55 = vld [vmem:[#allocation3 + $0x144] sm:$0x8]  ;;  %v16723_v57 = vshrl.u32 %v16721_v63, 16  ;;  %v6211_v16 = vshll.u32 %v6172_v22, 16  ;;  %v16325_v35 = vshrl.u32 %v14790_v60, 16 }
 0x330   : > { %v5764_v50 = vor.u32 %v14720_v56, %v14788_v26  ;;  %v6203_v8 = vor.u32 %v6202_v30, %v6201_v40  ;;  %8462 = vmatmul.mubr.bf16.gmra.mrb[216].mxu0 %v9589_v29  ;;  %v6150_v52 = vshrl.u32 %v5816_v55, 16  ;;  %v6160_v58 = vor.u32 %v16311_v62, %v6157_v24  ;;  %v11152_v56 = vld [vmem:[#allocation3 + $0x20] sm:$0xf]  ;;  %v11090_v22 = vld [vmem:[%s16124_s4 + $0x208] sm:$0xff]  }
 0x331   : > { %v6207_v53 = vrot.slane %v16723_v57, 4  ;;  %v6170_v51 = vsel %vm11373_vm8, %v6162_v0, %v6169_v39  ;;  %v9607_v13 = vcombine.low %v11151_v43, %v11152_v56  ;;  %v6213_v19 = vrot.slane %v6211_v16, 5  ;;  %v14841_v43 = vld [vmem:[#allocation3 + $0x44] sm:$0xf] }
 0x332   : > { %v6204_v32 = vrot.slane %v6203_v8, 4  ;;  %v6468_v54 = vrot.slane %v16325_v35, 7  ;;  %v9526_v40 = vrot.slane %v6150_v52, 11  ;;  %v5762_v24 = vsel %vm11408_vm11, %v14801_v5, %v14788_v26  ;;  %v5546_v55 = vld [vmem:[#allocation3 + $0x13c] sm:$0x1]  ;;  %v11153_v26 = vld [vmem:[%s16124_s4 + $0x200] sm:$0xff]  }
 0x333   : > { %v6208_v7 = vor.u32 %v6207_v53, %v6205_v47  ;;  %v16324_v0 = vshll.u32 %v14790_v60, 16  ;;  %v16322_v39 = vshrl.u32 %v14805_v48, 16  ;;  %8511 = vmatmul.mubr.bf16.vlgmr.msra.gmra.mrb[192].mxu1 %v9607_v13  ;;  %v5765_v38 = vrot.slane %v5764_v50, 4  ;;  %v11094_v56 = vld [vmem:[%s16124_s4 + $0x210] sm:$0xff]   ;;  %v6180_v35 = vld [vmem:[#allocation3 + $0xd8] sm:$0x1] }
 0x334   : > { %v6206_v30 = vsel %vm11408_vm11, %v6204_v32, %v6205_v47  ;;  %v16309_v33 = vshll.u32 %v14805_v48, 16  ;;  %v6161_v29 = vsel %vm11373_vm8, %v9526_v40, %v6160_v58  ;;  %10838 = vmatpush3.bf16.msra.mxu1 %v11153_v26  ;;  %v6473_v8 = vrot.slane %v6468_v54, 4  ;;  %v6412_v47 = vld [vmem:[#allocation3 + $0x2c] sm:$0x8]  ;;  %v6173_v58 = vld [vmem:[#allocation3 + $0x4c] sm:$0x1] }
 0x335   : > { %v6209_v63 = vrot.slane %v6208_v7, 4  ;;  %v6471_v5 = vor.u32 %v16324_v0, %v6468_v54  ;;  %v6477_v50 = vrot.slane %v16322_v39, 7  ;;  %v9606_v57 = vcombine.low %v6161_v29, %v6170_v51  ;;  %10839 = vmatprep.subr.bf16.mxu1 %v11090_v22  ;;  %v11154_v51 = vld [vmem:[#allocation3 + $0x30] sm:$0xf]  ;;  %v11155_v7 = vld [vmem:[#allocation3 + $0x34] sm:$0xf] }
 0x336   : > { %v5767_v53 = vshll.u32 %v5546_v55, 16  ;;  %v9655_v52 = vcombine.low %v14790_v60, %v14805_v48  ;;  %v9608_v54 = vcombine.low %v11154_v51, %v11155_v7  ;;  %v16725_v29 = vshll.u32 %v13896_v36, 16  ;;  %v14858_v7 = vld [vmem:[#allocation3 + $0x48] sm:$0xf] }
 0x337   : > { %v6214_v16 = vsel %vm11408_vm11, %v6209_v63, %v6213_v19  ;;  %v6480_v32 = vor.u32 %v16309_v33, %v6477_v50  ;;  %v16724_v19 = vshrl.u32 %v13896_v36, 16  ;;  %8469 = vmatprep.mubr.bf16.mxu0 %v9606_v57  ;;  %v16726_v26 = vshll.u32 %v13913_v18, 16 }
 0x338   : > { %v9624_v13 = vcombine.low %v6206_v30, %v6214_v16  ;;  %v5769_v63 = vrot.slane %v5767_v53, 5  ;;  %v6216_v55 = vrot.slane %v16725_v29, 5  ;;  %v16727_v28 = vshrl.u32 %v13913_v18, 16  ;;  %10840 = vmatpush3.bf16.msra.mxu1 %v11090_v22  ;;  %v6813_v18 = vld [vmem:[#allocation3 + $0x4c] sm:$0x1] }
 0x339   : > { %v6215_v40 = vrot.slane %v16724_v19, 4  ;;  %v6219_v20 = vrot.slane %v16726_v26, 5  ;;  %v6225_v16 = vshll.u32 %v6173_v58, 16  ;;  %v6461_v50 = vshrl.u32 %v6412_v47, 16  ;;  %10841 = vmatprep.subr.bf16.mxu1 %v11094_v56 }
 0x33a   : > { %v6221_v30 = vrot.slane %v16727_v28, 4  ;;  %8518 = vmatprep.mubr.bf16.mxu1 %v9624_v13  ;;  %v6481_v51 = vsel %vm11373_vm8, %v6473_v8, %v6480_v32  ;;  %v6488_v57 = vshrl.u32 %v14841_v43, 16  ;;  %v5770_v36 = vsel %vm11408_vm11, %v5765_v38, %v5769_v63  ;;  %v11098_v28 = vld [vmem:[%s16124_s4 + $0x218] sm:$0xff]  }
 0x33b   : > { %v6217_v53 = vor.u32 %v6216_v55, %v6215_v40  ;;  %v6491_v29 = vshll.u32 %v14841_v43, 16  ;;  %v9590_v47 = vcombine.low %v5762_v24, %v5770_v36  ;;  %v6227_v8 = vrot.slane %v6225_v16, 5  ;;  %8519 = vmatmul.mubr.bf16.gmra.mrb[196].mxu1 %v9608_v54  ;;  %v11102_v36 = vld [vmem:[%s16124_s4 + $0x220] sm:$0xff]  }
 0x33c   : > { %v6222_v19 = vor.u32 %v6221_v30, %v6219_v20  ;;  %v9527_v58 = vrot.slane %v6461_v50, 11  ;;  %v14867_v13 = vrot.slane %v6488_v57, 7  ;;  %v6497_v38 = vshrl.u32 %v14858_v7, 16  ;;  %10842 = vmatpush3.bf16.msra.mxu1 %v11094_v56  ;;  %v6415_v56 = vld [vmem:[#allocation3 + $0x40] sm:$0x8] }
 0x33d   : > { %v6218_v22 = vrot.slane %v6217_v53, 4  ;;  %v6500_v40 = vshll.u32 %v14858_v7, 16  ;;  %8470 = vmatmul.mubr.bf16.gmra.mrb[220].mxu0 %v9590_v47  ;;  %v6842_v55 = vrot.slane %v6488_v57, 4  ;;  %v6843_v26 = vrot.slane %v6491_v29, 5  ;;  %10843 = vmatprep.subr.bf16.mxu1 %v11098_v28  ;;  %v11156_v47 = vld [vmem:[#allocation3 + $0x44] sm:$0xf] }
 0x33e   : > { %v6223_v32 = vrot.slane %v6222_v19, 4  ;;  %v6472_v63 = vsel %vm11373_vm8, %v9527_v58, %v6471_v5  ;;  %v6852_v30 = vshll.u32 %v6813_v18, 16  ;;  %8671 = vmatprep.mubr.bf16.mxu0 %v9655_v52  ;;  %v6499_v50 = vrot.slane %v6497_v38, 7  ;;  %v6174_v18 = vld [vmem:[#allocation3 + $0x60] sm:$0x1] }
 0x33f   : > { %v6220_v24 = vsel %vm11408_vm11, %v6218_v22, %v6219_v20  ;;  %v9639_v16 = vcombine.low %v6472_v63, %v6481_v51  ;;  %v6844_v5 = vor.u32 %v6843_v26, %v6842_v55  ;;  %v6846_v57 = vrot.slane %v6500_v40, 5  ;;  %v11157_v58 = vld [vmem:[#allocation3 + $0x48] sm:$0xf] }
 0x340   : > { %v6228_v54 = vsel %vm11408_vm11, %v6223_v32, %v6227_v8  ;;  %v6848_v19 = vrot.slane %v6497_v38, 4  ;;  %v6854_v52 = vrot.slane %v6852_v30, 5  ;;  %v9656_v20 = vcombine.low %v14841_v43, %v14858_v7  ;;  %10844 = vmatpush3.bf16.msra.mxu1 %v11098_v28 }
 0x341   : > { %v9625_v53 = vcombine.low %v6220_v24, %v6228_v54  ;;  %v9609_v8 = vcombine.low %v11156_v47, %v11157_v58  ;;  %v16728_v51 = vshrl.u32 %v14012_v1, 16  ;;  %v6845_v32 = vrot.slane %v6844_v5, 4  ;;  %v14891_v58 = vld [vmem:[#allocation3 + $0x58] sm:$0xf]  ;;  %10845 = vmatprep.subr.bf16.mxu1 %v11102_v36 }
 0x342   : > { %v6849_v63 = vor.u32 %v6848_v19, %v6846_v57  ;;  %v16729_v24 = vshll.u32 %v14012_v1, 16  ;;  %v16730_v38 = vshll.u32 %v14019_v21, 16  ;;  %v16731_v30 = vshrl.u32 %v14019_v21, 16 }
 0x343   : > { %v6229_v22 = vrot.slane %v16728_v51, 4  ;;  %8526 = vmatprep.mubr.bf16.mxu1 %v9625_v53  ;;  %v6239_v43 = vshll.u32 %v6174_v18, 16  ;;  %v6483_v7 = vshrl.u32 %v6415_v56, 16  ;;  %v6493_v47 = vor.u32 %v6491_v29, %v14867_v13  ;;  %v11106_v53 = vld [vmem:[%s16124_s4 + $0x228] sm:$0xff]  }
 0x344   : > { %v6230_v55 = vrot.slane %v16729_v24, 5  ;;  %v6233_v26 = vrot.slane %v16730_v38, 5  ;;  %v6235_v54 = vrot.slane %v16731_v30, 4  ;;  %v6847_v1 = vsel %vm11408_vm11, %v6845_v32, %v6846_v57  ;;  %8527 = vmatmul.mubr.bf16.gmra.mrb[200].mxu1 %v9609_v8  ;;  %v14899_v29 = vld [vmem:[#allocation3 + $0x5c] sm:$0xf] }
 0x345   : > { %v6850_v5 = vrot.slane %v6849_v63, 4  ;;  %v6495_v28 = vrot.slane %v14867_v13, 4  ;;  %v6241_v18 = vrot.slane %v6239_v43, 5  ;;  %v9528_v56 = vrot.slane %v6483_v7, 11  ;;  %16732 = vst [vmem:[#allocation39_spill] sm:$0xff] %v14899_v29  ;;  %8672 = vmatmul.mubr.bf16.vlgmr.msra.gmra.mrb[224].mxu0 %v9639_v16  ;;  %10846 = vmatpush3.bf16.msra.mxu1 %v11102_v36 }
 0x346   : > { %v6231_v19 = vor.u32 %v6230_v55, %v6229_v22  ;;  %v6236_v21 = vor.u32 %v6235_v54, %v6233_v26  ;;  %v6502_v51 = vor.u32 %v6500_v40, %v6499_v50  ;;  %v16321_v30 = vshrl.u32 %v14891_v58, 16  ;;  %8679 = vmatprep.mubr.bf16.mxu0 %v9656_v20  ;;  %10847 = vmatprep.subr.bf16.mxu1 %v11106_v53  ;;  %v11110_v40 = vld [vmem:[%s16124_s4 + $0x230] sm:$0xff]   ;;  %v6175_v63 = vld [vmem:[#allocation3 + $0x74] sm:$0x1]  ;;  %v6418_v55 = vld [vmem:[#allocation3 + $0x54] sm:$0x8] }
 0x347   : > { %v6855_v24 = vsel %vm11408_vm11, %v6850_v5, %v6854_v52  ;;  %v6494_v50 = vsel %vm11373_vm8, %v9528_v56, %v6493_v47  ;;  %v16310_v52 = vshrl.u32 %v14899_v29, 16  ;;  %v16319_v32 = vshll.u32 %v14891_v58, 16  ;;  %v14926_v47 = vld [vmem:[#allocation3 + $0x6c] sm:$0xf]  ;;  %v11159_v5 = vld [vmem:[#allocation3 + $0x5c] sm:$0xf] }
 0x348   : > { %v6232_v38 = vrot.slane %v6231_v19, 4  ;;  %v14904_v57 = vcombine.low %v6847_v1, %v6855_v24  ;;  %v6237_v22 = vrot.slane %v6236_v21, 4  ;;  %v6503_v13 = vsel %vm11373_vm8, %v6495_v28, %v6502_v51  ;;  %v11158_v1 = vld [vmem:[#allocation3 + $0x58] sm:$0xf] }
 0x349   : > { %v6512_v36 = vrot.slane %v16321_v30, 7  ;;  %v9640_v8 = vcombine.low %v6494_v50, %v6503_v13  ;;  %v16308_v43 = vshll.u32 %v14899_v29, 16  ;;  %v9657_v7 = vcombine.low %v14891_v58, %v14899_v29  ;;  %10848 = vmatpush3.bf16.msra.mxu1 %v11106_v53  ;;  %v11173_v29 = vld [vmem:[#allocation3 + $0xe8] sm:$0xf] }
 0x34a   : > { %16733 = vst [vmem:[#allocation38_spill] sm:$0xff] %v14904_v57  ;;  %v6234_v16 = vsel %vm11408_vm11, %v6232_v38, %v6233_v26  ;;  %v6242_v20 = vsel %vm11408_vm11, %v6237_v22, %v6241_v18  ;;  %v6521_v26 = vrot.slane %v16310_v52, 7  ;;  %v9610_v19 = vcombine.low %v11158_v1, %v11159_v5  ;;  %10849 = vmatprep.subr.bf16.mxu1 %v11110_v40  ;;  %v11114_v38 = vld [vmem:[%s16124_s4 + $0x238] sm:$0xff]  }
 0x34b   : > { %v9626_v54 = vcombine.low %v6234_v16, %v6242_v20  ;;  %v16734_v28 = vshrl.u32 %v14089_v11, 16  ;;  %v16735_v18 = vshll.u32 %v14089_v11, 16  ;;  %v16736_v51 = vshll.u32 %v14100_v3, 16  ;;  %v14941_v20 = vld [vmem:[#allocation3 + $0x70] sm:$0xf] }
 0x34c   : > { %v16737_v53 = vshrl.u32 %v14100_v3, 16  ;;  %v6253_v13 = vshll.u32 %v6175_v63, 16  ;;  %v6505_v16 = vshrl.u32 %v6418_v55, 16  ;;  %v6515_v50 = vor.u32 %v16319_v32, %v6512_v36 }
 0x34d   : > { %v6243_v21 = vrot.slane %v16734_v28, 4  ;;  %v6244_v56 = vrot.slane %v16735_v18, 5  ;;  %v6247_v24 = vrot.slane %v16736_v51, 5  ;;  %8534 = vmatprep.mubr.bf16.mxu1 %v9626_v54  ;;  %v6517_v1 = vrot.slane %v6512_v36, 4  ;;  %8680 = vmatmul.mubr.bf16.gmra.mrb[228].mxu0 %v9640_v8 }
 0x34e   : > { %v6249_v22 = vrot.slane %v16737_v53, 4  ;;  %8535 = vmatmul.mubr.bf16.gmra.mrb[204].mxu1 %v9610_v19  ;;  %v6524_v5 = vor.u32 %v16308_v43, %v6521_v26  ;;  %v6532_v28 = vshrl.u32 %v14926_v47, 16  ;;  %v6255_v18 = vrot.slane %v6253_v13, 5  ;;  %8687 = vmatprep.mubr.bf16.mxu0 %v9657_v7  ;;  %v6176_v43 = vld [vmem:[#allocation3 + $0x88] sm:$0x1] }
 0x34f   : > { %v6245_v11 = vor.u32 %v6244_v56, %v6243_v21  ;;  %v9529_v3 = vrot.slane %v6505_v16, 11  ;;  %v6535_v63 = vshll.u32 %v14926_v47, 16  ;;  %10850 = vmatpush3.bf16.msra.mxu1 %v11110_v40  ;;  %v6541_v36 = vshrl.u32 %v14941_v20, 16  ;;  %v6815_v21 = vld [vmem:[#allocation3 + $0x74] sm:$0x1] }
 0x350   : > { %v6250_v54 = vor.u32 %v6249_v22, %v6247_v24  ;;  %v6525_v51 = vsel %vm11373_vm8, %v6517_v1, %v6524_v5  ;;  %v6534_v19 = vrot.slane %v6532_v28, 7  ;;  %10851 = vmatprep.subr.bf16.mxu1 %v11114_v38  ;;  %v6544_v56 = vshll.u32 %v14941_v20, 16 }
 0x351   : > { %v6246_v55 = vrot.slane %v6245_v11, 4  ;;  %v6516_v8 = vsel %vm11373_vm8, %v9529_v3, %v6515_v50  ;;  %v6870_v53 = vrot.slane %v6532_v28, 4  ;;  %v6543_v22 = vrot.slane %v6541_v36, 7  ;;  %v11160_v28 = vld [vmem:[#allocation3 + $0x6c] sm:$0xf] }
 0x352   : > { %v6251_v26 = vrot.slane %v6250_v54, 4  ;;  %v9641_v7 = vcombine.low %v6516_v8, %v6525_v51  ;;  %v6871_v13 = vrot.slane %v6535_v63, 5  ;;  %v6874_v11 = vrot.slane %v6544_v56, 5  ;;  %v11161_v3 = vld [vmem:[#allocation3 + $0x70] sm:$0xf] }
 0x353   : > { %v6248_v40 = vsel %vm11408_vm11, %v6246_v55, %v6247_v24  ;;  %v6876_v1 = vrot.slane %v6541_v36, 4  ;;  %v6880_v5 = vshll.u32 %v6815_v21, 16  ;;  %10852 = vmatpush3.bf16.msra.mxu1 %v11114_v38  ;;  %v9658_v50 = vcombine.low %v14926_v47, %v14941_v20  ;;  %v6421_v24 = vld [vmem:[#allocation3 + $0x68] sm:$0x8] }
 0x354   : > { %v6256_v16 = vsel %vm11408_vm11, %v6251_v26, %v6255_v18  ;;  %v6872_v33 = vor.u32 %v6871_v13, %v6870_v53  ;;  %v9611_v52 = vcombine.low %v11160_v28, %v11161_v3  ;;  %v16738_v8 = vshrl.u32 %v14194_v61, 16  ;;  %v14971_v3 = vld [vmem:[#allocation3 + $0x84] sm:$0xf] }
 0x355   : > { %v9627_v54 = vcombine.low %v6248_v40, %v6256_v16  ;;  %v6877_v55 = vor.u32 %v6876_v1, %v6874_v11  ;;  %v6882_v51 = vrot.slane %v6880_v5, 5  ;;  %v16739_v18 = vshll.u32 %v14194_v61, 16  ;;  %8688 = vmatmul.mubr.bf16.gmra.mrb[232].mxu0 %v9641_v7  ;;  %v14967_v5 = vld [vmem:[#allocation3 + $0x80] sm:$0xf]  ;;  %16743 = vst [vmem:[#allocation44_spill] sm:$0xff] %v14971_v3 }
 0x356   : > { %v6257_v62 = vrot.slane %v16738_v8, 4  ;;  %v6873_v21 = vrot.slane %v6872_v33, 4  ;;  %v16740_v38 = vshll.u32 %v14202_v49, 16  ;;  %v16741_v53 = vshrl.u32 %v14202_v49, 16  ;;  %16742 = vst [vmem:[#allocation42_spill] sm:$0xff] %v14967_v5  ;;  %8695 = vmatprep.mubr.bf16.mxu0 %v9658_v50 }
 0x357   : > { %v6258_v36 = vrot.slane %v16739_v18, 5  ;;  %8542 = vmatprep.mubr.bf16.mxu1 %v9627_v54  ;;  %v6267_v20 = vshll.u32 %v6176_v43, 16  ;;  %v6878_v40 = vrot.slane %v6877_v55, 4  ;;  %v6527_v16 = vshrl.u32 %v6421_v24, 16 }
 0x358   : > { %v6261_v26 = vrot.slane %v16740_v38, 5  ;;  %v6263_v47 = vrot.slane %v16741_v53, 4  ;;  %8543 = vmatmul.mubr.bf16.gmra.mrb[208].mxu1 %v9611_v52  ;;  %v6537_v1 = vor.u32 %v6535_v63, %v6534_v19  ;;  %v6875_v61 = vsel %vm11408_vm11, %v6873_v21, %v6874_v11  ;;  %v6424_v38 = vld [vmem:[#allocation3 + $0x7c] sm:$0x8] }
 0x359   : > { %v6259_v13 = vor.u32 %v6258_v36, %v6257_v62  ;;  %v6269_v54 = vrot.slane %v6267_v20, 5  ;;  %v6539_v28 = vrot.slane %v6534_v19, 4  ;;  %v6883_v49 = vsel %vm11408_vm11, %v6878_v40, %v6882_v51  ;;  %v11163_v20 = vld [vmem:[#allocation3 + $0x84] sm:$0xf] }
 0x35a   : > { %v6264_v33 = vor.u32 %v6263_v47, %v6261_v26  ;;  %v9530_v7 = vrot.slane %v6527_v16, 11  ;;  %v6546_v52 = vor.u32 %v6544_v56, %v6543_v22  ;;  %v14975_v62 = vcombine.low %v6875_v61, %v6883_v49  ;;  %v6177_v22 = vld [vmem:[#allocation3 + $0x9c] sm:$0x1]  ;;  %v11162_v47 = vld [vmem:[#allocation3 + $0x80] sm:$0xf] }
 0x35b   : > { %v6260_v43 = vrot.slane %v6259_v13, 4  ;;  %v16315_v24 = vshrl.u32 %v14967_v5, 16  ;;  %v16313_v19 = vshrl.u32 %v14971_v3, 16  ;;  %v16314_v36 = vshll.u32 %v14967_v5, 16 }
 0x35c   : > { %16744 = vst [vmem:[#allocation46_spill] sm:$0xff] %v14975_v62  ;;  %v6265_v63 = vrot.slane %v6264_v33, 4  ;;  %v6547_v50 = vsel %vm11373_vm8, %v6539_v28, %v6546_v52  ;;  %v6538_v51 = vsel %vm11373_vm8, %v9530_v7, %v6537_v1  ;;  %v9659_v53 = vcombine.low %v14967_v5, %v14971_v3  ;;  %v14997_v1 = vld [vmem:[#allocation3 + $0x94] sm:$0xf]  ;;  %v15005_v52 = vld [vmem:[#allocation3 + $0x98] sm:$0xf] }
 0x35d   : > { %v6262_v11 = vsel %vm11408_vm11, %v6260_v43, %v6261_v26  ;;  %v6556_v56 = vrot.slane %v16315_v24, 7  ;;  %v9642_v18 = vcombine.low %v6538_v51, %v6547_v50  ;;  %v6565_v21 = vrot.slane %v16313_v19, 7  ;;  %v11164_v24 = vld [vmem:[#allocation3 + $0x94] sm:$0xf] }
 0x35e   : > { %v6270_v55 = vsel %vm11408_vm11, %v6265_v63, %v6269_v54  ;;  %v16312_v26 = vshll.u32 %v14971_v3, 16  ;;  %v9612_v40 = vcombine.low %v11162_v47, %v11163_v20  ;;  %v16745_v13 = vshrl.u32 %v14246_v9, 16  ;;  %v6817_v47 = vld [vmem:[#allocation3 + $0x9c] sm:$0x1]  ;;  %v15016_v20 = vpop.f32.mrb[132].mxu1 }
 0x35f   : > { %v9628_v8 = vcombine.low %v6262_v11, %v6270_v55  ;;  %8696 = vmatmul.mubr.bf16.gmra.mrb[236].mxu0 %v9642_v18  ;;  %v16746_v61 = vshll.u32 %v14246_v9, 16  ;;  %v16747_v54 = vshll.u32 %v14252_v12, 16  ;;  %v16748_v49 = vshrl.u32 %v14252_v12, 16 }
 0x360   : > { %v6271_v16 = vrot.slane %v16745_v13, 4  ;;  %v6281_v7 = vshll.u32 %v6177_v22, 16  ;;  %8703 = vmatprep.mubr.bf16.mxu0 %v9659_v53  ;;  %v6549_v63 = vshrl.u32 %v6424_v38, 16  ;;  %v6559_v11 = vor.u32 %v16314_v36, %v6556_v56 }
 0x361   : > { %8550 = vmatprep.mubr.bf16.mxu1 %v9628_v8  ;;  %v6272_v33 = vrot.slane %v16746_v61, 5  ;;  %v6275_v28 = vrot.slane %v16747_v54, 5  ;;  %v6277_v43 = vrot.slane %v16748_v49, 4  ;;  %v6561_v50 = vrot.slane %v6556_v56, 4 }
 0x362   : > { %8551 = vmatmul.mubr.bf16.gmra.mrb[212].mxu1 %v9612_v40  ;;  %v6568_v9 = vor.u32 %v16312_v26, %v6565_v21  ;;  %v6283_v8 = vrot.slane %v6281_v7, 5  ;;  %v6576_v18 = vshrl.u32 %v14997_v1, 16  ;;  %v9531_v12 = vrot.slane %v6549_v63, 11 }
 0x363   : > { %v6273_v55 = vor.u32 %v6272_v33, %v6271_v16  ;;  %v6278_v51 = vor.u32 %v6277_v43, %v6275_v28  ;;  %v6579_v53 = vshll.u32 %v14997_v1, 16  ;;  %v6585_v38 = vshrl.u32 %v15005_v52, 16  ;;  %v15019_v16 = vpop.f32.mrb[133].mxu1 }
 0x364   : > { %v6569_v22 = vsel %vm11373_vm8, %v6561_v50, %v6568_v9  ;;  %v6578_v13 = vrot.slane %v6576_v18, 7  ;;  %v6588_v21 = vshll.u32 %v15005_v52, 16  ;;  %v6560_v61 = vsel %vm11373_vm8, %v9531_v12, %v6559_v11  ;;  %v15023_v43 = vpop.f32.mrb[134].mxu1  ;;  %v6178_v11 = vld [vmem:[#allocation3 + $0xb0] sm:$0x1] }
 0x365   : > { %v6274_v56 = vrot.slane %v6273_v55, 4  ;;  %v6279_v40 = vrot.slane %v6278_v51, 4  ;;  %v6587_v33 = vrot.slane %v6585_v38, 7  ;;  %v6898_v54 = vrot.slane %v6576_v18, 4  ;;  %v15029_v55 = vpop.f32.mrb[135].mxu1 }
 0x366   : > { %v6899_v49 = vrot.slane %v6579_v53, 5  ;;  %v9643_v50 = vcombine.low %v6560_v61, %v6569_v22  ;;  %v6902_v9 = vrot.slane %v6588_v21, 5  ;;  %v6904_v19 = vrot.slane %v6585_v38, 4  ;;  %v6427_v12 = vld [vmem:[#allocation3 + $0x90] sm:$0x8] }
 0x367   : > { %v6276_v7 = vsel %vm11408_vm11, %v6274_v56, %v6275_v28  ;;  %v6284_v63 = vsel %vm11408_vm11, %v6279_v40, %v6283_v8  ;;  %v6908_v36 = vshll.u32 %v6817_v47, 16  ;;  %v9660_v18 = vcombine.low %v14997_v1, %v15005_v52 }
 0x368   : > { %v9629_v51 = vcombine.low %v6276_v7, %v6284_v63  ;;  %v6900_v26 = vor.u32 %v6899_v49, %v6898_v54  ;;  %8704 = vmatmul.mubr.bf16.gmra.mrb[240].mxu0 %v9643_v50  ;;  %v9613_v28 = vcombine.low %v11164_v24, %v11165_v37  ;;  %v16749_v56 = vshrl.u32 %v14295_v45, 16  ;;  %v15041_v63 = vld [vmem:[#allocation3 + $0xa8] sm:$0xf]  ;;  %v15043_v50 = vpop.f32.mrb[160].mxu0 }
 0x369   : > { %v16750_v22 = vshll.u32 %v14295_v45, 16  ;;  %v6905_v54 = vor.u32 %v6904_v19, %v6902_v9  ;;  %v6910_v38 = vrot.slane %v6908_v36, 5  ;;  %v16751_v47 = vshll.u32 %v14304_v14, 16  ;;  %8711 = vmatprep.mubr.bf16.mxu0 %v9660_v18  ;;  %16753 = vst [vmem:[#allocation43_spill] sm:$0xff] %v15041_v63 }
 0x36a   : > { %v6285_v8 = vrot.slane %v16749_v56, 4  ;;  %8558 = vmatprep.mubr.bf16.mxu1 %v9629_v51  ;;  %v6901_v61 = vrot.slane %v6900_v26, 4  ;;  %v16752_v1 = vshrl.u32 %v14304_v14, 16  ;;  %v6295_v37 = vshll.u32 %v6178_v11, 16  ;;  %v15047_v26 = vpop.f32.mrb[161].mxu0 }
 0x36b   : > { %v6286_v40 = vrot.slane %v16750_v22, 5  ;;  %v6289_v49 = vrot.slane %v16751_v47, 5  ;;  %8559 = vmatmul.mubr.bf16.gmra.mrb[216].mxu1 %v9613_v28  ;;  %v6571_v24 = vshrl.u32 %v6427_v12, 16  ;;  %v6906_v19 = vrot.slane %v6905_v54, 4  ;;  %v15051_v14 = vpop.f32.mrb[162].mxu0 }
 0x36c   : > { %v6291_v52 = vrot.slane %v16752_v1, 4  ;;  %v6903_v45 = vsel %vm11408_vm11, %v6901_v61, %v6902_v9  ;;  %v6581_v36 = vor.u32 %v6579_v53, %v6578_v13  ;;  %v6297_v28 = vrot.slane %v6295_v37, 5  ;;  %v15056_v9 = vpop.f32.mrb[163].mxu0  ;;  %v15072_v37 = vpop.f32.mrb[136].mxu1 }
 0x36d   : > { %v6287_v7 = vor.u32 %v6286_v40, %v6285_v8  ;;  %v9532_v56 = vrot.slane %v6571_v24, 11  ;;  %v15049_v8 = vld [vmem:[#allocation3 + $0xac] sm:$0xf]  ;;  %v6911_v11 = vsel %vm11408_vm11, %v6906_v19, %v6910_v38  ;;  %v6583_v12 = vrot.slane %v6578_v13, 4 }
 0x36e   : > { %v6292_v18 = vor.u32 %v6291_v52, %v6289_v49  ;;  %16754 = vst [vmem:[#allocation50_spill] sm:$0xff] %v15049_v8  ;;  %v6590_v22 = vor.u32 %v6588_v21, %v6587_v33  ;;  %v16318_v40 = vshrl.u32 %v15041_v63, 16  ;;  %v15058_v53 = vcombine.low %v6903_v45, %v6911_v11  ;;  %v6179_v52 = vld [vmem:[#allocation3 + $0xc4] sm:$0x1] }
 0x36f   : > { %v6288_v51 = vrot.slane %v6287_v7, 4  ;;  %v6582_v47 = vsel %vm11373_vm8, %v9532_v56, %v6581_v36  ;;  %v16317_v21 = vshrl.u32 %v15049_v8, 16  ;;  %v16320_v1 = vshll.u32 %v15041_v63, 16  ;;  %v11167_v56 = vld [vmem:[#allocation3 + $0xac] sm:$0xf] }
 0x370   : > { %16755 = vst [vmem:[#allocation51_spill] sm:$0xff] %v15058_v53  ;;  %v6293_v54 = vrot.slane %v6292_v18, 4  ;;  %v6591_v7 = vsel %vm11373_vm8, %v6583_v12, %v6590_v22  ;;  %v6600_v13 = vrot.slane %v16318_v40, 7  ;;  %v16323_v19 = vshll.u32 %v15049_v8, 16  ;;  %v15081_v18 = vpop.f32.mrb[137].mxu1 }
 0x371   : > { %v6290_v61 = vsel %vm11408_vm11, %v6288_v51, %v6289_v49  ;;  %v9644_v38 = vcombine.low %v6582_v47, %v6591_v7  ;;  %v6430_v49 = vld [vmem:[#allocation3 + $0xa4] sm:$0x8]  ;;  %v6609_v45 = vrot.slane %v16317_v21, 7  ;;  %v9661_v36 = vcombine.low %v15041_v63, %v15049_v8  ;;  %v15079_v51 = vld [vmem:[#allocation3 + $0xbc] sm:$0xf] }
 0x372   : > { %v6298_v33 = vsel %vm11408_vm11, %v6293_v54, %v6297_v28  ;;  %v11166_v28 = vld [vmem:[#allocation3 + $0xa8] sm:$0xf]  ;;  %v16756_v12 = vshrl.u32 %v14347_v46, 16  ;;  %v16758_v47 = vshll.u32 %v14355_v27, 16  ;;  %v16759_v21 = vshrl.u32 %v14355_v27, 16 }
 0x373   : > { %v9630_v24 = vcombine.low %v6290_v61, %v6298_v33  ;;  %8712 = vmatmul.mubr.bf16.gmra.mrb[244].mxu0 %v9644_v38  ;;  %v9614_v11 = vcombine.low %v11166_v28, %v11167_v56  ;;  %v16757_v61 = vshll.u32 %v14347_v46, 16  ;;  %v15089_v33 = vpop.f32.mrb[138].mxu1  ;;  %v6309_v38 = vshll.u32 %v6179_v52, 16  ;;  %v15095_v56 = vld [vmem:[#allocation3 + $0xc0] sm:$0xf] }
 0x374   : > { %v6299_v22 = vrot.slane %v16756_v12, 4  ;;  %v6303_v7 = vrot.slane %v16758_v47, 5  ;;  %8719 = vmatprep.mubr.bf16.mxu0 %v9661_v36  ;;  %v6305_v40 = vrot.slane %v16759_v21, 4  ;;  %v6593_v32 = vshrl.u32 %v6430_v49, 16  ;;  %v15097_v12 = vpop.f32.mrb[139].mxu1 }
 0x375   : > { %v6300_v54 = vrot.slane %v16757_v61, 5  ;;  %8566 = vmatprep.mubr.bf16.mxu1 %v9630_v24  ;;  %v6603_v28 = vor.u32 %v16320_v1, %v6600_v13  ;;  %v6605_v61 = vrot.slane %v6600_v13, 4  ;;  %v6612_v47 = vor.u32 %v16323_v19, %v6609_v45 }
 0x376   : > { %8567 = vmatmul.mubr.bf16.gmra.mrb[220].mxu1 %v9614_v11  ;;  %v6620_v24 = vshrl.u32 %v15079_v51, 16  ;;  %v6306_v36 = vor.u32 %v6305_v40, %v6303_v7  ;;  %v6311_v27 = vrot.slane %v6309_v38, 5  ;;  %v9533_v21 = vrot.slane %v6593_v32, 11  ;;  %v6819_v11 = vld [vmem:[#allocation3 + $0xc4] sm:$0x1] }
 0x377   : > { %v6301_v46 = vor.u32 %v6300_v54, %v6299_v22  ;;  %v6623_v52 = vshll.u32 %v15079_v51, 16  ;;  %v6613_v1 = vsel %vm11373_vm8, %v6605_v61, %v6612_v47  ;;  %v6629_v39 = vshrl.u32 %v15095_v56, 16 }
 0x378   : > { %v6622_v30 = vrot.slane %v6620_v24, 7  ;;  %v6307_v22 = vrot.slane %v6306_v36, 4  ;;  %v6604_v13 = vsel %vm11373_vm8, %v9533_v21, %v6603_v28  ;;  %v6632_v45 = vshll.u32 %v15095_v56, 16  ;;  %v11169_v21 = vld [vmem:[#allocation3 + $0xc0] sm:$0xf] }
 0x379   : > { %v6302_v49 = vrot.slane %v6301_v46, 4  ;;  %v6926_v54 = vrot.slane %v6620_v24, 4  ;;  %v9645_v40 = vcombine.low %v6604_v13, %v6613_v1  ;;  %v6631_v38 = vrot.slane %v6629_v39, 7  ;;  %v11168_v24 = vld [vmem:[#allocation3 + $0xbc] sm:$0xf] }
 0x37a   : > { %v6927_v46 = vrot.slane %v6623_v52, 5  ;;  %v6312_v61 = vsel %vm11408_vm11, %v6307_v22, %v6311_v27  ;;  %v6930_v47 = vrot.slane %v6632_v45, 5  ;;  %v6932_v19 = vrot.slane %v6629_v39, 4 }
 0x37b   : > { %v6304_v32 = vsel %vm11408_vm11, %v6302_v49, %v6303_v7  ;;  %v6936_v0 = vshll.u32 %v6819_v11, 16  ;;  %8720 = vmatmul.mubr.bf16.gmra.mrb[248].mxu0 %v9645_v40  ;;  %v9662_v28 = vcombine.low %v15079_v51, %v15095_v56  ;;  %v9615_v62 = vcombine.low %v11168_v24, %v11169_v21  ;;  %v6433_v7 = vld [vmem:[#allocation3 + $0xb8] sm:$0x8]  ;;  %v15123_v40 = vld [vmem:[#allocation3 + $0xd0] sm:$0xf] }
 0x37c   : > { %v9631_v36 = vcombine.low %v6304_v32, %v6312_v61  ;;  %v6928_v53 = vor.u32 %v6927_v46, %v6926_v54  ;;  %v6933_v1 = vor.u32 %v6932_v19, %v6930_v47  ;;  %v16760_v13 = vshrl.u32 %v14398_v44, 16  ;;  %16764 = vst [vmem:[#allocation47_spill] sm:$0xff] %v15123_v40  ;;  %v6436_v24 = vld [vmem:[#allocation3 + $0xcc] sm:$0x8] }
 0x37d   : > { %v6938_v49 = vrot.slane %v6936_v0, 5  ;;  %v16761_v27 = vshll.u32 %v14398_v44, 16  ;;  %8727 = vmatprep.mubr.bf16.mxu0 %v9662_v28  ;;  %v16762_v22 = vshll.u32 %v14407_v15, 16  ;;  %v16763_v51 = vshrl.u32 %v14407_v15, 16  ;;  %v15125_v44 = vpop.f32.mrb[164].mxu0 }
 0x37e   : > { %v6313_v57 = vrot.slane %v16760_v13, 4  ;;  %8574 = vmatprep.mubr.bf16.mxu1 %v9631_v36  ;;  %v6929_v11 = vrot.slane %v6928_v53, 4  ;;  %v6323_v32 = vshll.u32 %v6180_v35, 16  ;;  %v6934_v19 = vrot.slane %v6933_v1, 4  ;;  %v15129_v13 = vpop.f32.mrb[165].mxu0 }
 0x37f   : > { %v6314_v39 = vrot.slane %v16761_v27, 5  ;;  %v6317_v54 = vrot.slane %v16762_v22, 5  ;;  %v6319_v56 = vrot.slane %v16763_v51, 4  ;;  %8575 = vmatmul.mubr.bf16.gmra.mrb[224].mxu1 %v9615_v62  ;;  %v6615_v46 = vshrl.u32 %v6433_v7, 16  ;;  %v15137_v27 = vld [vmem:[#allocation3 + $0xd4] sm:$0xf] }
 0x380   : > { %v6625_v61 = vor.u32 %v6623_v52, %v6622_v30  ;;  %v6931_v53 = vsel %vm11408_vm11, %v6929_v11, %v6930_v47  ;;  %v6325_v28 = vrot.slane %v6323_v32, 5  ;;  %v6627_v21 = vrot.slane %v6622_v30, 4  ;;  %16766 = vst [vmem:[#allocation54_spill] sm:$0xff] %v15137_v27  ;;  %v15149_v22 = vpop.f32.mrb[140].mxu1 }
 0x381   : > { %v6315_v0 = vor.u32 %v6314_v39, %v6313_v57  ;;  %v6320_v36 = vor.u32 %v6319_v56, %v6317_v54  ;;  %v6939_v15 = vsel %vm11408_vm11, %v6934_v19, %v6938_v49  ;;  %v9534_v1 = vrot.slane %v6615_v46, 11  ;;  %v15133_v57 = vpop.f32.mrb[166].mxu0 }
 0x382   : > { %v6634_v62 = vor.u32 %v6632_v45, %v6631_v38  ;;  %v15135_v52 = vcombine.low %v6931_v53, %v6939_v15  ;;  %v6637_v39 = vshrl.u32 %v6436_v24, 16  ;;  %v16327_v47 = vshrl.u32 %v15123_v40, 16  ;;  %v15140_v11 = vpop.f32.mrb[167].mxu0  ;;  %v6439_v15 = vld [vmem:[#allocation3 + $0xe0] sm:$0x8] }
 0x383   : > { %v6316_v35 = vrot.slane %v6315_v0, 4  ;;  %v6321_v7 = vrot.slane %v6320_v36, 4  ;;  %v6626_v49 = vsel %vm11373_vm8, %v9534_v1, %v6625_v61  ;;  %v16326_v38 = vshll.u32 %v15123_v40, 16  ;;  %v15155_v0 = vpop.f32.mrb[141].mxu1  ;;  %v15158_v61 = vld [vmem:[#allocation3 + $0xe4] sm:$0xf] }
 0x384   : > { %16765 = vst [vmem:[#allocation49_spill] sm:$0xff] %v15135_v52  ;;  %v6635_v45 = vsel %vm11373_vm8, %v6627_v21, %v6634_v62  ;;  %v9535_v32 = vrot.slane %v6637_v39, 11  ;;  %v6644_v19 = vrot.slane %v16327_v47, 7  ;;  %v16328_v46 = vshrl.u32 %v15137_v27, 16  ;;  %v15160_v24 = vpop.f32.mrb[142].mxu1 }
 0x385   : > { %v6318_v30 = vsel %vm11408_vm11, %v6316_v35, %v6317_v54  ;;  %v6326_v51 = vsel %vm11408_vm11, %v6321_v7, %v6325_v28  ;;  %v9646_v56 = vcombine.low %v6626_v49, %v6635_v45  ;;  %v9663_v28 = vcombine.low %v15123_v40, %v15137_v27  ;;  %v6181_v21 = vld [vmem:[#allocation3 + $0xec] sm:$0x1]  ;;  %v15167_v35 = vpop.f32.mrb[143].mxu1  ;;  %v11170_v7 = vld [vmem:[#allocation3 + $0xd0] sm:$0xf] }
 0x386   : > { %v9632_v54 = vcombine.low %v6318_v30, %v6326_v51  ;;  %v6647_v53 = vor.u32 %v16326_v38, %v6644_v19  ;;  %v6649_v1 = vrot.slane %v6644_v19, 4  ;;  %v6653_v62 = vrot.slane %v16328_v46, 7  ;;  %v11171_v39 = vld [vmem:[#allocation3 + $0xd4] sm:$0xf]  ;;  %v6441_v51 = vld [vmem:[#allocation3 + $0xe8] sm:$0xf] }
 0x387   : > { %8728 = vmatmul.mubr.bf16.gmra.mrb[252].mxu0 %v9646_v56  ;;  %v9616_v30 = vcombine.low %v11170_v7, %v11171_v39  ;;  %v16767_v49 = vshrl.u32 %v14450_v25, 16  ;;  %v16768_v38 = vshll.u32 %v14450_v25, 16  ;;  %v16770_v36 = vshrl.u32 %v14458_v23, 16 }
 0x388   : > { %8582 = vmatprep.mubr.bf16.mxu1 %v9632_v54  ;;  %v6648_v56 = vsel %vm11373_vm8, %v9535_v32, %v6647_v53  ;;  %8735 = vmatprep.mubr.bf16.mxu0 %v9663_v28  ;;  %v16769_v54 = vshll.u32 %v14458_v23, 16  ;;  %v16771_v52 = vshll.u32 %v15137_v27, 16  ;;  %v6337_v39 = vshll.u32 %v6181_v21, 16 }
 0x389   : > { %v6327_v45 = vrot.slane %v16767_v49, 4  ;;  %v6328_v47 = vrot.slane %v16768_v38, 5  ;;  %v6333_v46 = vrot.slane %v16770_v36, 4  ;;  %8583 = vmatmul.mubr.bf16.gmra.mrb[228].mxu1 %v9616_v30  ;;  %v6659_v49 = vshrl.u32 %v6439_v15, 16 }
 0x38a   : > { %v6331_v19 = vrot.slane %v16769_v54, 5  ;;  %v6656_v7 = vor.u32 %v16771_v52, %v6653_v62  ;;  %v6664_v40 = vshrl.u32 %v15158_v61, 16  ;;  %v6667_v53 = vshll.u32 %v15158_v61, 16  ;;  %v15187_v62 = vpop.f32.mrb[168].mxu0 }
 0x38b   : > { %v6329_v8 = vor.u32 %v6328_v47, %v6327_v45  ;;  %v6673_v25 = vshrl.u32 %v6441_v51, 16  ;;  %v6339_v28 = vrot.slane %v6337_v39, 5  ;;  %v9536_v54 = vrot.slane %v6659_v49, 11  ;;  %v6821_v47 = vld [vmem:[#allocation3 + $0xec] sm:$0x1]  ;;  %v15189_v45 = vpop.f32.mrb[169].mxu0 }
 0x38c   : > { %v6334_v32 = vor.u32 %v6333_v46, %v6331_v19  ;;  %v6657_v38 = vsel %vm11373_vm8, %v6649_v1, %v6656_v7  ;;  %v6666_v23 = vrot.slane %v6664_v40, 7  ;;  %v6676_v30 = vshll.u32 %v6441_v51, 16  ;;  %v15195_v7 = vpop.f32.mrb[170].mxu0 }
 0x38d   : > { %v9647_v36 = vcombine.low %v6648_v56, %v6657_v38  ;;  %v6330_v63 = vrot.slane %v6329_v8, 4  ;;  %v6675_v52 = vrot.slane %v6673_v25, 7  ;;  %v6954_v46 = vrot.slane %v6664_v40, 4  ;;  %v15199_v40 = vpop.f32.mrb[171].mxu0 }
 0x38e   : > { %v6335_v27 = vrot.slane %v6334_v32, 4  ;;  %v6669_v21 = vor.u32 %v6667_v53, %v6666_v23  ;;  %v6671_v15 = vrot.slane %v6666_v23, 4  ;;  %v6955_v56 = vrot.slane %v6667_v53, 5  ;;  %v15202_v53 = vld [vmem:[#allocation3 + $0xf8] sm:$0xf] }
 0x38f   : > { %v6332_v3 = vsel %vm11408_vm11, %v6330_v63, %v6331_v19  ;;  %8736 = vmatmul.mubr.bf16.gmra.mrb[0].mxu0 %v9647_v36  ;;  %v6960_v8 = vrot.slane %v6673_v25, 4  ;;  %v6678_v32 = vor.u32 %v6676_v30, %v6675_v52  ;;  %v6958_v38 = vrot.slane %v6676_v30, 5  ;;  %v11172_v19 = vld [vmem:[#allocation3 + $0xe4] sm:$0xf]  ;;  %16772 = vst [vmem:[#allocation52_spill] sm:$0xff] %v15202_v53  ;;  %v15204_v25 = vpop.f32.mrb[144].mxu1 }
 0x390   : > { %v6340_v1 = vsel %vm11408_vm11, %v6335_v27, %v6339_v28  ;;  %v6670_v49 = vsel %vm11373_vm8, %v9536_v54, %v6669_v21  ;;  %v6956_v23 = vor.u32 %v6955_v56, %v6954_v46  ;;  %v6964_v5 = vshll.u32 %v6821_v47, 16  ;;  %v6182_v28 = vld [vmem:[#allocation3 + $0x100] sm:$0x1] }
 0x391   : > { %v9633_v39 = vcombine.low %v6332_v3, %v6340_v1  ;;  %v9664_v63 = vcombine.low %v15158_v61, %v6441_v51  ;;  %v9617_v27 = vcombine.low %v11172_v19, %v11173_v29  ;;  %v6679_v3 = vsel %vm11373_vm8, %v6671_v15, %v6678_v32  ;;  %v6442_v61 = vld [vmem:[#allocation3 + $0xf4] sm:$0x8]  ;;  %v15212_v51 = vpop.f32.mrb[145].mxu1 }
 0x392   : > { %v6961_v54 = vor.u32 %v6960_v8, %v6958_v38  ;;  %v16773_v36 = vshrl.u32 %v14508_v41, 16  ;;  %v16774_v21 = vshll.u32 %v14508_v41, 16  ;;  %v6957_v29 = vrot.slane %v6956_v23, 4 }
 0x393   : > { %8590 = vmatprep.mubr.bf16.mxu1 %v9633_v39  ;;  %v6966_v47 = vrot.slane %v6964_v5, 5  ;;  %v9648_v46 = vcombine.low %v6670_v49, %v6679_v3  ;;  %8743 = vmatprep.mubr.bf16.mxu0 %v9664_v63  ;;  %v16775_v1 = vshll.u32 %v14510_v42, 16  ;;  %v15216_v39 = vpop.f32.mrb[146].mxu1  ;;  %v16777_v32 = vshrl.u32 %v14510_v42, 16  ;;  %v15228_v49 = vld [vmem:[#allocation3 + $0xfc] sm:$0xf] }
 0x394   : > { %v6341_v52 = vrot.slane %v16773_v36, 4  ;;  %v6342_v30 = vrot.slane %v16774_v21, 5  ;;  %8591 = vmatmul.mubr.bf16.gmra.mrb[232].mxu1 %v9617_v27  ;;  %16776 = vst [vmem:[#allocation55_spill] sm:$0xff] %v15216_v39  ;;  %v6962_v15 = vrot.slane %v6961_v54, 4  ;;  %v6351_v41 = vshll.u32 %v6182_v28, 16  ;;  %v15220_v36 = vpop.f32.mrb[147].mxu1 }
 0x395   : > { %v6345_v56 = vrot.slane %v16775_v1, 5  ;;  %v6347_v19 = vrot.slane %v16777_v32, 4  ;;  %16778 = vst [vmem:[#allocation64_spill] sm:$0xff] %v15220_v36  ;;  %v6959_v23 = vsel %vm11408_vm11, %v6957_v29, %v6958_v38  ;;  %v15226_v5 = vadd.f32 %v14670_v34, %v14641_v17  ;;  %16779 = vst [vmem:[#allocation6_spill] sm:$0xff] %v15228_v49  ;;  %v15252_v32 = vld [vmem:[#allocation3 + $0x10c] sm:$0xf] }
 0x396   : > { %v6343_v8 = vor.u32 %v6342_v30, %v6341_v52  ;;  %v6681_v63 = vshrl.u32 %v6442_v61, 16  ;;  %v16345_v27 = vshrl.u32 %v15202_v53, 16  ;;  %v6967_v3 = vsel %vm11408_vm11, %v6962_v15, %v6966_v47 }
 0x397   : > { %v6348_v54 = vor.u32 %v6347_v19, %v6345_v56  ;;  %v6353_v28 = vrot.slane %v6351_v41, 5  ;;  %v15233_v52 = vcombine.low %v6959_v23, %v6967_v3  ;;  %8744 = vmatmul.mubr.bf16.gmra.mrb[4].mxu0 %v9648_v46  ;;  %v16343_v17 = vshll.u32 %v15202_v53, 16 }
 0x398   : > { %v6344_v42 = vrot.slane %v6343_v8, 4  ;;  %v9537_v21 = vrot.slane %v6681_v63, 11  ;;  %v6688_v38 = vrot.slane %v16345_v27, 7  ;;  %v16344_v61 = vshrl.u32 %v15228_v49, 16  ;;  %v6445_v63 = vld [vmem:[#allocation3 + $0x108] sm:$0x8] }
 0x399   : > { %16780 = vst [vmem:[#allocation66_spill] sm:$0xff] %v15233_v52  ;;  %v6349_v30 = vrot.slane %v6348_v54, 4  ;;  %v16781_v29 = vshrl.u32 %v14790_v60, 16  ;;  %v16783_v1 = vshll.u32 %v14790_v60, 16  ;;  %v16348_v8 = vshll.u32 %v15228_v49, 16  ;;  %v16785_v54 = vld [vmem:[#allocation41_spill] sm:$0xff] }
 0x39a   : > { %v6346_v34 = vsel %vm11408_vm11, %v6344_v42, %v6345_v56  ;;  %v6691_v46 = vor.u32 %v16343_v17, %v6688_v38  ;;  %v6693_v19 = vrot.slane %v6688_v38, 4  ;;  %v6697_v41 = vrot.slane %v16344_v61, 7  ;;  %v6183_v60 = vld [vmem:[#allocation3 + $0x114] sm:$0x1]  ;;  %v11175_v17 = vld [vmem:[#allocation3 + $0xfc] sm:$0xf] }
 0x39b   : > { %v15243_v47 = vrot.slane %v16781_v29, 4  ;;  %v15247_v15 = vrot.slane %v16783_v1, 5  ;;  %v6354_v56 = vsel %vm11408_vm11, %v6349_v30, %v6353_v28  ;;  %v9665_v23 = vcombine.low %v15202_v53, %v15228_v49  ;;  %v11174_v1 = vld [vmem:[#allocation3 + $0xf8] sm:$0xf]  ;;  %v6447_v38 = vld [vmem:[#allocation3 + $0x110] sm:$0xf] }
 0x39c   : > { %v9634_v3 = vcombine.low %v6346_v34, %v6354_v56  ;;  %v6692_v42 = vsel %vm11373_vm8, %v9537_v21, %v6691_v46  ;;  %v15264_v29 = vadd.f32 %v16785_v54, %v14684_v4  ;;  %v9618_v28 = vcombine.low %v11174_v1, %v11175_v17  ;;  %v15266_v30 = vpop.f32.mrb[172].mxu0  ;;  %v16787_v27 = vld [vmem:[#allocation31_spill] sm:$0xff]  ;;  %v16790_v46 = vld [vmem:[#allocation34_spill] sm:$0xff] }
 0x39d   : > { %16782 = vst [vmem:[#allocation8_spill] sm:$0xff] %v15243_v47  ;;  %16784 = vst [vmem:[#allocation9_spill] sm:$0xff] %v15247_v15  ;;  %v6700_v61 = vor.u32 %v16348_v8, %v6697_v41  ;;  %8751 = vmatprep.mubr.bf16.mxu0 %v9665_v23  ;;  %v16788_v52 = vshrl.u32 %v16787_v27, 16  ;;  %v16789_v56 = vshll.u32 %v16787_v27, 16  ;;  %v16791_v53 = vshll.u32 %v16790_v46, 16  ;;  %v15276_v54 = vpop.f32.mrb[173].mxu0 }
 0x39e   : > { %16786 = vst [vmem:[#allocation7_spill] sm:$0xff] %v15266_v30  ;;  %16792 = vst [vmem:[#allocation72_spill] sm:$0xff] %v15276_v54  ;;  %8598 = vmatprep.mubr.bf16.mxu1 %v9634_v3  ;;  %v16793_v17 = vshrl.u32 %v16790_v46, 16  ;;  %v6365_v15 = vshll.u32 %v6183_v60, 16  ;;  %v6703_v47 = vshrl.u32 %v6445_v63, 16  ;;  %v6708_v41 = vshrl.u32 %v15252_v32, 16 }
 0x39f   : > { %v6355_v34 = vrot.slane %v16788_v52, 4  ;;  %v6356_v21 = vrot.slane %v16789_v56, 5  ;;  %v6359_v4 = vrot.slane %v16791_v53, 5  ;;  %v15281_v23 = vpop.f32.mrb[174].mxu0  ;;  %v6701_v52 = vsel %vm11373_vm8, %v6693_v19, %v6700_v61  ;;  %8599 = vmatmul.mubr.bf16.gmra.mrb[236].mxu1 %v9618_v28  ;;  %v6823_v60 = vld [vmem:[#allocation3 + $0x114] sm:$0x1] }
 0x3a0   : > { %v6361_v1 = vrot.slane %v16793_v17, 4  ;;  %16794 = vst [vmem:[#allocation12_spill] sm:$0xff] %v15281_v23  ;;  %v6711_v56 = vshll.u32 %v15252_v32, 16  ;;  %v6717_v53 = vshrl.u32 %v6447_v38, 16  ;;  %v15286_v8 = vpop.f32.mrb[175].mxu0  ;;  %v9649_v3 = vcombine.low %v6692_v42, %v6701_v52  ;;  %v15288_v23 = vpop.f32.mrb[148].mxu1 }
 0x3a1   : > { %v6357_v27 = vor.u32 %v6356_v21, %v6355_v34  ;;  %v6367_v46 = vrot.slane %v6365_v15, 5  ;;  %v9538_v17 = vrot.slane %v6703_v47, 11  ;;  %v6710_v36 = vrot.slane %v6708_v41, 7  ;;  %16795 = vst [vmem:[#allocation13_spill] sm:$0xff] %v15288_v23  ;;  %v15290_v34 = vpop.f32.mrb[149].mxu1 }
 0x3a2   : > { %v6362_v49 = vor.u32 %v6361_v1, %v6359_v4  ;;  %v6719_v39 = vrot.slane %v6717_v53, 7  ;;  %v6720_v54 = vshll.u32 %v6447_v38, 16  ;;  %8752 = vmatmul.mubr.bf16.gmra.mrb[8].mxu0 %v9649_v3  ;;  %v6982_v61 = vrot.slane %v6708_v41, 4  ;;  %v15294_v1 = vpop.f32.mrb[150].mxu1 }
 0x3a3   : > { %v6358_v63 = vrot.slane %v6357_v27, 4  ;;  %v6983_v19 = vrot.slane %v6711_v56, 5  ;;  %v6988_v28 = vrot.slane %v6717_v53, 4  ;;  %v6713_v21 = vor.u32 %v6711_v56, %v6710_v36  ;;  %16796 = vst [vmem:[#allocation56_spill] sm:$0xff] %v15294_v1  ;;  %v15298_v3 = vpop.f32.mrb[151].mxu1 }
 0x3a4   : > { %v6363_v30 = vrot.slane %v6362_v49, 4  ;;  %v6715_v15 = vrot.slane %v6710_v36, 4  ;;  %v6722_v47 = vor.u32 %v6720_v54, %v6719_v39  ;;  %v6986_v23 = vrot.slane %v6720_v54, 5 }
 0x3a5   : > { %v6360_v42 = vsel %vm11408_vm11, %v6358_v63, %v6359_v4  ;;  %v6984_v27 = vor.u32 %v6983_v19, %v6982_v61  ;;  %v6992_v49 = vshll.u32 %v6823_v60, 16  ;;  %v6714_v53 = vsel %vm11373_vm8, %v9538_v17, %v6713_v21  ;;  %v6184_v17 = vld [vmem:[#allocation3 + $0x128] sm:$0x1]  ;;  %v6448_v61 = vld [vmem:[#allocation3 + $0x11c] sm:$0x8] }
 0x3a6   : > { %v6368_v52 = vsel %vm11408_vm11, %v6363_v30, %v6367_v46  ;;  %v6723_v4 = vsel %vm11373_vm8, %v6715_v15, %v6722_v47  ;;  %v9666_v36 = vcombine.low %v15252_v32, %v6447_v38  ;;  %v6989_v56 = vor.u32 %v6988_v28, %v6986_v23  ;;  %v16797_v60 = vld [vmem:[#allocation36_spill] sm:$0xff]  ;;  %v16802_v47 = vld [vmem:[#allocation37_spill] sm:$0xff] }
 0x3a7   : > { %v9635_v41 = vcombine.low %v6360_v42, %v6368_v52  ;;  %v6985_v39 = vrot.slane %v6984_v27, 4  ;;  %v6994_v63 = vrot.slane %v6992_v49, 5  ;;  %v9650_v1 = vcombine.low %v6714_v53, %v6723_v4  ;;  %v11177_v42 = vld [vmem:[#allocation3 + $0x110] sm:$0xf] }
 0x3a8   : > { %8759 = vmatprep.mubr.bf16.mxu0 %v9666_v36  ;;  %v15307_v30 = vadd.f32 %v15019_v16, %v15016_v20  ;;  %v10447_v54 = vadd.f32 %v15047_v26, %v15043_v50  ;;  %v15313_v46 = vadd.f32 %v15029_v55, %v15023_v43  ;;  %v16798_v32 = vshrl.u32 %v16797_v60, 16  ;;  %v11176_v16 = vld [vmem:[#allocation3 + $0x10c] sm:$0xf]  ;;  %v15321_v50 = vld [vmem:[#allocation3 + $0x120] sm:$0xf] }
 0x3a9   : > { %8606 = vmatprep.mubr.bf16.mxu1 %v9635_v41  ;;  %v6987_v19 = vsel %vm11408_vm11, %v6985_v39, %v6986_v23  ;;  %v6990_v28 = vrot.slane %v6989_v56, 4  ;;  %v10450_v20 = vadd.f32 %v15056_v9, %v15051_v14  ;;  %v9619_v21 = vcombine.low %v11176_v16, %v11177_v42  ;;  %v15323_v26 = vld [vmem:[#allocation3 + $0x124] sm:$0xf]  ;;  %v15334_v14 = vpop.f32.mrb[176].mxu0  ;;  %v15336_v9 = vpop.f32.mrb[152].mxu1 }
 0x3aa   : > { %v6369_v38 = vrot.slane %v16798_v32, 4  ;;  %16799 = vst [vmem:[#allocation57_spill] sm:$0xff] %v15323_v26  ;;  %v15326_v43 = vadd.f32 %v10447_v54, %v15226_v5  ;;  %v16801_v55 = vshll.u32 %v16797_v60, 16  ;;  %v16803_v52 = vshll.u32 %v16802_v47, 16  ;;  %8760 = vmatmul.mubr.bf16.gmra.mrb[12].mxu0 %v9650_v1  ;;  %v15343_v36 = vpop.f32.mrb[177].mxu0  ;;  %v15345_v39 = vpop.f32.mrb[153].mxu1 }
 0x3ab   : > { %v16804_v27 = vshrl.u32 %v16802_v47, 16  ;;  %v6995_v41 = vsel %vm11408_vm11, %v6990_v28, %v6994_v63  ;;  %v15341_v53 = vadd.f32 %v10450_v20, %v15264_v29  ;;  %8607 = vmatmul.mubr.bf16.gmra.mrb[240].mxu1 %v9619_v21  ;;  %v6379_v5 = vshll.u32 %v6184_v17, 16  ;;  %v15350_v16 = vpop.f32.mrb[178].mxu0  ;;  %v15352_v63 = vpop.f32.mrb[154].mxu1 }
 0x3ac   : > { %16800 = vst [vmem:[#allocation58_spill] sm:$0xff] %v15326_v43  ;;  %v6370_v15 = vrot.slane %v16801_v55, 5  ;;  %v6373_v23 = vrot.slane %v16803_v52, 5  ;;  %v6725_v4 = vshrl.u32 %v6448_v61, 16  ;;  %v15347_v56 = vcombine.low %v6987_v19, %v6995_v41  ;;  %v15359_v20 = vpop.f32.mrb[179].mxu0  ;;  %v15361_v19 = vpop.f32.mrb[155].mxu1 }
 0x3ad   : > { %v6375_v49 = vrot.slane %v16804_v27, 4  ;;  %16805 = vst [vmem:[#allocation59_spill] sm:$0xff] %v15341_v53  ;;  %v16354_v32 = vshrl.u32 %v15321_v50, 16  ;;  %v16807_v29 = vshrl.u32 %v14805_v48, 16  ;;  %v6381_v1 = vrot.slane %v6379_v5, 5 }
 0x3ae   : > { %16806 = vst [vmem:[#allocation60_spill] sm:$0xff] %v15347_v56  ;;  %v6371_v54 = vor.u32 %v6370_v15, %v6369_v38  ;;  %v9539_v17 = vrot.slane %v6725_v4, 11  ;;  %v16351_v61 = vshrl.u32 %v15323_v26, 16  ;;  %v16353_v55 = vshll.u32 %v15321_v50, 16 }
 0x3af   : > { %v6376_v60 = vor.u32 %v6375_v49, %v6373_v23  ;;  %v15356_v28 = vrot.slane %v16807_v29, 4  ;;  %v6732_v21 = vrot.slane %v16354_v32, 7  ;;  %v16808_v15 = vshrl.u32 %v14891_v58, 16 }
 0x3b0   : > { %v6372_v38 = vrot.slane %v6371_v54, 4  ;;  %v16809_v52 = vshll.u32 %v14891_v58, 16  ;;  %v6741_v49 = vrot.slane %v16351_v61, 7  ;;  %v16352_v41 = vshll.u32 %v15323_v26, 16  ;;  %v15391_v61 = vld [vmem:[#allocation3 + $0x134] sm:$0xf] }
 0x3b1   : > { %v6377_v42 = vrot.slane %v6376_v60, 4  ;;  %v15368_v47 = vrot.slane %v16808_v15, 4  ;;  %v6735_v54 = vor.u32 %v16353_v55, %v6732_v21  ;;  %v6737_v60 = vrot.slane %v6732_v21, 4  ;;  %v6185_v21 = vld [vmem:[#allocation3 + $0x13c] sm:$0x1] }
 0x3b2   : > { %v15372_v27 = vrot.slane %v16809_v52, 5  ;;  %v6374_v5 = vsel %vm11408_vm11, %v6372_v38, %v6373_v23  ;;  %v6744_v58 = vor.u32 %v16352_v41, %v6741_v49  ;;  %v9667_v15 = vcombine.low %v15321_v50, %v15323_v26  ;;  %v6451_v49 = vld [vmem:[#allocation3 + $0x130] sm:$0x8]  ;;  %v6453_v41 = vld [vmem:[#allocation3 + $0x138] sm:$0xf] }
 0x3b3   : > { %v6382_v4 = vsel %vm11408_vm11, %v6377_v42, %v6381_v1  ;;  %v15389_v52 = vadd.f32 %v15081_v18, %v15072_v37  ;;  %v6736_v23 = vsel %vm11373_vm8, %v9539_v17, %v6735_v54  ;;  %v10453_v1 = vadd.f32 %v15129_v13, %v15125_v44  ;;  %v11178_v18 = vld [vmem:[#allocation3 + $0x120] sm:$0xf]  ;;  %v11179_v17 = vld [vmem:[#allocation3 + $0x124] sm:$0xf] }
 0x3b4   : > { %v9636_v29 = vcombine.low %v6374_v5, %v6382_v4  ;;  %v15399_v38 = vadd.f32 %v15097_v12, %v15089_v33  ;;  %v10456_v42 = vadd.f32 %v15140_v11, %v15133_v57  ;;  %v15403_v5 = vpop.f32.mrb[156].mxu1  ;;  %v6745_v37 = vsel %vm11373_vm8, %v6737_v60, %v6744_v58  ;;  %8767 = vmatprep.mubr.bf16.mxu0 %v9667_v15  ;;  %v16811_v44 = vld [vmem:[#allocation35_spill] sm:$0xff]  ;;  %v15411_v57 = vpop.f32.mrb[180].mxu0  ;;  %v16817_v58 = vld [vmem:[#allocation40_spill] sm:$0xff] }
 0x3b5   : > { %16810 = vst [vmem:[#allocation61_spill] sm:$0xff] %v15403_v5  ;;  %v9620_v4 = vcombine.low %v11178_v18, %v11179_v17  ;;  %v16812_v13 = vshrl.u32 %v16811_v44, 16  ;;  %v16813_v33 = vshll.u32 %v16811_v44, 16  ;;  %v15413_v11 = vpop.f32.mrb[157].mxu1  ;;  %v9651_v55 = vcombine.low %v6736_v23, %v6745_v37  ;;  %v15423_v17 = vpop.f32.mrb[181].mxu0 }
 0x3b6   : > { %8614 = vmatprep.mubr.bf16.mxu1 %v9636_v29  ;;  %16814 = vst [vmem:[#allocation62_spill] sm:$0xff] %v15413_v11  ;;  %v15416_v29 = vadd.f32 %v10453_v1, %v15307_v30  ;;  %v15419_v60 = vadd.f32 %v10456_v42, %v15313_v46  ;;  %v16818_v15 = vshll.u32 %v16817_v58, 16  ;;  %v6393_v53 = vshll.u32 %v6185_v21, 16  ;;  %v15429_v37 = vpop.f32.mrb[182].mxu0 }
 0x3b7   : > { %v6383_v54 = vrot.slane %v16812_v13, 4  ;;  %v6384_v12 = vrot.slane %v16813_v33, 5  ;;  %v15425_v13 = vpop.f32.mrb[158].mxu1  ;;  %8615 = vmatmul.mubr.bf16.gmra.mrb[244].mxu1 %v9620_v4  ;;  %v16820_v33 = vshrl.u32 %v16817_v58, 16  ;;  %v6747_v23 = vshrl.u32 %v6451_v49, 16  ;;  %16821 = vst [vmem:[#allocation68_spill] sm:$0xff] %v15429_v37  ;;  %8768 = vmatmul.mubr.bf16.gmra.mrb[16].mxu0 %v9651_v55 }
 0x3b8   : > { %16815 = vst [vmem:[#allocation63_spill] sm:$0xff] %v15416_v29  ;;  %16816 = vst [vmem:[#allocation65_spill] sm:$0xff] %v15419_v60  ;;  %v6387_v18 = vrot.slane %v16818_v15, 5  ;;  %v15431_v30 = vpop.f32.mrb[159].mxu1  ;;  %v6752_v46 = vshrl.u32 %v15391_v61, 16  ;;  %v6755_v1 = vshll.u32 %v15391_v61, 16  ;;  %v10477_v59 = vadd.f32 %v15423_v17, %v15411_v57 }
 0x3b9   : > { %16819 = vst [vmem:[#allocation67_spill] sm:$0xff] %v15425_v13  ;;  %v6385_v44 = vor.u32 %v6384_v12, %v6383_v54  ;;  %v6389_v32 = vrot.slane %v16820_v33, 4  ;;  %16822 = vst [vmem:[#allocation69_spill] sm:$0xff] %v15431_v30  ;;  %v6761_v42 = vshrl.u32 %v6453_v41, 16  ;;  %v6764_v15 = vshll.u32 %v6453_v41, 16  ;;  %v15435_v60 = vpop.f32.mrb[183].mxu0 }
 0x3ba   : > { %16823 = vst [vmem:[#allocation76_spill] sm:$0xff] %v15435_v60  ;;  %v6395_v12 = vrot.slane %v6393_v53, 5  ;;  %v9540_v58 = vrot.slane %v6747_v23, 11  ;;  %v6754_v33 = vrot.slane %v6752_v46, 7  ;;  %v6825_v49 = vld [vmem:[#allocation3 + $0x13c] sm:$0x1]  ;;  %v9668_v23 = vcombine.low %v15391_v61, %v6453_v41 }
 0x3bb   : > { %v6386_v4 = vrot.slane %v6385_v44, 4  ;;  %v6390_v54 = vor.u32 %v6389_v32, %v6387_v18  ;;  %v6763_v21 = vrot.slane %v6761_v42, 7  ;;  %v7010_v29 = vrot.slane %v6752_v46, 4  ;;  %v15442_v60 = vpop.f32.mrb[160].mxu1 }
 0x3bc   : > { %v7011_v43 = vrot.slane %v6755_v1, 5  ;;  %v7014_v30 = vrot.slane %v6764_v15, 5  ;;  %v7016_v13 = vrot.slane %v6761_v42, 4  ;;  %v6757_v11 = vor.u32 %v6755_v1, %v6754_v33  ;;  %8775 = vmatprep.mubr.bf16.mxu0 %v9668_v23 }
 0x3bd   : > { %v6388_v55 = vsel %vm11408_vm11, %v6386_v4, %v6387_v18  ;;  %v6391_v56 = vrot.slane %v6390_v54, 4  ;;  %v6759_v5 = vrot.slane %v6754_v33, 4  ;;  %v6766_v26 = vor.u32 %v6764_v15, %v6763_v21  ;;  %v507_v4 = vld [vmem:[#allocation3 + $0x150] sm:$0x1]  ;;  %v15448_v15 = vpop.f32.mrb[184].mxu0 }
 0x3be   : > { %v7012_v37 = vor.u32 %v7011_v43, %v7010_v29  ;;  %v7017_v53 = vor.u32 %v7016_v13, %v7014_v30  ;;  %v7020_v44 = vshll.u32 %v6825_v49, 16  ;;  %v6758_v18 = vsel %vm11373_vm8, %v9540_v58, %v6757_v11  ;;  %v15450_v43 = vpop.f32.mrb[161].mxu1  ;;  %v15456_v41 = vpop.f32.mrb[185].mxu0  ;;  %v11180_v33 = vld [vmem:[#allocation3 + $0x134] sm:$0xf] }
 0x3bf   : > { %v6396_v32 = vsel %vm11408_vm11, %v6391_v56, %v6395_v12  ;;  %v6767_v42 = vsel %vm11373_vm8, %v6759_v5, %v6766_v26  ;;  %v15454_v61 = vadd.f32 %v15155_v0, %v15149_v22  ;;  %v15458_v11 = vpop.f32.mrb[162].mxu1  ;;  %v10459_v5 = vadd.f32 %v15189_v45, %v15187_v62  ;;  %v6454_v22 = vld [vmem:[#allocation3 + $0x144] sm:$0x8]  ;;  %v15470_v0 = vld [vmem:[#allocation3 + $0x148] sm:$0xf]  ;;  %v15472_v12 = vpop.f32.mrb[186].mxu0 }
 0x3c0   : > { %v9637_v46 = vcombine.low %v6388_v55, %v6396_v32  ;;  %v7013_v1 = vrot.slane %v7012_v37, 4  ;;  %v7018_v56 = vrot.slane %v7017_v53, 4  ;;  %v7022_v29 = vrot.slane %v7020_v44, 5  ;;  %16824 = vst [vmem:[#allocation70_spill] sm:$0xff] %v15470_v0  ;;  %v15474_v58 = vpop.f32.mrb[163].mxu1 }
 0x3c1   : > { %v9652_v13 = vcombine.low %v6758_v18, %v6767_v42  ;;  %v15466_v37 = vadd.f32 %v15167_v35, %v15160_v24  ;;  %v10462_v54 = vadd.f32 %v15199_v40, %v15195_v7  ;;  %v11181_v21 = vld [vmem:[#allocation3 + $0x138] sm:$0xf]  ;;  %v508_v24 = vsel %vm11355_vm6, 0, %v507_v4  ;;  %v15482_v7 = vld [vmem:[#allocation3 + $0x14c] sm:$0xf]  ;;  %v15484_v40 = vpop.f32.mrb[187].mxu0 }
 0x3c2   : > { %8622 = vmatprep.mubr.bf16.mxu1 %v9637_v46  ;;  %v7015_v26 = vsel %vm11408_vm11, %v7013_v1, %v7014_v30  ;;  %v7023_v30 = vsel %vm11408_vm11, %v7018_v56, %v7022_v29  ;;  %v9621_v62 = vcombine.low %v11180_v33, %v11181_v21  ;;  %v16825_v35 = vshrl.u32 %v14752_v10, 16  ;;  %16826 = vst [vmem:[#allocation71_spill] sm:$0xff] %v15482_v7 }
 0x3c3   : > { %8776 = vmatmul.mubr.bf16.gmra.mrb[20].mxu0 %v9652_v13  ;;  %v15486_v49 = vcombine.low %v7015_v26, %v7023_v30  ;;  %v15489_v55 = vadd.f32 %v10459_v5, %v15389_v52  ;;  %v15492_v32 = vadd.f32 %v10462_v54, %v15399_v38  ;;  %509 = vst [vmem:[#allocation3 + $0x150] sm:$0x1] %v508_v24  ;;  %v16830_v53 = vshll.u32 %v14752_v10, 16  ;;  %v16833_v52 = vld [vmem:[#allocation39_spill] sm:$0xff]  ;;  %v16835_v38 = vld [vmem:[#allocation42_spill] sm:$0xff] }
 0x3c4   : > { %v6397_v45 = vrot.slane %v16825_v35, 4  ;;  %8623 = vmatmul.mubr.bf16.gmra.mrb[248].mxu1 %v9621_v62  ;;  %v16831_v23 = vshll.u32 %v14758_v2, 16  ;;  %v16832_v18 = vshrl.u32 %v14758_v2, 16  ;;  %v6769_v1 = vshrl.u32 %v6454_v22, 16 }
 0x3c5   : > { %16827 = vst [vmem:[#allocation45_spill] sm:$0xff] %v15486_v49  ;;  %16828 = vst [vmem:[#allocation48_spill] sm:$0xff] %v15489_v55  ;;  %v6398_v44 = vrot.slane %v16830_v53, 5  ;;  %v16359_v4 = vshrl.u32 %v15470_v0, 16  ;;  %v16834_v56 = vshrl.u32 %v16833_v52, 16  ;;  %v16836_v13 = vshrl.u32 %v16835_v38, 16 }
 0x3c6   : > { %16829 = vst [vmem:[#allocation53_spill] sm:$0xff] %v15492_v32  ;;  %v15498_v46 = vrot.slane %v16831_v23, 5  ;;  %v6403_v42 = vrot.slane %v16832_v18, 4  ;;  %v16357_v5 = vshrl.u32 %v15482_v7, 16  ;;  %v9541_v30 = vrot.slane %v6769_v1, 11 }
 0x3c7   : > { %v15505_v29 = vrot.slane %v16834_v56, 4  ;;  %v15509_v26 = vrot.slane %v16836_v13, 4  ;;  %v6399_v10 = vor.u32 %v6398_v44, %v6397_v45  ;;  %v6776_v2 = vrot.slane %v16359_v4, 7  ;;  %v15523_v45 = vpop.f32.mrb[164].mxu1 }
 0x3c8   : > { %v6404_v54 = vor.u32 %v6403_v42, %v15498_v46  ;;  %v16358_v22 = vshll.u32 %v15470_v0, 16  ;;  %v16837_v33 = vshll.u32 %v16835_v38, 16  ;;  %v6785_v24 = vrot.slane %v16357_v5, 7  ;;  %v15529_v42 = vpop.f32.mrb[188].mxu0  ;;  %v15531_v1 = vpop.f32.mrb[165].mxu1 }
 0x3c9   : > { %v6400_v62 = vrot.slane %v6399_v10, 4  ;;  %v16360_v35 = vshll.u32 %v15482_v7, 16  ;;  %v6781_v23 = vrot.slane %v6776_v2, 4  ;;  %v9669_v18 = vcombine.low %v15470_v0, %v15482_v7  ;;  %16838 = vst [vmem:[#allocation73_spill] sm:$0xff] %v15531_v1  ;;  %v16839_v10 = vld [vmem:[#allocation7_spill] sm:$0xff]  ;;  %v15542_v5 = vpop.f32.mrb[189].mxu0 }
 0x3ca   : > { %v15518_v21 = vrot.slane %v16837_v33, 5  ;;  %v6405_v53 = vrot.slane %v6404_v54, 4  ;;  %v6779_v44 = vor.u32 %v16358_v22, %v6776_v2  ;;  %v10359_v13 = vadd.f32 %v15212_v51, %v15204_v25  ;;  %v16840_v54 = vld [vmem:[#allocation72_spill] sm:$0xff]  ;;  %v6812_v33 = vld [vmem:[#allocation3 + $0x38] sm:$0x1]  ;;  %v15544_v22 = vpop.f32.mrb[166].mxu1 }
 0x3cb   : > { %v6402_v56 = vsel %vm11408_vm11, %v6400_v62, %v15498_v46  ;;  %v6788_v38 = vor.u32 %v16360_v35, %v6785_v24  ;;  %v10465_v2 = vadd.f32 %v16840_v54, %v16839_v10  ;;  %16841 = vst [vmem:[#allocation74_spill] sm:$0xff] %v15544_v22  ;;  %v6186_v4 = vld [vmem:[#allocation3 + $0x150] sm:$0x1]  ;;  %8783 = vmatprep.mubr.bf16.mxu0 %v9669_v18  ;;  %v16842_v46 = vld [vmem:[#allocation55_spill] sm:$0xff]  ;;  %v16843_v62 = vld [vmem:[#allocation64_spill] sm:$0xff]  ;;  %v15552_v10 = vpop.f32.mrb[190].mxu0 }
 0x3cc   : > { %v6780_v32 = vsel %vm11373_vm8, %v9541_v30, %v6779_v44  ;;  %v10362_v55 = vadd.f32 %v16843_v62, %v16842_v46  ;;  %v16844_v24 = vld [vmem:[#allocation12_spill] sm:$0xff]  ;;  %v15554_v54 = vpop.f32.mrb[167].mxu1  ;;  %v6407_v7 = vshll.u32 %v6186_v4, 16  ;;  %v16848_v18 = vld [vmem:[#allocation9_spill] sm:$0xff]  ;;  %v15563_v62 = vpop.f32.mrb[191].mxu0  ;;  %v6886_v57 = vor.u32 %v15518_v21, %v15509_v26 }
 0x3cd   : > { %v10468_v35 = vadd.f32 %v15286_v8, %v16844_v24  ;;  %v11182_v25 = vld [vmem:[#allocation3 + $0x148] sm:$0xf]  ;;  %v11183_v51 = vld [vmem:[#allocation3 + $0x14c] sm:$0xf]  ;;  %16845 = vst [vmem:[#allocation75_spill] sm:$0xff] %v15554_v54  ;;  %v6789_v0 = vsel %vm11373_vm8, %v6781_v23, %v6788_v38  ;;  %v15559_v30 = vadd.f32 %v10465_v2, %v15454_v61  ;;  %v6838_v54 = vshll.u32 %v6812_v33, 16 }
 0x3ce   : > { %v9622_v49 = vcombine.low %v11182_v25, %v11183_v51  ;;  %v16847_v44 = vld [vmem:[#allocation8_spill] sm:$0xff]  ;;  %v9653_v8 = vcombine.low %v6780_v32, %v6789_v0  ;;  %v16850_v25 = vshll.u32 %v14805_v48, 16  ;;  %v410_v4 = vld [vmem:[#allocation3 + $0x164] sm:$0x1]  ;;  %v6409_v22 = vrot.slane %v6407_v7, 5  ;;  %v16851_v23 = vld [vmem:[#allocation13_spill] sm:$0xff] }
 0x3cf   : > { %16846 = vst [vmem:[#allocation77_spill] sm:$0xff] %v15559_v30  ;;  %v6830_v46 = vor.u32 %v16848_v18, %v16847_v44  ;;  %v15566_v24 = vadd.f32 %v10468_v35, %v15466_v37  ;;  %v15572_v61 = vadd.f32 %v15290_v34, %v16851_v23  ;;  %v10471_v38 = vadd.f32 %v15343_v36, %v15334_v14  ;;  %v6457_v2 = vld [vmem:[#allocation3 + $0x158] sm:$0x8]  ;;  %v16852_v32 = vld [vmem:[#allocation56_spill] sm:$0xff]  ;;  %v15583_v35 = vld [vmem:[#allocation3 + $0x15c] sm:$0xf] }
 0x3d0   : > { %v6832_v51 = vrot.slane %v16850_v25, 5  ;;  %8784 = vmatmul.mubr.bf16.gmra.mrb[24].mxu0 %v9653_v8  ;;  %v6840_v37 = vrot.slane %v6838_v54, 5  ;;  %v15579_v48 = vadd.f32 %v15298_v3, %v16852_v32  ;;  %v10474_v7 = vadd.f32 %v15359_v20, %v15350_v16  ;;  %16853 = vst [vmem:[#allocation79_spill] sm:$0xff] %v15583_v35  ;;  %v15585_v33 = vld [vmem:[#allocation3 + $0x160] sm:$0xf]  ;;  %v15597_v20 = vpop.f32.mrb[168].mxu1 }
 0x3d1   : > { %16849 = vst [vmem:[#allocation78_spill] sm:$0xff] %v15566_v24  ;;  %v6831_v1 = vrot.slane %v6830_v46, 4  ;;  %16854 = vst [vmem:[#allocation80_spill] sm:$0xff] %v15585_v33  ;;  %v6410_v34 = vsel %vm11408_vm11, %v6405_v53, %v6409_v22  ;;  %v15591_v36 = vadd.f32 %v10471_v38, %v10359_v13  ;;  %v6791_v16 = vshrl.u32 %v6457_v2, 16  ;;  %v15603_v13 = vpop.f32.mrb[192].mxu0  ;;  %v15605_v6 = vpop.f32.mrb[169].mxu1 }
 0x3d2   : > { %v6835_v0 = vor.u32 %v15356_v28, %v6832_v51  ;;  %v411_v28 = vsel %vm11355_vm6, 0, %v410_v4  ;;  %v9638_v3 = vcombine.low %v6402_v56, %v6410_v34  ;;  %v15595_v44 = vadd.f32 %v10474_v7, %v10362_v55  ;;  %v16857_v56 = vld [vmem:[#allocation44_spill] sm:$0xff]  ;;  %v15617_v23 = vpop.f32.mrb[193].mxu0  ;;  %v15619_v38 = vpop.f32.mrb[170].mxu1 }
 0x3d3   : > { %v6833_v14 = vsel %vm11408_vm11, %v6831_v1, %v6832_v51  ;;  %16855 = vst [vmem:[#allocation11_spill] sm:$0xff] %v15591_v36  ;;  %412 = vst [vmem:[#allocation3 + $0x164] sm:$0x1] %v411_v28  ;;  %v16366_v18 = vshrl.u32 %v15583_v35, 16  ;;  %v16367_v22 = vshll.u32 %v15583_v35, 16  ;;  %v16365_v53 = vshrl.u32 %v15585_v33, 16 }
 0x3d4   : > { %v6836_v54 = vrot.slane %v6835_v0, 4  ;;  %16856 = vst [vmem:[#allocation16_spill] sm:$0xff] %v15595_v44  ;;  %v16368_v1 = vshll.u32 %v15585_v33, 16  ;;  %v16858_v46 = vshrl.u32 %v16857_v56, 16  ;;  %8630 = vmatprep.mubr.bf16.mxu1 %v9638_v3  ;;  %v9670_v25 = vcombine.low %v15583_v35, %v15585_v33  ;;  %v6814_v51 = vld [vmem:[#allocation3 + $0x60] sm:$0x1] }
 0x3d5   : > { %v6858_v4 = vor.u32 %v15372_v27, %v15368_v47  ;;  %8631 = vmatmul.mubr.bf16.gmra.mrb[252].mxu1 %v9622_v49  ;;  %v9542_v0 = vrot.slane %v6791_v16, 11  ;;  %v6798_v32 = vrot.slane %v16366_v18, 7  ;;  %v15625_v7 = vpop.f32.mrb[194].mxu0  ;;  %v15627_v34 = vpop.f32.mrb[171].mxu1  ;;  %v16859_v28 = vld [vmem:[#allocation43_spill] sm:$0xff]  ;;  %v16862_v49 = vld [vmem:[#allocation50_spill] sm:$0xff] }
 0x3d6   : > { %v15609_v55 = vrot.slane %v16858_v46, 4  ;;  %v6841_v8 = vsel %vm11408_vm11, %v6836_v54, %v6840_v37  ;;  %v6807_v37 = vrot.slane %v16365_v53, 7  ;;  %v16860_v3 = vshrl.u32 %v16859_v28, 16  ;;  %8791 = vmatprep.mubr.bf16.mxu0 %v9670_v25  ;;  %v16865_v44 = vld [vmem:[#allocation47_spill] sm:$0xff] }
 0x3d7   : > { %v9671_v2 = vcombine.low %v6833_v14, %v6841_v8  ;;  %v16861_v27 = vshll.u32 %v16859_v28, 16  ;;  %v16863_v14 = vshrl.u32 %v16862_v49, 16  ;;  %v6859_v46 = vrot.slane %v6858_v4, 4  ;;  %v15641_v8 = vpop.f32.mrb[195].mxu0 }
 0x3d8   : > { %v15631_v47 = vrot.slane %v16860_v3, 4  ;;  %v6801_v53 = vor.u32 %v16367_v22, %v6798_v32  ;;  %v6803_v18 = vrot.slane %v6798_v32, 4  ;;  %v6810_v3 = vor.u32 %v16368_v1, %v6807_v37  ;;  %v16868_v22 = vld [vmem:[#allocation54_spill] sm:$0xff]  ;;  %v15696_v17 = vpop.f32.mrb[196].mxu0 }
 0x3d9   : > { %v15635_v54 = vrot.slane %v16861_v27, 5  ;;  %v15639_v16 = vrot.slane %v16863_v14, 4  ;;  %10853 = vmatprep.mubr.bf16.mxu1 %v9671_v2  ;;  %v16864_v28 = vshll.u32 %v16833_v52, 16  ;;  %v16866_v36 = vshrl.u32 %v16865_v44, 16 }
 0x3da   : > { %v16867_v25 = vshll.u32 %v16865_v44, 16  ;;  %v6866_v14 = vshll.u32 %v6814_v51, 16  ;;  %v10371_v2 = vadd.f32 %v15345_v39, %v15336_v9  ;;  %v16869_v32 = vshrl.u32 %v16868_v22, 16 }
 0x3db   : > { %v6860_v27 = vrot.slane %v16864_v28, 5  ;;  %v15651_v24 = vrot.slane %v16866_v36, 4  ;;  %v6802_v52 = vsel %vm11373_vm8, %v9542_v0, %v6801_v53  ;;  %v6811_v37 = vsel %vm11373_vm8, %v6803_v18, %v6810_v3  ;;  %v16870_v28 = vld [vmem:[#allocation52_spill] sm:$0xff]  ;;  %v15682_v18 = vpop.f32.mrb[172].mxu1  ;;  %v16873_v0 = vld [vmem:[#allocation6_spill] sm:$0xff] }
 0x3dc   : > { %v15655_v4 = vrot.slane %v16867_v25, 5  ;;  %v15661_v30 = vrot.slane %v16869_v32, 4  ;;  %v16871_v44 = vshrl.u32 %v16870_v28, 16  ;;  %v16872_v51 = vshll.u32 %v16870_v28, 16  ;;  %v6816_v32 = vld [vmem:[#allocation3 + $0x88] sm:$0x1] }
 0x3dd   : > { %v6863_v36 = vor.u32 %v15505_v29, %v6860_v27  ;;  %v9654_v9 = vcombine.low %v6802_v52, %v6811_v37  ;;  %v6861_v39 = vsel %vm11408_vm11, %v6859_v46, %v6860_v27  ;;  %v6868_v53 = vrot.slane %v6866_v14, 5  ;;  %v16876_v46 = vld [vmem:[#allocation68_spill] sm:$0xff] }
 0x3de   : > { %v15670_v25 = vrot.slane %v16871_v44, 4  ;;  %v15674_v1 = vrot.slane %v16872_v51, 5  ;;  %v10374_v29 = vadd.f32 %v15361_v19, %v15352_v63  ;;  %v16874_v3 = vshrl.u32 %v16873_v0, 16  ;;  %v16877_v27 = vld [vmem:[#allocation76_spill] sm:$0xff]  ;;  %v15698_v63 = vpop.f32.mrb[173].mxu1  ;;  %v16878_v19 = vld [vmem:[#allocation38_spill] sm:$0xff] }
 0x3df   : > { %v6864_v33 = vrot.slane %v6863_v36, 4  ;;  %v16875_v52 = vshrl.u32 %v15321_v50, 16  ;;  %8792 = vmatmul.mubr.bf16.gmra.mrb[28].mxu0 %v9654_v9  ;;  %v10480_v14 = vadd.f32 %v16877_v27, %v16876_v46  ;;  %10854 = vmatmul.mubr.bf16.vlgmr.msra.gmra.mrb[0].mxu1 %v16878_v19  ;;  %v15704_v44 = vadd.f32 %v10477_v59, %v15572_v61  ;;  %v15710_v46 = vpop.f32.mrb[174].mxu1 }
 0x3e0   : > { %v15686_v28 = vrot.slane %v16874_v3, 4  ;;  %v16880_v51 = vshll.u32 %v16857_v56, 16  ;;  %v6894_v3 = vshll.u32 %v6816_v32, 16  ;;  %16881 = vst [vmem:[#allocation18_spill] sm:$0xff] %v15710_v46  ;;  %v16882_v26 = vshll.u32 %v15321_v50, 16  ;;  %v15721_v59 = vpop.f32.mrb[175].mxu1 }
 0x3e1   : > { %v15690_v37 = vrot.slane %v16875_v52, 4  ;;  %v6869_v36 = vsel %vm11408_vm11, %v6864_v33, %v6868_v53  ;;  %16879 = vst [vmem:[#allocation14_spill] sm:$0xff] %v15704_v44  ;;  %v15708_v52 = vpop.f32.mrb[197].mxu0  ;;  %v15717_v19 = vadd.f32 %v10480_v14, %v15579_v48  ;;  %v6887_v33 = vrot.slane %v6886_v57, 4  ;;  %v6818_v53 = vld [vmem:[#allocation3 + $0xb0] sm:$0x1] }
 0x3e2   : > { %v6888_v9 = vrot.slane %v16880_v51, 5  ;;  %v15714_v21 = vrot.slane %v16882_v26, 5  ;;  %v9673_v27 = vcombine.low %v6861_v39, %v6869_v36  ;;  %v15719_v61 = vpop.f32.mrb[198].mxu0  ;;  %16884 = vst [vmem:[#allocation15_spill] sm:$0xff] %v15721_v59  ;;  %v16885_v56 = vld [vmem:[#allocation57_spill] sm:$0xff]  ;;  %v6896_v35 = vrot.slane %v6894_v3, 5 }
 0x3e3   : > { %16883 = vst [vmem:[#allocation10_spill] sm:$0xff] %v15717_v19  ;;  %v16886_v32 = vshrl.u32 %v16885_v56, 16  ;;  %v16887_v50 = vld [vmem:[#allocation61_spill] sm:$0xff]  ;;  %v16888_v26 = vld [vmem:[#allocation62_spill] sm:$0xff]  ;;  %v15730_v39 = vpop.f32.mrb[199].mxu0  ;;  %v10483_v14 = vadd.f32 %v15456_v41, %v15448_v15  ;;  %v16889_v57 = vld [vmem:[#allocation67_spill] sm:$0xff]  ;;  %v6914_v3 = vor.u32 %v15635_v54, %v15631_v47  ;;  %v10383_v15 = vadd.f32 %v15450_v43, %v15442_v60 }
 0x3e4   : > { %v6891_v44 = vor.u32 %v15609_v55, %v6888_v9  ;;  %v10377_v46 = vadd.f32 %v16888_v26, %v16887_v50  ;;  %10857 = vmatprep.mubr.bf16.mxu1 %v9673_v27  ;;  %v6889_v48 = vsel %vm11408_vm11, %v6887_v33, %v6888_v9  ;;  %v16890_v36 = vld [vmem:[#allocation69_spill] sm:$0xff]  ;;  %v16891_v50 = vshll.u32 %v16862_v49, 16  ;;  %v6820_v49 = vld [vmem:[#allocation3 + $0xd8] sm:$0x1] }
 0x3e5   : > { %v15725_v51 = vrot.slane %v16886_v32, 4  ;;  %v10380_v19 = vadd.f32 %v16890_v36, %v16889_v57  ;;  %v10486_v32 = vadd.f32 %v15484_v40, %v15472_v12  ;;  %v6922_v27 = vshll.u32 %v6818_v53, 16  ;;  %v16892_v43 = vld [vmem:[#allocation46_spill] sm:$0xff]  ;;  %v16896_v36 = vld [vmem:[#allocation75_spill] sm:$0xff] }
 0x3e6   : > { %v6892_v55 = vrot.slane %v6891_v44, 4  ;;  %v6916_v26 = vrot.slane %v16891_v50, 5  ;;  %v15744_v59 = vadd.f32 %v10483_v14, %v10371_v2  ;;  %v10489_v41 = vadd.f32 %v15542_v5, %v15529_v42  ;;  %v10405_v14 = vpop.f32.mrb[176].mxu1 }
 0x3e7   : > { %v15746_v9 = vadd.f32 %v10486_v32, %v10374_v29  ;;  %v6915_v40 = vrot.slane %v6914_v3, 4  ;;  %v6924_v54 = vrot.slane %v6922_v27, 5  ;;  %v10386_v2 = vadd.f32 %v15474_v58, %v15458_v11  ;;  %10858 = vmatmul.mubr.bf16.gmra.mrb[4].mxu1 %v16892_v43  ;;  %v16894_v58 = vld [vmem:[#allocation73_spill] sm:$0xff]  ;;  %v10406_v3 = vpop.f32.mrb[177].mxu1 }
 0x3e8   : > { %v6897_v12 = vsel %vm11408_vm11, %v6892_v55, %v6896_v35  ;;  %v6919_v47 = vor.u32 %v15639_v16, %v6916_v26  ;;  %v15755_v33 = vadd.f32 %v10489_v41, %v10377_v46  ;;  %v10492_v60 = vadd.f32 %v15563_v62, %v15552_v10  ;;  %v10505_v46 = vpop.f32.mrb[200].mxu0  ;;  %v10408_v27 = vpop.f32.mrb[178].mxu1 }
 0x3e9   : > { %v9675_v44 = vcombine.low %v6889_v48, %v6897_v12  ;;  %v6917_v5 = vsel %vm11408_vm11, %v6915_v40, %v6916_v26  ;;  %v6942_v35 = vor.u32 %v15655_v4, %v15651_v24  ;;  %v16893_v16 = vshll.u32 %v16868_v22, 16  ;;  %v10506_v48 = vpop.f32.mrb[201].mxu0  ;;  %v16895_v4 = vld [vmem:[#allocation74_spill] sm:$0xff] }
 0x3ea   : > { %v6920_v42 = vrot.slane %v6919_v47, 4  ;;  %v15768_v53 = vadd.f32 %v10492_v60, %v10380_v19  ;;  %v6950_v11 = vshll.u32 %v6820_v49, 16  ;;  %v10389_v10 = vadd.f32 %v16894_v58, %v15523_v45  ;;  %v6822_v19 = vld [vmem:[#allocation3 + $0x100] sm:$0x1]  ;;  %v10508_v55 = vpop.f32.mrb[202].mxu0  ;;  %v16900_v58 = vld [vmem:[#allocation18_spill] sm:$0xff] }
 0x3eb   : > { %v6944_v29 = vrot.slane %v16893_v16, 5  ;;  %10861 = vmatprep.mubr.bf16.mxu1 %v9675_v44  ;;  %v10495_v62 = vadd.f32 %v15617_v23, %v15603_v13  ;;  %v6943_v24 = vrot.slane %v6942_v35, 4  ;;  %v10392_v32 = vadd.f32 %v16896_v36, %v16895_v4  ;;  %v10509_v23 = vpop.f32.mrb[203].mxu0  ;;  %v16902_v4 = vld [vmem:[#allocation49_spill] sm:$0xff] }
 0x3ec   : > { %v6925_v57 = vsel %vm11408_vm11, %v6920_v42, %v6924_v54  ;;  %v6952_v26 = vrot.slane %v6950_v11, 5  ;;  %v10498_v13 = vadd.f32 %v15641_v8, %v15625_v7  ;;  %v16897_v40 = vshll.u32 %v16873_v0, 16  ;;  %v10409_v54 = vpop.f32.mrb[179].mxu1  ;;  %v10511_v36 = vpop.f32.mrb[204].mxu0 }
 0x3ed   : > { %v6947_v22 = vor.u32 %v15661_v30, %v6944_v29  ;;  %v9677_v50 = vcombine.low %v6917_v5, %v6925_v57  ;;  %v15779_v45 = vadd.f32 %v10495_v62, %v10383_v15  ;;  %v6945_v41 = vsel %vm11408_vm11, %v6943_v24, %v6944_v29 }
 0x3ee   : > { %v6970_v30 = vor.u32 %v15674_v1, %v15670_v25  ;;  %v6972_v47 = vrot.slane %v16897_v40, 5  ;;  %v15789_v49 = vadd.f32 %v10498_v13, %v10386_v2  ;;  %v6978_v15 = vshll.u32 %v6822_v19, 16  ;;  %v6824_v25 = vld [vmem:[#allocation3 + $0x128] sm:$0x1]  ;;  %v10411_v19 = vpop.f32.mrb[180].mxu1  ;;  %v16903_v40 = vld [vmem:[#allocation70_spill] sm:$0xff] }
 0x3ef   : > { %v6948_v12 = vrot.slane %v6947_v22, 4  ;;  %v10395_v44 = vadd.f32 %v15605_v6, %v15597_v20  ;;  %v10501_v7 = vadd.f32 %v15708_v52, %v15696_v17  ;;  %v10398_v1 = vadd.f32 %v15627_v34, %v15619_v38  ;;  %v16898_v6 = vld [vmem:[#allocation51_spill] sm:$0xff] }
 0x3f0   : > { %v6971_v60 = vrot.slane %v6970_v30, 4  ;;  %v6975_v43 = vor.u32 %v15686_v28, %v6972_v47  ;;  %v6980_v2 = vrot.slane %v6978_v15, 5  ;;  %v10504_v20 = vadd.f32 %v15730_v39, %v15719_v61  ;;  %10862 = vmatmul.mubr.bf16.gmra.mrb[8].mxu1 %v16898_v6  ;;  %v16910_v6 = vld [vmem:[#allocation79_spill] sm:$0xff] }
 0x3f1   : > { %v6953_v8 = vsel %vm11408_vm11, %v6948_v12, %v6952_v26  ;;  %v15800_v5 = vadd.f32 %v10501_v7, %v10389_v10  ;;  %v6998_v28 = vor.u32 %v15714_v21, %v15690_v37  ;;  %v16899_v42 = vshll.u32 %v16885_v56, 16  ;;  %10865 = vmatprep.mubr.bf16.mxu1 %v9677_v50  ;;  %v16901_v10 = vld [vmem:[#allocation15_spill] sm:$0xff]  ;;  %v10412_v26 = vpop.f32.mrb[181].mxu1 }
 0x3f2   : > { %v9679_v0 = vcombine.low %v6945_v41, %v6953_v8  ;;  %v6973_v17 = vsel %vm11408_vm11, %v6971_v60, %v6972_v47  ;;  %v6976_v52 = vrot.slane %v6975_v43, 4  ;;  %v15811_v34 = vadd.f32 %v10504_v20, %v10392_v32  ;;  %v10512_v32 = vpop.f32.mrb[205].mxu0  ;;  %v10414_v41 = vpop.f32.mrb[182].mxu1  ;;  %v16906_v7 = vld [vmem:[#allocation71_spill] sm:$0xff]  ;;  %v16908_v43 = vld [vmem:[#allocation66_spill] sm:$0xff] }
 0x3f3   : > { %v7000_v38 = vrot.slane %v16899_v42, 5  ;;  %v7006_v35 = vshll.u32 %v6824_v25, 16  ;;  %v10401_v16 = vadd.f32 %v15698_v63, %v15682_v18  ;;  %v10507_v61 = vadd.f32 %v10506_v48, %v10505_v46 }
 0x3f4   : > { %v6981_v39 = vsel %vm11408_vm11, %v6976_v52, %v6980_v2  ;;  %v6999_v29 = vrot.slane %v6998_v28, 4  ;;  %v10404_v37 = vadd.f32 %v16901_v10, %v16900_v58  ;;  %v10510_v57 = vadd.f32 %v10509_v23, %v10508_v55  ;;  %v10514_v55 = vpop.f32.mrb[206].mxu0 }
 0x3f5   : > { %v7003_v11 = vor.u32 %v15725_v51, %v7000_v38  ;;  %v9681_v21 = vcombine.low %v6973_v17, %v6981_v39  ;;  %v7008_v56 = vrot.slane %v7006_v35, 5  ;;  %v15820_v62 = vadd.f32 %v10507_v61, %v10395_v44  ;;  %v10515_v13 = vpop.f32.mrb[207].mxu0  ;;  %v16913_v61 = vld [vmem:[#allocation80_spill] sm:$0xff] }
 0x3f6   : > { %v7001_v24 = vsel %vm11408_vm11, %v6999_v29, %v7000_v38  ;;  %v15824_v18 = vadd.f32 %v10510_v57, %v10398_v1  ;;  %v10407_v63 = vadd.f32 %v10406_v3, %v10405_v14  ;;  %v10410_v46 = vadd.f32 %v10409_v54, %v10408_v27  ;;  %v10415_v3 = vpop.f32.mrb[183].mxu1  ;;  %v10517_v2 = vpop.f32.mrb[208].mxu0 }
 0x3f7   : > { %v7004_v22 = vrot.slane %v7003_v11, 4  ;;  %v10513_v50 = vadd.f32 %v10512_v32, %v10511_v36  ;;  %v10413_v23 = vadd.f32 %v10412_v26, %v10411_v19  ;;  %v10516_v14 = vadd.f32 %v10515_v13, %v10514_v55  ;;  %v10518_v20 = vpop.f32.mrb[209].mxu0  ;;  %v6827_v36 = vld [vmem:[#allocation3 + $0x164] sm:$0x1]  ;;  %v16916_v55 = vld [vmem:[#allocation60_spill] sm:$0xff] }
 0x3f8   : > { %10866 = vmatmul.mubr.bf16.gmra.mrb[12].mxu1 %v16902_v4  ;;  %v10416_v27 = vadd.f32 %v10415_v3, %v10414_v41  ;;  %v16904_v47 = vshrl.u32 %v16903_v40, 16  ;;  %v16905_v15 = vshll.u32 %v16903_v40, 16  ;;  %v16907_v8 = vshrl.u32 %v16906_v7, 16  ;;  %v10520_v35 = vpop.f32.mrb[210].mxu0 }
 0x3f9   : > { %v7009_v48 = vsel %vm11408_vm11, %v7004_v22, %v7008_v56  ;;  %10869 = vmatprep.mubr.bf16.mxu1 %v9679_v0  ;;  %v15829_v12 = vadd.f32 %v10513_v50, %v10401_v16  ;;  %v15831_v30 = vadd.f32 %v10516_v14, %v10404_v37  ;;  %v16909_v1 = vshll.u32 %v16906_v7, 16  ;;  %v6826_v0 = vld [vmem:[#allocation3 + $0x150] sm:$0x1]  ;;  %v10417_v16 = vpop.f32.mrb[184].mxu1  ;;  %v10521_v37 = vpop.f32.mrb[211].mxu0 }
 0x3fa   : > { %v9683_v51 = vcombine.low %v7001_v24, %v7009_v48  ;;  %v7024_v54 = vrot.slane %v16904_v47, 4  ;;  %v7025_v44 = vrot.slane %v16905_v15, 5  ;;  %v7030_v60 = vrot.slane %v16907_v8, 4  ;;  %v10523_v47 = vpop.f32.mrb[212].mxu0 }
 0x3fb   : > { %v7028_v25 = vrot.slane %v16909_v1, 5  ;;  %v16911_v17 = vshrl.u32 %v16910_v6, 16  ;;  %v16912_v28 = vshll.u32 %v16910_v6, 16  ;;  %v10519_v38 = vadd.f32 %v10518_v20, %v10517_v2  ;;  %v10524_v15 = vpop.f32.mrb[213].mxu0 }
 0x3fc   : > { %v16914_v39 = vshll.u32 %v16913_v61, 16  ;;  %v7026_v11 = vor.u32 %v7025_v44, %v7024_v54  ;;  %v7034_v10 = vshll.u32 %v6826_v0, 16  ;;  %v16915_v56 = vshrl.u32 %v16913_v61, 16 }
 0x3fd   : > { %v7038_v52 = vrot.slane %v16911_v17, 4  ;;  %v7039_v42 = vrot.slane %v16912_v28, 5  ;;  %v7031_v58 = vor.u32 %v7030_v60, %v7028_v25  ;;  %v15850_v24 = vadd.f32 %v10519_v38, %v10407_v63  ;;  %v10526_v60 = vpop.f32.mrb[214].mxu0 }
 0x3fe   : > { %v7042_v29 = vrot.slane %v16914_v39, 5  ;;  %v7044_v57 = vrot.slane %v16915_v56, 4  ;;  %v10522_v22 = vadd.f32 %v10521_v37, %v10520_v35  ;;  %v7027_v26 = vrot.slane %v7026_v11, 4 }
 0x3ff   : > { %v7032_v13 = vrot.slane %v7031_v58, 4  ;;  %v7036_v41 = vrot.slane %v7034_v10, 5  ;;  %v7040_v14 = vor.u32 %v7039_v42, %v7038_v52  ;;  %v7048_v40 = vshll.u32 %v6827_v36, 16 }
 0x400   : > { %10870 = vmatmul.mubr.bf16.gmra.mrb[16].mxu1 %v16908_v43  ;;  %v15852_v19 = vadd.f32 %v10522_v22, %v10410_v46  ;;  %v7045_v3 = vor.u32 %v7044_v57, %v7042_v29  ;;  %v7029_v63 = vsel %vm11408_vm11, %v7027_v26, %v7028_v25  ;;  %v10525_v8 = vadd.f32 %v10524_v15, %v10523_v47  ;;  %v10527_v43 = vpop.f32.mrb[215].mxu0  ;;  %v16918_v22 = vld [vmem:[#allocation58_spill] sm:$0xff]  ;;  %v16920_v15 = vld [vmem:[#allocation63_spill] sm:$0xff] }
 0x401   : > { %10873 = vmatprep.mubr.bf16.mxu1 %v9681_v21  ;;  %v10418_v21 = vpop.f32.mrb[185].mxu1  ;;  %v7037_v54 = vsel %vm11408_vm11, %v7032_v13, %v7036_v41  ;;  %v7041_v46 = vrot.slane %v7040_v14, 4  ;;  %v7050_v7 = vrot.slane %v7048_v40, 5  ;;  %v10528_v2 = vadd.f32 %v10527_v43, %v10526_v60 }
 0x402   : > { %v10419_v48 = vadd.f32 %v10418_v21, %v10417_v16  ;;  %v10420_v4 = vpop.f32.mrb[186].mxu1  ;;  %v7046_v44 = vrot.slane %v7045_v3, 4  ;;  %v9685_v1 = vcombine.low %v7029_v63, %v7037_v54  ;;  %v15859_v0 = vadd.f32 %v10525_v8, %v10413_v23  ;;  %v16921_v8 = vld [vmem:[#allocation65_spill] sm:$0xff] }
 0x403   : > { %v10421_v32 = vpop.f32.mrb[187].mxu1  ;;  %v7043_v25 = vsel %vm11408_vm11, %v7041_v46, %v7042_v29  ;;  %v15866_v52 = vadd.f32 %v10528_v2, %v10416_v27  ;;  %v10529_v16 = vpop.f32.mrb[216].mxu0 }
 0x404   : > { %v10422_v50 = vadd.f32 %v10421_v32, %v10420_v4  ;;  %v10423_v20 = vpop.f32.mrb[188].mxu1  ;;  %v7051_v17 = vsel %vm11408_vm11, %v7046_v44, %v7050_v7  ;;  %v10530_v61 = vpop.f32.mrb[217].mxu0  ;;  %v16919_v32 = vld [vmem:[#allocation59_spill] sm:$0xff] }
 0x405   : > { %v10424_v6 = vpop.f32.mrb[189].mxu1  ;;  %v9686_v23 = vcombine.low %v7043_v25, %v7051_v17  ;;  %v10531_v39 = vadd.f32 %v10530_v61, %v10529_v16  ;;  %v10532_v11 = vpop.f32.mrb[218].mxu0  ;;  %v16922_v16 = vld [vmem:[#allocation48_spill] sm:$0xff] }
 0x406   : > { %v10425_v28 = vadd.f32 %v10424_v6, %v10423_v20  ;;  %v10426_v42 = vpop.f32.mrb[190].mxu1  ;;  %v10533_v58 = vpop.f32.mrb[219].mxu0 }
 0x407   : > { %v10427_v38 = vpop.f32.mrb[191].mxu1  ;;  %v15868_v37 = vadd.f32 %v10531_v39, %v10419_v48  ;;  %v10534_v29 = vadd.f32 %v10533_v58, %v10532_v11  ;;  %v16923_v11 = vld [vmem:[#allocation53_spill] sm:$0xff] }
 0x408   : > { %10874 = vmatmul.mubr.bf16.gmra.mrb[20].mxu1 %v16916_v55  ;;  %v10428_v35 = vadd.f32 %v10427_v38, %v10426_v42  ;;  %v10557_v10 = vpop.f32.mrb[192].mxu1 }
 0x409   : > { %10877 = vmatprep.mubr.bf16.mxu1 %v9683_v51  ;;  %v16917_v51 = vld [vmem:[#allocation45_spill] sm:$0xff]  ;;  %v10558_v31 = vpop.f32.mrb[193].mxu1  ;;  %v15870_v27 = vadd.f32 %v10534_v29, %v10422_v50 }
 0x40a   : > { %v10559_v21 = vadd.f32 %v10558_v31, %v10557_v10  ;;  %v10560_v56 = vpop.f32.mrb[194].mxu1 }
 0x40b   : > { %v10561_v57 = vpop.f32.mrb[195].mxu1 }
 0x40c   : > { %v8513_v4 = vadd.f32 %v10559_v21, %v16918_v22  ;;  %v10562_v36 = vadd.f32 %v10561_v57, %v10560_v56 }
 0x40e   : > { %v8516_v55 = vadd.f32 %v10562_v36, %v16919_v32  ;;  %v10563_v26 = vpop.f32.mrb[196].mxu1 }
 0x40f   : > { %v10564_v41 = vpop.f32.mrb[197].mxu1 }
 0x410   : > { %10878 = vmatmul.mubr.bf16.gmra.mrb[24].mxu1 %v16917_v51  ;;  %v10535_v13 = vpop.f32.mrb[220].mxu0  ;;  %v10565_v3 = vadd.f32 %v10564_v41, %v10563_v26  ;;  %v10566_v40 = vpop.f32.mrb[198].mxu1  ;;  %v16924_v26 = vld [vmem:[#allocation77_spill] sm:$0xff] }
 0x411   : > { %10881 = vmatprep.mubr.bf16.mxu1 %v9685_v1  ;;  %v10536_v14 = vpop.f32.mrb[221].mxu0  ;;  %v10567_v63 = vpop.f32.mrb[199].mxu1 }
 0x412   : > { %v10537_v48 = vadd.f32 %v10536_v14, %v10535_v13  ;;  %v10538_v47 = vpop.f32.mrb[222].mxu0  ;;  %v8521_v46 = vadd.f32 %v10565_v3, %v16920_v15  ;;  %v10568_v50 = vadd.f32 %v10567_v63, %v10566_v40  ;;  %v16925_v40 = vld [vmem:[#allocation78_spill] sm:$0xff] }
 0x413   : > { %v10539_v54 = vpop.f32.mrb[223].mxu0 }
 0x414   : > { %v15875_v44 = vadd.f32 %v10537_v48, %v10425_v28  ;;  %v10540_v7 = vadd.f32 %v10539_v54, %v10538_v47  ;;  %v8524_v60 = vadd.f32 %v10568_v50, %v16921_v8 }
 0x416   : > { %v15878_v43 = vadd.f32 %v10540_v7, %v10428_v35 }
 0x417   : > { %v10569_v1 = vpop.f32.mrb[200].mxu1 }
 0x418   : > { %10882 = vmatmul.mubr.bf16.gmra.mrb[28].mxu1 %v9686_v23  ;;  %v10669_v2 = vpop.f32.mrb[224].mxu0  ;;  %v10570_v20 = vpop.f32.mrb[201].mxu1 }
 0x419   : > { %v10670_v51 = vpop.f32.mrb[225].mxu0  ;;  %v10571_v6 = vadd.f32 %v10570_v20, %v10569_v1  ;;  %v10572_v25 = vpop.f32.mrb[202].mxu1 }
 0x41a   : > { %v10671_v17 = vadd.f32 %v10670_v51, %v10669_v2  ;;  %v10672_v42 = vpop.f32.mrb[226].mxu0  ;;  %v10573_v38 = vpop.f32.mrb[203].mxu1 }
 0x41b   : > { %v10673_v23 = vpop.f32.mrb[227].mxu0  ;;  %v8529_v61 = vadd.f32 %v10571_v6, %v16922_v16  ;;  %v10574_v39 = vadd.f32 %v10573_v38, %v10572_v25  ;;  %v16926_v6 = vld [vmem:[#allocation11_spill] sm:$0xff] }
 0x41c   : > { %v10674_v28 = vadd.f32 %v10673_v23, %v10672_v42  ;;  %v15887_v38 = vadd.f32 %v10671_v17, %v8513_v4  ;;  %v16927_v23 = vld [vmem:[#allocation16_spill] sm:$0xff] }
 0x41d   : > { %v8532_v58 = vadd.f32 %v10574_v39, %v16923_v11 }
 0x41e   : > { %v15892_v39 = vadd.f32 %v10674_v28, %v8516_v55 }
 0x420   : > { %v10675_v29 = vpop.f32.mrb[228].mxu0 }
 0x421   : > { %v10575_v10 = vpop.f32.mrb[204].mxu1  ;;  %v10676_v31 = vpop.f32.mrb[229].mxu0 }
 0x422   : > { %v10576_v35 = vpop.f32.mrb[205].mxu1  ;;  %v10677_v57 = vadd.f32 %v10676_v31, %v10675_v29  ;;  %v10678_v22 = vpop.f32.mrb[230].mxu0 }
 0x423   : > { %v10577_v21 = vadd.f32 %v10576_v35, %v10575_v10  ;;  %v10578_v56 = vpop.f32.mrb[206].mxu1  ;;  %v10679_v32 = vpop.f32.mrb[231].mxu0 }
 0x424   : > { %v10579_v36 = vpop.f32.mrb[207].mxu1  ;;  %v10680_v14 = vadd.f32 %v10679_v32, %v10678_v22  ;;  %v15883_v3 = vadd.f32 %v10677_v57, %v8521_v46 }
 0x425   : > { %v8537_v13 = vadd.f32 %v10577_v21, %v16924_v26  ;;  %v10580_v41 = vadd.f32 %v10579_v36, %v10578_v56 }
 0x426   : > { %v15889_v46 = vadd.f32 %v10680_v14, %v8524_v60  ;;  %v16928_v60 = vld [vmem:[#allocation14_spill] sm:$0xff] }
 0x427   : > { %v8540_v48 = vadd.f32 %v10580_v41, %v16925_v40  ;;  %v16929_v14 = vld [vmem:[#allocation10_spill] sm:$0xff] }
 0x428   : > { %v10681_v47 = vpop.f32.mrb[232].mxu0 }
 0x429   : > { %v10682_v54 = vpop.f32.mrb[233].mxu0 }
 0x42a   : > { %v10683_v50 = vadd.f32 %v10682_v54, %v10681_v47  ;;  %v10684_v7 = vpop.f32.mrb[234].mxu0 }
 0x42b   : > { %v10581_v63 = vpop.f32.mrb[208].mxu1  ;;  %v10685_v2 = vpop.f32.mrb[235].mxu0 }
 0x42c   : > { %v10582_v15 = vpop.f32.mrb[209].mxu1  ;;  %v10686_v51 = vadd.f32 %v10685_v2, %v10684_v7  ;;  %v15896_v4 = vadd.f32 %v10683_v50, %v8529_v61 }
 0x42d   : > { %v10583_v8 = vadd.f32 %v10582_v15, %v10581_v63  ;;  %v10584_v1 = vpop.f32.mrb[210].mxu1 }
 0x42e   : > { %v10585_v20 = vpop.f32.mrb[211].mxu1  ;;  %v15901_v28 = vadd.f32 %v10686_v51, %v8532_v58 }
 0x42f   : > { %v8545_v25 = vadd.f32 %v10583_v8, %v16926_v6  ;;  %v10586_v42 = vadd.f32 %v10585_v20, %v10584_v1 }
 0x431   : > { %v8548_v16 = vadd.f32 %v10586_v42, %v16927_v23 }
 0x432   : > { %v10687_v11 = vpop.f32.mrb[236].mxu0 }
 0x433   : > { %v10688_v10 = vpop.f32.mrb[237].mxu0 }
 0x434   : > { %v10689_v35 = vadd.f32 %v10688_v10, %v10687_v11  ;;  %v10690_v31 = vpop.f32.mrb[238].mxu0 }
 0x435   : > { %v10587_v29 = vpop.f32.mrb[212].mxu1  ;;  %v10691_v56 = vpop.f32.mrb[239].mxu0 }
 0x436   : > { %v10588_v21 = vpop.f32.mrb[213].mxu1  ;;  %v10692_v36 = vadd.f32 %v10691_v56, %v10690_v31  ;;  %v15894_v26 = vadd.f32 %v10689_v35, %v8537_v13 }
 0x437   : > { %v10589_v57 = vadd.f32 %v10588_v21, %v10587_v29  ;;  %v10590_v22 = vpop.f32.mrb[214].mxu1 }
 0x438   : > { %v10591_v32 = vpop.f32.mrb[215].mxu1  ;;  %v15899_v55 = vadd.f32 %v10692_v36, %v8540_v48 }
 0x439   : > { %v8553_v17 = vadd.f32 %v10589_v57, %v16928_v60  ;;  %v10592_v41 = vadd.f32 %v10591_v32, %v10590_v22 }
 0x43b   : > { %v8556_v40 = vadd.f32 %v10592_v41, %v16929_v14  ;;  %v10693_v47 = vpop.f32.mrb[240].mxu0 }
 0x43c   : > { %v10694_v63 = vpop.f32.mrb[241].mxu0 }
 0x43d   : > { %v10695_v54 = vadd.f32 %v10694_v63, %v10693_v47  ;;  %v10696_v15 = vpop.f32.mrb[242].mxu0 }
 0x43e   : > { %v10593_v7 = vpop.f32.mrb[216].mxu1  ;;  %v10697_v8 = vpop.f32.mrb[243].mxu0 }
 0x43f   : > { %v10594_v1 = vpop.f32.mrb[217].mxu1  ;;  %v10698_v13 = vadd.f32 %v10697_v8, %v10696_v15  ;;  %v15904_v50 = vadd.f32 %v10695_v54, %v8545_v25 }
 0x440   : > { %v10595_v2 = vadd.f32 %v10594_v1, %v10593_v7  ;;  %v10596_v61 = vpop.f32.mrb[218].mxu1 }
 0x441   : > { %v10597_v20 = vpop.f32.mrb[219].mxu1  ;;  %v15907_v58 = vadd.f32 %v10698_v13, %v8548_v16 }
 0x442   : > { %v8561_v48 = vadd.f32 %v10595_v2, %v15744_v59  ;;  %v10598_v6 = vadd.f32 %v10597_v20, %v10596_v61 }
 0x444   : > { %v8564_v51 = vadd.f32 %v10598_v6, %v15746_v9 }
 0x446   : > { %v10699_v42 = vpop.f32.mrb[244].mxu0 }
 0x447   : > { %v10700_v23 = vpop.f32.mrb[245].mxu0 }
 0x448   : > { %v10701_v11 = vadd.f32 %v10700_v23, %v10699_v42  ;;  %v10702_v10 = vpop.f32.mrb[246].mxu0 }
 0x449   : > { %v10599_v29 = vpop.f32.mrb[220].mxu1  ;;  %v10703_v35 = vpop.f32.mrb[247].mxu0 }
 0x44a   : > { %v10600_v31 = vpop.f32.mrb[221].mxu1  ;;  %v10704_v21 = vadd.f32 %v10703_v35, %v10702_v10  ;;  %v15910_v25 = vadd.f32 %v10701_v11, %v8553_v17 }
 0x44b   : > { %v10601_v56 = vadd.f32 %v10600_v31, %v10599_v29  ;;  %v10602_v57 = vpop.f32.mrb[222].mxu1 }
 0x44c   : > { %v10603_v22 = vpop.f32.mrb[223].mxu1  ;;  %v15913_v16 = vadd.f32 %v10704_v21, %v8556_v40 }
 0x44d   : > { %v8569_v59 = vadd.f32 %v10601_v56, %v15755_v33  ;;  %v10604_v36 = vadd.f32 %v10603_v22, %v10602_v57 }
 0x44e   : > { %v10705_v32 = vpop.f32.mrb[248].mxu0 }
 0x44f   : > { %v8572_v9 = vadd.f32 %v10604_v36, %v15768_v53  ;;  %v10706_v60 = vpop.f32.mrb[249].mxu0 }
 0x450   : > { %v10707_v41 = vadd.f32 %v10706_v60, %v10705_v32  ;;  %v10708_v14 = vpop.f32.mrb[250].mxu0 }
 0x451   : > { %v10709_v47 = vpop.f32.mrb[251].mxu0 }
 0x452   : > { %v10605_v63 = vpop.f32.mrb[224].mxu1  ;;  %v10710_v54 = vadd.f32 %v10709_v47, %v10708_v14  ;;  %v15916_v7 = vadd.f32 %v10707_v41, %v8561_v48 }
 0x453   : > { %v10606_v15 = vpop.f32.mrb[225].mxu1 }
 0x454   : > { %v10607_v17 = vadd.f32 %v10606_v15, %v10605_v63  ;;  %v10608_v8 = vpop.f32.mrb[226].mxu1  ;;  %v15918_v13 = vadd.f32 %v10710_v54, %v8564_v51 }
 0x455   : > { %v10609_v1 = vpop.f32.mrb[227].mxu1 }
 0x456   : > { %v8577_v33 = vadd.f32 %v10607_v17, %v15779_v45  ;;  %v10610_v40 = vadd.f32 %v10609_v1, %v10608_v8 }
 0x458   : > { %v8580_v2 = vadd.f32 %v10610_v40, %v15789_v49 }
 0x45a   : > { %v10711_v53 = vpop.f32.mrb[252].mxu0 }
 0x45b   : > { %v10712_v61 = vpop.f32.mrb[253].mxu0 }
 0x45c   : > { %v10713_v20 = vadd.f32 %v10712_v61, %v10711_v53  ;;  %v10714_v6 = vpop.f32.mrb[254].mxu0  ;;  %v10611_v23 = vpop.f32.mrb[228].mxu1 }
 0x45d   : > { %v10715_v42 = vpop.f32.mrb[255].mxu0  ;;  %v10612_v10 = vpop.f32.mrb[229].mxu1 }
 0x45e   : > { %v10716_v11 = vadd.f32 %v10715_v42, %v10714_v6  ;;  %v15922_v48 = vadd.f32 %v10713_v20, %v8569_v59  ;;  %v10613_v29 = vadd.f32 %v10612_v10, %v10611_v23  ;;  %v10614_v35 = vpop.f32.mrb[230].mxu1 }
 0x45f   : > { %v10615_v31 = vpop.f32.mrb[231].mxu1 }
 0x460   : > { %v15924_v51 = vadd.f32 %v10716_v11, %v8572_v9  ;;  %v8585_v45 = vadd.f32 %v10613_v29, %v15800_v5  ;;  %v10616_v21 = vadd.f32 %v10615_v31, %v10614_v35 }
 0x462   : > { %v10717_v56 = vpop.f32.mrb[0].mxu0  ;;  %v8588_v57 = vadd.f32 %v10616_v21, %v15811_v34 }
 0x463   : > { %v10718_v49 = vpop.f32.mrb[1].mxu0 }
 0x464   : > { %v10719_v22 = vadd.f32 %v10718_v49, %v10717_v56  ;;  %v10720_v36 = vpop.f32.mrb[2].mxu0 }
 0x465   : > { %v10721_v32 = vpop.f32.mrb[3].mxu0 }
 0x466   : > { %v10722_v60 = vadd.f32 %v10721_v32, %v10720_v36  ;;  %v15928_v14 = vadd.f32 %v10719_v22, %v8577_v33 }
 0x467   : > { %v10617_v41 = vpop.f32.mrb[232].mxu1 }
 0x468   : > { %v10618_v59 = vpop.f32.mrb[233].mxu1  ;;  %v15930_v54 = vadd.f32 %v10722_v60, %v8580_v2 }
 0x469   : > { %v10619_v47 = vadd.f32 %v10618_v59, %v10617_v41  ;;  %v10620_v63 = vpop.f32.mrb[234].mxu1 }
 0x46a   : > { %v10621_v9 = vpop.f32.mrb[235].mxu1  ;;  %v10723_v15 = vpop.f32.mrb[4].mxu0 }
 0x46b   : > { %v8593_v5 = vadd.f32 %v10619_v47, %v15820_v62  ;;  %v10622_v17 = vadd.f32 %v10621_v9, %v10620_v63  ;;  %v10724_v8 = vpop.f32.mrb[5].mxu0 }
 0x46c   : > { %v10725_v1 = vadd.f32 %v10724_v8, %v10723_v15  ;;  %v10726_v40 = vpop.f32.mrb[6].mxu0 }
 0x46d   : > { %v8596_v34 = vadd.f32 %v10622_v17, %v15824_v18  ;;  %v10727_v53 = vpop.f32.mrb[7].mxu0 }
 0x46e   : > { %v10728_v61 = vadd.f32 %v10727_v53, %v10726_v40  ;;  %v15934_v20 = vadd.f32 %v10725_v1, %v8585_v45 }
 0x470   : > { %v15936_v33 = vadd.f32 %v10728_v61, %v8588_v57 }
 0x472   : > { %v10623_v6 = vpop.f32.mrb[236].mxu1 }
 0x473   : > { %v10624_v42 = vpop.f32.mrb[237].mxu1 }
 0x474   : > { %v10625_v2 = vadd.f32 %v10624_v42, %v10623_v6  ;;  %v10626_v23 = vpop.f32.mrb[238].mxu1 }
 0x475   : > { %v10729_v11 = vpop.f32.mrb[8].mxu0  ;;  %v10627_v10 = vpop.f32.mrb[239].mxu1 }
 0x476   : > { %v8601_v62 = vadd.f32 %v10625_v2, %v15829_v12  ;;  %v10730_v29 = vpop.f32.mrb[9].mxu0  ;;  %v10628_v35 = vadd.f32 %v10627_v10, %v10626_v23 }
 0x477   : > { %v10731_v31 = vadd.f32 %v10730_v29, %v10729_v11  ;;  %v10732_v21 = vpop.f32.mrb[10].mxu0 }
 0x478   : > { %v8604_v18 = vadd.f32 %v10628_v35, %v15831_v30  ;;  %v10733_v56 = vpop.f32.mrb[11].mxu0 }
 0x479   : > { %v10734_v49 = vadd.f32 %v10733_v56, %v10732_v21  ;;  %v15940_v45 = vadd.f32 %v10731_v31, %v8593_v5 }
 0x47b   : > { %v15942_v57 = vadd.f32 %v10734_v49, %v8596_v34 }
 0x47d   : > { %v10735_v36 = vpop.f32.mrb[12].mxu0 }
 0x47e   : > { %v10629_v22 = vpop.f32.mrb[240].mxu1  ;;  %v10736_v60 = vpop.f32.mrb[13].mxu0 }
 0x47f   : > { %v10630_v32 = vpop.f32.mrb[241].mxu1  ;;  %v10737_v47 = vadd.f32 %v10736_v60, %v10735_v36  ;;  %v10738_v12 = vpop.f32.mrb[14].mxu0 }
 0x480   : > { %v10631_v41 = vadd.f32 %v10630_v32, %v10629_v22  ;;  %v10632_v59 = vpop.f32.mrb[242].mxu1  ;;  %v10739_v9 = vpop.f32.mrb[15].mxu0 }
 0x481   : > { %v10633_v63 = vpop.f32.mrb[243].mxu1  ;;  %v10740_v30 = vadd.f32 %v10739_v9, %v10738_v12  ;;  %v15945_v8 = vadd.f32 %v10737_v47, %v8601_v62 }
 0x482   : > { %v8609_v15 = vadd.f32 %v10631_v41, %v15850_v24  ;;  %v10634_v17 = vadd.f32 %v10633_v63, %v10632_v59 }
 0x483   : > { %v15948_v1 = vadd.f32 %v10740_v30, %v8604_v18 }
 0x484   : > { %v8612_v5 = vadd.f32 %v10634_v17, %v15852_v19 }
 0x48a   : > { %v10635_v34 = vpop.f32.mrb[244].mxu1  ;;  %v10741_v53 = vpop.f32.mrb[16].mxu0 }
 0x48b   : > { %v10636_v40 = vpop.f32.mrb[245].mxu1  ;;  %v10742_v42 = vpop.f32.mrb[17].mxu0 }
 0x48c   : > { %v10637_v61 = vadd.f32 %v10636_v40, %v10635_v34  ;;  %v10638_v6 = vpop.f32.mrb[246].mxu1  ;;  %v10743_v2 = vadd.f32 %v10742_v42, %v10741_v53  ;;  %v10744_v11 = vpop.f32.mrb[18].mxu0 }
 0x48d   : > { %v10639_v23 = vpop.f32.mrb[247].mxu1  ;;  %v10745_v29 = vpop.f32.mrb[19].mxu0 }
 0x48e   : > { %v8617_v10 = vadd.f32 %v10637_v61, %v15859_v0  ;;  %v10640_v24 = vadd.f32 %v10639_v23, %v10638_v6  ;;  %v10746_v35 = vadd.f32 %v10745_v29, %v10744_v11  ;;  %v15951_v62 = vadd.f32 %v10743_v2, %v8609_v15  ;;  %v15971_v29 = vld [vmem:[%s16125_s5] ss:$0 sm:$0xff] }
 0x490   : > { %v8620_v19 = vadd.f32 %v10640_v24, %v15866_v52  ;;  %v15954_v31 = vadd.f32 %v10746_v35, %v8612_v5 }
 0x496   : > { %v10747_v21 = vpop.f32.mrb[20].mxu0 }
 0x497   : > { %v10748_v18 = vpop.f32.mrb[21].mxu0  ;;  %v10641_v56 = vpop.f32.mrb[248].mxu1 }
 0x498   : > { %v10749_v49 = vadd.f32 %v10748_v18, %v10747_v21  ;;  %v10750_v22 = vpop.f32.mrb[22].mxu0  ;;  %v10642_v36 = vpop.f32.mrb[249].mxu1 }
 0x499   : > { %v10751_v32 = vpop.f32.mrb[23].mxu0  ;;  %v10643_v60 = vadd.f32 %v10642_v36, %v10641_v56  ;;  %v10644_v41 = vpop.f32.mrb[250].mxu1 }
 0x49a   : > { %v10752_v59 = vadd.f32 %v10751_v32, %v10750_v22  ;;  %v15956_v0 = vadd.f32 %v10749_v49, %v8617_v10  ;;  %v10645_v47 = vpop.f32.mrb[251].mxu1 }
 0x49b   : > { %v8625_v12 = vadd.f32 %v10643_v60, %v15868_v37  ;;  %v10646_v63 = vadd.f32 %v10645_v47, %v10644_v41 }
 0x49c   : > { %v15959_v9 = vadd.f32 %v10752_v59, %v8620_v19 }
 0x49d   : > { %v8628_v52 = vadd.f32 %v10646_v63, %v15870_v27 }
 0x4a3   : > { %v10753_v15 = vpop.f32.mrb[24].mxu0 }
 0x4a4   : > { %v10754_v17 = vpop.f32.mrb[25].mxu0 }
 0x4a5   : > { %v10755_v30 = vadd.f32 %v10754_v17, %v10753_v15  ;;  %v10756_v5 = vpop.f32.mrb[26].mxu0 }
 0x4a6   : > { %v10757_v34 = vpop.f32.mrb[27].mxu0 }
 0x4a7   : > { %v10758_v40 = vadd.f32 %v10757_v34, %v10756_v5  ;;  %v15962_v53 = vadd.f32 %v10755_v30, %v8625_v12 }
 0x4a8   : > { %v10647_v61 = vpop.f32.mrb[252].mxu1 }
 0x4a9   : > { %v10648_v6 = vpop.f32.mrb[253].mxu1  ;;  %v15964_v42 = vadd.f32 %v10758_v40, %v8628_v52 }
 0x4aa   : > { %v10649_v2 = vadd.f32 %v10648_v6, %v10647_v61  ;;  %v10650_v23 = vpop.f32.mrb[254].mxu1 }
 0x4ab   : > { %v10651_v37 = vpop.f32.mrb[255].mxu1 }
 0x4ac   : > { %v8633_v11 = vadd.f32 %v10649_v2, %v15875_v44  ;;  %v10652_v10 = vadd.f32 %v10651_v37, %v10650_v23  ;;  %v15977_v44 = vld [vmem:[%s16126_s6] ss:$0 sm:$0xff] }
 0x4ae   : > { %v8636_v27 = vadd.f32 %v10652_v10, %v15878_v43 }
 0x4b2   : > { %v10759_v24 = vpop.f32.mrb[28].mxu0  ;;  %v10855_v35 = vpop.f32.mrb[0].mxu1 }
 0x4b3   : > { %v10760_v19 = vpop.f32.mrb[29].mxu0  ;;  %v8843_v21 = vadd.f32 %v10855_v35, %v15883_v3  ;;  %v8834_v18 = vpop.f32.mrb[1].mxu1 }
 0x4b4   : > { %v10761_v56 = vadd.f32 %v10760_v19, %v10759_v24  ;;  %v10762_v49 = vpop.f32.mrb[30].mxu0  ;;  %v8835_v43 = vadd.f32 %v8834_v18, %v15887_v38  ;;  %v10856_v22 = vpop.f32.mrb[2].mxu1 }
 0x4b5   : > { %v10763_v36 = vpop.f32.mrb[31].mxu0  ;;  %v8969_v32 = vmul.f32 %v15971_v29, %v8843_v21  ;;  %v8846_v60 = vadd.f32 %v10856_v22, %v15889_v46  ;;  %v8837_v41 = vpop.f32.mrb[3].mxu1 }
 0x4b6   : > { %v10764_v59 = vadd.f32 %v10763_v36, %v10762_v49  ;;  %v15982_v3 = vadd.f32 %v10761_v56, %v8633_v11  ;;  %v8967_v47 = vmul.f32 %v15971_v29, %v8835_v43  ;;  %v8838_v12 = vadd.f32 %v8837_v41, %v15892_v39 }
 0x4b7   : > { %v9007_v63 = vadd.f32 %v15977_v44, %v8969_v32  ;;  %v8970_v52 = vmul.f32 %v15971_v29, %v8846_v60 }
 0x4b8   : > { %v15988_v15 = vadd.f32 %v10764_v59, %v8636_v27  ;;  %v9005_v38 = vadd.f32 %v15977_v44, %v8967_v47  ;;  %v8968_v46 = vmul.f32 %v15971_v29, %v8838_v12 }
 0x4b9   : > { %v9039_v39 = vmax.f32 %v9007_v63, 0.0  ;;  %v9008_v17 = vadd.f32 %v15977_v44, %v8970_v52 }
 0x4ba   : > { %v9037_v30 = vmax.f32 %v9005_v38, 0.0  ;;  %v9006_v5 = vadd.f32 %v15977_v44, %v8968_v46  ;;  %v10859_v34 = vpop.f32.mrb[4].mxu1 }
 0x4bb   : > { %9071 = vst [vmem:[%s15995_s9 + $0x10] sm:$0xff] %v9039_v39  ;;  %v9040_v40 = vmax.f32 %v9008_v17, 0.0  ;;  %v8859_v61 = vadd.f32 %v10859_v34, %v15894_v26  ;;  %v8850_v6 = vpop.f32.mrb[5].mxu1 }
 0x4bc   : > { %9069 = vst [vmem:[%s15995_s9] sm:$0xff] %v9037_v30  ;;  %v9038_v2 = vmax.f32 %v9006_v5, 0.0  ;;  %v8851_v23 = vadd.f32 %v8850_v6, %v15896_v4  ;;  %v10860_v37 = vpop.f32.mrb[6].mxu1 }
 0x4bd   : > { %9072 = vst [vmem:[%s15995_s9 + $0x18] sm:$0xff] %v9040_v40  ;;  %v8973_v11 = vmul.f32 %v15971_v29, %v8859_v61  ;;  %v8862_v10 = vadd.f32 %v10860_v37, %v15899_v55  ;;  %v8853_v27 = vpop.f32.mrb[7].mxu1 }
 0x4be   : > { %9070 = vst [vmem:[%s15995_s9 + $0x8] sm:$0xff] %v9038_v2  ;;  %v8971_v24 = vmul.f32 %v15971_v29, %v8851_v23  ;;  %v8854_v35 = vadd.f32 %v8853_v27, %v15901_v28 }
 0x4bf   : > { %v9011_v26 = vadd.f32 %v15977_v44, %v8973_v11  ;;  %v8974_v19 = vmul.f32 %v15971_v29, %v8862_v10 }
 0x4c0   : > { %v9009_v4 = vadd.f32 %v15977_v44, %v8971_v24  ;;  %v8972_v21 = vmul.f32 %v15971_v29, %v8854_v35 }
 0x4c1   : > { %v9043_v18 = vmax.f32 %v9011_v26, 0.0  ;;  %v9012_v56 = vadd.f32 %v15977_v44, %v8974_v19 }
 0x4c2   : > { %v9041_v55 = vmax.f32 %v9009_v4, 0.0  ;;  %v9010_v49 = vadd.f32 %v15977_v44, %v8972_v21 }
 0x4c3   : > { %v10863_v43 = vpop.f32.mrb[8].mxu1  ;;  %9075 = vst [vmem:[%s15995_s9 + $0x30] sm:$0xff] %v9043_v18  ;;  %v9044_v22 = vmax.f32 %v9012_v56, 0.0 }
 0x4c4   : > { %v8875_v28 = vadd.f32 %v10863_v43, %v15910_v25  ;;  %v8866_v36 = vpop.f32.mrb[9].mxu1  ;;  %9073 = vst [vmem:[%s15995_s9 + $0x20] sm:$0xff] %v9041_v55  ;;  %v9042_v32 = vmax.f32 %v9010_v49, 0.0 }
 0x4c5   : > { %v8867_v60 = vadd.f32 %v8866_v36, %v15904_v50  ;;  %v10864_v41 = vpop.f32.mrb[10].mxu1  ;;  %9076 = vst [vmem:[%s15995_s9 + $0x38] sm:$0xff] %v9044_v22 }
 0x4c6   : > { %v8977_v59 = vmul.f32 %v15971_v29, %v8875_v28  ;;  %v8878_v47 = vadd.f32 %v10864_v41, %v15913_v16  ;;  %v8869_v12 = vpop.f32.mrb[11].mxu1  ;;  %9074 = vst [vmem:[%s15995_s9 + $0x28] sm:$0xff] %v9042_v32 }
 0x4c7   : > { %v8975_v63 = vmul.f32 %v15971_v29, %v8867_v60  ;;  %v8870_v52 = vadd.f32 %v8869_v12, %v15907_v58 }
 0x4c8   : > { %v9015_v25 = vadd.f32 %v15977_v44, %v8977_v59  ;;  %v8978_v38 = vmul.f32 %v15971_v29, %v8878_v47 }
 0x4c9   : > { %v9013_v50 = vadd.f32 %v15977_v44, %v8975_v63  ;;  %v8976_v46 = vmul.f32 %v15971_v29, %v8870_v52 }
 0x4ca   : > { %v9047_v39 = vmax.f32 %v9015_v25, 0.0  ;;  %v9016_v17 = vadd.f32 %v15977_v44, %v8978_v38 }
 0x4cb   : > { %v9045_v16 = vmax.f32 %v9013_v50, 0.0  ;;  %v9014_v30 = vadd.f32 %v15977_v44, %v8976_v46  ;;  %v10867_v5 = vpop.f32.mrb[12].mxu1 }
 0x4cc   : > { %9079 = vst [vmem:[%s15995_s9 + $0x50] sm:$0xff] %v9047_v39  ;;  %v9048_v34 = vmax.f32 %v9016_v17, 0.0  ;;  %v8891_v58 = vadd.f32 %v10867_v5, %v15922_v48  ;;  %v8882_v40 = vpop.f32.mrb[13].mxu1 }
 0x4cd   : > { %9077 = vst [vmem:[%s15995_s9 + $0x40] sm:$0xff] %v9045_v16  ;;  %v9046_v61 = vmax.f32 %v9014_v30, 0.0  ;;  %v8883_v6 = vadd.f32 %v8882_v40, %v15916_v7  ;;  %v10868_v2 = vpop.f32.mrb[14].mxu1 }
 0x4ce   : > { %9080 = vst [vmem:[%s15995_s9 + $0x58] sm:$0xff] %v9048_v34  ;;  %v8981_v23 = vmul.f32 %v15971_v29, %v8891_v58  ;;  %v8894_v37 = vadd.f32 %v10868_v2, %v15924_v51  ;;  %v8885_v11 = vpop.f32.mrb[15].mxu1 }
 0x4cf   : > { %9078 = vst [vmem:[%s15995_s9 + $0x48] sm:$0xff] %v9046_v61  ;;  %v8979_v10 = vmul.f32 %v15971_v29, %v8883_v6  ;;  %v8886_v27 = vadd.f32 %v8885_v11, %v15918_v13 }
 0x4d0   : > { %v9019_v48 = vadd.f32 %v15977_v44, %v8981_v23  ;;  %v8982_v24 = vmul.f32 %v15971_v29, %v8894_v37 }
 0x4d1   : > { %v9017_v7 = vadd.f32 %v15977_v44, %v8979_v10  ;;  %v8980_v35 = vmul.f32 %v15971_v29, %v8886_v27 }
 0x4d2   : > { %v9051_v26 = vmax.f32 %v9019_v48, 0.0  ;;  %v9020_v19 = vadd.f32 %v15977_v44, %v8982_v24 }
 0x4d3   : > { %v9049_v51 = vmax.f32 %v9017_v7, 0.0  ;;  %v9018_v4 = vadd.f32 %v15977_v44, %v8980_v35  ;;  %v10871_v21 = vpop.f32.mrb[16].mxu1 }
 0x4d4   : > { %9083 = vst [vmem:[%s15995_s9 + $0x70] sm:$0xff] %v9051_v26  ;;  %v9052_v18 = vmax.f32 %v9020_v19, 0.0  ;;  %v8907_v13 = vadd.f32 %v10871_v21, %v15934_v20  ;;  %v8898_v56 = vpop.f32.mrb[17].mxu1 }
 0x4d5   : > { %9081 = vst [vmem:[%s15995_s9 + $0x60] sm:$0xff] %v9049_v51  ;;  %v9050_v55 = vmax.f32 %v9018_v4, 0.0  ;;  %v8899_v49 = vadd.f32 %v8898_v56, %v15928_v14  ;;  %v10872_v43 = vpop.f32.mrb[18].mxu1 }
 0x4d6   : > { %9084 = vst [vmem:[%s15995_s9 + $0x78] sm:$0xff] %v9052_v18  ;;  %v8985_v22 = vmul.f32 %v15971_v29, %v8907_v13  ;;  %v8910_v28 = vadd.f32 %v10872_v43, %v15936_v33  ;;  %v8901_v36 = vpop.f32.mrb[19].mxu1 }
 0x4d7   : > { %9082 = vst [vmem:[%s15995_s9 + $0x68] sm:$0xff] %v9050_v55  ;;  %v8983_v32 = vmul.f32 %v15971_v29, %v8899_v49  ;;  %v8902_v60 = vadd.f32 %v8901_v36, %v15930_v54 }
 0x4d8   : > { %v9023_v20 = vadd.f32 %v15977_v44, %v8985_v22  ;;  %v8986_v41 = vmul.f32 %v15971_v29, %v8910_v28 }
 0x4d9   : > { %v9021_v14 = vadd.f32 %v15977_v44, %v8983_v32  ;;  %v8984_v59 = vmul.f32 %v15971_v29, %v8902_v60 }
 0x4da   : > { %v9055_v47 = vmax.f32 %v9023_v20, 0.0  ;;  %v9024_v12 = vadd.f32 %v15977_v44, %v8986_v41 }
 0x4db   : > { %v9053_v33 = vmax.f32 %v9021_v14, 0.0  ;;  %v9022_v63 = vadd.f32 %v15977_v44, %v8984_v59  ;;  %v10875_v52 = vpop.f32.mrb[20].mxu1 }
 0x4dc   : > { %9087 = vst [vmem:[%s15995_s9 + $0x90] sm:$0xff] %v9055_v47  ;;  %v9056_v25 = vmax.f32 %v9024_v12, 0.0  ;;  %v8923_v54 = vadd.f32 %v10875_v52, %v15945_v8  ;;  %v8914_v38 = vpop.f32.mrb[21].mxu1 }
 0x4dd   : > { %9085 = vst [vmem:[%s15995_s9 + $0x80] sm:$0xff] %v9053_v33  ;;  %v9054_v50 = vmax.f32 %v9022_v63, 0.0  ;;  %v8915_v46 = vadd.f32 %v8914_v38, %v15940_v45  ;;  %v10876_v39 = vpop.f32.mrb[22].mxu1 }
 0x4de   : > { %9088 = vst [vmem:[%s15995_s9 + $0x98] sm:$0xff] %v9056_v25  ;;  %v8989_v17 = vmul.f32 %v15971_v29, %v8923_v54  ;;  %v8926_v16 = vadd.f32 %v10876_v39, %v15948_v1  ;;  %v8917_v30 = vpop.f32.mrb[23].mxu1 }
 0x4df   : > { %9086 = vst [vmem:[%s15995_s9 + $0x88] sm:$0xff] %v9054_v50  ;;  %v8987_v5 = vmul.f32 %v15971_v29, %v8915_v46  ;;  %v8918_v34 = vadd.f32 %v8917_v30, %v15942_v57 }
 0x4e0   : > { %v9027_v8 = vadd.f32 %v15977_v44, %v8989_v17  ;;  %v8990_v58 = vmul.f32 %v15971_v29, %v8926_v16 }
 0x4e1   : > { %v9025_v45 = vadd.f32 %v15977_v44, %v8987_v5  ;;  %v8988_v40 = vmul.f32 %v15971_v29, %v8918_v34 }
 0x4e2   : > { %v9059_v61 = vmax.f32 %v9027_v8, 0.0  ;;  %v9028_v6 = vadd.f32 %v15977_v44, %v8990_v58 }
 0x4e3   : > { %v9057_v1 = vmax.f32 %v9025_v45, 0.0  ;;  %v9026_v2 = vadd.f32 %v15977_v44, %v8988_v40  ;;  %v10879_v23 = vpop.f32.mrb[24].mxu1 }
 0x4e4   : > { %9091 = vst [vmem:[%s15995_s9 + $0xb0] sm:$0xff] %v9059_v61  ;;  %v9060_v37 = vmax.f32 %v9028_v6, 0.0  ;;  %v8939_v57 = vadd.f32 %v10879_v23, %v15956_v0  ;;  %v8930_v11 = vpop.f32.mrb[25].mxu1 }
 0x4e5   : > { %9089 = vst [vmem:[%s15995_s9 + $0xa0] sm:$0xff] %v9057_v1  ;;  %v9058_v10 = vmax.f32 %v9026_v2, 0.0  ;;  %v8931_v27 = vadd.f32 %v8930_v11, %v15951_v62  ;;  %v10880_v48 = vpop.f32.mrb[26].mxu1 }
 0x4e6   : > { %9092 = vst [vmem:[%s15995_s9 + $0xb8] sm:$0xff] %v9060_v37  ;;  %v8993_v24 = vmul.f32 %v15971_v29, %v8939_v57  ;;  %v8942_v7 = vadd.f32 %v10880_v48, %v15959_v9  ;;  %v8933_v35 = vpop.f32.mrb[27].mxu1 }
 0x4e7   : > { %9090 = vst [vmem:[%s15995_s9 + $0xa8] sm:$0xff] %v9058_v10  ;;  %v8991_v26 = vmul.f32 %v15971_v29, %v8931_v27  ;;  %v8934_v19 = vadd.f32 %v8933_v35, %v15954_v31 }
 0x4e8   : > { %v9031_v0 = vadd.f32 %v15977_v44, %v8993_v24  ;;  %v8994_v51 = vmul.f32 %v15971_v29, %v8942_v7 }
 0x4e9   : > { %v9029_v62 = vadd.f32 %v15977_v44, %v8991_v26  ;;  %v8992_v4 = vmul.f32 %v15971_v29, %v8934_v19 }
 0x4ea   : > { %v9063_v21 = vmax.f32 %v9031_v0, 0.0  ;;  %v9032_v18 = vadd.f32 %v15977_v44, %v8994_v51 }
 0x4eb   : > { %v9061_v9 = vmax.f32 %v9029_v62, 0.0  ;;  %v9030_v13 = vadd.f32 %v15977_v44, %v8992_v4  ;;  %v10883_v56 = vpop.f32.mrb[28].mxu1 }
 0x4ec   : > { %9095 = vst [vmem:[%s15995_s9 + $0xd0] sm:$0xff] %v9063_v21  ;;  %v9064_v55 = vmax.f32 %v9032_v18, 0.0  ;;  %v8955_v31 = vadd.f32 %v10883_v56, %v15982_v3  ;;  %v8946_v49 = vpop.f32.mrb[29].mxu1 }
 0x4ed   : > { %9093 = vst [vmem:[%s15995_s9 + $0xc0] sm:$0xff] %v9061_v9  ;;  %v9062_v43 = vmax.f32 %v9030_v13, 0.0  ;;  %v8947_v22 = vadd.f32 %v8946_v49, %v15962_v53  ;;  %v10884_v28 = vpop.f32.mrb[30].mxu1 }
 0x4ee   : > { %9096 = vst [vmem:[%s15995_s9 + $0xd8] sm:$0xff] %v9064_v55  ;;  %v8997_v36 = vmul.f32 %v15971_v29, %v8955_v31  ;;  %v8958_v32 = vadd.f32 %v10884_v28, %v15988_v15  ;;  %v8949_v60 = vpop.f32.mrb[31].mxu1 }
 0x4ef   : > { %9094 = vst [vmem:[%s15995_s9 + $0xc8] sm:$0xff] %v9062_v43  ;;  %v8995_v20 = vmul.f32 %v15971_v29, %v8947_v22  ;;  %v8950_v3 = vadd.f32 %v8949_v60, %v15964_v42 }
 0x4f0   : > { %v9035_v41 = vadd.f32 %v15977_v44, %v8997_v36  ;;  %v8998_v53 = vmul.f32 %v15971_v29, %v8958_v32 }
 0x4f1   : > { %v9033_v14 = vadd.f32 %v15977_v44, %v8995_v20  ;;  %v8996_v59 = vmul.f32 %v15971_v29, %v8950_v3 }
 0x4f2   : > { %v9067_v47 = vmax.f32 %v9035_v41, 0.0  ;;  %v9036_v12 = vadd.f32 %v15977_v44, %v8998_v53 }
 0x4f3   : > { %v9065_v15 = vmax.f32 %v9033_v14, 0.0  ;;  %v9034_v33 = vadd.f32 %v15977_v44, %v8996_v59 }
 0x4f4   : > { %9099 = vst [vmem:[%s15995_s9 + $0xf0] sm:$0xff] %v9067_v47  ;;  %v9068_v63 = vmax.f32 %v9036_v12, 0.0 }
 0x4f5   : > { %9097 = vst [vmem:[%s15995_s9 + $0xe0] sm:$0xff] %v9065_v15  ;;  %v9066_v52 = vmax.f32 %v9034_v33, 0.0 }
 0x4f6   : > { %9100 = vst [vmem:[%s15995_s9 + $0xf8] sm:$0xff] %v9068_v63 }
 0x4f7   : > { %9098 = vst [vmem:[%s15995_s9 + $0xe8] sm:$0xff] %v9066_v52 }
 0x4f8 PF: > { %s17_s24 = sadd.s32 1, %s11190_s24  }
 0x4f9   : > { %p14_p4 = scmp.ge.s32.totalorder %s17_s24, 4  }
 0x4fb   :  { %16 = sbr.rel (!%p14_p4) target bundleno = 1 (0x1), region = 84 }

</bundles_post_ra>
